<compile_context>
chip_gen: v5e
topology: v5e:2x2
jax: 0.10.0
libtpu: 0.0.40
codegen_flags: <defaults>
</compile_context>

<pallas_src>
import math

import jax
import jax.numpy as jnp
from jax import lax
from jax.experimental import pallas as pl
from jax.experimental.pallas import tpu as pltpu


def make_decoder_kernel(num_layers: int, hp: int, seq_len: int, batch: int, out_dim: int):
    """Builds a Pallas kernel for a `num_layers`-deep LSTM + Linear head.

    Ref order:
      x2d (S*B, D_in), h0 (L,B,Hp), c0 (L,B,Hp),
      w_in0 (D_in,4Hp), b0 (1,4Hp), w_hh0 (Hp,4Hp),
      [w_cat_l (2Hp,4Hp), b_l (1,4Hp)] for l = 1..L-1,
      w_fc (Hp,D_out), b_fc (1,D_out),
      out (S*B,D_out), hn (L,B,Hp), cn (L,B,Hp),
      xp_scratch (S*B,4Hp), htop_scratch (S*B,Hp)
    """
    G = 4 * hp
    SB = seq_len * batch

    def kernel(*refs):
        x_ref, h0_ref, c0_ref, w_in0_ref, b0_ref, w_hh0_ref = refs[:6]
        p = 6
        w_cat, b_cat = [], []
        for _ in range(num_layers - 1):
            w_cat.append(refs[p])
            b_cat.append(refs[p + 1])
            p += 2
        w_fc_ref, b_fc_ref = refs[p], refs[p + 1]
        out_ref, hn_ref, cn_ref = refs[p + 2], refs[p + 3], refs[p + 4]
        xp_ref, htop_ref = refs[p + 5], refs[p + 6]

        # ---- (1) Hoisted layer-0 input projection for ALL timesteps: one big matmul.
        xp_ref[...] = (
            jnp.dot(x_ref[...], w_in0_ref[...], preferred_element_type=jnp.float32)
            + jnp.broadcast_to(b0_ref[...], (SB, G))
        )

        # Hoist loop-invariant bias broadcasts (layers >= 1).
        b_bc = [jnp.broadcast_to(b_cat[l][...], (batch, G)) for l in range(num_layers - 1)]

        def sigmoid(v):  # one EUP op instead of exp + reciprocal
            return 0.5 * jnp.tanh(0.5 * v) + 0.5

        def cell(gates, c_prev):
            # gate slices are 128-lane aligned because hp % 128 == 0
            i_g = sigmoid(gates[:, 0 * hp:1 * hp])
            f_g = sigmoid(gates[:, 1 * hp:2 * hp])
            g_g = jnp.tanh(gates[:, 2 * hp:3 * hp])
            o_g = sigmoid(gates[:, 3 * hp:4 * hp])
            c_new = f_g * c_prev + i_g * g_g
            h_new = o_g * jnp.tanh(c_new)
            return h_new, c_new

        h_init = tuple(h0_ref[l] for l in range(num_layers))
        c_init = tuple(c0_ref[l] for l in range(num_layers))

        def step(t, carry):
            hs, cs = carry
            base = t * batch
            # layer 0: input projection is precomputed; only the recurrent matmul remains.
            gates0 = xp_ref[pl.ds(base, batch), :] + jnp.dot(
                hs[0], w_hh0_ref[...], preferred_element_type=jnp.float32)
            h_l, c_l = cell(gates0, cs[0])
            new_h, new_c = [h_l], [c_l]
            x_l = h_l
            # layers >= 1: fused ih/hh matmul via lane-concat + stacked weight.
            for l in range(1, num_layers):
                cat = jnp.concatenate([x_l, hs[l]], axis=1)  # (B, 2Hp)
                gates = jnp.dot(cat, w_cat[l - 1][...],
                                preferred_element_type=jnp.float32) + b_bc[l - 1]
                h_l, c_l = cell(gates, cs[l])
                new_h.append(h_l)
                new_c.append(c_l)
                x_l = h_l
            # stage top-layer hidden for the hoisted FC head.
            htop_ref[pl.ds(base, batch), :] = x_l
            return tuple(new_h), tuple(new_c)

        hs, cs = lax.fori_loop(0, seq_len, step, (h_init, c_init), unroll=True)

        # write final states once (no per-step VMEM round-trips).
        for l in range(num_layers):
            hn_ref[l] = hs[l]
            cn_ref[l] = cs[l]

        # ---- (2) Hoisted FC head: one big matmul + single bulk store.
        out_ref[...] = (
            jnp.dot(htop_ref[...], w_fc_ref[...], preferred_element_type=jnp.float32)
            + jnp.broadcast_to(b_fc_ref[...], (SB, out_dim))
        )

    return kernel


def _pad_gate_cols(w, H, Hp):
    """(K, 4H) -> (K, 4Hp): each gate block placed at column offset k*Hp, rest zero."""
    K = w.shape[0]
    out = jnp.zeros((K, 4 * Hp), w.dtype)
    for k in range(4):
        out = out.at[:, k * Hp:k * Hp + H].set(w[:, k * H:(k + 1) * H])
    return out


def _pad_rows(w, Kp):
    K = w.shape[0]
    if K == Kp:
        return w
    return jnp.zeros((Kp, w.shape[1]), w.dtype).at[:K].set(w)


@jax.jit
def decoder_forward(x, hidden, cell, params):
    """x: (B,S,D) float32, hidden/cell: (L,B,H) float32."""
    B, S, D = x.shape
    L, _, H = hidden.shape
    Hp = ((H + 127) // 128) * 128  # lane-align the hidden dim (no-op when H % 128 == 0)

    # time-major flat input: row t*B + b corresponds to x[b, t]
    x2d = jnp.transpose(x, (1, 0, 2)).reshape(S * B, D)

    h0p = jnp.zeros((L, B, Hp), jnp.float32).at[:, :, :H].set(hidden)
    c0p = jnp.zeros((L, B, Hp), jnp.float32).at[:, :, :H].set(cell)

    # layer 0: separate input-projection weight (hoisted) + recurrent weight.
    w_in0 = _pad_gate_cols(params["w_ih_0"].T, H, Hp)                      # (D, 4Hp)
    b0 = _pad_gate_cols((params["b_ih_0"] + params["b_hh_0"])[None, :], H, Hp)
    w_hh0 = _pad_rows(_pad_gate_cols(params["w_hh_0"].T, H, Hp), Hp)       # (Hp, 4Hp)

    inputs = [x2d, h0p, c0p, w_in0, b0, w_hh0]

    # layers >= 1: stacked [W_ih ; W_hh] so the kernel does a single fused matmul.
    for l in range(1, L):
        w_ih_p = _pad_rows(_pad_gate_cols(params[f"w_ih_{l}"].T, H, Hp), Hp)
        w_hh_p = _pad_rows(_pad_gate_cols(params[f"w_hh_{l}"].T, H, Hp), Hp)
        w_cat = jnp.concatenate([w_ih_p, w_hh_p], axis=0)                  # (2Hp, 4Hp)
        b_l = _pad_gate_cols((params[f"b_ih_{l}"] + params[f"b_hh_{l}"])[None, :], H, Hp)
        inputs += [w_cat, b_l]

    w_fc_p = jnp.zeros((Hp, D), jnp.float32).at[:H].set(params["w_fc"].T)  # (Hp, D)
    inputs += [w_fc_p, params["b_fc"][None, :]]

    kernel = make_decoder_kernel(L, Hp, S, B, D)
    vmem = pl.BlockSpec(memory_space=pltpu.MemorySpace.VMEM)

    out_flat, hnp, cnp = pl.pallas_call(
        kernel,
        out_shape=(
            jax.ShapeDtypeStruct((S * B, D), jnp.float32),
            jax.ShapeDtypeStruct((L, B, Hp), jnp.float32),
            jax.ShapeDtypeStruct((L, B, Hp), jnp.float32),
        ),
        in_specs=[vmem] * len(inputs),
        out_specs=(vmem, vmem, vmem),
        scratch_shapes=[
            pltpu.VMEM((S * B, 4 * Hp), jnp.float32),  # hoisted input projection
            pltpu.VMEM((S * B, Hp), jnp.float32),      # staged top-layer hidden states
        ],
    )(*inputs)

    predictions = jnp.transpose(out_flat.reshape(S, B, D), (1, 0, 2))  # (B, S, D)
    return predictions, hnp[:, :, :H], cnp[:, :, :H]


def init_params(key, output_dim, hidden_dim, num_layers):
    """Deterministic init matching PyTorch LSTM/Linear shapes (uniform(-k, k))."""
    params = {}
    k_lstm = 1.0 / math.sqrt(hidden_dim)
    for l in range(num_layers):
        in_dim = output_dim if l == 0 else hidden_dim
        key, k1, k2, k3, k4 = jax.random.split(key, 5)
        params[f"w_ih_{l}"] = jax.random.uniform(
            k1, (4 * hidden_dim, in_dim), jnp.float32, -k_lstm, k_lstm)
        params[f"w_hh_{l}"] = jax.random.uniform(
            k2, (4 * hidden_dim, hidden_dim), jnp.float32, -k_lstm, k_lstm)
        params[f"b_ih_{l}"] = jax.random.uniform(
            k3, (4 * hidden_dim,), jnp.float32, -k_lstm, k_lstm)
        params[f"b_hh_{l}"] = jax.random.uniform(
            k4, (4 * hidden_dim,), jnp.float32, -k_lstm, k_lstm)
    k_fc = 1.0 / math.sqrt(hidden_dim)
    key, k1, k2 = jax.random.split(key, 3)
    params["w_fc"] = jax.random.uniform(
        k1, (output_dim, hidden_dim), jnp.float32, -k_fc, k_fc)
    params["b_fc"] = jax.random.uniform(
        k2, (output_dim,), jnp.float32, -k_fc, k_fc)
    return params


def reference_decoder(x, hidden, cell, params, num_layers):
    """Pure-JAX reference matching torch.nn.LSTM + Linear (eval mode)."""
    B, S, D = x.shape
    h = [hidden[l] for l in range(num_layers)]
    c = [cell[l] for l in range(num_layers)]
    outs = []
    for t in range(S):
        inp = x[:, t, :]
        for l in range(num_layers):
            gates = (inp @ params[f"w_ih_{l}"].T + params[f"b_ih_{l}"]
                     + h[l] @ params[f"w_hh_{l}"].T + params[f"b_hh_{l}"])
            i_g, f_g, g_g, o_g = jnp.split(gates, 4, axis=1)
            i_g = jax.nn.sigmoid(i_g)
            f_g = jax.nn.sigmoid(f_g)
            g_g = jnp.tanh(g_g)
            o_g = jax.nn.sigmoid(o_g)
            c[l] = f_g * c[l] + i_g * g_g
            h[l] = o_g * jnp.tanh(c[l])
            inp = h[l]
        outs.append(inp @ params["w_fc"].T + params["b_fc"])
    return jnp.stack(outs, axis=1), jnp.stack(h), jnp.stack(c)


if __name__ == "__main__":
    # Small shapes consistent with the module's forward.
    batch, seq_len, output_dim, hidden_dim, num_layers = 2, 8, 4, 32, 2

    key = jax.random.PRNGKey(0)
    key, kx, kh, kc, kp = jax.random.split(key, 5)
    x = jax.random.normal(kx, (batch, seq_len, output_dim), jnp.float32)
    hidden = jax.random.normal(kh, (num_layers, batch, hidden_dim), jnp.float32)
    cell = jax.random.normal(kc, (num_layers, batch, hidden_dim), jnp.float32)
    params = init_params(kp, output_dim, hidden_dim, num_layers)

    preds, h_n, c_n = decoder_forward(x, hidden, cell, params)
    jax.block_until_ready((preds, h_n, c_n))

    ref_preds, ref_h, ref_c = reference_decoder(x, hidden, cell, params, num_layers)
    assert preds.shape == (batch, seq_len, output_dim)
    assert h_n.shape == (num_layers, batch, hidden_dim)
    assert c_n.shape == (num_layers, batch, hidden_dim)
    assert jnp.allclose(preds, ref_preds, atol=1e-4, rtol=1e-4)
    assert jnp.allclose(h_n, ref_h, atol=1e-4, rtol=1e-4)
    assert jnp.allclose(c_n, ref_c, atol=1e-4, rtol=1e-4)

    print("KERNEL_OK")
</pallas_src>

<mosaic_0001>
module attributes {stable_mosaic.version = 11 : i64} {
  func.func @kernel(%arg0: memref<16x4xf32, #tpu.memory_space<vmem>>, %arg1: memref<2x2x128xf32, #tpu.memory_space<vmem>>, %arg2: memref<2x2x128xf32, #tpu.memory_space<vmem>>, %arg3: memref<4x512xf32, #tpu.memory_space<vmem>>, %arg4: memref<1x512xf32, #tpu.memory_space<vmem>>, %arg5: memref<128x512xf32, #tpu.memory_space<vmem>>, %arg6: memref<256x512xf32, #tpu.memory_space<vmem>>, %arg7: memref<1x512xf32, #tpu.memory_space<vmem>>, %arg8: memref<128x4xf32, #tpu.memory_space<vmem>>, %arg9: memref<1x4xf32, #tpu.memory_space<vmem>>, %arg10: memref<16x4xf32, #tpu.memory_space<vmem>>, %arg11: memref<2x2x128xf32, #tpu.memory_space<vmem>>, %arg12: memref<2x2x128xf32, #tpu.memory_space<vmem>>, %arg13: memref<16x512xf32, #tpu.memory_space<vmem>>, %arg14: memref<16x128xf32, #tpu.memory_space<vmem>>) attributes {dimension_semantics = [], scalar_prefetch = 0 : i64, scratch_operands = 2 : i64, tpu.core_type = #tpu.core_type<tc>} {
    %c0 = arith.constant 0 : index
    %c0_0 = arith.constant 0 : index
    %0 = vector.load %arg0[%c0, %c0_0] : memref<16x4xf32, #tpu.memory_space<vmem>>, vector<16x4xf32>
    %c0_1 = arith.constant 0 : index
    %c0_2 = arith.constant 0 : index
    %1 = vector.load %arg3[%c0_1, %c0_2] : memref<4x512xf32, #tpu.memory_space<vmem>>, vector<4x512xf32>
    %cst = arith.constant dense<0.000000e+00> : vector<16x512xf32>
    %2 = tpu.matmul %0, %1, %cst {dimension_numbers = #tpu.dot_dimension_numbers<[1], [0], [0], [1], [0, 0, 1, 1], [], []>} : vector<16x4xf32>, vector<4x512xf32>, vector<16x512xf32> -> vector<16x512xf32>
    %c0_3 = arith.constant 0 : index
    %c0_4 = arith.constant 0 : index
    %3 = vector.load %arg4[%c0_3, %c0_4] : memref<1x512xf32, #tpu.memory_space<vmem>>, vector<1x512xf32>
    %4 = vector.shape_cast %3 : vector<1x512xf32> to vector<1x512xf32>
    %5 = vector.broadcast %4 : vector<1x512xf32> to vector<16x512xf32>
    %6 = arith.addf %2, %5 : vector<16x512xf32>
    %c0_5 = arith.constant 0 : index
    %c0_6 = arith.constant 0 : index
    %7 = vector.load %arg13[%c0_5, %c0_6] : memref<16x512xf32, #tpu.memory_space<vmem>>, vector<16x512xf32>
    tpu.vector_store %arg13[%c0_5, %c0_6], %6 {strides = array<i32>} : memref<16x512xf32, #tpu.memory_space<vmem>>, vector<16x512xf32>,
    %c0_7 = arith.constant 0 : index
    %c0_8 = arith.constant 0 : index
    %8 = vector.load %arg7[%c0_7, %c0_8] : memref<1x512xf32, #tpu.memory_space<vmem>>, vector<1x512xf32>
    %9 = vector.shape_cast %8 : vector<1x512xf32> to vector<1x512xf32>
    %10 = vector.broadcast %9 : vector<1x512xf32> to vector<2x512xf32>
    %c0_9 = arith.constant 0 : index
    %c0_10 = arith.constant 0 : index
    %c0_11 = arith.constant 0 : index
    %11 = vector.load %arg1[%c0_9, %c0_10, %c0_11] : memref<2x2x128xf32, #tpu.memory_space<vmem>>, vector<1x2x128xf32>
    %12 = vector.shape_cast %11 : vector<1x2x128xf32> to vector<2x128xf32>
    %c1 = arith.constant 1 : index
    %c0_12 = arith.constant 0 : index
    %c0_13 = arith.constant 0 : index
    %13 = vector.load %arg1[%c1, %c0_12, %c0_13] : memref<2x2x128xf32, #tpu.memory_space<vmem>>, vector<1x2x128xf32>
    %14 = vector.shape_cast %13 : vector<1x2x128xf32> to vector<2x128xf32>
    %c0_14 = arith.constant 0 : index
    %c0_15 = arith.constant 0 : index
    %c0_16 = arith.constant 0 : index
    %15 = vector.load %arg2[%c0_14, %c0_15, %c0_16] : memref<2x2x128xf32, #tpu.memory_space<vmem>>, vector<1x2x128xf32>
    %16 = vector.shape_cast %15 : vector<1x2x128xf32> to vector<2x128xf32>
    %c1_17 = arith.constant 1 : index
    %c0_18 = arith.constant 0 : index
    %c0_19 = arith.constant 0 : index
    %17 = vector.load %arg2[%c1_17, %c0_18, %c0_19] : memref<2x2x128xf32, #tpu.memory_space<vmem>>, vector<1x2x128xf32>
    %18 = vector.shape_cast %17 : vector<1x2x128xf32> to vector<2x128xf32>
    %c0_i32 = arith.constant 0 : i32
    %c2_i32 = arith.constant 2 : i32
    %19 = arith.muli %c0_i32, %c2_i32 : i32
    %20 = arith.index_cast %19 : i32 to index
    %c0_20 = arith.constant 0 : index
    %21 = vector.load %arg13[%20, %c0_20] : memref<16x512xf32, #tpu.memory_space<vmem>>, vector<2x512xf32>
    %c0_21 = arith.constant 0 : index
    %c0_22 = arith.constant 0 : index
    %22 = vector.load %arg5[%c0_21, %c0_22] : memref<128x512xf32, #tpu.memory_space<vmem>>, vector<128x512xf32>
    %cst_23 = arith.constant dense<0.000000e+00> : vector<2x512xf32>
    %23 = tpu.matmul %12, %22, %cst_23 {dimension_numbers = #tpu.dot_dimension_numbers<[1], [0], [0], [1], [0, 0, 1, 1], [], []>} : vector<2x128xf32>, vector<128x512xf32>, vector<2x512xf32> -> vector<2x512xf32>
    %24 = arith.addf %21, %23 : vector<2x512xf32>
    %25 = vector.extract_strided_slice %24 {offsets = [0, 0], sizes = [2, 128], strides = [1, 1]} : vector<2x512xf32> to vector<2x128xf32>
    %cst_24 = arith.constant 5.000000e-01 : f32
    %26 = vector.broadcast %cst_24 : f32 to vector<2x128xf32>
    %27 = arith.mulf %26, %25 : vector<2x128xf32>
    %28 = math.tanh %27 : vector<2x128xf32>
    %cst_25 = arith.constant 5.000000e-01 : f32
    %29 = vector.broadcast %cst_25 : f32 to vector<2x128xf32>
    %30 = arith.mulf %29, %28 : vector<2x128xf32>
    %cst_26 = arith.constant 5.000000e-01 : f32
    %31 = vector.broadcast %cst_26 : f32 to vector<2x128xf32>
    %32 = arith.addf %30, %31 : vector<2x128xf32>
    %33 = vector.extract_strided_slice %24 {offsets = [0, 128], sizes = [2, 128], strides = [1, 1]} : vector<2x512xf32> to vector<2x128xf32>
    %cst_27 = arith.constant 5.000000e-01 : f32
    %34 = vector.broadcast %cst_27 : f32 to vector<2x128xf32>
    %35 = arith.mulf %34, %33 : vector<2x128xf32>
    %36 = math.tanh %35 : vector<2x128xf32>
    %cst_28 = arith.constant 5.000000e-01 : f32
    %37 = vector.broadcast %cst_28 : f32 to vector<2x128xf32>
    %38 = arith.mulf %37, %36 : vector<2x128xf32>
    %cst_29 = arith.constant 5.000000e-01 : f32
    %39 = vector.broadcast %cst_29 : f32 to vector<2x128xf32>
    %40 = arith.addf %38, %39 : vector<2x128xf32>
    %41 = vector.extract_strided_slice %24 {offsets = [0, 256], sizes = [2, 128], strides = [1, 1]} : vector<2x512xf32> to vector<2x128xf32>
    %42 = math.tanh %41 : vector<2x128xf32>
    %43 = vector.extract_strided_slice %24 {offsets = [0, 384], sizes = [2, 128], strides = [1, 1]} : vector<2x512xf32> to vector<2x128xf32>
    %cst_30 = arith.constant 5.000000e-01 : f32
    %44 = vector.broadcast %cst_30 : f32 to vector<2x128xf32>
    %45 = arith.mulf %44, %43 : vector<2x128xf32>
    %46 = math.tanh %45 : vector<2x128xf32>
    %cst_31 = arith.constant 5.000000e-01 : f32
    %47 = vector.broadcast %cst_31 : f32 to vector<2x128xf32>
    %48 = arith.mulf %47, %46 : vector<2x128xf32>
    %cst_32 = arith.constant 5.000000e-01 : f32
    %49 = vector.broadcast %cst_32 : f32 to vector<2x128xf32>
    %50 = arith.addf %48, %49 : vector<2x128xf32>
    %51 = arith.mulf %40, %16 : vector<2x128xf32>
    %52 = arith.mulf %32, %42 : vector<2x128xf32>
    %53 = arith.addf %51, %52 : vector<2x128xf32>
    %54 = math.tanh %53 : vector<2x128xf32>
    %55 = arith.mulf %50, %54 : vector<2x128xf32>
    %56 = tpu.concatenate %55, %14 in 1 : vector<2x128xf32>, vector<2x128xf32> -> vector<2x256xf32>
    %c0_33 = arith.constant 0 : index
    %c0_34 = arith.constant 0 : index
    %57 = vector.load %arg6[%c0_33, %c0_34] : memref<256x512xf32, #tpu.memory_space<vmem>>, vector<256x512xf32>
    %cst_35 = arith.constant dense<0.000000e+00> : vector<2x512xf32>
    %58 = tpu.matmul %56, %57, %cst_35 {dimension_numbers = #tpu.dot_dimension_numbers<[1], [0], [0], [1], [0, 0, 1, 1], [], []>} : vector<2x256xf32>, vector<256x512xf32>, vector<2x512xf32> -> vector<2x512xf32>
    %59 = arith.addf %58, %10 : vector<2x512xf32>
    %60 = vector.extract_strided_slice %59 {offsets = [0, 0], sizes = [2, 128], strides = [1, 1]} : vector<2x512xf32> to vector<2x128xf32>
    %cst_36 = arith.constant 5.000000e-01 : f32
    %61 = vector.broadcast %cst_36 : f32 to vector<2x128xf32>
    %62 = arith.mulf %61, %60 : vector<2x128xf32>
    %63 = math.tanh %62 : vector<2x128xf32>
    %cst_37 = arith.constant 5.000000e-01 : f32
    %64 = vector.broadcast %cst_37 : f32 to vector<2x128xf32>
    %65 = arith.mulf %64, %63 : vector<2x128xf32>
    %cst_38 = arith.constant 5.000000e-01 : f32
    %66 = vector.broadcast %cst_38 : f32 to vector<2x128xf32>
    %67 = arith.addf %65, %66 : vector<2x128xf32>
    %68 = vector.extract_strided_slice %59 {offsets = [0, 128], sizes = [2, 128], strides = [1, 1]} : vector<2x512xf32> to vector<2x128xf32>
    %cst_39 = arith.constant 5.000000e-01 : f32
    %69 = vector.broadcast %cst_39 : f32 to vector<2x128xf32>
    %70 = arith.mulf %69, %68 : vector<2x128xf32>
    %71 = math.tanh %70 : vector<2x128xf32>
    %cst_40 = arith.constant 5.000000e-01 : f32
    %72 = vector.broadcast %cst_40 : f32 to vector<2x128xf32>
    %73 = arith.mulf %72, %71 : vector<2x128xf32>
    %cst_41 = arith.constant 5.000000e-01 : f32
    %74 = vector.broadcast %cst_41 : f32 to vector<2x128xf32>
    %75 = arith.addf %73, %74 : vector<2x128xf32>
    %76 = vector.extract_strided_slice %59 {offsets = [0, 256], sizes = [2, 128], strides = [1, 1]} : vector<2x512xf32> to vector<2x128xf32>
    %77 = math.tanh %76 : vector<2x128xf32>
    %78 = vector.extract_strided_slice %59 {offsets = [0, 384], sizes = [2, 128], strides = [1, 1]} : vector<2x512xf32> to vector<2x128xf32>
    %cst_42 = arith.constant 5.000000e-01 : f32
    %79 = vector.broadcast %cst_42 : f32 to vector<2x128xf32>
    %80 = arith.mulf %79, %78 : vector<2x128xf32>
    %81 = math.tanh %80 : vector<2x128xf32>
    %cst_43 = arith.constant 5.000000e-01 : f32
    %82 = vector.broadcast %cst_43 : f32 to vector<2x128xf32>
    %83 = arith.mulf %82, %81 : vector<2x128xf32>
    %cst_44 = arith.constant 5.000000e-01 : f32
    %84 = vector.broadcast %cst_44 : f32 to vector<2x128xf32>
    %85 = arith.addf %83, %84 : vector<2x128xf32>
    %86 = arith.mulf %75, %18 : vector<2x128xf32>
    %87 = arith.mulf %67, %77 : vector<2x128xf32>
    %88 = arith.addf %86, %87 : vector<2x128xf32>
    %89 = math.tanh %88 : vector<2x128xf32>
    %90 = arith.mulf %85, %89 : vector<2x128xf32>
    %91 = arith.index_cast %19 : i32 to index
    %c0_45 = arith.constant 0 : index
    %92 = vector.load %arg14[%91, %c0_45] : memref<16x128xf32, #tpu.memory_space<vmem>>, vector<2x128xf32>
    tpu.vector_store %arg14[%91, %c0_45], %90 {strides = array<i32>} : memref<16x128xf32, #tpu.memory_space<vmem>>, vector<2x128xf32>,
    %c1_i32 = arith.constant 1 : i32
    %c2_i32_46 = arith.constant 2 : i32
    %93 = arith.muli %c1_i32, %c2_i32_46 : i32
    %94 = arith.index_cast %93 : i32 to index
    %c0_47 = arith.constant 0 : index
    %95 = vector.load %arg13[%94, %c0_47] : memref<16x512xf32, #tpu.memory_space<vmem>>, vector<2x512xf32>
    %c0_48 = arith.constant 0 : index
    %c0_49 = arith.constant 0 : index
    %96 = vector.load %arg5[%c0_48, %c0_49] : memref<128x512xf32, #tpu.memory_space<vmem>>, vector<128x512xf32>
    %cst_50 = arith.constant dense<0.000000e+00> : vector<2x512xf32>
    %97 = tpu.matmul %55, %96, %cst_50 {dimension_numbers = #tpu.dot_dimension_numbers<[1], [0], [0], [1], [0, 0, 1, 1], [], []>} : vector<2x128xf32>, vector<128x512xf32>, vector<2x512xf32> -> vector<2x512xf32>
    %98 = arith.addf %95, %97 : vector<2x512xf32>
    %99 = vector.extract_strided_slice %98 {offsets = [0, 0], sizes = [2, 128], strides = [1, 1]} : vector<2x512xf32> to vector<2x128xf32>
    %cst_51 = arith.constant 5.000000e-01 : f32
    %100 = vector.broadcast %cst_51 : f32 to vector<2x128xf32>
    %101 = arith.mulf %100, %99 : vector<2x128xf32>
    %102 = math.tanh %101 : vector<2x128xf32>
    %cst_52 = arith.constant 5.000000e-01 : f32
    %103 = vector.broadcast %cst_52 : f32 to vector<2x128xf32>
    %104 = arith.mulf %103, %102 : vector<2x128xf32>
    %cst_53 = arith.constant 5.000000e-01 : f32
    %105 = vector.broadcast %cst_53 : f32 to vector<2x128xf32>
    %106 = arith.addf %104, %105 : vector<2x128xf32>
    %107 = vector.extract_strided_slice %98 {offsets = [0, 128], sizes = [2, 128], strides = [1, 1]} : vector<2x512xf32> to vector<2x128xf32>
    %cst_54 = arith.constant 5.000000e-01 : f32
    %108 = vector.broadcast %cst_54 : f32 to vector<2x128xf32>
    %109 = arith.mulf %108, %107 : vector<2x128xf32>
    %110 = math.tanh %109 : vector<2x128xf32>
    %cst_55 = arith.constant 5.000000e-01 : f32
    %111 = vector.broadcast %cst_55 : f32 to vector<2x128xf32>
    %112 = arith.mulf %111, %110 : vector<2x128xf32>
    %cst_56 = arith.constant 5.000000e-01 : f32
    %113 = vector.broadcast %cst_56 : f32 to vector<2x128xf32>
    %114 = arith.addf %112, %113 : vector<2x128xf32>
    %115 = vector.extract_strided_slice %98 {offsets = [0, 256], sizes = [2, 128], strides = [1, 1]} : vector<2x512xf32> to vector<2x128xf32>
    %116 = math.tanh %115 : vector<2x128xf32>
    %117 = vector.extract_strided_slice %98 {offsets = [0, 384], sizes = [2, 128], strides = [1, 1]} : vector<2x512xf32> to vector<2x128xf32>
    %cst_57 = arith.constant 5.000000e-01 : f32
    %118 = vector.broadcast %cst_57 : f32 to vector<2x128xf32>
    %119 = arith.mulf %118, %117 : vector<2x128xf32>
    %120 = math.tanh %119 : vector<2x128xf32>
    %cst_58 = arith.constant 5.000000e-01 : f32
    %121 = vector.broadcast %cst_58 : f32 to vector<2x128xf32>
    %122 = arith.mulf %121, %120 : vector<2x128xf32>
    %cst_59 = arith.constant 5.000000e-01 : f32
    %123 = vector.broadcast %cst_59 : f32 to vector<2x128xf32>
    %124 = arith.addf %122, %123 : vector<2x128xf32>
    %125 = arith.mulf %114, %53 : vector<2x128xf32>
    %126 = arith.mulf %106, %116 : vector<2x128xf32>
    %127 = arith.addf %125, %126 : vector<2x128xf32>
    %128 = math.tanh %127 : vector<2x128xf32>
    %129 = arith.mulf %124, %128 : vector<2x128xf32>
    %130 = tpu.concatenate %129, %90 in 1 : vector<2x128xf32>, vector<2x128xf32> -> vector<2x256xf32>
    %c0_60 = arith.constant 0 : index
    %c0_61 = arith.constant 0 : index
    %131 = vector.load %arg6[%c0_60, %c0_61] : memref<256x512xf32, #tpu.memory_space<vmem>>, vector<256x512xf32>
    %cst_62 = arith.constant dense<0.000000e+00> : vector<2x512xf32>
    %132 = tpu.matmul %130, %131, %cst_62 {dimension_numbers = #tpu.dot_dimension_numbers<[1], [0], [0], [1], [0, 0, 1, 1], [], []>} : vector<2x256xf32>, vector<256x512xf32>, vector<2x512xf32> -> vector<2x512xf32>
    %133 = arith.addf %132, %10 : vector<2x512xf32>
    %134 = vector.extract_strided_slice %133 {offsets = [0, 0], sizes = [2, 128], strides = [1, 1]} : vector<2x512xf32> to vector<2x128xf32>
    %cst_63 = arith.constant 5.000000e-01 : f32
    %135 = vector.broadcast %cst_63 : f32 to vector<2x128xf32>
    %136 = arith.mulf %135, %134 : vector<2x128xf32>
    %137 = math.tanh %136 : vector<2x128xf32>
    %cst_64 = arith.constant 5.000000e-01 : f32
    %138 = vector.broadcast %cst_64 : f32 to vector<2x128xf32>
    %139 = arith.mulf %138, %137 : vector<2x128xf32>
    %cst_65 = arith.constant 5.000000e-01 : f32
    %140 = vector.broadcast %cst_65 : f32 to vector<2x128xf32>
    %141 = arith.addf %139, %140 : vector<2x128xf32>
    %142 = vector.extract_strided_slice %133 {offsets = [0, 128], sizes = [2, 128], strides = [1, 1]} : vector<2x512xf32> to vector<2x128xf32>
    %cst_66 = arith.constant 5.000000e-01 : f32
    %143 = vector.broadcast %cst_66 : f32 to vector<2x128xf32>
    %144 = arith.mulf %143, %142 : vector<2x128xf32>
    %145 = math.tanh %144 : vector<2x128xf32>
    %cst_67 = arith.constant 5.000000e-01 : f32
    %146 = vector.broadcast %cst_67 : f32 to vector<2x128xf32>
    %147 = arith.mulf %146, %145 : vector<2x128xf32>
    %cst_68 = arith.constant 5.000000e-01 : f32
    %148 = vector.broadcast %cst_68 : f32 to vector<2x128xf32>
    %149 = arith.addf %147, %148 : vector<2x128xf32>
    %150 = vector.extract_strided_slice %133 {offsets = [0, 256], sizes = [2, 128], strides = [1, 1]} : vector<2x512xf32> to vector<2x128xf32>
    %151 = math.tanh %150 : vector<2x128xf32>
    %152 = vector.extract_strided_slice %133 {offsets = [0, 384], sizes = [2, 128], strides = [1, 1]} : vector<2x512xf32> to vector<2x128xf32>
    %cst_69 = arith.constant 5.000000e-01 : f32
    %153 = vector.broadcast %cst_69 : f32 to vector<2x128xf32>
    %154 = arith.mulf %153, %152 : vector<2x128xf32>
    %155 = math.tanh %154 : vector<2x128xf32>
    %cst_70 = arith.constant 5.000000e-01 : f32
    %156 = vector.broadcast %cst_70 : f32 to vector<2x128xf32>
    %157 = arith.mulf %156, %155 : vector<2x128xf32>
    %cst_71 = arith.constant 5.000000e-01 : f32
    %158 = vector.broadcast %cst_71 : f32 to vector<2x128xf32>
    %159 = arith.addf %157, %158 : vector<2x128xf32>
    %160 = arith.mulf %149, %88 : vector<2x128xf32>
    %161 = arith.mulf %141, %151 : vector<2x128xf32>
    %162 = arith.addf %160, %161 : vector<2x128xf32>
    %163 = math.tanh %162 : vector<2x128xf32>
    %164 = arith.mulf %159, %163 : vector<2x128xf32>
    %165 = arith.index_cast %93 : i32 to index
    %c0_72 = arith.constant 0 : index
    %166 = vector.load %arg14[%165, %c0_72] : memref<16x128xf32, #tpu.memory_space<vmem>>, vector<2x128xf32>
    tpu.vector_store %arg14[%165, %c0_72], %164 {strides = array<i32>} : memref<16x128xf32, #tpu.memory_space<vmem>>, vector<2x128xf32>,
    %c2_i32_73 = arith.constant 2 : i32
    %c2_i32_74 = arith.constant 2 : i32
    %167 = arith.muli %c2_i32_73, %c2_i32_74 : i32
    %168 = arith.index_cast %167 : i32 to index
    %c0_75 = arith.constant 0 : index
    %169 = vector.load %arg13[%168, %c0_75] : memref<16x512xf32, #tpu.memory_space<vmem>>, vector<2x512xf32>
    %c0_76 = arith.constant 0 : index
    %c0_77 = arith.constant 0 : index
    %170 = vector.load %arg5[%c0_76, %c0_77] : memref<128x512xf32, #tpu.memory_space<vmem>>, vector<128x512xf32>
    %cst_78 = arith.constant dense<0.000000e+00> : vector<2x512xf32>
    %171 = tpu.matmul %129, %170, %cst_78 {dimension_numbers = #tpu.dot_dimension_numbers<[1], [0], [0], [1], [0, 0, 1, 1], [], []>} : vector<2x128xf32>, vector<128x512xf32>, vector<2x512xf32> -> vector<2x512xf32>
    %172 = arith.addf %169, %171 : vector<2x512xf32>
    %173 = vector.extract_strided_slice %172 {offsets = [0, 0], sizes = [2, 128], strides = [1, 1]} : vector<2x512xf32> to vector<2x128xf32>
    %cst_79 = arith.constant 5.000000e-01 : f32
    %174 = vector.broadcast %cst_79 : f32 to vector<2x128xf32>
    %175 = arith.mulf %174, %173 : vector<2x128xf32>
    %176 = math.tanh %175 : vector<2x128xf32>
    %cst_80 = arith.constant 5.000000e-01 : f32
    %177 = vector.broadcast %cst_80 : f32 to vector<2x128xf32>
    %178 = arith.mulf %177, %176 : vector<2x128xf32>
    %cst_81 = arith.constant 5.000000e-01 : f32
    %179 = vector.broadcast %cst_81 : f32 to vector<2x128xf32>
    %180 = arith.addf %178, %179 : vector<2x128xf32>
    %181 = vector.extract_strided_slice %172 {offsets = [0, 128], sizes = [2, 128], strides = [1, 1]} : vector<2x512xf32> to vector<2x128xf32>
    %cst_82 = arith.constant 5.000000e-01 : f32
    %182 = vector.broadcast %cst_82 : f32 to vector<2x128xf32>
    %183 = arith.mulf %182, %181 : vector<2x128xf32>
    %184 = math.tanh %183 : vector<2x128xf32>
    %cst_83 = arith.constant 5.000000e-01 : f32
    %185 = vector.broadcast %cst_83 : f32 to vector<2x128xf32>
    %186 = arith.mulf %185, %184 : vector<2x128xf32>
    %cst_84 = arith.constant 5.000000e-01 : f32
    %187 = vector.broadcast %cst_84 : f32 to vector<2x128xf32>
    %188 = arith.addf %186, %187 : vector<2x128xf32>
    %189 = vector.extract_strided_slice %172 {offsets = [0, 256], sizes = [2, 128], strides = [1, 1]} : vector<2x512xf32> to vector<2x128xf32>
    %190 = math.tanh %189 : vector<2x128xf32>
    %191 = vector.extract_strided_slice %172 {offsets = [0, 384], sizes = [2, 128], strides = [1, 1]} : vector<2x512xf32> to vector<2x128xf32>
    %cst_85 = arith.constant 5.000000e-01 : f32
    %192 = vector.broadcast %cst_85 : f32 to vector<2x128xf32>
    %193 = arith.mulf %192, %191 : vector<2x128xf32>
    %194 = math.tanh %193 : vector<2x128xf32>
    %cst_86 = arith.constant 5.000000e-01 : f32
    %195 = vector.broadcast %cst_86 : f32 to vector<2x128xf32>
    %196 = arith.mulf %195, %194 : vector<2x128xf32>
    %cst_87 = arith.constant 5.000000e-01 : f32
    %197 = vector.broadcast %cst_87 : f32 to vector<2x128xf32>
    %198 = arith.addf %196, %197 : vector<2x128xf32>
    %199 = arith.mulf %188, %127 : vector<2x128xf32>
    %200 = arith.mulf %180, %190 : vector<2x128xf32>
    %201 = arith.addf %199, %200 : vector<2x128xf32>
    %202 = math.tanh %201 : vector<2x128xf32>
    %203 = arith.mulf %198, %202 : vector<2x128xf32>
    %204 = tpu.concatenate %203, %164 in 1 : vector<2x128xf32>, vector<2x128xf32> -> vector<2x256xf32>
    %c0_88 = arith.constant 0 : index
    %c0_89 = arith.constant 0 : index
    %205 = vector.load %arg6[%c0_88, %c0_89] : memref<256x512xf32, #tpu.memory_space<vmem>>, vector<256x512xf32>
    %cst_90 = arith.constant dense<0.000000e+00> : vector<2x512xf32>
    %206 = tpu.matmul %204, %205, %cst_90 {dimension_numbers = #tpu.dot_dimension_numbers<[1], [0], [0], [1], [0, 0, 1, 1], [], []>} : vector<2x256xf32>, vector<256x512xf32>, vector<2x512xf32> -> vector<2x512xf32>
    %207 = arith.addf %206, %10 : vector<2x512xf32>
    %208 = vector.extract_strided_slice %207 {offsets = [0, 0], sizes = [2, 128], strides = [1, 1]} : vector<2x512xf32> to vector<2x128xf32>
    %cst_91 = arith.constant 5.000000e-01 : f32
    %209 = vector.broadcast %cst_91 : f32 to vector<2x128xf32>
    %210 = arith.mulf %209, %208 : vector<2x128xf32>
    %211 = math.tanh %210 : vector<2x128xf32>
    %cst_92 = arith.constant 5.000000e-01 : f32
    %212 = vector.broadcast %cst_92 : f32 to vector<2x128xf32>
    %213 = arith.mulf %212, %211 : vector<2x128xf32>
    %cst_93 = arith.constant 5.000000e-01 : f32
    %214 = vector.broadcast %cst_93 : f32 to vector<2x128xf32>
    %215 = arith.addf %213, %214 : vector<2x128xf32>
    %216 = vector.extract_strided_slice %207 {offsets = [0, 128], sizes = [2, 128], strides = [1, 1]} : vector<2x512xf32> to vector<2x128xf32>
    %cst_94 = arith.constant 5.000000e-01 : f32
    %217 = vector.broadcast %cst_94 : f32 to vector<2x128xf32>
    %218 = arith.mulf %217, %216 : vector<2x128xf32>
    %219 = math.tanh %218 : vector<2x128xf32>
    %cst_95 = arith.constant 5.000000e-01 : f32
    %220 = vector.broadcast %cst_95 : f32 to vector<2x128xf32>
    %221 = arith.mulf %220, %219 : vector<2x128xf32>
    %cst_96 = arith.constant 5.000000e-01 : f32
    %222 = vector.broadcast %cst_96 : f32 to vector<2x128xf32>
    %223 = arith.addf %221, %222 : vector<2x128xf32>
    %224 = vector.extract_strided_slice %207 {offsets = [0, 256], sizes = [2, 128], strides = [1, 1]} : vector<2x512xf32> to vector<2x128xf32>
    %225 = math.tanh %224 : vector<2x128xf32>
    %226 = vector.extract_strided_slice %207 {offsets = [0, 384], sizes = [2, 128], strides = [1, 1]} : vector<2x512xf32> to vector<2x128xf32>
    %cst_97 = arith.constant 5.000000e-01 : f32
    %227 = vector.broadcast %cst_97 : f32 to vector<2x128xf32>
    %228 = arith.mulf %227, %226 : vector<2x128xf32>
    %229 = math.tanh %228 : vector<2x128xf32>
    %cst_98 = arith.constant 5.000000e-01 : f32
    %230 = vector.broadcast %cst_98 : f32 to vector<2x128xf32>
    %231 = arith.mulf %230, %229 : vector<2x128xf32>
    %cst_99 = arith.constant 5.000000e-01 : f32
    %232 = vector.broadcast %cst_99 : f32 to vector<2x128xf32>
    %233 = arith.addf %231, %232 : vector<2x128xf32>
    %234 = arith.mulf %223, %162 : vector<2x128xf32>
    %235 = arith.mulf %215, %225 : vector<2x128xf32>
    %236 = arith.addf %234, %235 : vector<2x128xf32>
    %237 = math.tanh %236 : vector<2x128xf32>
    %238 = arith.mulf %233, %237 : vector<2x128xf32>
    %239 = arith.index_cast %167 : i32 to index
    %c0_100 = arith.constant 0 : index
    %240 = vector.load %arg14[%239, %c0_100] : memref<16x128xf32, #tpu.memory_space<vmem>>, vector<2x128xf32>
    tpu.vector_store %arg14[%239, %c0_100], %238 {strides = array<i32>} : memref<16x128xf32, #tpu.memory_space<vmem>>, vector<2x128xf32>,
    %c3_i32 = arith.constant 3 : i32
    %c2_i32_101 = arith.constant 2 : i32
    %241 = arith.muli %c3_i32, %c2_i32_101 : i32
    %242 = arith.index_cast %241 : i32 to index
    %c0_102 = arith.constant 0 : index
    %243 = vector.load %arg13[%242, %c0_102] : memref<16x512xf32, #tpu.memory_space<vmem>>, vector<2x512xf32>
    %c0_103 = arith.constant 0 : index
    %c0_104 = arith.constant 0 : index
    %244 = vector.load %arg5[%c0_103, %c0_104] : memref<128x512xf32, #tpu.memory_space<vmem>>, vector<128x512xf32>
    %cst_105 = arith.constant dense<0.000000e+00> : vector<2x512xf32>
    %245 = tpu.matmul %203, %244, %cst_105 {dimension_numbers = #tpu.dot_dimension_numbers<[1], [0], [0], [1], [0, 0, 1, 1], [], []>} : vector<2x128xf32>, vector<128x512xf32>, vector<2x512xf32> -> vector<2x512xf32>
    %246 = arith.addf %243, %245 : vector<2x512xf32>
    %247 = vector.extract_strided_slice %246 {offsets = [0, 0], sizes = [2, 128], strides = [1, 1]} : vector<2x512xf32> to vector<2x128xf32>
    %cst_106 = arith.constant 5.000000e-01 : f32
    %248 = vector.broadcast %cst_106 : f32 to vector<2x128xf32>
    %249 = arith.mulf %248, %247 : vector<2x128xf32>
    %250 = math.tanh %249 : vector<2x128xf32>
    %cst_107 = arith.constant 5.000000e-01 : f32
    %251 = vector.broadcast %cst_107 : f32 to vector<2x128xf32>
    %252 = arith.mulf %251, %250 : vector<2x128xf32>
    %cst_108 = arith.constant 5.000000e-01 : f32
    %253 = vector.broadcast %cst_108 : f32 to vector<2x128xf32>
    %254 = arith.addf %252, %253 : vector<2x128xf32>
    %255 = vector.extract_strided_slice %246 {offsets = [0, 128], sizes = [2, 128], strides = [1, 1]} : vector<2x512xf32> to vector<2x128xf32>
    %cst_109 = arith.constant 5.000000e-01 : f32
    %256 = vector.broadcast %cst_109 : f32 to vector<2x128xf32>
    %257 = arith.mulf %256, %255 : vector<2x128xf32>
    %258 = math.tanh %257 : vector<2x128xf32>
    %cst_110 = arith.constant 5.000000e-01 : f32
    %259 = vector.broadcast %cst_110 : f32 to vector<2x128xf32>
    %260 = arith.mulf %259, %258 : vector<2x128xf32>
    %cst_111 = arith.constant 5.000000e-01 : f32
    %261 = vector.broadcast %cst_111 : f32 to vector<2x128xf32>
    %262 = arith.addf %260, %261 : vector<2x128xf32>
    %263 = vector.extract_strided_slice %246 {offsets = [0, 256], sizes = [2, 128], strides = [1, 1]} : vector<2x512xf32> to vector<2x128xf32>
    %264 = math.tanh %263 : vector<2x128xf32>
    %265 = vector.extract_strided_slice %246 {offsets = [0, 384], sizes = [2, 128], strides = [1, 1]} : vector<2x512xf32> to vector<2x128xf32>
    %cst_112 = arith.constant 5.000000e-01 : f32
    %266 = vector.broadcast %cst_112 : f32 to vector<2x128xf32>
    %267 = arith.mulf %266, %265 : vector<2x128xf32>
    %268 = math.tanh %267 : vector<2x128xf32>
    %cst_113 = arith.constant 5.000000e-01 : f32
    %269 = vector.broadcast %cst_113 : f32 to vector<2x128xf32>
    %270 = arith.mulf %269, %268 : vector<2x128xf32>
    %cst_114 = arith.constant 5.000000e-01 : f32
    %271 = vector.broadcast %cst_114 : f32 to vector<2x128xf32>
    %272 = arith.addf %270, %271 : vector<2x128xf32>
    %273 = arith.mulf %262, %201 : vector<2x128xf32>
    %274 = arith.mulf %254, %264 : vector<2x128xf32>
    %275 = arith.addf %273, %274 : vector<2x128xf32>
    %276 = math.tanh %275 : vector<2x128xf32>
    %277 = arith.mulf %272, %276 : vector<2x128xf32>
    %278 = tpu.concatenate %277, %238 in 1 : vector<2x128xf32>, vector<2x128xf32> -> vector<2x256xf32>
    %c0_115 = arith.constant 0 : index
    %c0_116 = arith.constant 0 : index
    %279 = vector.load %arg6[%c0_115, %c0_116] : memref<256x512xf32, #tpu.memory_space<vmem>>, vector<256x512xf32>
    %cst_117 = arith.constant dense<0.000000e+00> : vector<2x512xf32>
    %280 = tpu.matmul %278, %279, %cst_117 {dimension_numbers = #tpu.dot_dimension_numbers<[1], [0], [0], [1], [0, 0, 1, 1], [], []>} : vector<2x256xf32>, vector<256x512xf32>, vector<2x512xf32> -> vector<2x512xf32>
    %281 = arith.addf %280, %10 : vector<2x512xf32>
    %282 = vector.extract_strided_slice %281 {offsets = [0, 0], sizes = [2, 128], strides = [1, 1]} : vector<2x512xf32> to vector<2x128xf32>
    %cst_118 = arith.constant 5.000000e-01 : f32
    %283 = vector.broadcast %cst_118 : f32 to vector<2x128xf32>
    %284 = arith.mulf %283, %282 : vector<2x128xf32>
    %285 = math.tanh %284 : vector<2x128xf32>
    %cst_119 = arith.constant 5.000000e-01 : f32
    %286 = vector.broadcast %cst_119 : f32 to vector<2x128xf32>
    %287 = arith.mulf %286, %285 : vector<2x128xf32>
    %cst_120 = arith.constant 5.000000e-01 : f32
    %288 = vector.broadcast %cst_120 : f32 to vector<2x128xf32>
    %289 = arith.addf %287, %288 : vector<2x128xf32>
    %290 = vector.extract_strided_slice %281 {offsets = [0, 128], sizes = [2, 128], strides = [1, 1]} : vector<2x512xf32> to vector<2x128xf32>
    %cst_121 = arith.constant 5.000000e-01 : f32
    %291 = vector.broadcast %cst_121 : f32 to vector<2x128xf32>
    %292 = arith.mulf %291, %290 : vector<2x128xf32>
    %293 = math.tanh %292 : vector<2x128xf32>
    %cst_122 = arith.constant 5.000000e-01 : f32
    %294 = vector.broadcast %cst_122 : f32 to vector<2x128xf32>
    %295 = arith.mulf %294, %293 : vector<2x128xf32>
    %cst_123 = arith.constant 5.000000e-01 : f32
    %296 = vector.broadcast %cst_123 : f32 to vector<2x128xf32>
    %297 = arith.addf %295, %296 : vector<2x128xf32>
    %298 = vector.extract_strided_slice %281 {offsets = [0, 256], sizes = [2, 128], strides = [1, 1]} : vector<2x512xf32> to vector<2x128xf32>
    %299 = math.tanh %298 : vector<2x128xf32>
    %300 = vector.extract_strided_slice %281 {offsets = [0, 384], sizes = [2, 128], strides = [1, 1]} : vector<2x512xf32> to vector<2x128xf32>
    %cst_124 = arith.constant 5.000000e-01 : f32
    %301 = vector.broadcast %cst_124 : f32 to vector<2x128xf32>
    %302 = arith.mulf %301, %300 : vector<2x128xf32>
    %303 = math.tanh %302 : vector<2x128xf32>
    %cst_125 = arith.constant 5.000000e-01 : f32
    %304 = vector.broadcast %cst_125 : f32 to vector<2x128xf32>
    %305 = arith.mulf %304, %303 : vector<2x128xf32>
    %cst_126 = arith.constant 5.000000e-01 : f32
    %306 = vector.broadcast %cst_126 : f32 to vector<2x128xf32>
    %307 = arith.addf %305, %306 : vector<2x128xf32>
    %308 = arith.mulf %297, %236 : vector<2x128xf32>
    %309 = arith.mulf %289, %299 : vector<2x128xf32>
    %310 = arith.addf %308, %309 : vector<2x128xf32>
    %311 = math.tanh %310 : vector<2x128xf32>
    %312 = arith.mulf %307, %311 : vector<2x128xf32>
    %313 = arith.index_cast %241 : i32 to index
    %c0_127 = arith.constant 0 : index
    %314 = vector.load %arg14[%313, %c0_127] : memref<16x128xf32, #tpu.memory_space<vmem>>, vector<2x128xf32>
    tpu.vector_store %arg14[%313, %c0_127], %312 {strides = array<i32>} : memref<16x128xf32, #tpu.memory_space<vmem>>, vector<2x128xf32>,
    %c4_i32 = arith.constant 4 : i32
    %c2_i32_128 = arith.constant 2 : i32
    %315 = arith.muli %c4_i32, %c2_i32_128 : i32
    %316 = arith.index_cast %315 : i32 to index
    %c0_129 = arith.constant 0 : index
    %317 = vector.load %arg13[%316, %c0_129] : memref<16x512xf32, #tpu.memory_space<vmem>>, vector<2x512xf32>
    %c0_130 = arith.constant 0 : index
    %c0_131 = arith.constant 0 : index
    %318 = vector.load %arg5[%c0_130, %c0_131] : memref<128x512xf32, #tpu.memory_space<vmem>>, vector<128x512xf32>
    %cst_132 = arith.constant dense<0.000000e+00> : vector<2x512xf32>
    %319 = tpu.matmul %277, %318, %cst_132 {dimension_numbers = #tpu.dot_dimension_numbers<[1], [0], [0], [1], [0, 0, 1, 1], [], []>} : vector<2x128xf32>, vector<128x512xf32>, vector<2x512xf32> -> vector<2x512xf32>
    %320 = arith.addf %317, %319 : vector<2x512xf32>
    %321 = vector.extract_strided_slice %320 {offsets = [0, 0], sizes = [2, 128], strides = [1, 1]} : vector<2x512xf32> to vector<2x128xf32>
    %cst_133 = arith.constant 5.000000e-01 : f32
    %322 = vector.broadcast %cst_133 : f32 to vector<2x128xf32>
    %323 = arith.mulf %322, %321 : vector<2x128xf32>
    %324 = math.tanh %323 : vector<2x128xf32>
    %cst_134 = arith.constant 5.000000e-01 : f32
    %325 = vector.broadcast %cst_134 : f32 to vector<2x128xf32>
    %326 = arith.mulf %325, %324 : vector<2x128xf32>
    %cst_135 = arith.constant 5.000000e-01 : f32
    %327 = vector.broadcast %cst_135 : f32 to vector<2x128xf32>
    %328 = arith.addf %326, %327 : vector<2x128xf32>
    %329 = vector.extract_strided_slice %320 {offsets = [0, 128], sizes = [2, 128], strides = [1, 1]} : vector<2x512xf32> to vector<2x128xf32>
    %cst_136 = arith.constant 5.000000e-01 : f32
    %330 = vector.broadcast %cst_136 : f32 to vector<2x128xf32>
    %331 = arith.mulf %330, %329 : vector<2x128xf32>
    %332 = math.tanh %331 : vector<2x128xf32>
    %cst_137 = arith.constant 5.000000e-01 : f32
    %333 = vector.broadcast %cst_137 : f32 to vector<2x128xf32>
    %334 = arith.mulf %333, %332 : vector<2x128xf32>
    %cst_138 = arith.constant 5.000000e-01 : f32
    %335 = vector.broadcast %cst_138 : f32 to vector<2x128xf32>
    %336 = arith.addf %334, %335 : vector<2x128xf32>
    %337 = vector.extract_strided_slice %320 {offsets = [0, 256], sizes = [2, 128], strides = [1, 1]} : vector<2x512xf32> to vector<2x128xf32>
    %338 = math.tanh %337 : vector<2x128xf32>
    %339 = vector.extract_strided_slice %320 {offsets = [0, 384], sizes = [2, 128], strides = [1, 1]} : vector<2x512xf32> to vector<2x128xf32>
    %cst_139 = arith.constant 5.000000e-01 : f32
    %340 = vector.broadcast %cst_139 : f32 to vector<2x128xf32>
    %341 = arith.mulf %340, %339 : vector<2x128xf32>
    %342 = math.tanh %341 : vector<2x128xf32>
    %cst_140 = arith.constant 5.000000e-01 : f32
    %343 = vector.broadcast %cst_140 : f32 to vector<2x128xf32>
    %344 = arith.mulf %343, %342 : vector<2x128xf32>
    %cst_141 = arith.constant 5.000000e-01 : f32
    %345 = vector.broadcast %cst_141 : f32 to vector<2x128xf32>
    %346 = arith.addf %344, %345 : vector<2x128xf32>
    %347 = arith.mulf %336, %275 : vector<2x128xf32>
    %348 = arith.mulf %328, %338 : vector<2x128xf32>
    %349 = arith.addf %347, %348 : vector<2x128xf32>
    %350 = math.tanh %349 : vector<2x128xf32>
    %351 = arith.mulf %346, %350 : vector<2x128xf32>
    %352 = tpu.concatenate %351, %312 in 1 : vector<2x128xf32>, vector<2x128xf32> -> vector<2x256xf32>
    %c0_142 = arith.constant 0 : index
    %c0_143 = arith.constant 0 : index
    %353 = vector.load %arg6[%c0_142, %c0_143] : memref<256x512xf32, #tpu.memory_space<vmem>>, vector<256x512xf32>
    %cst_144 = arith.constant dense<0.000000e+00> : vector<2x512xf32>
    %354 = tpu.matmul %352, %353, %cst_144 {dimension_numbers = #tpu.dot_dimension_numbers<[1], [0], [0], [1], [0, 0, 1, 1], [], []>} : vector<2x256xf32>, vector<256x512xf32>, vector<2x512xf32> -> vector<2x512xf32>
    %355 = arith.addf %354, %10 : vector<2x512xf32>
    %356 = vector.extract_strided_slice %355 {offsets = [0, 0], sizes = [2, 128], strides = [1, 1]} : vector<2x512xf32> to vector<2x128xf32>
    %cst_145 = arith.constant 5.000000e-01 : f32
    %357 = vector.broadcast %cst_145 : f32 to vector<2x128xf32>
    %358 = arith.mulf %357, %356 : vector<2x128xf32>
    %359 = math.tanh %358 : vector<2x128xf32>
    %cst_146 = arith.constant 5.000000e-01 : f32
    %360 = vector.broadcast %cst_146 : f32 to vector<2x128xf32>
    %361 = arith.mulf %360, %359 : vector<2x128xf32>
    %cst_147 = arith.constant 5.000000e-01 : f32
    %362 = vector.broadcast %cst_147 : f32 to vector<2x128xf32>
    %363 = arith.addf %361, %362 : vector<2x128xf32>
    %364 = vector.extract_strided_slice %355 {offsets = [0, 128], sizes = [2, 128], strides = [1, 1]} : vector<2x512xf32> to vector<2x128xf32>
    %cst_148 = arith.constant 5.000000e-01 : f32
    %365 = vector.broadcast %cst_148 : f32 to vector<2x128xf32>
    %366 = arith.mulf %365, %364 : vector<2x128xf32>
    %367 = math.tanh %366 : vector<2x128xf32>
    %cst_149 = arith.constant 5.000000e-01 : f32
    %368 = vector.broadcast %cst_149 : f32 to vector<2x128xf32>
    %369 = arith.mulf %368, %367 : vector<2x128xf32>
    %cst_150 = arith.constant 5.000000e-01 : f32
    %370 = vector.broadcast %cst_150 : f32 to vector<2x128xf32>
    %371 = arith.addf %369, %370 : vector<2x128xf32>
    %372 = vector.extract_strided_slice %355 {offsets = [0, 256], sizes = [2, 128], strides = [1, 1]} : vector<2x512xf32> to vector<2x128xf32>
    %373 = math.tanh %372 : vector<2x128xf32>
    %374 = vector.extract_strided_slice %355 {offsets = [0, 384], sizes = [2, 128], strides = [1, 1]} : vector<2x512xf32> to vector<2x128xf32>
    %cst_151 = arith.constant 5.000000e-01 : f32
    %375 = vector.broadcast %cst_151 : f32 to vector<2x128xf32>
    %376 = arith.mulf %375, %374 : vector<2x128xf32>
    %377 = math.tanh %376 : vector<2x128xf32>
    %cst_152 = arith.constant 5.000000e-01 : f32
    %378 = vector.broadcast %cst_152 : f32 to vector<2x128xf32>
    %379 = arith.mulf %378, %377 : vector<2x128xf32>
    %cst_153 = arith.constant 5.000000e-01 : f32
    %380 = vector.broadcast %cst_153 : f32 to vector<2x128xf32>
    %381 = arith.addf %379, %380 : vector<2x128xf32>
    %382 = arith.mulf %371, %310 : vector<2x128xf32>
    %383 = arith.mulf %363, %373 : vector<2x128xf32>
    %384 = arith.addf %382, %383 : vector<2x128xf32>
    %385 = math.tanh %384 : vector<2x128xf32>
    %386 = arith.mulf %381, %385 : vector<2x128xf32>
    %387 = arith.index_cast %315 : i32 to index
    %c0_154 = arith.constant 0 : index
    %388 = vector.load %arg14[%387, %c0_154] : memref<16x128xf32, #tpu.memory_space<vmem>>, vector<2x128xf32>
    tpu.vector_store %arg14[%387, %c0_154], %386 {strides = array<i32>} : memref<16x128xf32, #tpu.memory_space<vmem>>, vector<2x128xf32>,
    %c5_i32 = arith.constant 5 : i32
    %c2_i32_155 = arith.constant 2 : i32
    %389 = arith.muli %c5_i32, %c2_i32_155 : i32
    %390 = arith.index_cast %389 : i32 to index
    %c0_156 = arith.constant 0 : index
    %391 = vector.load %arg13[%390, %c0_156] : memref<16x512xf32, #tpu.memory_space<vmem>>, vector<2x512xf32>
    %c0_157 = arith.constant 0 : index
    %c0_158 = arith.constant 0 : index
    %392 = vector.load %arg5[%c0_157, %c0_158] : memref<128x512xf32, #tpu.memory_space<vmem>>, vector<128x512xf32>
    %cst_159 = arith.constant dense<0.000000e+00> : vector<2x512xf32>
    %393 = tpu.matmul %351, %392, %cst_159 {dimension_numbers = #tpu.dot_dimension_numbers<[1], [0], [0], [1], [0, 0, 1, 1], [], []>} : vector<2x128xf32>, vector<128x512xf32>, vector<2x512xf32> -> vector<2x512xf32>
    %394 = arith.addf %391, %393 : vector<2x512xf32>
    %395 = vector.extract_strided_slice %394 {offsets = [0, 0], sizes = [2, 128], strides = [1, 1]} : vector<2x512xf32> to vector<2x128xf32>
    %cst_160 = arith.constant 5.000000e-01 : f32
    %396 = vector.broadcast %cst_160 : f32 to vector<2x128xf32>
    %397 = arith.mulf %396, %395 : vector<2x128xf32>
    %398 = math.tanh %397 : vector<2x128xf32>
    %cst_161 = arith.constant 5.000000e-01 : f32
    %399 = vector.broadcast %cst_161 : f32 to vector<2x128xf32>
    %400 = arith.mulf %399, %398 : vector<2x128xf32>
    %cst_162 = arith.constant 5.000000e-01 : f32
    %401 = vector.broadcast %cst_162 : f32 to vector<2x128xf32>
    %402 = arith.addf %400, %401 : vector<2x128xf32>
    %403 = vector.extract_strided_slice %394 {offsets = [0, 128], sizes = [2, 128], strides = [1, 1]} : vector<2x512xf32> to vector<2x128xf32>
    %cst_163 = arith.constant 5.000000e-01 : f32
    %404 = vector.broadcast %cst_163 : f32 to vector<2x128xf32>
    %405 = arith.mulf %404, %403 : vector<2x128xf32>
    %406 = math.tanh %405 : vector<2x128xf32>
    %cst_164 = arith.constant 5.000000e-01 : f32
    %407 = vector.broadcast %cst_164 : f32 to vector<2x128xf32>
    %408 = arith.mulf %407, %406 : vector<2x128xf32>
    %cst_165 = arith.constant 5.000000e-01 : f32
    %409 = vector.broadcast %cst_165 : f32 to vector<2x128xf32>
    %410 = arith.addf %408, %409 : vector<2x128xf32>
    %411 = vector.extract_strided_slice %394 {offsets = [0, 256], sizes = [2, 128], strides = [1, 1]} : vector<2x512xf32> to vector<2x128xf32>
    %412 = math.tanh %411 : vector<2x128xf32>
    %413 = vector.extract_strided_slice %394 {offsets = [0, 384], sizes = [2, 128], strides = [1, 1]} : vector<2x512xf32> to vector<2x128xf32>
    %cst_166 = arith.constant 5.000000e-01 : f32
    %414 = vector.broadcast %cst_166 : f32 to vector<2x128xf32>
    %415 = arith.mulf %414, %413 : vector<2x128xf32>
    %416 = math.tanh %415 : vector<2x128xf32>
    %cst_167 = arith.constant 5.000000e-01 : f32
    %417 = vector.broadcast %cst_167 : f32 to vector<2x128xf32>
    %418 = arith.mulf %417, %416 : vector<2x128xf32>
    %cst_168 = arith.constant 5.000000e-01 : f32
    %419 = vector.broadcast %cst_168 : f32 to vector<2x128xf32>
    %420 = arith.addf %418, %419 : vector<2x128xf32>
    %421 = arith.mulf %410, %349 : vector<2x128xf32>
    %422 = arith.mulf %402, %412 : vector<2x128xf32>
    %423 = arith.addf %421, %422 : vector<2x128xf32>
    %424 = math.tanh %423 : vector<2x128xf32>
    %425 = arith.mulf %420, %424 : vector<2x128xf32>
    %426 = tpu.concatenate %425, %386 in 1 : vector<2x128xf32>, vector<2x128xf32> -> vector<2x256xf32>
    %c0_169 = arith.constant 0 : index
    %c0_170 = arith.constant 0 : index
    %427 = vector.load %arg6[%c0_169, %c0_170] : memref<256x512xf32, #tpu.memory_space<vmem>>, vector<256x512xf32>
    %cst_171 = arith.constant dense<0.000000e+00> : vector<2x512xf32>
    %428 = tpu.matmul %426, %427, %cst_171 {dimension_numbers = #tpu.dot_dimension_numbers<[1], [0], [0], [1], [0, 0, 1, 1], [], []>} : vector<2x256xf32>, vector<256x512xf32>, vector<2x512xf32> -> vector<2x512xf32>
    %429 = arith.addf %428, %10 : vector<2x512xf32>
    %430 = vector.extract_strided_slice %429 {offsets = [0, 0], sizes = [2, 128], strides = [1, 1]} : vector<2x512xf32> to vector<2x128xf32>
    %cst_172 = arith.constant 5.000000e-01 : f32
    %431 = vector.broadcast %cst_172 : f32 to vector<2x128xf32>
    %432 = arith.mulf %431, %430 : vector<2x128xf32>
    %433 = math.tanh %432 : vector<2x128xf32>
    %cst_173 = arith.constant 5.000000e-01 : f32
    %434 = vector.broadcast %cst_173 : f32 to vector<2x128xf32>
    %435 = arith.mulf %434, %433 : vector<2x128xf32>
    %cst_174 = arith.constant 5.000000e-01 : f32
    %436 = vector.broadcast %cst_174 : f32 to vector<2x128xf32>
    %437 = arith.addf %435, %436 : vector<2x128xf32>
    %438 = vector.extract_strided_slice %429 {offsets = [0, 128], sizes = [2, 128], strides = [1, 1]} : vector<2x512xf32> to vector<2x128xf32>
    %cst_175 = arith.constant 5.000000e-01 : f32
    %439 = vector.broadcast %cst_175 : f32 to vector<2x128xf32>
    %440 = arith.mulf %439, %438 : vector<2x128xf32>
    %441 = math.tanh %440 : vector<2x128xf32>
    %cst_176 = arith.constant 5.000000e-01 : f32
    %442 = vector.broadcast %cst_176 : f32 to vector<2x128xf32>
    %443 = arith.mulf %442, %441 : vector<2x128xf32>
    %cst_177 = arith.constant 5.000000e-01 : f32
    %444 = vector.broadcast %cst_177 : f32 to vector<2x128xf32>
    %445 = arith.addf %443, %444 : vector<2x128xf32>
    %446 = vector.extract_strided_slice %429 {offsets = [0, 256], sizes = [2, 128], strides = [1, 1]} : vector<2x512xf32> to vector<2x128xf32>
    %447 = math.tanh %446 : vector<2x128xf32>
    %448 = vector.extract_strided_slice %429 {offsets = [0, 384], sizes = [2, 128], strides = [1, 1]} : vector<2x512xf32> to vector<2x128xf32>
    %cst_178 = arith.constant 5.000000e-01 : f32
    %449 = vector.broadcast %cst_178 : f32 to vector<2x128xf32>
    %450 = arith.mulf %449, %448 : vector<2x128xf32>
    %451 = math.tanh %450 : vector<2x128xf32>
    %cst_179 = arith.constant 5.000000e-01 : f32
    %452 = vector.broadcast %cst_179 : f32 to vector<2x128xf32>
    %453 = arith.mulf %452, %451 : vector<2x128xf32>
    %cst_180 = arith.constant 5.000000e-01 : f32
    %454 = vector.broadcast %cst_180 : f32 to vector<2x128xf32>
    %455 = arith.addf %453, %454 : vector<2x128xf32>
    %456 = arith.mulf %445, %384 : vector<2x128xf32>
    %457 = arith.mulf %437, %447 : vector<2x128xf32>
    %458 = arith.addf %456, %457 : vector<2x128xf32>
    %459 = math.tanh %458 : vector<2x128xf32>
    %460 = arith.mulf %455, %459 : vector<2x128xf32>
    %461 = arith.index_cast %389 : i32 to index
    %c0_181 = arith.constant 0 : index
    %462 = vector.load %arg14[%461, %c0_181] : memref<16x128xf32, #tpu.memory_space<vmem>>, vector<2x128xf32>
    tpu.vector_store %arg14[%461, %c0_181], %460 {strides = array<i32>} : memref<16x128xf32, #tpu.memory_space<vmem>>, vector<2x128xf32>,
    %c6_i32 = arith.constant 6 : i32
    %c2_i32_182 = arith.constant 2 : i32
    %463 = arith.muli %c6_i32, %c2_i32_182 : i32
    %464 = arith.index_cast %463 : i32 to index
    %c0_183 = arith.constant 0 : index
    %465 = vector.load %arg13[%464, %c0_183] : memref<16x512xf32, #tpu.memory_space<vmem>>, vector<2x512xf32>
    %c0_184 = arith.constant 0 : index
    %c0_185 = arith.constant 0 : index
    %466 = vector.load %arg5[%c0_184, %c0_185] : memref<128x512xf32, #tpu.memory_space<vmem>>, vector<128x512xf32>
    %cst_186 = arith.constant dense<0.000000e+00> : vector<2x512xf32>
    %467 = tpu.matmul %425, %466, %cst_186 {dimension_numbers = #tpu.dot_dimension_numbers<[1], [0], [0], [1], [0, 0, 1, 1], [], []>} : vector<2x128xf32>, vector<128x512xf32>, vector<2x512xf32> -> vector<2x512xf32>
    %468 = arith.addf %465, %467 : vector<2x512xf32>
    %469 = vector.extract_strided_slice %468 {offsets = [0, 0], sizes = [2, 128], strides = [1, 1]} : vector<2x512xf32> to vector<2x128xf32>
    %cst_187 = arith.constant 5.000000e-01 : f32
    %470 = vector.broadcast %cst_187 : f32 to vector<2x128xf32>
    %471 = arith.mulf %470, %469 : vector<2x128xf32>
    %472 = math.tanh %471 : vector<2x128xf32>
    %cst_188 = arith.constant 5.000000e-01 : f32
    %473 = vector.broadcast %cst_188 : f32 to vector<2x128xf32>
    %474 = arith.mulf %473, %472 : vector<2x128xf32>
    %cst_189 = arith.constant 5.000000e-01 : f32
    %475 = vector.broadcast %cst_189 : f32 to vector<2x128xf32>
    %476 = arith.addf %474, %475 : vector<2x128xf32>
    %477 = vector.extract_strided_slice %468 {offsets = [0, 128], sizes = [2, 128], strides = [1, 1]} : vector<2x512xf32> to vector<2x128xf32>
    %cst_190 = arith.constant 5.000000e-01 : f32
    %478 = vector.broadcast %cst_190 : f32 to vector<2x128xf32>
    %479 = arith.mulf %478, %477 : vector<2x128xf32>
    %480 = math.tanh %479 : vector<2x128xf32>
    %cst_191 = arith.constant 5.000000e-01 : f32
    %481 = vector.broadcast %cst_191 : f32 to vector<2x128xf32>
    %482 = arith.mulf %481, %480 : vector<2x128xf32>
    %cst_192 = arith.constant 5.000000e-01 : f32
    %483 = vector.broadcast %cst_192 : f32 to vector<2x128xf32>
    %484 = arith.addf %482, %483 : vector<2x128xf32>
    %485 = vector.extract_strided_slice %468 {offsets = [0, 256], sizes = [2, 128], strides = [1, 1]} : vector<2x512xf32> to vector<2x128xf32>
    %486 = math.tanh %485 : vector<2x128xf32>
    %487 = vector.extract_strided_slice %468 {offsets = [0, 384], sizes = [2, 128], strides = [1, 1]} : vector<2x512xf32> to vector<2x128xf32>
    %cst_193 = arith.constant 5.000000e-01 : f32
    %488 = vector.broadcast %cst_193 : f32 to vector<2x128xf32>
    %489 = arith.mulf %488, %487 : vector<2x128xf32>
    %490 = math.tanh %489 : vector<2x128xf32>
    %cst_194 = arith.constant 5.000000e-01 : f32
    %491 = vector.broadcast %cst_194 : f32 to vector<2x128xf32>
    %492 = arith.mulf %491, %490 : vector<2x128xf32>
    %cst_195 = arith.constant 5.000000e-01 : f32
    %493 = vector.broadcast %cst_195 : f32 to vector<2x128xf32>
    %494 = arith.addf %492, %493 : vector<2x128xf32>
    %495 = arith.mulf %484, %423 : vector<2x128xf32>
    %496 = arith.mulf %476, %486 : vector<2x128xf32>
    %497 = arith.addf %495, %496 : vector<2x128xf32>
    %498 = math.tanh %497 : vector<2x128xf32>
    %499 = arith.mulf %494, %498 : vector<2x128xf32>
    %500 = tpu.concatenate %499, %460 in 1 : vector<2x128xf32>, vector<2x128xf32> -> vector<2x256xf32>
    %c0_196 = arith.constant 0 : index
    %c0_197 = arith.constant 0 : index
    %501 = vector.load %arg6[%c0_196, %c0_197] : memref<256x512xf32, #tpu.memory_space<vmem>>, vector<256x512xf32>
    %cst_198 = arith.constant dense<0.000000e+00> : vector<2x512xf32>
    %502 = tpu.matmul %500, %501, %cst_198 {dimension_numbers = #tpu.dot_dimension_numbers<[1], [0], [0], [1], [0, 0, 1, 1], [], []>} : vector<2x256xf32>, vector<256x512xf32>, vector<2x512xf32> -> vector<2x512xf32>
    %503 = arith.addf %502, %10 : vector<2x512xf32>
    %504 = vector.extract_strided_slice %503 {offsets = [0, 0], sizes = [2, 128], strides = [1, 1]} : vector<2x512xf32> to vector<2x128xf32>
    %cst_199 = arith.constant 5.000000e-01 : f32
    %505 = vector.broadcast %cst_199 : f32 to vector<2x128xf32>
    %506 = arith.mulf %505, %504 : vector<2x128xf32>
    %507 = math.tanh %506 : vector<2x128xf32>
    %cst_200 = arith.constant 5.000000e-01 : f32
    %508 = vector.broadcast %cst_200 : f32 to vector<2x128xf32>
    %509 = arith.mulf %508, %507 : vector<2x128xf32>
    %cst_201 = arith.constant 5.000000e-01 : f32
    %510 = vector.broadcast %cst_201 : f32 to vector<2x128xf32>
    %511 = arith.addf %509, %510 : vector<2x128xf32>
    %512 = vector.extract_strided_slice %503 {offsets = [0, 128], sizes = [2, 128], strides = [1, 1]} : vector<2x512xf32> to vector<2x128xf32>
    %cst_202 = arith.constant 5.000000e-01 : f32
    %513 = vector.broadcast %cst_202 : f32 to vector<2x128xf32>
    %514 = arith.mulf %513, %512 : vector<2x128xf32>
    %515 = math.tanh %514 : vector<2x128xf32>
    %cst_203 = arith.constant 5.000000e-01 : f32
    %516 = vector.broadcast %cst_203 : f32 to vector<2x128xf32>
    %517 = arith.mulf %516, %515 : vector<2x128xf32>
    %cst_204 = arith.constant 5.000000e-01 : f32
    %518 = vector.broadcast %cst_204 : f32 to vector<2x128xf32>
    %519 = arith.addf %517, %518 : vector<2x128xf32>
    %520 = vector.extract_strided_slice %503 {offsets = [0, 256], sizes = [2, 128], strides = [1, 1]} : vector<2x512xf32> to vector<2x128xf32>
    %521 = math.tanh %520 : vector<2x128xf32>
    %522 = vector.extract_strided_slice %503 {offsets = [0, 384], sizes = [2, 128], strides = [1, 1]} : vector<2x512xf32> to vector<2x128xf32>
    %cst_205 = arith.constant 5.000000e-01 : f32
    %523 = vector.broadcast %cst_205 : f32 to vector<2x128xf32>
    %524 = arith.mulf %523, %522 : vector<2x128xf32>
    %525 = math.tanh %524 : vector<2x128xf32>
    %cst_206 = arith.constant 5.000000e-01 : f32
    %526 = vector.broadcast %cst_206 : f32 to vector<2x128xf32>
    %527 = arith.mulf %526, %525 : vector<2x128xf32>
    %cst_207 = arith.constant 5.000000e-01 : f32
    %528 = vector.broadcast %cst_207 : f32 to vector<2x128xf32>
    %529 = arith.addf %527, %528 : vector<2x128xf32>
    %530 = arith.mulf %519, %458 : vector<2x128xf32>
    %531 = arith.mulf %511, %521 : vector<2x128xf32>
    %532 = arith.addf %530, %531 : vector<2x128xf32>
    %533 = math.tanh %532 : vector<2x128xf32>
    %534 = arith.mulf %529, %533 : vector<2x128xf32>
    %535 = arith.index_cast %463 : i32 to index
    %c0_208 = arith.constant 0 : index
    %536 = vector.load %arg14[%535, %c0_208] : memref<16x128xf32, #tpu.memory_space<vmem>>, vector<2x128xf32>
    tpu.vector_store %arg14[%535, %c0_208], %534 {strides = array<i32>} : memref<16x128xf32, #tpu.memory_space<vmem>>, vector<2x128xf32>,
    %c7_i32 = arith.constant 7 : i32
    %c2_i32_209 = arith.constant 2 : i32
    %537 = arith.muli %c7_i32, %c2_i32_209 : i32
    %538 = arith.index_cast %537 : i32 to index
    %c0_210 = arith.constant 0 : index
    %539 = vector.load %arg13[%538, %c0_210] : memref<16x512xf32, #tpu.memory_space<vmem>>, vector<2x512xf32>
    %c0_211 = arith.constant 0 : index
    %c0_212 = arith.constant 0 : index
    %540 = vector.load %arg5[%c0_211, %c0_212] : memref<128x512xf32, #tpu.memory_space<vmem>>, vector<128x512xf32>
    %cst_213 = arith.constant dense<0.000000e+00> : vector<2x512xf32>
    %541 = tpu.matmul %499, %540, %cst_213 {dimension_numbers = #tpu.dot_dimension_numbers<[1], [0], [0], [1], [0, 0, 1, 1], [], []>} : vector<2x128xf32>, vector<128x512xf32>, vector<2x512xf32> -> vector<2x512xf32>
    %542 = arith.addf %539, %541 : vector<2x512xf32>
    %543 = vector.extract_strided_slice %542 {offsets = [0, 0], sizes = [2, 128], strides = [1, 1]} : vector<2x512xf32> to vector<2x128xf32>
    %cst_214 = arith.constant 5.000000e-01 : f32
    %544 = vector.broadcast %cst_214 : f32 to vector<2x128xf32>
    %545 = arith.mulf %544, %543 : vector<2x128xf32>
    %546 = math.tanh %545 : vector<2x128xf32>
    %cst_215 = arith.constant 5.000000e-01 : f32
    %547 = vector.broadcast %cst_215 : f32 to vector<2x128xf32>
    %548 = arith.mulf %547, %546 : vector<2x128xf32>
    %cst_216 = arith.constant 5.000000e-01 : f32
    %549 = vector.broadcast %cst_216 : f32 to vector<2x128xf32>
    %550 = arith.addf %548, %549 : vector<2x128xf32>
    %551 = vector.extract_strided_slice %542 {offsets = [0, 128], sizes = [2, 128], strides = [1, 1]} : vector<2x512xf32> to vector<2x128xf32>
    %cst_217 = arith.constant 5.000000e-01 : f32
    %552 = vector.broadcast %cst_217 : f32 to vector<2x128xf32>
    %553 = arith.mulf %552, %551 : vector<2x128xf32>
    %554 = math.tanh %553 : vector<2x128xf32>
    %cst_218 = arith.constant 5.000000e-01 : f32
    %555 = vector.broadcast %cst_218 : f32 to vector<2x128xf32>
    %556 = arith.mulf %555, %554 : vector<2x128xf32>
    %cst_219 = arith.constant 5.000000e-01 : f32
    %557 = vector.broadcast %cst_219 : f32 to vector<2x128xf32>
    %558 = arith.addf %556, %557 : vector<2x128xf32>
    %559 = vector.extract_strided_slice %542 {offsets = [0, 256], sizes = [2, 128], strides = [1, 1]} : vector<2x512xf32> to vector<2x128xf32>
    %560 = math.tanh %559 : vector<2x128xf32>
    %561 = vector.extract_strided_slice %542 {offsets = [0, 384], sizes = [2, 128], strides = [1, 1]} : vector<2x512xf32> to vector<2x128xf32>
    %cst_220 = arith.constant 5.000000e-01 : f32
    %562 = vector.broadcast %cst_220 : f32 to vector<2x128xf32>
    %563 = arith.mulf %562, %561 : vector<2x128xf32>
    %564 = math.tanh %563 : vector<2x128xf32>
    %cst_221 = arith.constant 5.000000e-01 : f32
    %565 = vector.broadcast %cst_221 : f32 to vector<2x128xf32>
    %566 = arith.mulf %565, %564 : vector<2x128xf32>
    %cst_222 = arith.constant 5.000000e-01 : f32
    %567 = vector.broadcast %cst_222 : f32 to vector<2x128xf32>
    %568 = arith.addf %566, %567 : vector<2x128xf32>
    %569 = arith.mulf %558, %497 : vector<2x128xf32>
    %570 = arith.mulf %550, %560 : vector<2x128xf32>
    %571 = arith.addf %569, %570 : vector<2x128xf32>
    %572 = math.tanh %571 : vector<2x128xf32>
    %573 = arith.mulf %568, %572 : vector<2x128xf32>
    %574 = tpu.concatenate %573, %534 in 1 : vector<2x128xf32>, vector<2x128xf32> -> vector<2x256xf32>
    %c0_223 = arith.constant 0 : index
    %c0_224 = arith.constant 0 : index
    %575 = vector.load %arg6[%c0_223, %c0_224] : memref<256x512xf32, #tpu.memory_space<vmem>>, vector<256x512xf32>
    %cst_225 = arith.constant dense<0.000000e+00> : vector<2x512xf32>
    %576 = tpu.matmul %574, %575, %cst_225 {dimension_numbers = #tpu.dot_dimension_numbers<[1], [0], [0], [1], [0, 0, 1, 1], [], []>} : vector<2x256xf32>, vector<256x512xf32>, vector<2x512xf32> -> vector<2x512xf32>
    %577 = arith.addf %576, %10 : vector<2x512xf32>
    %578 = vector.extract_strided_slice %577 {offsets = [0, 0], sizes = [2, 128], strides = [1, 1]} : vector<2x512xf32> to vector<2x128xf32>
    %cst_226 = arith.constant 5.000000e-01 : f32
    %579 = vector.broadcast %cst_226 : f32 to vector<2x128xf32>
    %580 = arith.mulf %579, %578 : vector<2x128xf32>
    %581 = math.tanh %580 : vector<2x128xf32>
    %cst_227 = arith.constant 5.000000e-01 : f32
    %582 = vector.broadcast %cst_227 : f32 to vector<2x128xf32>
    %583 = arith.mulf %582, %581 : vector<2x128xf32>
    %cst_228 = arith.constant 5.000000e-01 : f32
    %584 = vector.broadcast %cst_228 : f32 to vector<2x128xf32>
    %585 = arith.addf %583, %584 : vector<2x128xf32>
    %586 = vector.extract_strided_slice %577 {offsets = [0, 128], sizes = [2, 128], strides = [1, 1]} : vector<2x512xf32> to vector<2x128xf32>
    %cst_229 = arith.constant 5.000000e-01 : f32
    %587 = vector.broadcast %cst_229 : f32 to vector<2x128xf32>
    %588 = arith.mulf %587, %586 : vector<2x128xf32>
    %589 = math.tanh %588 : vector<2x128xf32>
    %cst_230 = arith.constant 5.000000e-01 : f32
    %590 = vector.broadcast %cst_230 : f32 to vector<2x128xf32>
    %591 = arith.mulf %590, %589 : vector<2x128xf32>
    %cst_231 = arith.constant 5.000000e-01 : f32
    %592 = vector.broadcast %cst_231 : f32 to vector<2x128xf32>
    %593 = arith.addf %591, %592 : vector<2x128xf32>
    %594 = vector.extract_strided_slice %577 {offsets = [0, 256], sizes = [2, 128], strides = [1, 1]} : vector<2x512xf32> to vector<2x128xf32>
    %595 = math.tanh %594 : vector<2x128xf32>
    %596 = vector.extract_strided_slice %577 {offsets = [0, 384], sizes = [2, 128], strides = [1, 1]} : vector<2x512xf32> to vector<2x128xf32>
    %cst_232 = arith.constant 5.000000e-01 : f32
    %597 = vector.broadcast %cst_232 : f32 to vector<2x128xf32>
    %598 = arith.mulf %597, %596 : vector<2x128xf32>
    %599 = math.tanh %598 : vector<2x128xf32>
    %cst_233 = arith.constant 5.000000e-01 : f32
    %600 = vector.broadcast %cst_233 : f32 to vector<2x128xf32>
    %601 = arith.mulf %600, %599 : vector<2x128xf32>
    %cst_234 = arith.constant 5.000000e-01 : f32
    %602 = vector.broadcast %cst_234 : f32 to vector<2x128xf32>
    %603 = arith.addf %601, %602 : vector<2x128xf32>
    %604 = arith.mulf %593, %532 : vector<2x128xf32>
    %605 = arith.mulf %585, %595 : vector<2x128xf32>
    %606 = arith.addf %604, %605 : vector<2x128xf32>
    %607 = math.tanh %606 : vector<2x128xf32>
    %608 = arith.mulf %603, %607 : vector<2x128xf32>
    %609 = arith.index_cast %537 : i32 to index
    %c0_235 = arith.constant 0 : index
    %610 = vector.load %arg14[%609, %c0_235] : memref<16x128xf32, #tpu.memory_space<vmem>>, vector<2x128xf32>
    tpu.vector_store %arg14[%609, %c0_235], %608 {strides = array<i32>} : memref<16x128xf32, #tpu.memory_space<vmem>>, vector<2x128xf32>,
    %c8_i32 = arith.constant 8 : i32
    %c0_236 = arith.constant 0 : index
    %c0_237 = arith.constant 0 : index
    %c0_238 = arith.constant 0 : index
    %611 = vector.load %arg11[%c0_236, %c0_237, %c0_238] : memref<2x2x128xf32, #tpu.memory_space<vmem>>, vector<1x2x128xf32>
    %612 = vector.shape_cast %611 : vector<1x2x128xf32> to vector<2x128xf32>
    %613 = vector.shape_cast %573 : vector<2x128xf32> to vector<1x2x128xf32>
    tpu.vector_store %arg11[%c0_236, %c0_237, %c0_238], %613 {strides = array<i32>} : memref<2x2x128xf32, #tpu.memory_space<vmem>>, vector<1x2x128xf32>,
    %c0_239 = arith.constant 0 : index
    %c0_240 = arith.constant 0 : index
    %c0_241 = arith.constant 0 : index
    %614 = vector.load %arg12[%c0_239, %c0_240, %c0_241] : memref<2x2x128xf32, #tpu.memory_space<vmem>>, vector<1x2x128xf32>
    %615 = vector.shape_cast %614 : vector<1x2x128xf32> to vector<2x128xf32>
    %616 = vector.shape_cast %571 : vector<2x128xf32> to vector<1x2x128xf32>
    tpu.vector_store %arg12[%c0_239, %c0_240, %c0_241], %616 {strides = array<i32>} : memref<2x2x128xf32, #tpu.memory_space<vmem>>, vector<1x2x128xf32>,
    %c1_242 = arith.constant 1 : index
    %c0_243 = arith.constant 0 : index
    %c0_244 = arith.constant 0 : index
    %617 = vector.load %arg11[%c1_242, %c0_243, %c0_244] : memref<2x2x128xf32, #tpu.memory_space<vmem>>, vector<1x2x128xf32>
    %618 = vector.shape_cast %617 : vector<1x2x128xf32> to vector<2x128xf32>
    %619 = vector.shape_cast %608 : vector<2x128xf32> to vector<1x2x128xf32>
    tpu.vector_store %arg11[%c1_242, %c0_243, %c0_244], %619 {strides = array<i32>} : memref<2x2x128xf32, #tpu.memory_space<vmem>>, vector<1x2x128xf32>,
    %c1_245 = arith.constant 1 : index
    %c0_246 = arith.constant 0 : index
    %c0_247 = arith.constant 0 : index
    %620 = vector.load %arg12[%c1_245, %c0_246, %c0_247] : memref<2x2x128xf32, #tpu.memory_space<vmem>>, vector<1x2x128xf32>
    %621 = vector.shape_cast %620 : vector<1x2x128xf32> to vector<2x128xf32>
    %622 = vector.shape_cast %606 : vector<2x128xf32> to vector<1x2x128xf32>
    tpu.vector_store %arg12[%c1_245, %c0_246, %c0_247], %622 {strides = array<i32>} : memref<2x2x128xf32, #tpu.memory_space<vmem>>, vector<1x2x128xf32>,
    %c0_248 = arith.constant 0 : index
    %c0_249 = arith.constant 0 : index
    %623 = vector.load %arg14[%c0_248, %c0_249] : memref<16x128xf32, #tpu.memory_space<vmem>>, vector<16x128xf32>
    %c0_250 = arith.constant 0 : index
    %c0_251 = arith.constant 0 : index
    %624 = vector.load %arg8[%c0_250, %c0_251] : memref<128x4xf32, #tpu.memory_space<vmem>>, vector<128x4xf32>
    %cst_252 = arith.constant dense<0.000000e+00> : vector<16x4xf32>
    %625 = tpu.matmul %623, %624, %cst_252 {dimension_numbers = #tpu.dot_dimension_numbers<[1], [0], [0], [1], [0, 0, 1, 1], [], []>} : vector<16x128xf32>, vector<128x4xf32>, vector<16x4xf32> -> vector<16x4xf32>
    %c0_253 = arith.constant 0 : index
    %c0_254 = arith.constant 0 : index
    %626 = vector.load %arg9[%c0_253, %c0_254] : memref<1x4xf32, #tpu.memory_space<vmem>>, vector<1x4xf32>
    %627 = vector.shape_cast %626 : vector<1x4xf32> to vector<1x4xf32>
    %628 = vector.broadcast %627 : vector<1x4xf32> to vector<16x4xf32>
    %629 = arith.addf %625, %628 : vector<16x4xf32>
    %c0_255 = arith.constant 0 : index
    %c0_256 = arith.constant 0 : index
    %630 = vector.load %arg10[%c0_255, %c0_256] : memref<16x4xf32, #tpu.memory_space<vmem>>, vector<16x4xf32>
    tpu.vector_store %arg10[%c0_255, %c0_256], %629 {strides = array<i32>} : memref<16x4xf32, #tpu.memory_space<vmem>>, vector<16x4xf32>,
    return
  }
}

</mosaic_0001>

<bundles_post_ra>
// kernel: decoder_forward.1
= control target key start
LH: loop header
LB: loop body
LE: loop exit
PB: predicated region body
PF: predicated region fallthrough
CT: control target
= control target key end

     0   :  { %18 = vsyncpa [#allocation5], 0  ;;  %vm70_vm0 = vcmask 1043456   ;;  %vm63_vm1 = vcmask 31744   ;;  %s10168_s0 = inlined_call_operand.vmem [shape: f32[16,4], index: 0, kind: input, shape index: {}]   ;;  %s10169_s1 = inlined_call_operand.vmem [shape: f32[2,2,128], index: 1, kind: input, shape index: {}]   ;;  %s10170_s2 = inlined_call_operand.vmem [shape: f32[2,2,128], index: 2, kind: input, shape index: {}]   ;;  %s10171_s3 = inlined_call_operand.vmem [shape: f32[4,512], index: 3, kind: input, shape index: {}]   ;;  %s10172_s4 = inlined_call_operand.vmem [shape: f32[1,512], index: 4, kind: input, shape index: {}]   ;;  %s10173_s5 = inlined_call_operand.vmem [shape: f32[128,512], index: 5, kind: input, shape index: {}]   ;;  %s10174_s6 = inlined_call_operand.vmem [shape: f32[256,512], index: 6, kind: input, shape index: {}]   ;;  %s10175_s7 = inlined_call_operand.vmem [shape: f32[1,512], index: 7, kind: input, shape index: {}]   ;;  %s10176_s8 = inlined_call_operand.vmem [shape: f32[128,4], index: 8, kind: input, shape index: {}]   ;;  %s10177_s9 = inlined_call_operand.vmem [shape: f32[1,4], index: 9, kind: input, shape index: {}]   ;;  %s10178_s10 = inlined_call_operand.vmem [shape: f32[16,4], index: 10, kind: output, shape index: {0}]   ;;  %s10179_s11 = inlined_call_operand.hbm [shape: f32[2,2,128], index: 11, kind: output, shape index: {1}]   ;;  %s10180_s12 = inlined_call_operand.hbm [shape: f32[2,2,128], index: 12, kind: output, shape index: {2}]  }
   0x1   :  { %v259_v0 = vld [vmem:[%s10173_s5 + $0x1e0] sm:$0xff]  ;;  %v43_v5 = vld [vmem:[%s10171_s3 + $0x8] sm:$0xff]  ;;  %v261_v12 = vld [vmem:[%s10173_s5 + $0x1f0] sm:$0xff] }
   0x2   :  { %v255_v1 = vld [vmem:[%s10173_s5 + $0x1c0] sm:$0xff]  ;;  %263 = vmatpush.msra.mxu1 %v259_v0  ;;  %58 = vst [vmem:[#allocation1 + $0x10] ss:$2 sm:$0xff] %v43_v5  ;;  %v4588_v15 = vld [vmem:[%s10173_s5 + $0x1f8] sm:$0xff]  ;;  %v257_v17 = vld [vmem:[%s10173_s5 + $0x1d0] sm:$0xff] }
   0x3   :  { %v251_v2 = vld [vmem:[%s10173_s5 + $0x1a0] sm:$0xff]  ;;  %v4601_v18 = vld [vmem:[%s10173_s5 + $0x1d8] sm:$0xff]  ;;  %v253_v21 = vld [vmem:[%s10173_s5 + $0x1b0] sm:$0xff] }
   0x4   :  { %264 = vmatpush.msra.mxu1 %v255_v1  ;;  %v42_v3 = vld [vmem:[%s10171_s3] sm:$0xff]  ;;  %v4614_v22 = vld [vmem:[%s10173_s5 + $0x1b8] sm:$0xff]  ;;  %v249_v24 = vld [vmem:[%s10173_s5 + $0x190] sm:$0xff] }
   0x5   :  { %v247_v4 = vld [vmem:[%s10173_s5 + $0x180] sm:$0xff]  ;;  %56 = vst [vmem:[#allocation1] ss:$2 sm:$0xff] %v42_v3  ;;  %v4628_v25 = vld [vmem:[%s10168_s0 + $0x8] sm:$0xff]  ;;  %v4633_v26 = vld [vmem:[%s10173_s5 + $0x198] sm:$0xff] }
   0x6   :  { %265 = vmatpush.msra.mxu1 %v251_v2  ;;  %v243_v6 = vld [vmem:[%s10173_s5 + $0x160] sm:$0xff]  ;;  %v245_v28 = vld [vmem:[%s10173_s5 + $0x170] sm:$0xff]  ;;  %v4645_v29 = vld [vmem:[%s10173_s5 + $0x178] sm:$0xff] }
   0x7   :  { %v239_v7 = vld [vmem:[%s10173_s5 + $0x140] sm:$0xff]  ;;  %v4655_v31 = vld [vmem:[%s10173_s5 + $0x150] sm:$0xff]  ;;  %v4661_v32 = vld [vmem:[%s10173_s5 + $0x158] sm:$0xff] }
   0x8   :  { %266 = vmatpush.msra.mxu1 %v247_v4  ;;  %v235_v8 = vld [vmem:[%s10173_s5 + $0x120] sm:$0xff]  ;;  %10565 = vst [vmem:[#allocation10_spill] sm:$0xff] %v4655_v31 }
   0x9   :  { %v4574_v9 = vld [vmem:[%s10168_s0] sm:$0xff]  ;;  %v61_v13 = vld.sshfl [vmem:[#allocation1 + $0x10] sm:$0xff pattern:$0x75316420] }
   0xa   :  { %267 = vmatpush.msra.mxu1 %v243_v6  ;;  %v231_v10 = vld [vmem:[%s10173_s5 + $0x100] sm:$0xff]  ;;  %v62_v14 = vld.sshfl [vmem:[#allocation1 + $0x18] sm:$0xff pattern:$0x75316420] }
   0xb   :  { %v227_v16 = vld [vmem:[%s10173_s5 + $0xe0] sm:$0xff]  ;;  %4248 = vmatpush.msk.msra.mxu3 %vm70_vm0, %v62_v14 }
   0xc   :  { %268 = vmatpush.msra.mxu1 %v239_v7  ;;  %v60_v11 = vld.sshfl [vmem:[#allocation1 + $0x8] sm:$0xff pattern:$0x75316420]  ;;  %v59_v19 = vld.sshfl [vmem:[#allocation1] sm:$0xff pattern:$0x75316420] }
   0xd   :  { %4242 = vmatpush.msk.msra.mxu2 %vm70_vm0, %v60_v11  ;;  %v223_v20 = vld [vmem:[%s10173_s5 + $0xc0] sm:$0xff]  ;;  %323 = vmatpush.msrb.mxu3 %v4588_v15 }
   0xe   :  { %269 = vmatpush.msra.mxu1 %v235_v8  ;;  %4243 = vmatmul.msk.f32.vlgmr.msra.gmra.mxu2 %vm63_vm1, %v4574_v9  ;;  %v219_v23 = vld [vmem:[%s10173_s5 + $0xa0] sm:$0xff] }
   0xf   :  { %4245 = vmatpush.msk.msrb.mxu2 %vm70_vm0, %v61_v13  ;;  %4239 = vmatpush.msk.msra.mxu0 %vm70_vm0, %v59_v19  ;;  %v215_v27 = vld [vmem:[%s10173_s5 + $0x80] sm:$0xff] }
  0x10   :  { %270 = vmatpush.msra.mxu1 %v231_v10  ;;  %324 = vmatpush.msrb.mxu3 %v4601_v18  ;;  %v211_v30 = vld [vmem:[%s10173_s5 + $0x60] sm:$0xff] }
  0x11   :  { %303 = vmatpush.msra.mxu2 %v261_v12  ;;  %4240 = vmatmul.msk.f32.vlgmr.msra.gmra.mxu0 %vm63_vm1, %v4574_v9 }
  0x12   :  { %271 = vmatpush.msra.mxu1 %v227_v16  ;;  %325 = vmatpush.msrb.mxu3 %v4614_v22 }
  0x13   :  { %304 = vmatpush.msra.mxu2 %v257_v17 }
  0x14   :  { %272 = vmatpush.msra.mxu1 %v223_v20  ;;  %326 = vmatpush.msrb.mxu3 %v4633_v26 }
  0x15   :  { %305 = vmatpush.msra.mxu2 %v253_v21 }
  0x16   :  { %273 = vmatpush.msra.mxu1 %v219_v23  ;;  %4244 = vmatmul.msk.f32.gmra.mxu2 %vm63_vm1, %v4628_v25 }
  0x17   :  { %306 = vmatpush.msra.mxu2 %v249_v24 }
  0x18   :  { %274 = vmatpush.msra.mxu1 %v215_v27 }
  0x19   :  { %307 = vmatpush.msra.mxu2 %v245_v28 }
  0x1a   :  { %19 = vsyncpa [#allocation7], 0  ;;  %v207_v33 = vld [vmem:[%s10173_s5 + $0x40] sm:$0xff]  ;;  %v4669_v34 = vld [vmem:[%s10173_s5 + $0x130] sm:$0xff]  ;;  %327 = vmatpush.msrb.mxu3 %v4645_v29  ;;  %275 = vmatpush.msra.mxu1 %v211_v30  ;;  %s4475_s18 = smov [#allocation4]   ;;  %s4477_s21 = smov 2  }
  0x1b   :  { %10566 = vst [vmem:[#allocation11_spill] sm:$0xff] %v4669_v34  ;;  %308 = vmatpush.msra.mxu2 %v4655_v31  ;;  %v4676_v35 = vld [vmem:[%s10173_s5 + $0x138] sm:$0xff]  ;;  %v203_v36 = vld [vmem:[%s10173_s5 + $0x20] sm:$0xff]  ;;  %v4684_v37 = vld [vmem:[%s10173_s5 + $0x110] sm:$0xff]  ;;  %4241 = vmatmul.msk.f32.gmra.mxu0 %vm63_vm1, %v4628_v25  ;;  %s4205_s19 = sshll.u32 %s4475_s18, 4  ;;  %s4478_s22 = smov [#allocation6]   ;;  %s4206_s19 = int_to_ptr.vmem [resolvable:$true] %s4205_s19 }
  0x1c   :  { %10567 = vst [vmem:[#allocation12_spill] sm:$0xff] %v4684_v37  ;;  %328 = vmatpush.msrb.mxu3 %v4661_v32  ;;  %276 = vmatpush.msra.mxu1 %v207_v33  ;;  %v4693_v38 = vld [vmem:[%s10173_s5 + $0x118] sm:$0xff]  ;;  %v199_v39 = vld [vmem:[%s10173_s5] sm:$0xff]  ;;  %v4701_v40 = vld [vmem:[%s10173_s5 + $0xf0] sm:$0xff]  ;;  %s4218_s3 = sshll.u32 %s4478_s22, 4  ;;  %s4220_s25 = sshll.u32 %s10180_s12, 4  ;;  %s4219_s3 = int_to_ptr.vmem [resolvable:$true] %s4218_s3  ;;  %s4221_s25 = int_to_ptr.hbm [resolvable:$true] %s4220_s25 }
  0x1d   :  { %309 = vmatpush.msra.mxu2 %v4669_v34  ;;  %10568 = vst [vmem:[#allocation13_spill] sm:$0xff] %v4701_v40  ;;  %v4707_v41 = vld [vmem:[%s10173_s5 + $0x1e8] sm:$0xff]  ;;  %v4715_v42 = vld [vmem:[%s10173_s5 + $0xd0] sm:$0xff]  ;;  %v4721_v43 = vld [vmem:[%s10173_s5 + $0xf8] sm:$0xff]  ;;  %4249 = vmatmul.msk.f32.vlgmr.msra.gmra.mxu3 %vm63_vm1, %v4574_v9 }
  0x1e   :  { %329 = vmatpush.msrb.mxu3 %v4676_v35  ;;  %277 = vmatpush.msra.mxu1 %v203_v36  ;;  %10569 = vst [vmem:[#allocation14_spill] sm:$0xff] %v4715_v42  ;;  %v4726_v44 = vld [vmem:[%s10173_s5 + $0x1c8] sm:$0xff]  ;;  %v4733_v45 = vld [vmem:[%s10173_s5 + $0xb0] sm:$0xff]  ;;  %v4740_v46 = vld [vmem:[%s10173_s5 + $0xd8] sm:$0xff] }
  0x1f   :  { %310 = vmatpush.msra.mxu2 %v4684_v37  ;;  %10570 = vst [vmem:[#allocation15_spill] sm:$0xff] %v4733_v45  ;;  %v4745_v47 = vld [vmem:[%s10173_s5 + $0x1a8] sm:$0xff]  ;;  %v4753_v48 = vld [vmem:[%s10173_s5 + $0x90] sm:$0xff]  ;;  %v4758_v49 = vld [vmem:[%s10173_s5 + $0xb8] sm:$0xff] }
  0x20   :  { %4246 = vmatmul.msk.f32.vlgmr.msrb.gmra.mxu2 %vm63_vm1, %v4574_v9  ;;  %330 = vmatpush.msrb.mxu3 %v4693_v38  ;;  %10571 = vst [vmem:[#allocation16_spill] sm:$0xff] %v4753_v48  ;;  %v4763_v50 = vld [vmem:[%s10173_s5 + $0x188] sm:$0xff]  ;;  %v4771_v51 = vld [vmem:[%s10173_s5 + $0x70] sm:$0xff]  ;;  %v4776_v52 = vld [vmem:[%s10173_s5 + $0x98] sm:$0xff] }
  0x21   :  { %278 = vmatpush.msra.mxu1 %v199_v39  ;;  %311 = vmatpush.msra.mxu2 %v4701_v40  ;;  %10572 = vst [vmem:[#allocation17_spill] sm:$0xff] %v4771_v51  ;;  %v4781_v53 = vld [vmem:[%s10173_s5 + $0x168] sm:$0xff]  ;;  %v4791_v54 = vld [vmem:[%s10173_s5 + $0x50] sm:$0xff]  ;;  %v189_v55 = vld [vmem:[%s10169_s1] sm:$0x3] }
  0x22   :  { %331 = vmatpush.msrb.mxu3 %v4721_v43  ;;  %10573 = vst [vmem:[#allocation18_spill] sm:$0xff] %v4791_v54  ;;  %v4799_v56 = vld [vmem:[%s10173_s5 + $0x148] sm:$0xff]  ;;  %v4806_v57 = vld [vmem:[%s10173_s5 + $0x78] sm:$0xff]  ;;  %v4812_v58 = vld [vmem:[%s10173_s5 + $0x30] sm:$0xff]  ;;  %279 = vmatmul.f32.vlgmr.msra.gmra.mxu1 %v189_v55 }
  0x23   :  { %283 = vmatpush.msrb.mxu1 %v4707_v41  ;;  %312 = vmatpush.msra.mxu2 %v4715_v42  ;;  %10574 = vst [vmem:[#allocation19_spill] sm:$0xff] %v4812_v58  ;;  %v4819_v59 = vld [vmem:[%s10173_s5 + $0x128] sm:$0xff]  ;;  %v4825_v60 = vld [vmem:[%s10173_s5 + $0x58] sm:$0xff]  ;;  %v4831_v61 = vld [vmem:[%s10173_s5 + $0x10] sm:$0xff] }
  0x24   :  { %332 = vmatpush.msrb.mxu3 %v4740_v46  ;;  %10575 = vst [vmem:[#allocation20_spill] sm:$0xff] %v4831_v61  ;;  %v4837_v62 = vld [vmem:[%s10173_s5 + $0x108] sm:$0xff]  ;;  %v4845_v63 = vld [vmem:[%s10173_s5 + $0x38] sm:$0xff]  ;;  %v4946_v17 = vld [vmem:[%s10174_s6 + $0x3e0] sm:$0xff] }
  0x25   :  { %284 = vmatpush.msrb.mxu1 %v4726_v44  ;;  %313 = vmatpush.msra.mxu2 %v4733_v45  ;;  %v4850_v0 = vld [vmem:[%s10173_s5 + $0xe8] sm:$0xff]  ;;  %v4857_v1 = vld [vmem:[%s10173_s5 + $0x18] sm:$0xff]  ;;  %v4958_v20 = vld [vmem:[%s10174_s6 + $0x3c0] sm:$0xff] }
  0x26   :  { %333 = vmatpush.msrb.mxu3 %v4758_v49  ;;  %v4862_v2 = vld [vmem:[%s10173_s5 + $0xc8] sm:$0xff]  ;;  %v4970_v23 = vld [vmem:[%s10174_s6 + $0x3a0] sm:$0xff] }
  0x27   :  { %285 = vmatpush.msrb.mxu1 %v4745_v47  ;;  %314 = vmatpush.msra.mxu2 %v4753_v48  ;;  %v4869_v3 = vld [vmem:[%s10174_s6 + $0x3e8] sm:$0xff]  ;;  %v4994_v28 = vld [vmem:[%s10174_s6 + $0x360] sm:$0xff] }
  0x28   :  { %4247 = vmatmul.msk.f32.gmra.mxu2 %vm63_vm1, %v4628_v25  ;;  %334 = vmatpush.msrb.mxu3 %v4776_v52  ;;  %v4874_v4 = vld [vmem:[%s10173_s5 + $0xa8] sm:$0xff]  ;;  %v5006_v33 = vld [vmem:[%s10174_s6 + $0x340] sm:$0xff] }
  0x29   :  { %286 = vmatpush.msrb.mxu1 %v4763_v50  ;;  %315 = vmatpush.msra.mxu2 %v4771_v51  ;;  %v4881_v5 = vld [vmem:[%s10174_s6 + $0x3c8] sm:$0xff]  ;;  %v5018_v39 = vld [vmem:[%s10174_s6 + $0x320] sm:$0xff] }
  0x2a   :  { %4250 = vmatmul.msk.f32.gmra.mxu3 %vm63_vm1, %v4628_v25  ;;  %v4886_v6 = vld [vmem:[%s10173_s5 + $0x88] sm:$0xff]  ;;  %v4982_v25 = vld [vmem:[%s10174_s6 + $0x380] sm:$0xff] }
  0x2b   :  { %287 = vmatpush.msrb.mxu1 %v4781_v53  ;;  %316 = vmatpush.msra.mxu2 %v4791_v54  ;;  %v4893_v7 = vld [vmem:[%s10174_s6 + $0x3a8] sm:$0xff]  ;;  %v5042_v54 = vld [vmem:[%s10174_s6 + $0x2e0] sm:$0xff] }
  0x2c   :  { %335 = vmatpush.msrb.mxu3 %v4806_v57  ;;  %v4898_v8 = vld [vmem:[%s10173_s5 + $0x68] sm:$0xff]  ;;  %v5049_v51 = vld [vmem:[%s10174_s6 + $0x2c0] sm:$0xff] }
  0x2d   :  { %288 = vmatpush.msrb.mxu1 %v4799_v56  ;;  %317 = vmatpush.msra.mxu2 %v4812_v58  ;;  %v4905_v9 = vld [vmem:[%s10174_s6 + $0x388] sm:$0xff]  ;;  %v5056_v48 = vld [vmem:[%s10174_s6 + $0x2a0] sm:$0xff] }
  0x2e   :  { %336 = vmatpush.msrb.mxu3 %v4825_v60  ;;  %v4910_v10 = vld [vmem:[%s10173_s5 + $0x48] sm:$0xff]  ;;  %10581 = vst [vmem:[#allocation26_spill] sm:$0xff] %v5056_v48  ;;  %v5062_v45 = vld [vmem:[%s10174_s6 + $0x280] sm:$0xff] }
  0x2f   :  { %289 = vmatpush.msrb.mxu1 %v4819_v59  ;;  %318 = vmatpush.msra.mxu2 %v4831_v61  ;;  %v4917_v11 = vld [vmem:[%s10174_s6 + $0x368] sm:$0xff]  ;;  %v5030_v61 = vld [vmem:[%s10174_s6 + $0x300] sm:$0xff]  ;;  %10582 = vst [vmem:[#allocation27_spill] sm:$0xff] %v5062_v45 }
  0x30   :  { %319 = vmatmul.f32.vlgmr.msra.gmra.mxu2 %v189_v55  ;;  %337 = vmatpush.msrb.mxu3 %v4845_v63  ;;  %v4922_v12 = vld [vmem:[%s10173_s5 + $0x28] sm:$0xff]  ;;  %v5068_v42 = vld [vmem:[%s10174_s6 + $0x260] sm:$0xff] }
  0x31   :  { %290 = vmatpush.msrb.mxu1 %v4837_v62  ;;  %v4929_v13 = vld [vmem:[%s10174_s6 + $0x348] sm:$0xff]  ;;  %10583 = vst [vmem:[#allocation28_spill] sm:$0xff] %v5068_v42  ;;  %v5074_v40 = vld [vmem:[%s10174_s6 + $0x240] sm:$0xff] }
  0x32   :  { %338 = vmatpush.msrb.mxu3 %v4857_v1  ;;  %v4934_v14 = vld [vmem:[%s10173_s5 + $0x8] sm:$0xff]  ;;  %10584 = vst [vmem:[#allocation29_spill] sm:$0xff] %v5074_v40  ;;  %v5080_v37 = vld [vmem:[%s10174_s6 + $0x220] sm:$0xff] }
  0x33   :  { %291 = vmatpush.msrb.mxu1 %v4850_v0  ;;  %339 = vmatmul.f32.vlgmr.msrb.gmra.mxu3 %v189_v55  ;;  %v4941_v16 = vld [vmem:[%s10174_s6 + $0x328] sm:$0xff]  ;;  %10585 = vst [vmem:[#allocation30_spill] sm:$0xff] %v5080_v37  ;;  %v429_v34 = vld [vmem:[%s10174_s6 + $0x200] sm:$0xff] }
  0x34   :  { %553 = vmatpush.msra.mxu3 %v4869_v3  ;;  %v4953_v19 = vld [vmem:[%s10174_s6 + $0x308] sm:$0xff] }
  0x35   :  { %292 = vmatpush.msrb.mxu1 %v4862_v2  ;;  %v4965_v21 = vld [vmem:[%s10174_s6 + $0x2e8] sm:$0xff] }
  0x36   :  { %554 = vmatpush.msra.mxu3 %v4881_v5  ;;  %v4977_v24 = vld [vmem:[%s10174_s6 + $0x2c8] sm:$0xff] }
  0x37   :  { %293 = vmatpush.msrb.mxu1 %v4874_v4  ;;  %v4989_v27 = vld [vmem:[%s10174_s6 + $0x2a8] sm:$0xff] }
  0x38   :  { %555 = vmatpush.msra.mxu3 %v4893_v7  ;;  %10576 = vst [vmem:[#allocation21_spill] sm:$0xff] %v4989_v27  ;;  %v5001_v30 = vld [vmem:[%s10174_s6 + $0x288] sm:$0xff] }
  0x39   :  { %294 = vmatpush.msrb.mxu1 %v4886_v6  ;;  %10577 = vst [vmem:[#allocation22_spill] sm:$0xff] %v5001_v30  ;;  %v5013_v36 = vld [vmem:[%s10174_s6 + $0x268] sm:$0xff] }
  0x3a   :  { %556 = vmatpush.msra.mxu3 %v4905_v9  ;;  %10578 = vst [vmem:[#allocation23_spill] sm:$0xff] %v5013_v36  ;;  %v5037_v58 = vld [vmem:[%s10174_s6 + $0x228] sm:$0xff] }
  0x3b   :  { %295 = vmatpush.msrb.mxu1 %v4898_v8  ;;  %10580 = vst [vmem:[#allocation25_spill] sm:$0xff] %v5037_v58  ;;  %v430_v31 = vld [vmem:[%s10174_s6 + $0x208] sm:$0xff] }
  0x3c   :  { %557 = vmatpush.msra.mxu3 %v4917_v11 }
  0x3d   :  { %296 = vmatpush.msrb.mxu1 %v4910_v10 }
  0x3e   :  { %558 = vmatpush.msra.mxu3 %v4929_v13 }
  0x3f   :  { %297 = vmatpush.msrb.mxu1 %v4922_v12 }
  0x40   :  { %559 = vmatpush.msra.mxu3 %v4941_v16 }
  0x41   :  { %298 = vmatpush.msrb.mxu1 %v4934_v14 }
  0x42   :  { %299 = vmatmul.f32.vlgmr.msrb.gmra.mxu1 %v189_v55  ;;  %560 = vmatpush.msra.mxu3 %v4953_v19  ;;  %v5025_v55 = vld [vmem:[%s10174_s6 + $0x248] sm:$0xff] }
  0x43   :  { %513 = vmatpush.msra.mxu1 %v4946_v17  ;;  %10579 = vst [vmem:[#allocation24_spill] sm:$0xff] %v5025_v55 }
  0x44   :  { %561 = vmatpush.msra.mxu3 %v4965_v21 }
  0x45   :  { %514 = vmatpush.msra.mxu1 %v4958_v20 }
  0x46   :  { %562 = vmatpush.msra.mxu3 %v4977_v24 }
  0x47   :  { %515 = vmatpush.msra.mxu1 %v4970_v23 }
  0x48   :  { %563 = vmatpush.msra.mxu3 %v4989_v27 }
  0x49   :  { %516 = vmatpush.msra.mxu1 %v4982_v25 }
  0x4a   :  { %564 = vmatpush.msra.mxu3 %v5001_v30  ;;  %v5145_v30 = vld [vmem:[%s10174_s6 + $0x180] sm:$0xff] }
  0x4b   :  { %517 = vmatpush.msra.mxu1 %v4994_v28  ;;  %10592 = vst [vmem:[#allocation37_spill] sm:$0xff] %v5145_v30 }
  0x4c   :  { %565 = vmatpush.msra.mxu3 %v5013_v36  ;;  %v487_v36 = vld [vmem:[%s10174_s6 + $0x3d0] sm:$0xff] }
  0x4d   :  { %518 = vmatpush.msra.mxu1 %v5006_v33 }
  0x4e   :  { %566 = vmatpush.msra.mxu3 %v5025_v55  ;;  %v5098_v55 = vld [vmem:[%s10174_s6 + $0x1e8] sm:$0xff] }
  0x4f   :  { %519 = vmatpush.msra.mxu1 %v5018_v39  ;;  %10587 = vst [vmem:[#allocation32_spill] sm:$0xff] %v5098_v55  ;;  %533 = vmatpush.msrb.mxu2 %v5098_v55  ;;  %v488_v55 = vld [vmem:[%s10174_s6 + $0x3d8] sm:$0xff] }
  0x50   :  { %567 = vmatpush.msra.mxu3 %v5037_v58  ;;  %v5093_v58 = vld [vmem:[%s10174_s6 + $0x1e0] sm:$0xff] }
  0x51   :  { %520 = vmatpush.msra.mxu1 %v5030_v61  ;;  %10586 = vst [vmem:[#allocation31_spill] sm:$0xff] %v5093_v58  ;;  %493 = vmatpush.msrb.mxu0 %v5093_v58  ;;  %v5127_v58 = vld [vmem:[%s10174_s6 + $0x1a0] sm:$0xff] }
  0x52   :  { %568 = vmatpush.msra.mxu3 %v430_v31  ;;  %v5111_v31 = vld [vmem:[%s10174_s6 + $0x1c0] sm:$0xff]  ;;  %10590 = vst [vmem:[#allocation35_spill] sm:$0xff] %v5127_v58 }
  0x53   :  { %521 = vmatpush.msra.mxu1 %v5042_v54  ;;  %10588 = vst [vmem:[#allocation33_spill] sm:$0xff] %v5111_v31  ;;  %494 = vmatpush.msrb.mxu0 %v5111_v31  ;;  %v5150_v31 = vld [vmem:[%s10174_s6 + $0x188] sm:$0xff] }
  0x54   :  { %10593 = vst [vmem:[#allocation38_spill] sm:$0xff] %v5150_v31 }
  0x55   :  { %522 = vmatpush.msra.mxu1 %v5049_v51  ;;  %495 = vmatpush.msrb.mxu0 %v5127_v58  ;;  %v463_v58 = vld [vmem:[%s10174_s6 + $0x310] sm:$0xff] }
  0x57   :  { %523 = vmatpush.msra.mxu1 %v5056_v48  ;;  %496 = vmatpush.msrb.mxu0 %v5145_v30  ;;  %v468_v30 = vld [vmem:[%s10174_s6 + $0x338] sm:$0xff] }
  0x59   :  { %524 = vmatpush.msra.mxu1 %v5062_v45  ;;  %v5320_v45 = vld [vmem:[%s10174_s6 + $0x68] sm:$0xff] }
  0x5a   :  { %10611 = vst [vmem:[#allocation56_spill] sm:$0xff] %v5320_v45 }
  0x5b   :  { %525 = vmatpush.msra.mxu1 %v5068_v42  ;;  %v5132_v42 = vld [vmem:[%s10174_s6 + $0x1a8] sm:$0xff] }
  0x5c   :  { %10591 = vst [vmem:[#allocation36_spill] sm:$0xff] %v5132_v42 }
  0x5d   :  { %526 = vmatpush.msra.mxu1 %v5074_v40  ;;  %v492_v40 = vld [vmem:[%s10174_s6 + $0x3f8] sm:$0xff] }
  0x5e   :  { %633 = vmatpush.msrb.mxu3 %v492_v40  ;;  %v484_v40 = vld [vmem:[%s10174_s6 + $0x3b8] sm:$0xff] }
  0x5f   :  { %527 = vmatpush.msra.mxu1 %v5080_v37  ;;  %v491_v37 = vld [vmem:[%s10174_s6 + $0x3f0] sm:$0xff] }
  0x60   :  { %634 = vmatpush.msrb.mxu3 %v488_v55  ;;  %v5165_v55 = vld [vmem:[%s10174_s6 + $0x160] sm:$0xff] }
  0x61   :  { %528 = vmatpush.msra.mxu1 %v429_v34  ;;  %v5116_v34 = vld [vmem:[%s10174_s6 + $0x1c8] sm:$0xff]  ;;  %10594 = vst [vmem:[#allocation39_spill] sm:$0xff] %v5165_v55  ;;  %497 = vmatpush.msrb.mxu0 %v5165_v55  ;;  %v472_v55 = vld [vmem:[%s10174_s6 + $0x358] sm:$0xff] }
  0x62   :  { %10589 = vst [vmem:[#allocation34_spill] sm:$0xff] %v5116_v34  ;;  %534 = vmatpush.msrb.mxu2 %v5116_v34  ;;  %v479_v34 = vld [vmem:[%s10174_s6 + $0x390] sm:$0xff]  ;;  %635 = vmatpush.msrb.mxu3 %v484_v40  ;;  %v5183_v40 = vld [vmem:[%s10174_s6 + $0x140] sm:$0xff] }
  0x63   :  { %593 = vmatpush.msrb.mxu1 %v491_v37  ;;  %v483_v37 = vld [vmem:[%s10174_s6 + $0x3b0] sm:$0xff]  ;;  %10596 = vst [vmem:[#allocation41_spill] sm:$0xff] %v5183_v40  ;;  %498 = vmatpush.msrb.mxu0 %v5183_v40  ;;  %v5217_v40 = vld [vmem:[%s10174_s6 + $0x100] sm:$0xff] }
  0x64   :  { %535 = vmatpush.msrb.mxu2 %v5132_v42  ;;  %v5170_v42 = vld [vmem:[%s10174_s6 + $0x168] sm:$0xff]  ;;  %10600 = vst [vmem:[#allocation45_spill] sm:$0xff] %v5217_v40 }
  0x65   :  { %594 = vmatpush.msrb.mxu1 %v487_v36  ;;  %v480_v36 = vld [vmem:[%s10174_s6 + $0x398] sm:$0xff]  ;;  %10595 = vst [vmem:[#allocation40_spill] sm:$0xff] %v5170_v42 }
  0x66   :  { %536 = vmatpush.msrb.mxu2 %v5150_v31  ;;  %636 = vmatpush.msrb.mxu3 %v480_v36  ;;  %v5188_v36 = vld [vmem:[%s10174_s6 + $0x148] sm:$0xff]  ;;  %v5199_v31 = vld [vmem:[%s10174_s6 + $0x120] sm:$0xff] }
  0x67   :  { %595 = vmatpush.msrb.mxu1 %v483_v37  ;;  %v475_v37 = vld [vmem:[%s10174_s6 + $0x370] sm:$0xff]  ;;  %10597 = vst [vmem:[#allocation42_spill] sm:$0xff] %v5188_v36  ;;  %499 = vmatpush.msrb.mxu0 %v5199_v31 }
  0x68   :  { %537 = vmatpush.msrb.mxu2 %v5170_v42  ;;  %v471_v42 = vld [vmem:[%s10174_s6 + $0x350] sm:$0xff]  ;;  %10598 = vst [vmem:[#allocation43_spill] sm:$0xff] %v5199_v31 }
  0x69   :  { %596 = vmatpush.msrb.mxu1 %v479_v34  ;;  %v476_v34 = vld [vmem:[%s10174_s6 + $0x378] sm:$0xff]  ;;  %500 = vmatpush.msrb.mxu0 %v5217_v40  ;;  %v447_v31 = vld [vmem:[%s10174_s6 + $0x290] sm:$0xff] }
  0x6a   :  { %637 = vmatpush.msrb.mxu3 %v476_v34  ;;  %538 = vmatpush.msrb.mxu2 %v5188_v36  ;;  %v467_v34 = vld [vmem:[%s10174_s6 + $0x330] sm:$0xff]  ;;  %v5222_v36 = vld [vmem:[%s10174_s6 + $0x108] sm:$0xff]  ;;  %v452_v40 = vld [vmem:[%s10174_s6 + $0x2b8] sm:$0xff] }
  0x6b   :  { %597 = vmatpush.msrb.mxu1 %v475_v37  ;;  %v5206_v37 = vld [vmem:[%s10174_s6 + $0x128] sm:$0xff]  ;;  %10601 = vst [vmem:[#allocation46_spill] sm:$0xff] %v5222_v36 }
  0x6c   :  { %10599 = vst [vmem:[#allocation44_spill] sm:$0xff] %v5206_v37  ;;  %638 = vmatpush.msrb.mxu3 %v472_v55  ;;  %539 = vmatpush.msrb.mxu2 %v5206_v37  ;;  %v5237_v55 = vld [vmem:[%s10174_s6 + $0xe0] sm:$0xff]  ;;  %v5242_v37 = vld [vmem:[%s10174_s6 + $0xe8] sm:$0xff] }
  0x6d   :  { %598 = vmatpush.msrb.mxu1 %v471_v42  ;;  %v464_v42 = vld [vmem:[%s10174_s6 + $0x318] sm:$0xff]  ;;  %10602 = vst [vmem:[#allocation47_spill] sm:$0xff] %v5237_v55  ;;  %501 = vmatpush.msrb.mxu0 %v5237_v55 }
  0x6e   :  { %639 = vmatpush.msrb.mxu3 %v468_v30  ;;  %540 = vmatpush.msrb.mxu2 %v5222_v36  ;;  %10603 = vst [vmem:[#allocation48_spill] sm:$0xff] %v5242_v37  ;;  %v459_v30 = vld [vmem:[%s10174_s6 + $0x2f0] sm:$0xff]  ;;  %v456_v55 = vld [vmem:[%s10174_s6 + $0x2d8] sm:$0xff]  ;;  %v5271_v36 = vld [vmem:[%s10174_s6 + $0xa0] sm:$0xff] }
  0x6f   :  { %599 = vmatpush.msrb.mxu1 %v467_v34  ;;  %v5255_v34 = vld [vmem:[%s10174_s6 + $0xc0] sm:$0xff]  ;;  %10606 = vst [vmem:[#allocation51_spill] sm:$0xff] %v5271_v36 }
  0x70   :  { %640 = vmatpush.msrb.mxu3 %v464_v42  ;;  %541 = vmatpush.msrb.mxu2 %v5242_v37  ;;  %10604 = vst [vmem:[#allocation49_spill] sm:$0xff] %v5255_v34  ;;  %v5260_v42 = vld [vmem:[%s10174_s6 + $0xc8] sm:$0xff]  ;;  %v455_v37 = vld [vmem:[%s10174_s6 + $0x2d0] sm:$0xff] }
  0x71   :  { %600 = vmatpush.msrb.mxu1 %v463_v58  ;;  %v460_v58 = vld [vmem:[%s10174_s6 + $0x2f8] sm:$0xff]  ;;  %10605 = vst [vmem:[#allocation50_spill] sm:$0xff] %v5260_v42  ;;  %502 = vmatpush.msrb.mxu0 %v5255_v34  ;;  %v5289_v34 = vld [vmem:[%s10174_s6 + $0x80] sm:$0xff] }
  0x72   :  { %641 = vmatpush.msrb.mxu3 %v460_v58  ;;  %542 = vmatpush.msrb.mxu2 %v5260_v42  ;;  %v451_v58 = vld [vmem:[%s10174_s6 + $0x2b0] sm:$0xff]  ;;  %10608 = vst [vmem:[#allocation53_spill] sm:$0xff] %v5289_v34  ;;  %v5294_v42 = vld [vmem:[%s10174_s6 + $0x88] sm:$0xff] }
  0x73   :  { %601 = vmatpush.msrb.mxu1 %v459_v30  ;;  %v5278_v30 = vld [vmem:[%s10174_s6 + $0xa8] sm:$0xff]  ;;  %10609 = vst [vmem:[#allocation54_spill] sm:$0xff] %v5294_v42  ;;  %503 = vmatpush.msrb.mxu0 %v5271_v36  ;;  %v5315_v36 = vld [vmem:[%s10174_s6 + $0x60] sm:$0xff] }
  0x74   :  { %10607 = vst [vmem:[#allocation52_spill] sm:$0xff] %v5278_v30  ;;  %642 = vmatpush.msrb.mxu3 %v456_v55  ;;  %543 = vmatpush.msrb.mxu2 %v5278_v30  ;;  %v5307_v55 = vld [vmem:[%s10172_s4] sm:$0xf] }
  0x75   :  { %602 = vmatpush.msrb.mxu1 %v455_v37  ;;  %v448_v37 = vld [vmem:[%s10174_s6 + $0x298] sm:$0xff]  ;;  %504 = vmatpush.msrb.mxu0 %v5289_v34  ;;  %10610 = vst [vmem:[#allocation55_spill] sm:$0xff] %v5315_v36 }
  0x76   :  { %643 = vmatpush.msrb.mxu3 %v452_v40  ;;  %544 = vmatpush.msrb.mxu2 %v5294_v42  ;;  %v443_v40 = vld [vmem:[%s10174_s6 + $0x270] sm:$0xff]  ;;  %v10612_v42 = vperm.slane %v5307_v55, 0 }
  0x77   :  { %603 = vmatpush.msrb.mxu1 %v451_v58  ;;  %v47_v58 = vperm.slane %v5307_v55, 1  ;;  %505 = vmatpush.msrb.mxu0 %v5315_v36  ;;  %v5336_v36 = vld [vmem:[%s10174_s6 + $0x40] sm:$0xff] }
  0x78   :  { %644 = vmatpush.msrb.mxu3 %v448_v37  ;;  %545 = vmatpush.msrb.mxu2 %v5320_v45  ;;  %10613 = vst [vmem:[#allocation57_spill] sm:$0xff] %v5336_v36  ;;  %v5341_v45 = vld [vmem:[%s10174_s6 + $0x48] sm:$0xff] }
  0x79   :  { %604 = vmatpush.msrb.mxu1 %v447_v31  ;;  %v444_v31 = vld [vmem:[%s10174_s6 + $0x278] sm:$0xff]  ;;  %10614 = vst [vmem:[#allocation58_spill] sm:$0xff] %v5341_v45  ;;  %506 = vmatpush.msrb.mxu0 %v5336_v36 }
  0x7a   :  { %645 = vmatpush.msrb.mxu3 %v444_v31  ;;  %546 = vmatpush.msrb.mxu2 %v5341_v45  ;;  %v436_v31 = vld [vmem:[%s10174_s6 + $0x238] sm:$0xff] }
  0x7b   :  { %605 = vmatpush.msrb.mxu1 %v443_v40  ;;  %v5346_v40 = vld [vmem:[%s10174_s6 + $0x250] sm:$0xff]  ;;  %v432_v45 = vld [vmem:[%s10174_s6 + $0x218] sm:$0xff] }
  0x7c   :  { %10615 = vst [vmem:[#allocation59_spill] sm:$0xff] %v5346_v40 }
  0x7d   :  { %606 = vmatpush.msrb.mxu1 %v5346_v40  ;;  %v431_v40 = vld [vmem:[%s10174_s6 + $0x210] sm:$0xff] }
  0x8e   :  { %v96_v37 = vpop.f32.mrf.mxu0 }
  0x8f   :  { %v97_v34 = vadd.f32 %v96_v37, %v10612_v42  ;;  %v5363_v42 = vld [vmem:[%s10174_s6 + $0x28] sm:$0xff]  ;;  %v5376_v37 = vld [vmem:[%s10174_s6] sm:$0xff] }
  0x90   :  { %10618 = vst [vmem:[#allocation62_spill] sm:$0xff] %v5363_v42  ;;  %547 = vmatpush.msrb.mxu2 %v5363_v42  ;;  %v5396_v42 = vld [vmem:[%s10169_s1 + $0x2] sm:$0x3]  ;;  %s4207_s1 = sshll.u32 %s10179_s11, 4  ;;  %s4208_s1 = int_to_ptr.hbm [resolvable:$true] %s4207_s1 }
  0x91   :  { %v119_v30 = vpop.f32.mrf.mxu2  ;;  %171 = vst [vmem:[#allocation2 + $0x30] sm:$0xff] %v97_v34  ;;  %v5358_v34 = vld [vmem:[%s10174_s6 + $0x20] sm:$0xff]  ;;  %529 = vmatmul.f32.vlgmr.msra.gmra.mxu1 %v5396_v42  ;;  %569 = vmatmul.f32.vlgmr.msra.gmra.mxu3 %v5396_v42 }
  0x92   :  { %v120_v27 = vadd.f32 %v119_v30, %v47_v58  ;;  %10617 = vst [vmem:[#allocation61_spill] sm:$0xff] %v5358_v34  ;;  %v435_v30 = vld [vmem:[%s10174_s6 + $0x230] sm:$0xff]  ;;  %507 = vmatpush.msrb.mxu0 %v5358_v34 }
  0x93   :  { %607 = vmatpush.msrb.mxu1 %v435_v30  ;;  %v5401_v34 = vld [vmem:[%s10174_s6 + $0x1f0] sm:$0xff]  ;;  %v5406_v30 = vld [vmem:[%s10174_s6 + $0x1f8] sm:$0xff] }
  0x94   :  { %172 = vst [vmem:[#allocation2] sm:$0xff] %v120_v27  ;;  %v5353_v27 = vld [vmem:[%s10174_s6 + $0x258] sm:$0xff]  ;;  %508 = vmatpush.msrb.mxu0 %v5376_v37 }
  0x95   :  { %10616 = vst [vmem:[#allocation60_spill] sm:$0xff] %v5353_v27  ;;  %646 = vmatpush.msrb.mxu3 %v5353_v27  ;;  %v5383_v27 = vld [vmem:[%s10174_s6 + $0x8] sm:$0xff]  ;;  %608 = vmatpush.msrb.mxu1 %v431_v40  ;;  %v49_v40 = vperm.slane %v5307_v55, 3 }
  0x96   :  { %548 = vmatpush.msrb.mxu2 %v5383_v27  ;;  %573 = vmatpush.msra.mxu0 %v5401_v34 }
  0x97   :  { %647 = vmatpush.msrb.mxu3 %v436_v31  ;;  %v5413_v31 = vld [vmem:[%s10174_s6 + $0x1d0] sm:$0xff]  ;;  %760 = vmatpush.msra.mxu1 %v4707_v41  ;;  %v5447_v41 = vld [vmem:[%s10174_s6 + $0x198] sm:$0xff] }
  0x98   :  { %10619 = vst [vmem:[#allocation63_spill] sm:$0xff] %v5413_v31  ;;  %613 = vmatpush.msra.mxu2 %v5406_v30  ;;  %574 = vmatpush.msra.mxu0 %v5413_v31 }
  0x99   :  { %v122_v36 = vpop.f32.mrf.mxu2  ;;  %648 = vmatpush.msrb.mxu3 %v432_v45  ;;  %v5427_v45 = vld [vmem:[%s10174_s6 + $0x1b0] sm:$0xff]  ;;  %761 = vmatpush.msra.mxu1 %v4726_v44  ;;  %v5462_v44 = vld [vmem:[%s10174_s6 + $0x178] sm:$0xff] }
  0x9a   :  { %v123_v48 = vadd.f32 %v122_v36, %v47_v58  ;;  %v5418_v36 = vld [vmem:[%s10174_s6 + $0x1d8] sm:$0xff]  ;;  %575 = vmatpush.msra.mxu0 %v5427_v45  ;;  %609 = vmatmul.f32.vlgmr.msrb.gmra.mxu1 %v5396_v42 }
  0x9b   :  { %10620 = vst [vmem:[#allocation64_spill] sm:$0xff] %v5418_v36  ;;  %800 = vmatpush.msra.mxu3 %v4588_v15  ;;  %v5432_v58 = vld [vmem:[%s10174_s6 + $0x1b8] sm:$0xff]  ;;  %614 = vmatpush.msra.mxu2 %v5418_v36  ;;  %v5442_v15 = vld [vmem:[%s10174_s6 + $0x190] sm:$0xff] }
  0x9c   :  { %176 = vst [vmem:[#allocation2 + $0x20] sm:$0xff] %v123_v48  ;;  %v48_v48 = vperm.slane %v5307_v55, 2  ;;  %762 = vmatpush.msra.mxu1 %v4745_v47  ;;  %576 = vmatpush.msra.mxu0 %v5442_v15  ;;  %v5476_v47 = vld [vmem:[%s10174_s6 + $0x158] sm:$0xff] }
  0x9d   :  { %10621 = vst [vmem:[#allocation65_spill] sm:$0xff] %v5432_v58  ;;  %801 = vmatpush.msra.mxu3 %v4601_v18  ;;  %615 = vmatpush.msra.mxu2 %v5432_v58  ;;  %v5457_v18 = vld [vmem:[%s10174_s6 + $0x170] sm:$0xff] }
  0x9e   :  { %763 = vmatpush.msra.mxu1 %v4763_v50  ;;  %577 = vmatpush.msra.mxu0 %v5457_v18  ;;  %v5490_v50 = vld [vmem:[%s10174_s6 + $0x138] sm:$0xff] }
  0x9f   :  { %802 = vmatpush.msra.mxu3 %v4614_v22  ;;  %616 = vmatpush.msra.mxu2 %v5447_v41  ;;  %v5471_v22 = vld [vmem:[%s10174_s6 + $0x150] sm:$0xff] }
  0xa0   :  { %v165_v58 = vpop.f32.mrf.mxu3  ;;  %764 = vmatpush.msra.mxu1 %v4781_v53  ;;  %578 = vmatpush.msra.mxu0 %v5471_v22  ;;  %v5504_v53 = vld [vmem:[%s10174_s6 + $0x118] sm:$0xff] }
  0xa1   :  { %803 = vmatpush.msra.mxu3 %v4633_v26  ;;  %617 = vmatpush.msra.mxu2 %v5462_v44  ;;  %v5485_v26 = vld [vmem:[%s10174_s6 + $0x130] sm:$0xff] }
  0xa2   :  { %765 = vmatpush.msra.mxu1 %v4799_v56  ;;  %579 = vmatpush.msra.mxu0 %v5485_v26  ;;  %v5518_v56 = vld [vmem:[%s10174_s6 + $0xf8] sm:$0xff] }
  0xa3   :  { %v142_v36 = vpop.f32.mrf.mxu2  ;;  %804 = vmatpush.msra.mxu3 %v4645_v29  ;;  %618 = vmatpush.msra.mxu2 %v5476_v47  ;;  %v5499_v29 = vld [vmem:[%s10174_s6 + $0x110] sm:$0xff] }
  0xa4   :  { %v143_v31 = vadd.f32 %v142_v36, %v48_v48  ;;  %v166_v36 = vadd.f32 %v165_v58, %v49_v40  ;;  %766 = vmatpush.msra.mxu1 %v4819_v59  ;;  %580 = vmatpush.msra.mxu0 %v5499_v29  ;;  %v5532_v59 = vld [vmem:[%s10174_s6 + $0xd8] sm:$0xff] }
  0xa5   :  { %805 = vmatpush.msra.mxu3 %v4661_v32  ;;  %619 = vmatpush.msra.mxu2 %v5490_v50  ;;  %v5513_v32 = vld [vmem:[%s10174_s6 + $0xf0] sm:$0xff] }
  0xa6   :  { %173 = vst [vmem:[#allocation2 + $0x18] sm:$0xff] %v143_v31  ;;  %767 = vmatpush.msra.mxu1 %v4837_v62  ;;  %581 = vmatpush.msra.mxu0 %v5513_v32  ;;  %v5546_v62 = vld [vmem:[%s10174_s6 + $0xb8] sm:$0xff] }
  0xa7   :  { %174 = vst [vmem:[#allocation2 + $0x10] sm:$0xff] %v166_v36  ;;  %806 = vmatpush.msra.mxu3 %v4676_v35  ;;  %620 = vmatpush.msra.mxu2 %v5504_v53  ;;  %v5527_v35 = vld [vmem:[%s10174_s6 + $0xd0] sm:$0xff] }
  0xa8   :  { %768 = vmatpush.msra.mxu1 %v4850_v0  ;;  %582 = vmatpush.msra.mxu0 %v5527_v35  ;;  %v5560_v0 = vld [vmem:[%s10174_s6 + $0x98] sm:$0xff] }
  0xa9   :  { %807 = vmatpush.msra.mxu3 %v4693_v38  ;;  %621 = vmatpush.msra.mxu2 %v5518_v56  ;;  %v5541_v38 = vld [vmem:[%s10174_s6 + $0xb0] sm:$0xff] }
  0xaa   :  { %769 = vmatpush.msra.mxu1 %v4862_v2  ;;  %583 = vmatpush.msra.mxu0 %v5541_v38  ;;  %v5576_v2 = vld [vmem:[%s10174_s6 + $0x78] sm:$0xff] }
  0xab   :  { %v145_v31 = vpop.f32.mrf.mxu2  ;;  %808 = vmatpush.msra.mxu3 %v4721_v43  ;;  %622 = vmatpush.msra.mxu2 %v5532_v59  ;;  %v5555_v43 = vld [vmem:[%s10174_s6 + $0x90] sm:$0xff] }
  0xac   :  { %v146_v58 = vadd.f32 %v145_v31, %v48_v48  ;;  %v280_v31 = vpop.f32.mrf.mxu1  ;;  %770 = vmatpush.msra.mxu1 %v4874_v4  ;;  %584 = vmatpush.msra.mxu0 %v5555_v43  ;;  %v5590_v4 = vld [vmem:[%s10174_s6 + $0x58] sm:$0xff] }
  0xad   :  { %v168_v36 = vpop.f32.mrf.mxu3  ;;  %809 = vmatpush.msra.mxu3 %v4740_v46  ;;  %623 = vmatpush.msra.mxu2 %v5546_v62  ;;  %v5571_v46 = vld [vmem:[%s10174_s6 + $0x70] sm:$0xff] }
  0xae   :  { %177 = vst [vmem:[#allocation2 + $0x28] sm:$0xff] %v146_v58  ;;  %v169_v48 = vadd.f32 %v168_v36, %v49_v40  ;;  %v195_v40 = vld [vmem:[#allocation2 + $0x30] sm:$0x3]  ;;  %771 = vmatpush.msra.mxu1 %v4886_v6  ;;  %649 = vmatmul.f32.vlgmr.msrb.gmra.mxu3 %v5396_v42  ;;  %v196_v36 = vld [vmem:[#allocation2] sm:$0x3] }
  0xaf   :  { %810 = vmatpush.msra.mxu3 %v4758_v49  ;;  %624 = vmatpush.msra.mxu2 %v5560_v0  ;;  %v343_v58 = vadd.f32 %v280_v31, %v195_v40  ;;  %v5585_v49 = vld [vmem:[%s10174_s6 + $0x50] sm:$0xff]  ;;  %v5604_v6 = vld [vmem:[%s10174_s6 + $0x38] sm:$0xff] }
  0xb0   :  { %178 = vst [vmem:[#allocation2 + $0x38] sm:$0xff] %v169_v48  ;;  %585 = vmatpush.msra.mxu0 %v5571_v46  ;;  %772 = vmatpush.msra.mxu1 %v4898_v8  ;;  %v5618_v8 = vld [vmem:[%s10174_s6 + $0x18] sm:$0xff] }
  0xb1   :  { %811 = vmatpush.msra.mxu3 %v4776_v52  ;;  %625 = vmatpush.msra.mxu2 %v5576_v2  ;;  %v5599_v52 = vld [vmem:[%s10174_s6 + $0x30] sm:$0xff]  ;;  %v347_v42 = vmul.f32 0.5, %v343_v58  ;;  %10622 = vst [vmem:[#allocation66_spill] sm:$0xff] %v5618_v8  ;;  %v198_v31 = vld [vmem:[#allocation2 + $0x10] sm:$0x3] }
  0xb2   :  { %586 = vmatpush.msra.mxu0 %v5585_v49  ;;  %773 = vmatpush.msra.mxu1 %v4910_v10 }
  0xb3   :  { %812 = vmatpush.msra.mxu3 %v4806_v57  ;;  %626 = vmatpush.msra.mxu2 %v5590_v4  ;;  %v5613_v57 = vld [vmem:[%s10174_s6 + $0x10] sm:$0xff]  ;;  %4258 = vtanh.f32 %v347_v42  ;;  %v320_v10 = vpop.f32.mrf.mxu2 }
  0xb4   :  { %587 = vmatpush.msra.mxu0 %v5599_v52  ;;  %774 = vmatpush.msra.mxu1 %v4922_v12 }
  0xb5   :  { %813 = vmatpush.msra.mxu3 %v4825_v60  ;;  %627 = vmatpush.msra.mxu2 %v5604_v6  ;;  %v197_v60 = vld [vmem:[#allocation2 + $0x18] sm:$0x3] }
  0xb6   :  { %588 = vmatpush.msra.mxu0 %v5613_v57  ;;  %775 = vmatpush.msra.mxu1 %v4934_v14  ;;  %v340_v58 = vpop.f32.mrf.mxu3 }
  0xb7   :  { %814 = vmatpush.msra.mxu3 %v4845_v63  ;;  %628 = vmatpush.msra.mxu2 %v5618_v8  ;;  %v345_v63 = vadd.f32 %v320_v10, %v197_v60  ;;  %v346_v42 = vadd.f32 %v340_v58, %v198_v31  ;;  %v10629_v60 = vld [vmem:[#allocation29_spill] sm:$0xff]  ;;  %v10630_v10 = vld [vmem:[#allocation24_spill] sm:$0xff]  ;;  %v10631_v31 = vld [vmem:[#allocation30_spill] sm:$0xff] }
  0xb8   :  { %1012 = vmatpush.msrb.mxu1 %v4946_v17  ;;  %v4419_v58 = vld [vmem:[%s10173_s5 + $0x1d0] sm:$0xff] }
  0xb9   :  { %815 = vmatpush.msra.mxu3 %v4857_v1  ;;  %v4259_v8 = vpop.eup %4258 }
  0xba   :  { %1013 = vmatpush.msrb.mxu1 %v4958_v20  ;;  %v349_v1 = vmul.f32 0.5, %v4259_v8  ;;  %v192_v20 = vld [vmem:[%s10170_s2] sm:$0x3] }
  0xbb   :  { %1052 = vmatpush.msrb.mxu3 %v4869_v3  ;;  %v356_v3 = vmul.f32 0.5, %v346_v42  ;;  %v4420_v42 = vld [vmem:[%s10173_s5 + $0x1b0] sm:$0xff] }
  0xbc   :  { %1014 = vmatpush.msrb.mxu1 %v4970_v23 }
  0xbd   :  { %1053 = vmatpush.msrb.mxu3 %v4881_v5  ;;  %v350_v5 = vadd.f32 0.5, %v349_v1  ;;  %v5705_v1 = vld [vmem:[%s10173_s5 + $0x160] sm:$0xff] }
  0xbe   :  { %1015 = vmatpush.msrb.mxu1 %v4982_v25 }
  0xbf   :  { %v300_v48 = vpop.f32.mrf.mxu1  ;;  %1054 = vmatpush.msrb.mxu3 %v4893_v7 }
  0xc0   :  { %v344_v40 = vadd.f32 %v300_v48, %v196_v36  ;;  %1016 = vmatpush.msrb.mxu1 %v4994_v28  ;;  %v10623_v28 = vld [vmem:[#allocation26_spill] sm:$0xff]  ;;  %v4418_v48 = vld [vmem:[%s10173_s5 + $0x1f0] sm:$0xff] }
  0xc1   :  { %1055 = vmatpush.msrb.mxu3 %v4905_v9  ;;  %v5674_v36 = vld [vmem:[%s10173_s5 + $0x1c0] sm:$0xff] }
  0xc2   :  { %v351_v12 = vmul.f32 0.5, %v344_v40  ;;  %1017 = vmatpush.msrb.mxu1 %v5006_v33  ;;  %v10626_v33 = vld [vmem:[#allocation22_spill] sm:$0xff] }
  0xc3   :  { %1056 = vmatpush.msrb.mxu3 %v4917_v11  ;;  %v5685_v40 = vld [vmem:[%s10173_s5 + $0x1a0] sm:$0xff] }
  0xc4   :  { %4260 = vtanh.f32 %v351_v12  ;;  %1018 = vmatpush.msrb.mxu1 %v5018_v39  ;;  %v10628_v39 = vld [vmem:[#allocation23_spill] sm:$0xff]  ;;  %v10632_v12 = vld [vmem:[#allocation25_spill] sm:$0xff] }
  0xc5   :  { %4262 = vtanh.f32 %v345_v63  ;;  %1057 = vmatpush.msrb.mxu3 %v4929_v13  ;;  %v5695_v63 = vld [vmem:[%s10173_s5 + $0x180] sm:$0xff] }
  0xc6   :  { %4264 = vtanh.f32 %v356_v3  ;;  %1019 = vmatpush.msrb.mxu1 %v5030_v61  ;;  %v10624_v61 = vld [vmem:[#allocation21_spill] sm:$0xff]  ;;  %v4421_v3 = vld [vmem:[%s10173_s5 + $0x190] sm:$0xff] }
  0xc7   :  { %1058 = vmatpush.msrb.mxu3 %v4941_v16 }
  0xc8   :  { %1020 = vmatpush.msrb.mxu1 %v5042_v54 }
  0xc9   :  { %1059 = vmatpush.msrb.mxu3 %v4953_v19  ;;  %v10625_v19 = vld [vmem:[#allocation27_spill] sm:$0xff] }
  0xca   :  { %v4261_v14 = vpop.eup %4260  ;;  %1021 = vmatpush.msrb.mxu1 %v5049_v51 }
  0xcb   :  { %v353_v17 = vmul.f32 0.5, %v4261_v14  ;;  %v4263_v7 = vpop.eup %4262  ;;  %1060 = vmatpush.msrb.mxu3 %v4965_v21  ;;  %v10627_v21 = vld [vmem:[#allocation28_spill] sm:$0xff]  ;;  %v5715_v14 = vld [vmem:[%s10173_s5 + $0x140] sm:$0xff] }
  0xcc   :  { %v361_v11 = vmul.f32 %v4263_v7, %v350_v5  ;;  %v4265_v13 = vpop.eup %4264  ;;  %1022 = vmatpush.msrb.mxu1 %v10623_v28  ;;  %v4422_v5 = vld [vmem:[%s10173_s5 + $0x170] sm:$0xff]  ;;  %v10633_v7 = vld [vmem:[#allocation10_spill] sm:$0xff] }
  0xcd   :  { %v354_v9 = vadd.f32 0.5, %v353_v17  ;;  %1061 = vmatpush.msrb.mxu3 %v4977_v24  ;;  %v358_v16 = vmul.f32 0.5, %v4265_v13  ;;  %v5665_v24 = vld [vmem:[%s10173_s5 + $0x1e0] sm:$0xff] }
  0xce   :  { %1023 = vmatpush.msrb.mxu1 %v10625_v19  ;;  %v5725_v17 = vld [vmem:[%s10173_s5 + $0x120] sm:$0xff] }
  0xcf   :  { %v360_v23 = vmul.f32 %v354_v9, %v192_v20  ;;  %1062 = vmatpush.msrb.mxu3 %v10624_v61  ;;  %v359_v54 = vadd.f32 0.5, %v358_v16  ;;  %v5732_v20 = vld [vmem:[%s10173_s5 + $0x100] sm:$0xff]  ;;  %v10634_v9 = vld [vmem:[#allocation11_spill] sm:$0xff]  ;;  %v10636_v16 = vld [vmem:[#allocation13_spill] sm:$0xff] }
  0xd0   :  { %1024 = vmatpush.msrb.mxu1 %v10627_v21  ;;  %v5746_v13 = vld [vmem:[%s10173_s5 + $0xc0] sm:$0xff]  ;;  %v10639_v21 = vld [vmem:[#allocation16_spill] sm:$0xff] }
  0xd1   :  { %v5649_v25 = vadd.f32 %v361_v11, %v360_v23  ;;  %1063 = vmatpush.msrb.mxu3 %v10626_v33  ;;  %v5739_v11 = vld [vmem:[%s10173_s5 + $0xe0] sm:$0xff]  ;;  %v10635_v23 = vld [vmem:[#allocation12_spill] sm:$0xff]  ;;  %v10638_v33 = vld [vmem:[#allocation15_spill] sm:$0xff] }
  0xd2   :  { %1025 = vmatpush.msrb.mxu1 %v10629_v60  ;;  %v5753_v28 = vld [vmem:[%s10173_s5 + $0xa0] sm:$0xff] }
  0xd3   :  { %4266 = vtanh.f32 %v5649_v25  ;;  %1064 = vmatpush.msrb.mxu3 %v10628_v39  ;;  %v10637_v61 = vld [vmem:[#allocation14_spill] sm:$0xff] }
  0xd4   :  { %1026 = vmatpush.msrb.mxu1 %v10631_v31  ;;  %v5760_v19 = vld [vmem:[%s10173_s5 + $0x80] sm:$0xff]  ;;  %v10642_v31 = vld [vmem:[#allocation19_spill] sm:$0xff] }
  0xd5   :  { %1065 = vmatpush.msrb.mxu3 %v10630_v10  ;;  %v5774_v39 = vld [vmem:[%s10173_s5 + $0x40] sm:$0xff] }
  0xd6   :  { %v5781_v60 = vld [vmem:[%s10173_s5 + $0x20] sm:$0xff] }
  0xd7   :  { %1066 = vmatpush.msrb.mxu3 %v10632_v12  ;;  %v10641_v10 = vld [vmem:[#allocation18_spill] sm:$0xff]  ;;  %v10644_v12 = vld [vmem:[#allocation31_spill] sm:$0xff] }
  0xd9   :  { %v4267_v8 = vpop.eup %4266 }
  0xda   :  { %v5660_v51 = vmul.f32 %v4267_v8, %v359_v54  ;;  %v5767_v54 = vld [vmem:[%s10173_s5 + $0x60] sm:$0xff]  ;;  %v10640_v8 = vld [vmem:[#allocation17_spill] sm:$0xff] }
  0xdc   :  { %509 = vmatmul.f32.vlgmr.msrb.gmra.mxu0 %v5660_v51  ;;  %549 = vmatmul.f32.vlgmr.msrb.gmra.mxu2 %v5660_v51 }
  0xdd   :  { %740 = vmatpush.msrb.mxu0 %v5665_v24  ;;  %776 = vmatmul.f32.vlgmr.msra.gmra.mxu1 %v5660_v51 }
  0xde   :  { %780 = vmatpush.msrb.mxu2 %v4418_v48  ;;  %816 = vmatmul.f32.vlgmr.msra.gmra.mxu3 %v5660_v51  ;;  %v5788_v48 = vld [vmem:[%s10173_s5] sm:$0xff] }
  0xdf   :  { %741 = vmatpush.msrb.mxu0 %v5674_v36 }
  0xe0   :  { %781 = vmatpush.msrb.mxu2 %v4419_v58  ;;  %v10643_v58 = vld [vmem:[#allocation20_spill] sm:$0xff] }
  0xe1   :  { %742 = vmatpush.msrb.mxu0 %v5685_v40 }
  0xe2   :  { %782 = vmatpush.msrb.mxu2 %v4420_v42  ;;  %v10645_v42 = vld [vmem:[#allocation32_spill] sm:$0xff] }
  0xe3   :  { %743 = vmatpush.msrb.mxu0 %v5695_v63 }
  0xe4   :  { %783 = vmatpush.msrb.mxu2 %v4421_v3  ;;  %589 = vmatmul.f32.vlgmr.msra.gmra.mxu0 %v5660_v51  ;;  %v10646_v3 = vld [vmem:[#allocation33_spill] sm:$0xff] }
  0xe5   :  { %629 = vmatmul.f32.vlgmr.msra.gmra.mxu2 %v5660_v51  ;;  %744 = vmatpush.msrb.mxu0 %v5705_v1 }
  0xe6   :  { %784 = vmatpush.msrb.mxu2 %v4422_v5  ;;  %v10647_v5 = vld [vmem:[#allocation34_spill] sm:$0xff] }
  0xe7   :  { %745 = vmatpush.msrb.mxu0 %v5715_v14 }
  0xe8   :  { %785 = vmatpush.msrb.mxu2 %v10633_v7  ;;  %v99_v7 = vpop.f32.mrf.mxu0 }
  0xe9   :  { %746 = vmatpush.msrb.mxu0 %v5725_v17 }
  0xea   :  { %786 = vmatpush.msrb.mxu2 %v10634_v9  ;;  %v10648_v9 = vld [vmem:[#allocation35_spill] sm:$0xff] }
  0xeb   :  { %747 = vmatpush.msrb.mxu0 %v5732_v20 }
  0xec   :  { %787 = vmatpush.msrb.mxu2 %v10635_v23  ;;  %v10649_v23 = vperm.slane %v5307_v55, 0  ;;  %v10659_v55 = vld [vmem:[#allocation45_spill] sm:$0xff] }
  0xed   :  { %748 = vmatpush.msrb.mxu0 %v5739_v11 }
  0xee   :  { %788 = vmatpush.msrb.mxu2 %v10636_v16  ;;  %v100_v16 = vadd.f32 %v99_v7, %v10649_v23  ;;  %v10663_v7 = vld [vmem:[#allocation49_spill] sm:$0xff]  ;;  %v10665_v23 = vld [vmem:[#allocation51_spill] sm:$0xff] }
  0xef   :  { %749 = vmatpush.msrb.mxu0 %v5746_v13 }
  0xf0   :  { %789 = vmatpush.msrb.mxu2 %v10637_v61  ;;  %v10650_v61 = vld [vmem:[#allocation36_spill] sm:$0xff]  ;;  %175 = vst [vmem:[#allocation2 + $0x8] sm:$0xff] %v100_v16 }
  0xf1   :  { %750 = vmatpush.msrb.mxu0 %v5753_v28  ;;  %v10666_v16 = vld [vmem:[#allocation52_spill] sm:$0xff] }
  0xf2   :  { %790 = vmatpush.msrb.mxu2 %v10638_v33  ;;  %v10651_v33 = vld [vmem:[#allocation37_spill] sm:$0xff] }
  0xf3   :  { %751 = vmatpush.msrb.mxu0 %v5760_v19 }
  0xf4   :  { %791 = vmatpush.msrb.mxu2 %v10639_v21  ;;  %v10653_v21 = vld [vmem:[#allocation39_spill] sm:$0xff] }
  0xf5   :  { %752 = vmatpush.msrb.mxu0 %v5767_v54 }
  0xf6   :  { %792 = vmatpush.msrb.mxu2 %v10640_v8  ;;  %v10654_v8 = vld [vmem:[#allocation40_spill] sm:$0xff] }
  0xf7   :  { %753 = vmatpush.msrb.mxu0 %v5774_v39 }
  0xf8   :  { %793 = vmatpush.msrb.mxu2 %v10641_v10  ;;  %v10655_v10 = vld [vmem:[#allocation41_spill] sm:$0xff] }
  0xf9   :  { %754 = vmatpush.msrb.mxu0 %v5781_v60 }
  0xfa   :  { %794 = vmatpush.msrb.mxu2 %v10642_v31  ;;  %v10656_v31 = vld [vmem:[#allocation42_spill] sm:$0xff] }
  0xfb   :  { %755 = vmatpush.msrb.mxu0 %v5788_v48 }
  0xfc   :  { %795 = vmatpush.msrb.mxu2 %v10643_v58  ;;  %756 = vmatmul.f32.vlgmr.msrb.gmra.mxu0 %v5660_v51  ;;  %v10657_v58 = vld [vmem:[#allocation43_spill] sm:$0xff] }
  0xfd   :  { %796 = vmatmul.f32.vlgmr.msrb.gmra.mxu2 %v5660_v51  ;;  %992 = vmatpush.msra.mxu0 %v10644_v12  ;;  %v10652_v51 = vld [vmem:[#allocation38_spill] sm:$0xff]  ;;  %v10658_v12 = vld [vmem:[#allocation44_spill] sm:$0xff] }
  0xfe   :  { %1032 = vmatpush.msra.mxu2 %v10645_v42  ;;  %v10660_v42 = vld [vmem:[#allocation46_spill] sm:$0xff] }
  0xff   :  { %993 = vmatpush.msra.mxu0 %v10646_v3  ;;  %v10661_v3 = vld [vmem:[#allocation47_spill] sm:$0xff] }
 0x100   :  { %1033 = vmatpush.msra.mxu2 %v10647_v5  ;;  %v10662_v5 = vld [vmem:[#allocation48_spill] sm:$0xff] }
 0x101   :  { %994 = vmatpush.msra.mxu0 %v10648_v9  ;;  %v10664_v9 = vld [vmem:[#allocation50_spill] sm:$0xff] }
 0x102   :  { %1034 = vmatpush.msra.mxu2 %v10650_v61  ;;  %v10667_v61 = vld [vmem:[#allocation53_spill] sm:$0xff] }
 0x103   :  { %995 = vmatpush.msra.mxu0 %v10651_v33  ;;  %v10668_v33 = vld [vmem:[#allocation54_spill] sm:$0xff] }
 0x104   :  { %1035 = vmatpush.msra.mxu2 %v10652_v51  ;;  %v10669_v51 = vld [vmem:[#allocation55_spill] sm:$0xff] }
 0x105   :  { %996 = vmatpush.msra.mxu0 %v10653_v21  ;;  %v10670_v21 = vld [vmem:[#allocation56_spill] sm:$0xff] }
 0x106   :  { %1036 = vmatpush.msra.mxu2 %v10654_v8  ;;  %v10671_v8 = vld [vmem:[#allocation57_spill] sm:$0xff] }
 0x107   :  { %997 = vmatpush.msra.mxu0 %v10655_v10  ;;  %v10672_v10 = vld [vmem:[#allocation58_spill] sm:$0xff] }
 0x108   :  { %1037 = vmatpush.msra.mxu2 %v10656_v31  ;;  %v10673_v31 = vld [vmem:[#allocation61_spill] sm:$0xff] }
 0x109   :  { %998 = vmatpush.msra.mxu0 %v10657_v58  ;;  %v10674_v58 = vld [vmem:[#allocation62_spill] sm:$0xff] }
 0x10a   :  { %1038 = vmatpush.msra.mxu2 %v10658_v12  ;;  %v10675_v12 = vld [vmem:[#allocation63_spill] sm:$0xff] }
 0x10b   :  { %999 = vmatpush.msra.mxu0 %v10659_v55  ;;  %v10676_v55 = vld [vmem:[#allocation64_spill] sm:$0xff] }
 0x10c   :  { %1039 = vmatpush.msra.mxu2 %v10660_v42  ;;  %v10677_v42 = vld [vmem:[#allocation65_spill] sm:$0xff] }
 0x10d   :  { %1000 = vmatpush.msra.mxu0 %v10661_v3  ;;  %v6015_v3 = vld [vmem:[%s10174_s6 + $0x290] sm:$0xff] }
 0x10e   :  { %1040 = vmatpush.msra.mxu2 %v10662_v5  ;;  %10680 = vst [vmem:[#allocation21_spill] sm:$0xff] %v6015_v3  ;;  %v6020_v5 = vld [vmem:[%s10174_s6 + $0x298] sm:$0xff] }
 0x10f   :  { %1001 = vmatpush.msra.mxu0 %v10663_v7  ;;  %10681 = vst [vmem:[#allocation27_spill] sm:$0xff] %v6020_v5 }
 0x110   :  { %1041 = vmatpush.msra.mxu2 %v10664_v9 }
 0x111   :  { %1002 = vmatpush.msra.mxu0 %v10665_v23  ;;  %v6029_v23 = vld [vmem:[%s10174_s6 + $0x270] sm:$0xff] }
 0x112   :  { %1042 = vmatpush.msra.mxu2 %v10666_v16  ;;  %10683 = vst [vmem:[#allocation28_spill] sm:$0xff] %v6029_v23  ;;  %v6034_v16 = vld [vmem:[%s10174_s6 + $0x278] sm:$0xff] }
 0x113   :  { %1003 = vmatpush.msra.mxu0 %v10667_v61  ;;  %10684 = vst [vmem:[#allocation23_spill] sm:$0xff] %v6034_v16 }
 0x114   :  { %1043 = vmatpush.msra.mxu2 %v10668_v33 }
 0x115   :  { %1004 = vmatpush.msra.mxu0 %v10669_v51 }
 0x116   :  { %1044 = vmatpush.msra.mxu2 %v10670_v21  ;;  %v10686_v21 = vld [vmem:[#allocation59_spill] sm:$0xff] }
 0x117   :  { %1005 = vmatpush.msra.mxu0 %v10671_v8  ;;  %v10687_v8 = vld [vmem:[#allocation60_spill] sm:$0xff] }
 0x118   :  { %1045 = vmatpush.msra.mxu2 %v10672_v10  ;;  %v570_v10 = vpop.f32.mrf.mxu3 }
 0x119   :  { %1006 = vmatpush.msra.mxu0 %v10673_v31 }
 0x11a   :  { %1046 = vmatpush.msra.mxu2 %v10674_v58  ;;  %v6046_v58 = vld [vmem:[%s10174_s6 + $0x230] sm:$0xff] }
 0x11b   :  { %1007 = vmatpush.msra.mxu0 %v5376_v37  ;;  %v5870_v37 = vld [vmem:[%s10174_s6 + $0x208] sm:$0xff]  ;;  %10688 = vst [vmem:[#allocation24_spill] sm:$0xff] %v6046_v58 }
 0x11c   :  { %1047 = vmatpush.msra.mxu2 %v5383_v27  ;;  %v10678_v27 = vld [vmem:[#allocation66_spill] sm:$0xff]  ;;  %1067 = vmatpush.msrb.mxu3 %v5870_v37 }
 0x11d   :  { %1072 = vmatpush.msrb.mxu0 %v5401_v34  ;;  %v5865_v34 = vld [vmem:[%s10174_s6 + $0x200] sm:$0xff] }
 0x11e   :  { %1112 = vmatpush.msrb.mxu2 %v5406_v30  ;;  %1027 = vmatpush.msrb.mxu1 %v5865_v34  ;;  %v5877_v30 = vld [vmem:[%s10174_s6 + $0x3f0] sm:$0xff] }
 0x11f   :  { %1073 = vmatpush.msrb.mxu0 %v10675_v12  ;;  %v6051_v12 = vld [vmem:[%s10174_s6 + $0x238] sm:$0xff] }
 0x120   :  { %1113 = vmatpush.msrb.mxu2 %v10676_v55  ;;  %1092 = vmatpush.msra.mxu1 %v5877_v30  ;;  %10689 = vst [vmem:[#allocation30_spill] sm:$0xff] %v6051_v12 }
 0x121   :  { %1074 = vmatpush.msrb.mxu0 %v5427_v45  ;;  %v5882_v45 = vld [vmem:[%s10174_s6 + $0x3f8] sm:$0xff] }
 0x122   :  { %1114 = vmatpush.msrb.mxu2 %v10677_v42  ;;  %1132 = vmatpush.msra.mxu3 %v5882_v45 }
 0x123   :  { %1075 = vmatpush.msrb.mxu0 %v5442_v15  ;;  %v5889_v15 = vld [vmem:[%s10174_s6 + $0x3d0] sm:$0xff] }
 0x124   :  { %1115 = vmatpush.msrb.mxu2 %v5447_v41  ;;  %v5894_v41 = vld [vmem:[%s10174_s6 + $0x3d8] sm:$0xff]  ;;  %1093 = vmatpush.msra.mxu1 %v5889_v15 }
 0x125   :  { %1076 = vmatpush.msrb.mxu0 %v5457_v18  ;;  %1133 = vmatpush.msra.mxu3 %v5894_v41  ;;  %v5901_v18 = vld [vmem:[%s10174_s6 + $0x3b0] sm:$0xff] }
 0x126   :  { %1116 = vmatpush.msrb.mxu2 %v5462_v44  ;;  %v5906_v44 = vld [vmem:[%s10174_s6 + $0x3b8] sm:$0xff]  ;;  %1094 = vmatpush.msra.mxu1 %v5901_v18 }
 0x127   :  { %1077 = vmatpush.msrb.mxu0 %v5471_v22  ;;  %1134 = vmatpush.msra.mxu3 %v5906_v44  ;;  %v5913_v22 = vld [vmem:[%s10174_s6 + $0x390] sm:$0xff] }
 0x128   :  { %1117 = vmatpush.msrb.mxu2 %v5476_v47  ;;  %v5918_v47 = vld [vmem:[%s10174_s6 + $0x398] sm:$0xff]  ;;  %1095 = vmatpush.msra.mxu1 %v5913_v22 }
 0x129   :  { %1078 = vmatpush.msrb.mxu0 %v5485_v26  ;;  %1135 = vmatpush.msra.mxu3 %v5918_v47  ;;  %v5925_v26 = vld [vmem:[%s10174_s6 + $0x370] sm:$0xff] }
 0x12a   :  { %1118 = vmatpush.msrb.mxu2 %v5490_v50  ;;  %v5930_v50 = vld [vmem:[%s10174_s6 + $0x378] sm:$0xff]  ;;  %1096 = vmatpush.msra.mxu1 %v5925_v26 }
 0x12b   :  { %1079 = vmatpush.msrb.mxu0 %v5499_v29  ;;  %1136 = vmatpush.msra.mxu3 %v5930_v50  ;;  %v5937_v29 = vld [vmem:[%s10174_s6 + $0x350] sm:$0xff] }
 0x12c   :  { %1119 = vmatpush.msrb.mxu2 %v5504_v53  ;;  %v5942_v53 = vld [vmem:[%s10174_s6 + $0x358] sm:$0xff]  ;;  %1097 = vmatpush.msra.mxu1 %v5937_v29 }
 0x12d   :  { %1080 = vmatpush.msrb.mxu0 %v5513_v32  ;;  %1137 = vmatpush.msra.mxu3 %v5942_v53  ;;  %v5949_v32 = vld [vmem:[%s10174_s6 + $0x330] sm:$0xff] }
 0x12e   :  { %1120 = vmatpush.msrb.mxu2 %v5518_v56  ;;  %v5954_v56 = vld [vmem:[%s10174_s6 + $0x338] sm:$0xff]  ;;  %1098 = vmatpush.msra.mxu1 %v5949_v32 }
 0x12f   :  { %1081 = vmatpush.msrb.mxu0 %v5527_v35  ;;  %1138 = vmatpush.msra.mxu3 %v5954_v56  ;;  %v5961_v35 = vld [vmem:[%s10174_s6 + $0x310] sm:$0xff] }
 0x130   :  { %1121 = vmatpush.msrb.mxu2 %v5532_v59  ;;  %v5966_v59 = vld [vmem:[%s10174_s6 + $0x318] sm:$0xff]  ;;  %1099 = vmatpush.msra.mxu1 %v5961_v35 }
 0x131   :  { %1082 = vmatpush.msrb.mxu0 %v5541_v38  ;;  %v179_v38 = vld [vmem:[%s10175_s7] sm:$0xf]  ;;  %1139 = vmatpush.msra.mxu3 %v5966_v59 }
 0x132   :  { %1122 = vmatpush.msrb.mxu2 %v5546_v62  ;;  %v5976_v62 = vld [vmem:[%s10174_s6 + $0x2f0] sm:$0xff]  ;;  %v6024_v9 = vperm.slane %v179_v38, 1  ;;  %v6038_v33 = vperm.slane %v179_v38, 2 }
 0x133   :  { %1083 = vmatpush.msrb.mxu0 %v5555_v43  ;;  %v5981_v43 = vld [vmem:[%s10174_s6 + $0x2f8] sm:$0xff]  ;;  %1100 = vmatpush.msra.mxu1 %v5976_v62 }
 0x134   :  { %1123 = vmatpush.msrb.mxu2 %v5560_v0  ;;  %1140 = vmatpush.msra.mxu3 %v5981_v43  ;;  %v5985_v0 = vperm.slane %v179_v38, 0  ;;  %10682 = vst [vmem:[#allocation22_spill] sm:$0xff] %v6024_v9 }
 0x135   :  { %1084 = vmatpush.msrb.mxu0 %v5571_v46  ;;  %v5990_v46 = vld [vmem:[%s10174_s6 + $0x2d0] sm:$0xff]  ;;  %10685 = vst [vmem:[#allocation29_spill] sm:$0xff] %v6038_v33 }
 0x136   :  { %1124 = vmatpush.msrb.mxu2 %v5576_v2  ;;  %10679 = vst [vmem:[#allocation26_spill] sm:$0xff] %v5985_v0  ;;  %v5995_v2 = vld [vmem:[%s10174_s6 + $0x2d8] sm:$0xff]  ;;  %1101 = vmatpush.msra.mxu1 %v5990_v46 }
 0x137   :  { %1085 = vmatpush.msrb.mxu0 %v5585_v49  ;;  %1141 = vmatpush.msra.mxu3 %v5995_v2  ;;  %v530_v49 = vpop.f32.mrf.mxu1 }
 0x138   :  { %1125 = vmatpush.msrb.mxu2 %v5590_v4  ;;  %v6002_v4 = vld [vmem:[%s10174_s6 + $0x2b0] sm:$0xff] }
 0x139   :  { %1086 = vmatpush.msrb.mxu0 %v5599_v52  ;;  %v6007_v52 = vld [vmem:[%s10174_s6 + $0x2b8] sm:$0xff]  ;;  %1102 = vmatpush.msra.mxu1 %v6002_v4 }
 0x13a   :  { %1126 = vmatpush.msrb.mxu2 %v5604_v6  ;;  %1142 = vmatpush.msra.mxu3 %v6007_v52 }
 0x13b   :  { %1087 = vmatpush.msrb.mxu0 %v5613_v57  ;;  %1103 = vmatpush.msra.mxu1 %v6015_v3 }
 0x13c   :  { %1127 = vmatpush.msrb.mxu2 %v10678_v27  ;;  %1143 = vmatpush.msra.mxu3 %v6020_v5 }
 0x13d   :  { %1104 = vmatpush.msra.mxu1 %v6029_v23 }
 0x13e   :  { %1144 = vmatpush.msra.mxu3 %v6034_v16 }
 0x13f   :  { %1105 = vmatpush.msra.mxu1 %v10686_v21  ;;  %v610_v42 = vpop.f32.mrf.mxu1 }
 0x140   :  { %1145 = vmatpush.msra.mxu3 %v10687_v8 }
 0x141   :  { %1106 = vmatpush.msra.mxu1 %v6046_v58 }
 0x142   :  { %1146 = vmatpush.msra.mxu3 %v6051_v12 }
 0x159   :  { %v510_v6 = vpop.f32.mrf.mxu0 }
 0x15a   :  { %v511_v57 = vadd.f32 %v510_v6, %v5985_v0  ;;  %v6059_v6 = vld [vmem:[%s10174_s6 + $0x210] sm:$0xff] }
 0x15b   :  { %10690 = vst [vmem:[#allocation25_spill] sm:$0xff] %v6059_v6  ;;  %1107 = vmatpush.msra.mxu1 %v6059_v6 }
 0x15c   :  { %v531_v7 = vadd.f32 %v530_v49, %v511_v57  ;;  %v6064_v57 = vld [vmem:[%s10174_s6 + $0x218] sm:$0xff] }
 0x15d   :  { %10691 = vst [vmem:[#allocation10_spill] sm:$0xff] %v6064_v57  ;;  %1147 = vmatpush.msra.mxu3 %v6064_v57  ;;  %v673_v57 = vld [vmem:[#allocation2] sm:$0xc] }
 0x15e   :  { %v653_v61 = vmul.f32 0.5, %v531_v7 }
 0x15f   :  { %v550_v51 = vpop.f32.mrf.mxu2 }
 0x160   :  { %v551_v31 = vadd.f32 %v550_v51, %v6024_v9  ;;  %4268 = vtanh.f32 %v653_v61  ;;  %v6068_v61 = vperm.slane %v179_v38, 3 }
 0x161   :  { %v590_v55 = vpop.f32.mrf.mxu0 }
 0x162   :  { %v571_v27 = vadd.f32 %v570_v10, %v551_v31  ;;  %v591_v49 = vadd.f32 %v590_v55, %v6038_v33  ;;  %10692 = vst [vmem:[#allocation11_spill] sm:$0xff] %v6068_v61  ;;  %v650_v31 = vpop.f32.mrf.mxu3  ;;  %v777_v33 = vpop.f32.mrf.mxu1 }
 0x164   :  { %v657_v7 = vmul.f32 0.5, %v571_v27  ;;  %v611_v51 = vadd.f32 %v610_v42, %v591_v49  ;;  %v4252_v42 = vld [vmem:[%s10170_s2 + $0x2] sm:$0x3]  ;;  %v825_v27 = vrot.slane %v777_v33, 6  ;;  %v672_v33 = vld [vmem:[#allocation2 + $0x30] sm:$0xc] }
 0x166   :  { %4270 = vtanh.f32 %v657_v7  ;;  %v4269_v21 = vpop.eup %4268 }
 0x167   :  { %4272 = vtanh.f32 %v611_v51  ;;  %v655_v55 = vmul.f32 0.5, %v4269_v21 }
 0x168   :  { %v630_v8 = vpop.f32.mrf.mxu2 }
 0x169   :  { %v631_v10 = vadd.f32 %v630_v8, %v6068_v61  ;;  %v656_v38 = vadd.f32 0.5, %v655_v55  ;;  %v833_v8 = vadd.f32 %v825_v27, %v673_v57 }
 0x16b   :  { %v651_v12 = vadd.f32 %v650_v31, %v631_v10  ;;  %v817_v10 = vpop.f32.mrf.mxu3 }
 0x16c   :  { %v4271_v58 = vpop.eup %4270 }
 0x16d   :  { %v659_v9 = vmul.f32 0.5, %v4271_v58  ;;  %v662_v16 = vmul.f32 0.5, %v651_v12  ;;  %v4273_v6 = vpop.eup %4272  ;;  %v840_v12 = vmul.f32 0.5, %v833_v8  ;;  %v6090_v8 = vld [vmem:[%s10173_s5 + $0x1c8] sm:$0xff] }
 0x16e   :  { %v667_v51 = vmul.f32 %v4273_v6, %v656_v38 }
 0x16f   :  { %v660_v49 = vadd.f32 0.5, %v659_v9  ;;  %4274 = vtanh.f32 %v662_v16  ;;  %v827_v9 = vrot.slane %v817_v10, 6 }
 0x171   :  { %v666_v7 = vmul.f32 %v4252_v42, %v660_v49  ;;  %v675_v42 = vld [vmem:[#allocation2 + $0x10] sm:$0xc] }
 0x172   :  { %v835_v38 = vadd.f32 %v827_v9, %v675_v42  ;;  %v6126_v42 = vld [vmem:[%s10173_s5 + $0x168] sm:$0xff] }
 0x173   :  { %v6074_v61 = vadd.f32 %v667_v51, %v666_v7  ;;  %v6080_v7 = vld [vmem:[%s10173_s5 + $0x1e8] sm:$0xff]  ;;  %v6085_v51 = vld [vmem:[%s10173_s5 + $0x1f8] sm:$0xff] }
 0x174   :  { %v845_v10 = vmul.f32 0.5, %v835_v38  ;;  %v6131_v38 = vld [vmem:[%s10173_s5 + $0x178] sm:$0xff] }
 0x175   :  { %v4275_v21 = vpop.eup %4274  ;;  %4276 = vtanh.f32 %v6074_v61 }
 0x176   :  { %v664_v58 = vmul.f32 0.5, %v4275_v21  ;;  %4278 = vtanh.f32 %v840_v12  ;;  %v6095_v21 = vld [vmem:[%s10173_s5 + $0x1d8] sm:$0xff] }
 0x178   :  { %v665_v23 = vadd.f32 0.5, %v664_v58 }
 0x179   :  { %v757_v31 = vpop.f32.mrf.mxu0 }
 0x17a   :  { %v824_v5 = vrot.slane %v757_v31, 6  ;;  %v6102_v31 = vld [vmem:[%s10173_s5 + $0x1a8] sm:$0xff] }
 0x17b   :  { %v4277_v3 = vpop.eup %4276 }
 0x17c   :  { %v670_v16 = vmul.f32 %v4277_v3, %v665_v23  ;;  %v832_v55 = vadd.f32 %v824_v5, %v672_v33  ;;  %v4279_v3 = vpop.eup %4278  ;;  %v674_v23 = vld [vmem:[#allocation2 + $0x18] sm:$0xc]  ;;  %v6107_v33 = vld [vmem:[%s10173_s5 + $0x1b8] sm:$0xff] }
 0x17d   :  { %v842_v12 = vmul.f32 0.5, %v4279_v3  ;;  %v850_v3 = vrot.slane %v5649_v25, 6  ;;  %v6151_v25 = vld [vmem:[%s10173_s5 + $0x128] sm:$0xff] }
 0x17e   :  { %671 = vst [vmem:[#allocation3] sm:$0x3] %v670_v16  ;;  %v836_v6 = vmul.f32 0.5, %v832_v55  ;;  %v858_v57 = vrot.slane %v670_v16, 6  ;;  %v6114_v16 = vld [vmem:[%s10173_s5 + $0x188] sm:$0xff]  ;;  %v6119_v55 = vld [vmem:[%s10173_s5 + $0x198] sm:$0xff] }
 0x17f   :  { %10694 = vst [vmem:[#allocation13_spill] sm:$0xff] %v6151_v25 }
 0x180   :  { %4280 = vtanh.f32 %v836_v6  ;;  %v797_v27 = vpop.f32.mrf.mxu2  ;;  %v989_v49 = vrot.slane %v858_v57, 2  ;;  %v843_v57 = vadd.f32 0.5, %v842_v12 }
 0x181   :  { %v826_v5 = vrot.slane %v797_v27, 6 }
 0x182   :  { %1028 = vmatmul.f32.vlgmr.msrb.gmra.mxu1 %v989_v49  ;;  %1068 = vmatmul.f32.vlgmr.msrb.gmra.mxu3 %v989_v49  ;;  %v852_v12 = vmul.f32 %v850_v3, %v843_v57  ;;  %v6165_v57 = vld [vmem:[%s10173_s5 + $0x108] sm:$0xff] }
 0x183   :  { %v834_v58 = vadd.f32 %v826_v5, %v674_v23  ;;  %1259 = vmatpush.msrb.mxu1 %v6080_v7  ;;  %1299 = vmatpush.msrb.mxu3 %v6085_v51  ;;  %v6139_v5 = vld [vmem:[%s10173_s5 + $0x148] sm:$0xff]  ;;  %v6144_v23 = vld [vmem:[%s10173_s5 + $0x158] sm:$0xff]  ;;  %10696 = vst [vmem:[#allocation15_spill] sm:$0xff] %v6165_v57 }
 0x184   :  { %10693 = vst [vmem:[#allocation12_spill] sm:$0xff] %v6144_v23  ;;  %v6178_v3 = vld [vmem:[%s10173_s5 + $0xe8] sm:$0xff] }
 0x185   :  { %4282 = vtanh.f32 %v834_v58  ;;  %1260 = vmatpush.msrb.mxu1 %v6090_v8  ;;  %1300 = vmatpush.msrb.mxu3 %v6095_v21  ;;  %10698 = vst [vmem:[#allocation17_spill] sm:$0xff] %v6178_v3 }
 0x186   :  { %v4281_v9 = vpop.eup %4280  ;;  %4284 = vtanh.f32 %v845_v10 }
 0x187   :  { %v838_v6 = vmul.f32 0.5, %v4281_v9  ;;  %1261 = vmatpush.msrb.mxu1 %v6102_v31  ;;  %1301 = vmatpush.msrb.mxu3 %v6107_v33 }
 0x189   :  { %v839_v27 = vadd.f32 0.5, %v838_v6  ;;  %1262 = vmatpush.msrb.mxu1 %v6114_v16  ;;  %1302 = vmatpush.msrb.mxu3 %v6119_v55 }
 0x18a   :  { %1108 = vmatmul.f32.vlgmr.msra.gmra.mxu1 %v989_v49  ;;  %1148 = vmatmul.f32.vlgmr.msra.gmra.mxu3 %v989_v49  ;;  %v6156_v49 = vld [vmem:[%s10173_s5 + $0x138] sm:$0xff] }
 0x18b   :  { %v4283_v58 = vpop.eup %4282  ;;  %1263 = vmatpush.msrb.mxu1 %v6126_v42  ;;  %1303 = vmatpush.msrb.mxu3 %v6131_v38  ;;  %10695 = vst [vmem:[#allocation14_spill] sm:$0xff] %v6156_v49 }
 0x18c   :  { %v853_v10 = vmul.f32 %v4283_v58, %v839_v27  ;;  %v4285_v9 = vpop.eup %4284  ;;  %v6170_v27 = vld [vmem:[%s10173_s5 + $0x118] sm:$0xff] }
 0x18d   :  { %1264 = vmatpush.msrb.mxu1 %v6139_v5  ;;  %1304 = vmatpush.msrb.mxu3 %v6144_v23  ;;  %10697 = vst [vmem:[#allocation16_spill] sm:$0xff] %v6170_v27  ;;  %v6183_v58 = vld [vmem:[%s10173_s5 + $0xf8] sm:$0xff] }
 0x18e   :  { %v6160_v6 = vadd.f32 %v853_v10, %v852_v12  ;;  %10699 = vst [vmem:[#allocation18_spill] sm:$0xff] %v6183_v58  ;;  %v847_v12 = vmul.f32 0.5, %v4285_v9  ;;  %v6190_v10 = vld [vmem:[%s10173_s5 + $0xc8] sm:$0xff] }
 0x18f   :  { %1265 = vmatpush.msrb.mxu1 %v6151_v25  ;;  %1305 = vmatpush.msrb.mxu3 %v6156_v49  ;;  %10700 = vst [vmem:[#allocation19_spill] sm:$0xff] %v6190_v10  ;;  %v6195_v49 = vld [vmem:[%s10173_s5 + $0xd8] sm:$0xff]  ;;  %v6202_v9 = vld [vmem:[%s10173_s5 + $0xa8] sm:$0xff] }
 0x190   :  { %4286 = vtanh.f32 %v6160_v6  ;;  %10701 = vst [vmem:[#allocation20_spill] sm:$0xff] %v6195_v49 }
 0x191   :  { %1266 = vmatpush.msrb.mxu1 %v6165_v57  ;;  %1306 = vmatpush.msrb.mxu3 %v6170_v27  ;;  %v6207_v27 = vld [vmem:[%s10173_s5 + $0xb8] sm:$0xff]  ;;  %v848_v57 = vadd.f32 0.5, %v847_v12 }
 0x193   :  { %1267 = vmatpush.msrb.mxu1 %v6178_v3  ;;  %1307 = vmatpush.msrb.mxu3 %v6183_v58  ;;  %v6214_v58 = vld [vmem:[%s10173_s5 + $0x88] sm:$0xff]  ;;  %v6219_v3 = vld [vmem:[%s10173_s5 + $0x98] sm:$0xff] }
 0x194   :  { %10702 = vst [vmem:[#allocation31_spill] sm:$0xff] %v6219_v3 }
 0x195   :  { %1268 = vmatpush.msrb.mxu1 %v6190_v10  ;;  %1308 = vmatpush.msrb.mxu3 %v6195_v49  ;;  %v6230_v49 = vld [vmem:[%s10173_s5 + $0x1f0] sm:$0xff]  ;;  %v6235_v10 = vld [vmem:[%s10173_s5 + $0x68] sm:$0xff] }
 0x196   :  { %v4287_v25 = vpop.eup %4286  ;;  %10703 = vst [vmem:[#allocation32_spill] sm:$0xff] %v6230_v49 }
 0x197   :  { %v856_v23 = vmul.f32 %v4287_v25, %v848_v57  ;;  %1269 = vmatpush.msrb.mxu1 %v6202_v9  ;;  %1309 = vmatpush.msrb.mxu3 %v6207_v27  ;;  %10704 = vst [vmem:[#allocation33_spill] sm:$0xff] %v6235_v10  ;;  %v6240_v25 = vld [vmem:[%s10173_s5 + $0x78] sm:$0xff]  ;;  %v6254_v57 = vld [vmem:[%s10173_s5 + $0x48] sm:$0xff] }
 0x198   :  { %10706 = vst [vmem:[#allocation35_spill] sm:$0xff] %v6254_v57 }
 0x199   :  { %v6223_v12 = vrot.slane %v856_v23, 2  ;;  %1270 = vmatpush.msrb.mxu1 %v6214_v58  ;;  %1310 = vmatpush.msrb.mxu3 %v6219_v3  ;;  %v6247_v23 = vld [vmem:[%s10173_s5 + $0x1d0] sm:$0xff]  ;;  %v6259_v3 = vld [vmem:[%s10173_s5 + $0x58] sm:$0xff] }
 0x19a   :  { %10705 = vst [vmem:[#allocation34_spill] sm:$0xff] %v6247_v23 }
 0x19b   :  { %1008 = vmatmul.f32.vlgmr.msra.gmra.mxu0 %v6223_v12  ;;  %1048 = vmatmul.f32.vlgmr.msra.gmra.mxu2 %v6223_v12 }
 0x19c   :  { %1239 = vmatpush.msra.mxu0 %v5665_v24  ;;  %1279 = vmatpush.msra.mxu2 %v6230_v49  ;;  %v6266_v24 = vld [vmem:[%s10173_s5 + $0x1b0] sm:$0xff]  ;;  %v6273_v49 = vld [vmem:[%s10173_s5 + $0x28] sm:$0xff] }
 0x19d   :  { %1271 = vmatpush.msrb.mxu1 %v6235_v10  ;;  %1311 = vmatpush.msrb.mxu3 %v6240_v25  ;;  %v6278_v10 = vld [vmem:[%s10173_s5 + $0x38] sm:$0xff] }
 0x19e   :  { %1240 = vmatpush.msra.mxu0 %v5674_v36  ;;  %1280 = vmatpush.msra.mxu2 %v6247_v23  ;;  %v6285_v36 = vld [vmem:[%s10173_s5 + $0x190] sm:$0xff]  ;;  %v6292_v23 = vld [vmem:[%s10173_s5 + $0x8] sm:$0xff] }
 0x19f   :  { %1272 = vmatpush.msrb.mxu1 %v6254_v57  ;;  %1312 = vmatpush.msrb.mxu3 %v6259_v3  ;;  %10707 = vst [vmem:[#allocation36_spill] sm:$0xff] %v6285_v36  ;;  %v6297_v57 = vld [vmem:[%s10173_s5 + $0x18] sm:$0xff] }
 0x1a0   :  { %1241 = vmatpush.msra.mxu0 %v5685_v40  ;;  %1281 = vmatpush.msra.mxu2 %v6266_v24  ;;  %v6308_v40 = vld [vmem:[%s10173_s5 + $0x170] sm:$0xff] }
 0x1a1   :  { %1273 = vmatpush.msrb.mxu1 %v6273_v49  ;;  %1313 = vmatpush.msrb.mxu3 %v6278_v10 }
 0x1a2   :  { %1242 = vmatpush.msra.mxu0 %v5695_v63  ;;  %1282 = vmatpush.msra.mxu2 %v6285_v36  ;;  %v6317_v63 = vld [vmem:[%s10173_s5 + $0x150] sm:$0xff] }
 0x1a3   :  { %1274 = vmatpush.msrb.mxu1 %v6292_v23  ;;  %1314 = vmatpush.msrb.mxu3 %v6297_v57  ;;  %v6325_v36 = vld [vmem:[%s10173_s5 + $0x130] sm:$0xff] }
 0x1a4   :  { %1088 = vmatmul.f32.vlgmr.msrb.gmra.mxu0 %v6223_v12  ;;  %1128 = vmatmul.f32.vlgmr.msrb.gmra.mxu2 %v6223_v12 }
 0x1a5   :  { %1243 = vmatpush.msra.mxu0 %v5705_v1  ;;  %1275 = vmatmul.f32.vlgmr.msrb.gmra.mxu1 %v6223_v12  ;;  %v6332_v1 = vld [vmem:[%s10173_s5 + $0x110] sm:$0xff] }
 0x1a6   :  { %1283 = vmatpush.msra.mxu2 %v6308_v40  ;;  %1315 = vmatmul.f32.vlgmr.msrb.gmra.mxu3 %v6223_v12 }
 0x1a7   :  { %1244 = vmatpush.msra.mxu0 %v5715_v14  ;;  %v6339_v14 = vld [vmem:[%s10173_s5 + $0xf0] sm:$0xff] }
 0x1a8   :  { %1284 = vmatpush.msra.mxu2 %v6317_v63  ;;  %10708 = vst [vmem:[#allocation37_spill] sm:$0xff] %v6339_v14 }
 0x1a9   :  { %1245 = vmatpush.msra.mxu0 %v5725_v17  ;;  %v6346_v17 = vld [vmem:[%s10173_s5 + $0xd0] sm:$0xff] }
 0x1aa   :  { %1285 = vmatpush.msra.mxu2 %v6325_v36  ;;  %10709 = vst [vmem:[#allocation38_spill] sm:$0xff] %v6346_v17 }
 0x1ab   :  { %1246 = vmatpush.msra.mxu0 %v5732_v20  ;;  %v6353_v20 = vld [vmem:[%s10173_s5 + $0xb0] sm:$0xff] }
 0x1ac   :  { %1286 = vmatpush.msra.mxu2 %v6332_v1  ;;  %10710 = vst [vmem:[#allocation39_spill] sm:$0xff] %v6353_v20 }
 0x1ad   :  { %1247 = vmatpush.msra.mxu0 %v5739_v11  ;;  %v6360_v11 = vld [vmem:[%s10173_s5 + $0x90] sm:$0xff] }
 0x1ae   :  { %1287 = vmatpush.msra.mxu2 %v6339_v14  ;;  %10711 = vst [vmem:[#allocation40_spill] sm:$0xff] %v6360_v11  ;;  %v6461_v14 = vld [vmem:[%s10174_s6 + $0x348] sm:$0xff] }
 0x1af   :  { %1248 = vmatpush.msra.mxu0 %v5746_v13  ;;  %v6367_v13 = vld [vmem:[%s10173_s5 + $0x70] sm:$0xff]  ;;  %10721 = vst [vmem:[#allocation50_spill] sm:$0xff] %v6461_v14 }
 0x1b0   :  { %1288 = vmatpush.msra.mxu2 %v6346_v17  ;;  %10712 = vst [vmem:[#allocation41_spill] sm:$0xff] %v6367_v13  ;;  %v6456_v17 = vld [vmem:[%s10174_s6 + $0x340] sm:$0xff] }
 0x1b1   :  { %1249 = vmatpush.msra.mxu0 %v5753_v28  ;;  %v6374_v28 = vld [vmem:[%s10173_s5 + $0x50] sm:$0xff]  ;;  %10720 = vst [vmem:[#allocation49_spill] sm:$0xff] %v6456_v17 }
 0x1b2   :  { %1289 = vmatpush.msra.mxu2 %v6353_v20  ;;  %10713 = vst [vmem:[#allocation42_spill] sm:$0xff] %v6374_v28  ;;  %v6451_v20 = vld [vmem:[%s10174_s6 + $0x368] sm:$0xff] }
 0x1b3   :  { %1250 = vmatpush.msra.mxu0 %v5760_v19  ;;  %v6381_v19 = vld [vmem:[%s10173_s5 + $0x30] sm:$0xff]  ;;  %10719 = vst [vmem:[#allocation48_spill] sm:$0xff] %v6451_v20 }
 0x1b4   :  { %1290 = vmatpush.msra.mxu2 %v6360_v11  ;;  %10714 = vst [vmem:[#allocation43_spill] sm:$0xff] %v6381_v19  ;;  %v6444_v11 = vld [vmem:[%s10174_s6 + $0x360] sm:$0xff] }
 0x1b5   :  { %1251 = vmatpush.msra.mxu0 %v5767_v54  ;;  %v6388_v54 = vld [vmem:[%s10173_s5 + $0x10] sm:$0xff]  ;;  %10718 = vst [vmem:[#allocation47_spill] sm:$0xff] %v6444_v11 }
 0x1b6   :  { %1291 = vmatpush.msra.mxu2 %v6367_v13  ;;  %10715 = vst [vmem:[#allocation44_spill] sm:$0xff] %v6388_v54  ;;  %v6439_v13 = vld [vmem:[%s10174_s6 + $0x388] sm:$0xff] }
 0x1b7   :  { %1252 = vmatpush.msra.mxu0 %v5774_v39  ;;  %v6398_v39 = vld [vmem:[%s10174_s6 + $0x3e0] sm:$0xff]  ;;  %10717 = vst [vmem:[#allocation46_spill] sm:$0xff] %v6439_v13 }
 0x1b8   :  { %1292 = vmatpush.msra.mxu2 %v6374_v28  ;;  %1511 = vmatpush.msra.mxu1 %v6398_v39  ;;  %v6434_v28 = vld [vmem:[%s10174_s6 + $0x380] sm:$0xff] }
 0x1b9   :  { %1253 = vmatpush.msra.mxu0 %v5781_v60  ;;  %v6403_v60 = vld [vmem:[%s10174_s6 + $0x3e8] sm:$0xff]  ;;  %10716 = vst [vmem:[#allocation45_spill] sm:$0xff] %v6434_v28 }
 0x1ba   :  { %1293 = vmatpush.msra.mxu2 %v6381_v19  ;;  %1551 = vmatpush.msra.mxu3 %v6403_v60  ;;  %v6427_v19 = vld [vmem:[%s10174_s6 + $0x3a8] sm:$0xff] }
 0x1bb   :  { %1254 = vmatpush.msra.mxu0 %v5788_v48  ;;  %v6408_v48 = vld [vmem:[%s10174_s6 + $0x3c0] sm:$0xff] }
 0x1bc   :  { %1294 = vmatpush.msra.mxu2 %v6388_v54  ;;  %1255 = vmatmul.f32.vlgmr.msra.gmra.mxu0 %v6223_v12  ;;  %v6422_v54 = vld [vmem:[%s10174_s6 + $0x3a0] sm:$0xff] }
 0x1bd   :  { %1295 = vmatmul.f32.vlgmr.msra.gmra.mxu2 %v6223_v12  ;;  %v6415_v12 = vld [vmem:[%s10174_s6 + $0x3c8] sm:$0xff]  ;;  %1512 = vmatpush.msra.mxu1 %v6408_v48 }
 0x1be   :  { %1552 = vmatpush.msra.mxu3 %v6415_v12 }
 0x1bf   :  { %1513 = vmatpush.msra.mxu1 %v6422_v54 }
 0x1c0   :  { %1553 = vmatpush.msra.mxu3 %v6427_v19 }
 0x1c1   :  { %1514 = vmatpush.msra.mxu1 %v6434_v28  ;;  %v6475_v28 = vld [vmem:[%s10174_s6 + $0x328] sm:$0xff] }
 0x1c2   :  { %1554 = vmatpush.msra.mxu3 %v6439_v13  ;;  %v6470_v13 = vld [vmem:[%s10174_s6 + $0x320] sm:$0xff]  ;;  %10723 = vst [vmem:[#allocation52_spill] sm:$0xff] %v6475_v28 }
 0x1c3   :  { %1515 = vmatpush.msra.mxu1 %v6444_v11  ;;  %10722 = vst [vmem:[#allocation51_spill] sm:$0xff] %v6470_v13  ;;  %v6480_v11 = vld [vmem:[%s10174_s6 + $0x300] sm:$0xff] }
 0x1c4   :  { %1555 = vmatpush.msra.mxu3 %v6451_v20  ;;  %10724 = vst [vmem:[#allocation53_spill] sm:$0xff] %v6480_v11  ;;  %v6497_v20 = vld [vmem:[%s10174_s6 + $0x2e8] sm:$0xff] }
 0x1c5   :  { %1516 = vmatpush.msra.mxu1 %v6456_v17  ;;  %v6492_v17 = vld [vmem:[%s10174_s6 + $0x2e0] sm:$0xff]  ;;  %10727 = vst [vmem:[#allocation56_spill] sm:$0xff] %v6497_v20 }
 0x1c6   :  { %1556 = vmatpush.msra.mxu3 %v6461_v14  ;;  %v6487_v14 = vld [vmem:[%s10174_s6 + $0x308] sm:$0xff]  ;;  %10726 = vst [vmem:[#allocation55_spill] sm:$0xff] %v6492_v17 }
 0x1c7   :  { %1517 = vmatpush.msra.mxu1 %v6470_v13  ;;  %10725 = vst [vmem:[#allocation54_spill] sm:$0xff] %v6487_v14  ;;  %v6509_v13 = vld [vmem:[%s10174_s6 + $0x2c8] sm:$0xff] }
 0x1c8   :  { %1557 = vmatpush.msra.mxu3 %v6475_v28  ;;  %v6504_v28 = vld [vmem:[%s10174_s6 + $0x2c0] sm:$0xff] }
 0x1c9   :  { %1518 = vmatpush.msra.mxu1 %v6480_v11  ;;  %v6516_v11 = vld [vmem:[%s10174_s6 + $0x2a0] sm:$0xff] }
 0x1ca   :  { %1558 = vmatpush.msra.mxu3 %v6487_v14  ;;  %10728 = vst [vmem:[#allocation57_spill] sm:$0xff] %v6516_v11  ;;  %v6521_v14 = vld [vmem:[%s10174_s6 + $0x2a8] sm:$0xff] }
 0x1cb   :  { %1519 = vmatpush.msra.mxu1 %v6492_v17  ;;  %10729 = vst [vmem:[#allocation58_spill] sm:$0xff] %v6521_v14  ;;  %v6535_v17 = vld [vmem:[%s10174_s6 + $0x288] sm:$0xff] }
 0x1cc   :  { %1559 = vmatpush.msra.mxu3 %v6497_v20  ;;  %v6530_v20 = vld [vmem:[%s10174_s6 + $0x280] sm:$0xff]  ;;  %10731 = vst [vmem:[#allocation62_spill] sm:$0xff] %v6535_v17 }
 0x1cd   :  { %1520 = vmatpush.msra.mxu1 %v6504_v28  ;;  %10730 = vst [vmem:[#allocation61_spill] sm:$0xff] %v6530_v20 }
 0x1ce   :  { %1560 = vmatpush.msra.mxu3 %v6509_v13 }
 0x1cf   :  { %1521 = vmatpush.msra.mxu1 %v6516_v11  ;;  %v6542_v11 = vld [vmem:[%s10174_s6 + $0x1e0] sm:$0xff] }
 0x1d0   :  { %1561 = vmatpush.msra.mxu3 %v6521_v14  ;;  %10732 = vst [vmem:[#allocation63_spill] sm:$0xff] %v6542_v11  ;;  %v6547_v14 = vld [vmem:[%s10174_s6 + $0x1e8] sm:$0xff]  ;;  %1491 = vmatpush.msrb.mxu0 %v6542_v11  ;;  %v6566_v11 = vld [vmem:[%s10174_s6 + $0x1c0] sm:$0xff] }
 0x1d1   :  { %1522 = vmatpush.msra.mxu1 %v6530_v20  ;;  %10733 = vst [vmem:[#allocation64_spill] sm:$0xff] %v6547_v14  ;;  %1531 = vmatpush.msrb.mxu2 %v6547_v14  ;;  %v6554_v20 = vld [vmem:[%s10174_s6 + $0x260] sm:$0xff]  ;;  %v6571_v14 = vld [vmem:[%s10174_s6 + $0x1c8] sm:$0xff] }
 0x1d2   :  { %1562 = vmatpush.msra.mxu3 %v6535_v17  ;;  %10734 = vst [vmem:[#allocation65_spill] sm:$0xff] %v6554_v20  ;;  %v6559_v17 = vld [vmem:[%s10174_s6 + $0x268] sm:$0xff]  ;;  %1492 = vmatpush.msrb.mxu0 %v6566_v11 }
 0x1d3   :  { %10735 = vst [vmem:[#allocation66_spill] sm:$0xff] %v6559_v17  ;;  %1523 = vmatpush.msra.mxu1 %v6554_v20  ;;  %1532 = vmatpush.msrb.mxu2 %v6571_v14  ;;  %v6578_v20 = vld [vmem:[%s10174_s6 + $0x240] sm:$0xff] }
 0x1d4   :  { %1563 = vmatpush.msra.mxu3 %v6559_v17  ;;  %10736 = vst [vmem:[#allocation59_spill] sm:$0xff] %v6566_v11  ;;  %v6583_v17 = vld [vmem:[%s10174_s6 + $0x248] sm:$0xff]  ;;  %v6590_v11 = vld [vmem:[%s10174_s6 + $0x1a0] sm:$0xff] }
 0x1d5   :  { %10737 = vst [vmem:[#allocation60_spill] sm:$0xff] %v6571_v14  ;;  %1524 = vmatpush.msra.mxu1 %v6578_v20  ;;  %v6595_v14 = vld [vmem:[%s10174_s6 + $0x1a8] sm:$0xff]  ;;  %1493 = vmatpush.msrb.mxu0 %v6590_v11 }
 0x1d6   :  { %10738 = vst [vmem:[#allocation67_spill] sm:$0xff] %v6578_v20  ;;  %1564 = vmatpush.msra.mxu3 %v6583_v17  ;;  %1533 = vmatpush.msrb.mxu2 %v6595_v14  ;;  %v6602_v20 = vld [vmem:[%s10174_s6 + $0x220] sm:$0xff] }
 0x1d7   :  { %10739 = vst [vmem:[#allocation68_spill] sm:$0xff] %v6583_v17  ;;  %v6607_v17 = vld [vmem:[%s10174_s6 + $0x228] sm:$0xff]  ;;  %1525 = vmatpush.msra.mxu1 %v6602_v20 }
 0x1d8   :  { %10740 = vst [vmem:[#allocation69_spill] sm:$0xff] %v6590_v11  ;;  %1565 = vmatpush.msra.mxu3 %v6607_v17  ;;  %v6614_v11 = vld [vmem:[%s10174_s6 + $0x180] sm:$0xff] }
 0x1d9   :  { %10741 = vst [vmem:[#allocation70_spill] sm:$0xff] %v6595_v14  ;;  %v6619_v14 = vld [vmem:[%s10174_s6 + $0x188] sm:$0xff]  ;;  %1494 = vmatpush.msrb.mxu0 %v6614_v11  ;;  %1526 = vmatpush.msra.mxu1 %v5865_v34  ;;  %v6642_v34 = vld [vmem:[%s10174_s6 + $0x140] sm:$0xff] }
 0x1da   :  { %10742 = vst [vmem:[#allocation71_spill] sm:$0xff] %v6602_v20  ;;  %1534 = vmatpush.msrb.mxu2 %v6619_v14  ;;  %1566 = vmatpush.msra.mxu3 %v5870_v37  ;;  %v6633_v20 = vld [vmem:[%s10174_s6 + $0x168] sm:$0xff] }
 0x1db   :  { %10743 = vst [vmem:[#allocation72_spill] sm:$0xff] %v6607_v17  ;;  %v6628_v17 = vld [vmem:[%s10174_s6 + $0x160] sm:$0xff]  ;;  %1591 = vmatpush.msrb.mxu1 %v5877_v30  ;;  %v6647_v37 = vld [vmem:[%s10174_s6 + $0x148] sm:$0xff] }
 0x1dc   :  { %1495 = vmatpush.msrb.mxu0 %v6628_v17  ;;  %1535 = vmatpush.msrb.mxu2 %v6633_v20  ;;  %v6656_v30 = vld [vmem:[%s10174_s6 + $0x120] sm:$0xff] }
 0x1dd   :  { %1631 = vmatpush.msrb.mxu3 %v5882_v45  ;;  %1592 = vmatpush.msrb.mxu1 %v5889_v15  ;;  %v6661_v45 = vld [vmem:[%s10174_s6 + $0x128] sm:$0xff]  ;;  %v6670_v15 = vld [vmem:[%s10174_s6 + $0x100] sm:$0xff] }
 0x1de   :  { %1496 = vmatpush.msrb.mxu0 %v6642_v34  ;;  %1536 = vmatpush.msrb.mxu2 %v6647_v37 }
 0x1df   :  { %1632 = vmatpush.msrb.mxu3 %v5894_v41  ;;  %1593 = vmatpush.msrb.mxu1 %v5901_v18  ;;  %v6675_v41 = vld [vmem:[%s10174_s6 + $0x108] sm:$0xff]  ;;  %v6684_v18 = vld [vmem:[%s10174_s6 + $0xe0] sm:$0xff] }
 0x1e0   :  { %1497 = vmatpush.msrb.mxu0 %v6656_v30  ;;  %1537 = vmatpush.msrb.mxu2 %v6661_v45  ;;  %10744 = vst [vmem:[#allocation73_spill] sm:$0xff] %v6684_v18 }
 0x1e1   :  { %1633 = vmatpush.msrb.mxu3 %v5906_v44  ;;  %1594 = vmatpush.msrb.mxu1 %v5913_v22  ;;  %v6689_v44 = vld [vmem:[%s10174_s6 + $0xe8] sm:$0xff]  ;;  %v6698_v22 = vld [vmem:[%s10174_s6 + $0xc0] sm:$0xff] }
 0x1e2   :  { %1498 = vmatpush.msrb.mxu0 %v6670_v15  ;;  %1538 = vmatpush.msrb.mxu2 %v6675_v41  ;;  %10745 = vst [vmem:[#allocation74_spill] sm:$0xff] %v6689_v44 }
 0x1e3   :  { %1634 = vmatpush.msrb.mxu3 %v5918_v47  ;;  %1595 = vmatpush.msrb.mxu1 %v5925_v26  ;;  %10746 = vst [vmem:[#allocation75_spill] sm:$0xff] %v6698_v22  ;;  %v6703_v47 = vld [vmem:[%s10174_s6 + $0xc8] sm:$0xff]  ;;  %v6712_v26 = vld [vmem:[%s10174_s6 + $0xa0] sm:$0xff] }
 0x1e4   :  { %1499 = vmatpush.msrb.mxu0 %v6684_v18  ;;  %1539 = vmatpush.msrb.mxu2 %v6689_v44  ;;  %10747 = vst [vmem:[#allocation76_spill] sm:$0xff] %v6703_v47 }
 0x1e5   :  { %1635 = vmatpush.msrb.mxu3 %v5930_v50  ;;  %1596 = vmatpush.msrb.mxu1 %v5937_v29  ;;  %10748 = vst [vmem:[#allocation77_spill] sm:$0xff] %v6712_v26  ;;  %v6717_v50 = vld [vmem:[%s10174_s6 + $0xa8] sm:$0xff]  ;;  %v6726_v29 = vld [vmem:[%s10174_s6 + $0x80] sm:$0xff] }
 0x1e6   :  { %1500 = vmatpush.msrb.mxu0 %v6698_v22  ;;  %1540 = vmatpush.msrb.mxu2 %v6703_v47  ;;  %10749 = vst [vmem:[#allocation78_spill] sm:$0xff] %v6717_v50 }
 0x1e7   :  { %1636 = vmatpush.msrb.mxu3 %v5942_v53  ;;  %1597 = vmatpush.msrb.mxu1 %v5949_v32  ;;  %10750 = vst [vmem:[#allocation79_spill] sm:$0xff] %v6726_v29  ;;  %v6731_v53 = vld [vmem:[%s10174_s6 + $0x88] sm:$0xff]  ;;  %v6740_v32 = vld [vmem:[%s10174_s6 + $0x60] sm:$0xff] }
 0x1e8   :  { %1501 = vmatpush.msrb.mxu0 %v6712_v26  ;;  %1541 = vmatpush.msrb.mxu2 %v6717_v50  ;;  %10751 = vst [vmem:[#allocation80_spill] sm:$0xff] %v6731_v53  ;;  %v1174_v50 = vld [vmem:[#allocation2 + $0x10] sm:$0x30] }
 0x1e9   :  { %1637 = vmatpush.msrb.mxu3 %v5954_v56  ;;  %1598 = vmatpush.msrb.mxu1 %v5961_v35  ;;  %10752 = vst [vmem:[#allocation81_spill] sm:$0xff] %v6740_v32  ;;  %v6745_v56 = vld [vmem:[%s10174_s6 + $0x68] sm:$0xff]  ;;  %v6754_v35 = vld [vmem:[%s10174_s6 + $0x40] sm:$0xff] }
 0x1ea   :  { %1502 = vmatpush.msrb.mxu0 %v6726_v29  ;;  %1542 = vmatpush.msrb.mxu2 %v6731_v53  ;;  %10753 = vst [vmem:[#allocation82_spill] sm:$0xff] %v6745_v56 }
 0x1eb   :  { %1638 = vmatpush.msrb.mxu3 %v5966_v59  ;;  %1599 = vmatpush.msrb.mxu1 %v5976_v62  ;;  %10754 = vst [vmem:[#allocation83_spill] sm:$0xff] %v6754_v35  ;;  %v6759_v59 = vld [vmem:[%s10174_s6 + $0x48] sm:$0xff]  ;;  %v6768_v62 = vld [vmem:[%s10174_s6 + $0x20] sm:$0xff] }
 0x1ec   :  { %1503 = vmatpush.msrb.mxu0 %v6740_v32  ;;  %1543 = vmatpush.msrb.mxu2 %v6745_v56  ;;  %10755 = vst [vmem:[#allocation84_spill] sm:$0xff] %v6759_v59 }
 0x1ed   :  { %1639 = vmatpush.msrb.mxu3 %v5981_v43  ;;  %1600 = vmatpush.msrb.mxu1 %v5990_v46  ;;  %10756 = vst [vmem:[#allocation85_spill] sm:$0xff] %v6768_v62  ;;  %v6773_v43 = vld [vmem:[%s10174_s6 + $0x28] sm:$0xff]  ;;  %v6783_v46 = vld [vmem:[%s10174_s6] sm:$0xff] }
 0x1ee   :  { %1504 = vmatpush.msrb.mxu0 %v6754_v35  ;;  %1544 = vmatpush.msrb.mxu2 %v6759_v59  ;;  %10757 = vst [vmem:[#allocation86_spill] sm:$0xff] %v6773_v43 }
 0x1ef   :  { %1640 = vmatpush.msrb.mxu3 %v5995_v2  ;;  %1601 = vmatpush.msrb.mxu1 %v6002_v4  ;;  %10758 = vst [vmem:[#allocation87_spill] sm:$0xff] %v6783_v46  ;;  %v6788_v2 = vld [vmem:[%s10174_s6 + $0x8] sm:$0xff]  ;;  %v6795_v4 = vld [vmem:[%s10174_s6 + $0x1f0] sm:$0xff] }
 0x1f0   :  { %1505 = vmatpush.msrb.mxu0 %v6768_v62  ;;  %1545 = vmatpush.msrb.mxu2 %v6773_v43  ;;  %10759 = vst [vmem:[#allocation88_spill] sm:$0xff] %v6788_v2 }
 0x1f1   :  { %1641 = vmatpush.msrb.mxu3 %v6007_v52  ;;  %10760 = vst [vmem:[#allocation89_spill] sm:$0xff] %v6795_v4  ;;  %v6800_v52 = vld [vmem:[%s10174_s6 + $0x1f8] sm:$0xff] }
 0x1f2   :  { %1506 = vmatpush.msrb.mxu0 %v6783_v46  ;;  %1546 = vmatpush.msrb.mxu2 %v6788_v2  ;;  %10761 = vst [vmem:[#allocation90_spill] sm:$0xff] %v6800_v52  ;;  %v10766_v46 = vld [vmem:[#allocation28_spill] sm:$0xff] }
 0x1f4   :  { %1571 = vmatpush.msra.mxu0 %v6795_v4  ;;  %1611 = vmatpush.msra.mxu2 %v6800_v52  ;;  %v10770_v4 = vld [vmem:[#allocation22_spill] sm:$0xff] }
 0x1ff   :  { %v1029_v56 = vpop.f32.mrf.mxu1 }
 0x205   :  { %v1069_v52 = vpop.f32.mrf.mxu3 }
 0x218   :  { %v1009_v32 = vpop.f32.mrf.mxu0 }
 0x219   :  { %v1010_v35 = vadd.f32 %v1009_v32, %v5985_v0  ;;  %v10762_v32 = vld [vmem:[#allocation21_spill] sm:$0xff]  ;;  %v10763_v0 = vld [vmem:[#allocation27_spill] sm:$0xff] }
 0x21a   :  { %1602 = vmatpush.msrb.mxu1 %v10762_v32  ;;  %1642 = vmatpush.msrb.mxu3 %v10763_v0  ;;  %v10767_v32 = vld [vmem:[#allocation23_spill] sm:$0xff]  ;;  %v6821_v0 = vld [vmem:[%s10174_s6 + $0x250] sm:$0xff] }
 0x21b   :  { %v1030_v59 = vadd.f32 %v1029_v56, %v1010_v35  ;;  %v6809_v56 = vld [vmem:[%s10174_s6 + $0x1d0] sm:$0xff]  ;;  %v6814_v35 = vld [vmem:[%s10174_s6 + $0x1d8] sm:$0xff]  ;;  %10768 = vst [vmem:[#allocation28_spill] sm:$0xff] %v6821_v0 }
 0x21c   :  { %10764 = vst [vmem:[#allocation21_spill] sm:$0xff] %v6809_v56  ;;  %1603 = vmatpush.msrb.mxu1 %v10766_v46  ;;  %1643 = vmatpush.msrb.mxu3 %v10767_v32  ;;  %v6834_v46 = vld [vmem:[%s10174_s6 + $0x1b0] sm:$0xff]  ;;  %v6839_v32 = vld [vmem:[%s10174_s6 + $0x1b8] sm:$0xff] }
 0x21d   :  { %v1152_v43 = vmul.f32 0.5, %v1030_v59  ;;  %10765 = vst [vmem:[#allocation27_spill] sm:$0xff] %v6814_v35  ;;  %v6826_v59 = vld [vmem:[%s10174_s6 + $0x258] sm:$0xff]  ;;  %1572 = vmatpush.msra.mxu0 %v6809_v56  ;;  %1612 = vmatpush.msra.mxu2 %v6814_v35  ;;  %v6848_v35 = vld [vmem:[%s10174_s6 + $0x190] sm:$0xff] }
 0x21e   :  { %v1049_v2 = vpop.f32.mrf.mxu2  ;;  %10769 = vst [vmem:[#allocation23_spill] sm:$0xff] %v6826_v59  ;;  %1604 = vmatpush.msrb.mxu1 %v6821_v0  ;;  %1644 = vmatpush.msrb.mxu3 %v6826_v59  ;;  %v6853_v56 = vld [vmem:[%s10174_s6 + $0x198] sm:$0xff]  ;;  %v10776_v59 = vld [vmem:[#allocation24_spill] sm:$0xff] }
 0x21f   :  { %v1050_v62 = vadd.f32 %v1049_v2, %v10770_v4  ;;  %10771 = vst [vmem:[#allocation91_spill] sm:$0xff] %v6834_v46  ;;  %4288 = vtanh.f32 %v1152_v43  ;;  %1573 = vmatpush.msra.mxu0 %v6834_v46  ;;  %1613 = vmatpush.msra.mxu2 %v6839_v32  ;;  %v10775_v0 = vld [vmem:[#allocation29_spill] sm:$0xff]  ;;  %v1109_v43 = vpop.f32.mrf.mxu1 }
 0x220   :  { %10772 = vst [vmem:[#allocation92_spill] sm:$0xff] %v6839_v32  ;;  %1605 = vmatpush.msrb.mxu1 %v10776_v59  ;;  %v6863_v32 = vld [vmem:[%s10174_s6 + $0x170] sm:$0xff]  ;;  %v6868_v46 = vld [vmem:[%s10174_s6 + $0x178] sm:$0xff] }
 0x221   :  { %v1070_v2 = vadd.f32 %v1069_v52, %v1050_v62  ;;  %v1089_v4 = vpop.f32.mrf.mxu0  ;;  %10773 = vst [vmem:[#allocation93_spill] sm:$0xff] %v6848_v35  ;;  %v10777_v62 = vld [vmem:[#allocation30_spill] sm:$0xff]  ;;  %1574 = vmatpush.msra.mxu0 %v6848_v35  ;;  %1614 = vmatpush.msra.mxu2 %v6853_v56  ;;  %v10780_v59 = vld [vmem:[#allocation25_spill] sm:$0xff] }
 0x222   :  { %10774 = vst [vmem:[#allocation94_spill] sm:$0xff] %v6853_v56  ;;  %v1090_v53 = vadd.f32 %v1089_v4, %v10775_v0  ;;  %1645 = vmatpush.msrb.mxu3 %v10777_v62  ;;  %1606 = vmatpush.msrb.mxu1 %v10780_v59  ;;  %v10781_v62 = vld [vmem:[#allocation10_spill] sm:$0xff]  ;;  %v6882_v0 = vld [vmem:[%s10174_s6 + $0x158] sm:$0xff] }
 0x223   :  { %v1156_v52 = vmul.f32 0.5, %v1070_v2  ;;  %10778 = vst [vmem:[#allocation24_spill] sm:$0xff] %v6863_v32  ;;  %1575 = vmatpush.msra.mxu0 %v6863_v32  ;;  %1615 = vmatpush.msra.mxu2 %v6868_v46  ;;  %v6877_v2 = vld [vmem:[%s10174_s6 + $0x150] sm:$0xff]  ;;  %v6894_v59 = vld [vmem:[%s10174_s6 + $0x138] sm:$0xff]  ;;  %v1149_v32 = vpop.f32.mrf.mxu3 }
 0x224   :  { %10779 = vst [vmem:[#allocation30_spill] sm:$0xff] %v6868_v46  ;;  %v1110_v4 = vadd.f32 %v1109_v43, %v1090_v53  ;;  %1646 = vmatpush.msrb.mxu3 %v10781_v62  ;;  %v10786_v62 = vld [vmem:[#allocation11_spill] sm:$0xff] }
 0x225   :  { %4290 = vtanh.f32 %v1156_v52  ;;  %10782 = vst [vmem:[#allocation25_spill] sm:$0xff] %v6877_v2  ;;  %v4289_v53 = vpop.eup %4288  ;;  %1576 = vmatpush.msra.mxu0 %v6877_v2  ;;  %1616 = vmatpush.msra.mxu2 %v6882_v0  ;;  %v6889_v52 = vld [vmem:[%s10174_s6 + $0x130] sm:$0xff] }
 0x226   :  { %10783 = vst [vmem:[#allocation10_spill] sm:$0xff] %v6882_v0  ;;  %4292 = vtanh.f32 %v1110_v4  ;;  %v6902_v4 = vld [vmem:[%s10174_s6 + $0x110] sm:$0xff]  ;;  %v6907_v0 = vld [vmem:[%s10174_s6 + $0x118] sm:$0xff]  ;;  %v1154_v2 = vmul.f32 0.5, %v4289_v53 }
 0x227   :  { %v1129_v43 = vpop.f32.mrf.mxu2  ;;  %10784 = vst [vmem:[#allocation95_spill] sm:$0xff] %v6889_v52  ;;  %1577 = vmatpush.msra.mxu0 %v6889_v52  ;;  %1617 = vmatpush.msra.mxu2 %v6894_v59  ;;  %v1276_v52 = vpop.f32.mrf.mxu1 }
 0x228   :  { %10785 = vst [vmem:[#allocation96_spill] sm:$0xff] %v6894_v59  ;;  %v1130_v46 = vadd.f32 %v1129_v43, %v10786_v62  ;;  %v6914_v43 = vld [vmem:[%s10174_s6 + $0xf0] sm:$0xff]  ;;  %v6919_v62 = vld [vmem:[%s10174_s6 + $0xf8] sm:$0xff] }
 0x229   :  { %10787 = vst [vmem:[#allocation97_spill] sm:$0xff] %v6902_v4  ;;  %1578 = vmatpush.msra.mxu0 %v6902_v4  ;;  %1618 = vmatpush.msra.mxu2 %v6907_v0 }
 0x22a   :  { %10788 = vst [vmem:[#allocation98_spill] sm:$0xff] %v6907_v0  ;;  %v1150_v56 = vadd.f32 %v1149_v32, %v1130_v46  ;;  %v6926_v46 = vld [vmem:[%s10174_s6 + $0xd0] sm:$0xff]  ;;  %v6931_v32 = vld [vmem:[%s10174_s6 + $0xd8] sm:$0xff]  ;;  %v1155_v0 = vadd.f32 0.5, %v1154_v2 }
 0x22b   :  { %v4291_v35 = vpop.eup %4290  ;;  %10789 = vst [vmem:[#allocation99_spill] sm:$0xff] %v6914_v43  ;;  %1579 = vmatpush.msra.mxu0 %v6914_v43  ;;  %1619 = vmatpush.msra.mxu2 %v6919_v62 }
 0x22c   :  { %10790 = vst [vmem:[#allocation100_spill] sm:$0xff] %v6919_v62  ;;  %v1158_v59 = vmul.f32 0.5, %v4291_v35  ;;  %v1161_v29 = vmul.f32 0.5, %v1150_v56  ;;  %v4293_v53 = vpop.eup %4292  ;;  %v1324_v35 = vrot.slane %v1276_v52, 4  ;;  %v6938_v56 = vld [vmem:[%s10174_s6 + $0xb0] sm:$0xff]  ;;  %v6943_v62 = vld [vmem:[%s10174_s6 + $0xb8] sm:$0xff] }
 0x22d   :  { %10791 = vst [vmem:[#allocation101_spill] sm:$0xff] %v6926_v46  ;;  %1580 = vmatpush.msra.mxu0 %v6926_v46  ;;  %1620 = vmatpush.msra.mxu2 %v6931_v32  ;;  %v1166_v2 = vmul.f32 %v4293_v53, %v1155_v0  ;;  %v6956_v52 = vld [vmem:[%s10174_s6 + $0x98] sm:$0xff]  ;;  %v6978_v53 = vld [vmem:[%s10174_s6 + $0x50] sm:$0xff] }
 0x22e   :  { %10792 = vst [vmem:[#allocation102_spill] sm:$0xff] %v6931_v32  ;;  %v1159_v4 = vadd.f32 0.5, %v1158_v59  ;;  %4294 = vtanh.f32 %v1161_v29  ;;  %v6951_v29 = vld [vmem:[%s10174_s6 + $0x90] sm:$0xff]  ;;  %v1172_v32 = vld [vmem:[#allocation2] sm:$0x30]  ;;  %v6970_v0 = vld [vmem:[%s10174_s6 + $0x78] sm:$0xff] }
 0x22f   :  { %10793 = vst [vmem:[#allocation103_spill] sm:$0xff] %v6938_v56  ;;  %1581 = vmatpush.msra.mxu0 %v6938_v56  ;;  %1621 = vmatpush.msra.mxu2 %v6943_v62  ;;  %v1332_v46 = vadd.f32 %v1324_v35, %v1172_v32  ;;  %v6983_v32 = vld [vmem:[%s10174_s6 + $0x58] sm:$0xff] }
 0x230   :  { %10794 = vst [vmem:[#allocation104_spill] sm:$0xff] %v6943_v62  ;;  %v1165_v43 = vmul.f32 %v1159_v4, %v6074_v61  ;;  %v6965_v61 = vld [vmem:[%s10174_s6 + $0x70] sm:$0xff] }
 0x231   :  { %10795 = vst [vmem:[#allocation105_spill] sm:$0xff] %v6951_v29  ;;  %1582 = vmatpush.msra.mxu0 %v6951_v29  ;;  %1622 = vmatpush.msra.mxu2 %v6956_v52  ;;  %v1339_v35 = vmul.f32 0.5, %v1332_v46  ;;  %v7002_v46 = vld [vmem:[%s10174_s6 + $0x10] sm:$0xff]  ;;  %v1171_v29 = vld [vmem:[#allocation2 + $0x30] sm:$0x30] }
 0x232   :  { %10796 = vst [vmem:[#allocation106_spill] sm:$0xff] %v6956_v52  ;;  %v6958_v59 = vadd.f32 %v1166_v2, %v1165_v43  ;;  %v6990_v2 = vld [vmem:[%s10174_s6 + $0x30] sm:$0xff] }
 0x233   :  { %10798 = vst [vmem:[#allocation108_spill] sm:$0xff] %v6965_v61  ;;  %1583 = vmatpush.msra.mxu0 %v6965_v61  ;;  %1623 = vmatpush.msra.mxu2 %v6970_v0 }
 0x234   :  { %10797 = vst [vmem:[#allocation107_spill] sm:$0xff] %v6958_v59  ;;  %v4295_v4 = vpop.eup %4294  ;;  %4296 = vtanh.f32 %v6958_v59 }
 0x235   :  { %10799 = vst [vmem:[#allocation109_spill] sm:$0xff] %v6970_v0  ;;  %v1163_v43 = vmul.f32 0.5, %v4295_v4  ;;  %1584 = vmatpush.msra.mxu0 %v6978_v53  ;;  %1624 = vmatpush.msra.mxu2 %v6983_v32  ;;  %v6995_v4 = vld [vmem:[%s10174_s6 + $0x38] sm:$0xff]  ;;  %v1316_v0 = vpop.f32.mrf.mxu3  ;;  %4298 = vtanh.f32 %v1339_v35 }
 0x236   :  { %10800 = vst [vmem:[#allocation110_spill] sm:$0xff] %v6978_v53 }
 0x237   :  { %10801 = vst [vmem:[#allocation111_spill] sm:$0xff] %v6983_v32  ;;  %v1164_v59 = vadd.f32 0.5, %v1163_v43  ;;  %1585 = vmatpush.msra.mxu0 %v6990_v2  ;;  %1625 = vmatpush.msra.mxu2 %v6995_v4  ;;  %v7007_v32 = vld [vmem:[%s10174_s6 + $0x18] sm:$0xff] }
 0x238   :  { %10802 = vst [vmem:[#allocation112_spill] sm:$0xff] %v6990_v2 }
 0x239   :  { %10803 = vst [vmem:[#allocation113_spill] sm:$0xff] %v6995_v4  ;;  %v1256_v61 = vpop.f32.mrf.mxu0  ;;  %1586 = vmatpush.msra.mxu0 %v7002_v46  ;;  %1626 = vmatpush.msra.mxu2 %v7007_v32  ;;  %v1326_v4 = vrot.slane %v1316_v0, 4 }
 0x23a   :  { %v4297_v53 = vpop.eup %4296  ;;  %v1323_v52 = vrot.slane %v1256_v61, 4 }
 0x23b   :  { %v1169_v43 = vmul.f32 %v4297_v53, %v1164_v59  ;;  %v1334_v47 = vadd.f32 %v1326_v4, %v1174_v50  ;;  %v4299_v44 = vpop.eup %4298  ;;  %v1173_v59 = vld [vmem:[#allocation2 + $0x18] sm:$0x30] }
 0x23c   :  { %v1331_v2 = vadd.f32 %v1323_v52, %v1171_v29  ;;  %v1341_v0 = vmul.f32 0.5, %v4299_v44  ;;  %v10806_v44 = vld [vmem:[#allocation14_spill] sm:$0xff] }
 0x23d   :  { %1170 = vst [vmem:[#allocation3 + $0x2] sm:$0x3] %v1169_v43  ;;  %v1357_v62 = vrot.slane %v1169_v43, 4  ;;  %v1344_v29 = vmul.f32 0.5, %v1334_v47  ;;  %v10809_v47 = vld [vmem:[#allocation17_spill] sm:$0xff]  ;;  %v7044_v43 = vld [vmem:[%s10173_s5 + $0x1e0] sm:$0xff] }
 0x23e   :  { %v1335_v56 = vmul.f32 0.5, %v1331_v2  ;;  %v10813_v2 = vld [vmem:[#allocation31_spill] sm:$0xff] }
 0x23f   :  { %v1488_v26 = vrot.slane %v1357_v62, 4  ;;  %v1342_v62 = vadd.f32 0.5, %v1341_v0  ;;  %v7071_v0 = vld [vmem:[%s10173_s5 + $0x180] sm:$0xff] }
 0x240   :  { %4300 = vtanh.f32 %v1335_v56  ;;  %v1296_v22 = vpop.f32.mrf.mxu2  ;;  %v10812_v56 = vld [vmem:[#allocation20_spill] sm:$0xff] }
 0x241   :  { %v1325_v18 = vrot.slane %v1296_v22, 4  ;;  %1527 = vmatmul.f32.vlgmr.msra.gmra.mxu1 %v1488_v26  ;;  %1567 = vmatmul.f32.vlgmr.msra.gmra.mxu3 %v1488_v26 }
 0x242   :  { %1758 = vmatpush.msra.mxu1 %v6080_v7  ;;  %1798 = vmatpush.msra.mxu3 %v6085_v51  ;;  %v1349_v51 = vrot.slane %v6160_v6, 6  ;;  %v10807_v6 = vld [vmem:[#allocation15_spill] sm:$0xff] }
 0x243   :  { %v1333_v61 = vadd.f32 %v1325_v18, %v1173_v59  ;;  %v10814_v59 = vld [vmem:[#allocation33_spill] sm:$0xff] }
 0x244   :  { %1759 = vmatpush.msra.mxu1 %v6090_v8  ;;  %1799 = vmatpush.msra.mxu3 %v6095_v21  ;;  %v1351_v21 = vmul.f32 %v1349_v51, %v1342_v62  ;;  %v10828_v62 = vld [vmem:[#allocation51_spill] sm:$0xff]  ;;  %v7160_v51 = vld [vmem:[%s10173_s5 + $0x40] sm:$0xff] }
 0x245   :  { %4302 = vtanh.f32 %v1333_v61  ;;  %v10817_v61 = vld [vmem:[#allocation34_spill] sm:$0xff] }
 0x246   :  { %v4301_v50 = vpop.eup %4300  ;;  %1760 = vmatpush.msra.mxu1 %v6102_v31  ;;  %1800 = vmatpush.msra.mxu3 %v6107_v33  ;;  %4304 = vtanh.f32 %v1344_v29  ;;  %v10804_v33 = vld [vmem:[#allocation12_spill] sm:$0xff]  ;;  %v10826_v29 = vld [vmem:[#allocation39_spill] sm:$0xff] }
 0x247   :  { %v1337_v22 = vmul.f32 0.5, %v4301_v50  ;;  %v7151_v50 = vld [vmem:[%s10173_s5 + $0x60] sm:$0xff] }
 0x248   :  { %1761 = vmatpush.msra.mxu1 %v6114_v16  ;;  %1801 = vmatpush.msra.mxu3 %v6119_v55  ;;  %v10805_v55 = vld [vmem:[#allocation13_spill] sm:$0xff] }
 0x249   :  { %v1338_v7 = vadd.f32 0.5, %v1337_v22  ;;  %1607 = vmatmul.f32.vlgmr.msrb.gmra.mxu1 %v1488_v26  ;;  %1647 = vmatmul.f32.vlgmr.msrb.gmra.mxu3 %v1488_v26  ;;  %v10810_v26 = vld [vmem:[#allocation18_spill] sm:$0xff] }
 0x24a   :  { %1762 = vmatpush.msra.mxu1 %v6126_v42  ;;  %1802 = vmatpush.msra.mxu3 %v6131_v38  ;;  %v10808_v42 = vld [vmem:[#allocation16_spill] sm:$0xff]  ;;  %v10827_v22 = vld [vmem:[#allocation50_spill] sm:$0xff] }
 0x24b   :  { %v4303_v8 = vpop.eup %4302 }
 0x24c   :  { %v1352_v31 = vmul.f32 %v4303_v8, %v1338_v7  ;;  %1763 = vmatpush.msra.mxu1 %v6139_v5  ;;  %1803 = vmatpush.msra.mxu3 %v10804_v33  ;;  %v4305_v18 = vpop.eup %4304  ;;  %v10811_v5 = vld [vmem:[#allocation19_spill] sm:$0xff]  ;;  %v10829_v7 = vld [vmem:[#allocation40_spill] sm:$0xff]  ;;  %v7169_v33 = vld [vmem:[%s10173_s5 + $0x20] sm:$0xff] }
 0x24d   :  { %v1346_v38 = vmul.f32 0.5, %v4305_v18  ;;  %v10830_v8 = vld [vmem:[#allocation52_spill] sm:$0xff]  ;;  %v10833_v18 = vld [vmem:[#allocation54_spill] sm:$0xff] }
 0x24e   :  { %v7024_v16 = vadd.f32 %v1352_v31, %v1351_v21  ;;  %1764 = vmatpush.msra.mxu1 %v10805_v55  ;;  %1804 = vmatpush.msra.mxu3 %v10806_v44  ;;  %v10831_v21 = vld [vmem:[#allocation53_spill] sm:$0xff]  ;;  %v10834_v55 = vld [vmem:[#allocation55_spill] sm:$0xff]  ;;  %v10835_v44 = vld [vmem:[#allocation42_spill] sm:$0xff] }
 0x24f   :  { %v1347_v52 = vadd.f32 0.5, %v1346_v38  ;;  %v10832_v31 = vld [vmem:[#allocation41_spill] sm:$0xff]  ;;  %v10837_v38 = vld [vmem:[#allocation43_spill] sm:$0xff] }
 0x250   :  { %4306 = vtanh.f32 %v7024_v16  ;;  %1765 = vmatpush.msra.mxu1 %v10807_v6  ;;  %1805 = vmatpush.msra.mxu3 %v10808_v42  ;;  %v7178_v6 = vld [vmem:[%s10173_s5] sm:$0xff]  ;;  %v10836_v42 = vld [vmem:[#allocation56_spill] sm:$0xff] }
 0x252   :  { %1766 = vmatpush.msra.mxu1 %v10809_v47  ;;  %1806 = vmatpush.msra.mxu3 %v10810_v26  ;;  %v10838_v47 = vld [vmem:[#allocation57_spill] sm:$0xff]  ;;  %v10839_v26 = vld [vmem:[#allocation44_spill] sm:$0xff] }
 0x254   :  { %1767 = vmatpush.msra.mxu1 %v10811_v5  ;;  %1807 = vmatpush.msra.mxu3 %v10812_v56  ;;  %v10840_v5 = vld [vmem:[#allocation58_spill] sm:$0xff]  ;;  %v10841_v56 = vld [vmem:[#allocation61_spill] sm:$0xff] }
 0x256   :  { %v4307_v53 = vpop.eup %4306  ;;  %1768 = vmatpush.msra.mxu1 %v6202_v9  ;;  %1808 = vmatpush.msra.mxu3 %v6207_v27  ;;  %v7053_v27 = vld [vmem:[%s10173_s5 + $0x1c0] sm:$0xff]  ;;  %v10816_v9 = vld [vmem:[#allocation35_spill] sm:$0xff] }
 0x257   :  { %v1355_v35 = vmul.f32 %v4307_v53, %v1347_v52  ;;  %v10842_v52 = vld [vmem:[#allocation63_spill] sm:$0xff]  ;;  %v10844_v53 = vld [vmem:[#allocation64_spill] sm:$0xff] }
 0x258   :  { %1769 = vmatpush.msra.mxu1 %v6214_v58  ;;  %1809 = vmatpush.msra.mxu3 %v10813_v2  ;;  %v10815_v58 = vld [vmem:[#allocation32_spill] sm:$0xff]  ;;  %v10847_v2 = vld [vmem:[#allocation66_spill] sm:$0xff] }
 0x259   :  { %v7039_v4 = vrot.slane %v1355_v35, 4  ;;  %v10846_v35 = vld [vmem:[#allocation59_spill] sm:$0xff] }
 0x25a   :  { %1770 = vmatpush.msra.mxu1 %v10814_v59  ;;  %1810 = vmatpush.msra.mxu3 %v6240_v25  ;;  %v7062_v25 = vld [vmem:[%s10173_s5 + $0x1a0] sm:$0xff]  ;;  %v10848_v59 = vld [vmem:[#allocation60_spill] sm:$0xff] }
 0x25b   :  { %1507 = vmatmul.f32.vlgmr.msrb.gmra.mxu0 %v7039_v4  ;;  %1547 = vmatmul.f32.vlgmr.msrb.gmra.mxu2 %v7039_v4 }
 0x25c   :  { %1738 = vmatpush.msrb.mxu0 %v7044_v43  ;;  %1778 = vmatpush.msrb.mxu2 %v10815_v58  ;;  %v10849_v58 = vld [vmem:[#allocation67_spill] sm:$0xff] }
 0x25d   :  { %1771 = vmatpush.msra.mxu1 %v10816_v9  ;;  %1811 = vmatpush.msra.mxu3 %v6259_v3  ;;  %v7080_v3 = vld [vmem:[%s10173_s5 + $0x160] sm:$0xff]  ;;  %v10851_v9 = vld [vmem:[#allocation68_spill] sm:$0xff] }
 0x25e   :  { %1739 = vmatpush.msrb.mxu0 %v7053_v27  ;;  %1779 = vmatpush.msrb.mxu2 %v10817_v61  ;;  %v10852_v61 = vld [vmem:[#allocation70_spill] sm:$0xff] }
 0x25f   :  { %1772 = vmatpush.msra.mxu1 %v6273_v49  ;;  %1812 = vmatpush.msra.mxu3 %v6278_v10  ;;  %v10818_v49 = vld [vmem:[#allocation36_spill] sm:$0xff]  ;;  %v7089_v10 = vld [vmem:[%s10173_s5 + $0x140] sm:$0xff] }
 0x260   :  { %1740 = vmatpush.msrb.mxu0 %v7062_v25  ;;  %1780 = vmatpush.msrb.mxu2 %v6266_v24  ;;  %v7115_v24 = vld [vmem:[%s10173_s5 + $0xe0] sm:$0xff] }
 0x261   :  { %1773 = vmatpush.msra.mxu1 %v6292_v23  ;;  %1813 = vmatpush.msra.mxu3 %v6297_v57  ;;  %v7098_v23 = vld [vmem:[%s10173_s5 + $0x120] sm:$0xff] }
 0x262   :  { %1741 = vmatpush.msrb.mxu0 %v7071_v0  ;;  %1781 = vmatpush.msrb.mxu2 %v10818_v49  ;;  %v7106_v57 = vld [vmem:[%s10173_s5 + $0x100] sm:$0xff]  ;;  %v10853_v49 = vld [vmem:[#allocation71_spill] sm:$0xff] }
 0x263   :  { %1587 = vmatmul.f32.vlgmr.msra.gmra.mxu0 %v7039_v4  ;;  %1627 = vmatmul.f32.vlgmr.msra.gmra.mxu2 %v7039_v4 }
 0x264   :  { %1742 = vmatpush.msrb.mxu0 %v7080_v3  ;;  %1774 = vmatmul.f32.vlgmr.msra.gmra.mxu1 %v7039_v4 }
 0x265   :  { %1782 = vmatpush.msrb.mxu2 %v6308_v40  ;;  %1814 = vmatmul.f32.vlgmr.msra.gmra.mxu3 %v7039_v4  ;;  %v7124_v40 = vld [vmem:[%s10173_s5 + $0xc0] sm:$0xff] }
 0x266   :  { %1743 = vmatpush.msrb.mxu0 %v7089_v10  ;;  %2010 = vmatpush.msrb.mxu1 %v6398_v39  ;;  %v7133_v39 = vld [vmem:[%s10173_s5 + $0xa0] sm:$0xff] }
 0x267   :  { %1783 = vmatpush.msrb.mxu2 %v6317_v63  ;;  %2050 = vmatpush.msrb.mxu3 %v6403_v60  ;;  %v10820_v63 = vld [vmem:[#allocation37_spill] sm:$0xff]  ;;  %v10823_v60 = vld [vmem:[#allocation38_spill] sm:$0xff] }
 0x268   :  { %1744 = vmatpush.msrb.mxu0 %v7098_v23  ;;  %2011 = vmatpush.msrb.mxu1 %v6408_v48  ;;  %v10824_v48 = vld [vmem:[#allocation48_spill] sm:$0xff] }
 0x269   :  { %1784 = vmatpush.msrb.mxu2 %v6325_v36  ;;  %2051 = vmatpush.msrb.mxu3 %v6415_v12  ;;  %v10819_v36 = vld [vmem:[#allocation45_spill] sm:$0xff] }
 0x26a   :  { %1745 = vmatpush.msrb.mxu0 %v7106_v57  ;;  %2012 = vmatpush.msrb.mxu1 %v6422_v54  ;;  %v10821_v54 = vld [vmem:[#allocation46_spill] sm:$0xff]  ;;  %v10825_v12 = vld [vmem:[#allocation49_spill] sm:$0xff] }
 0x26b   :  { %1785 = vmatpush.msrb.mxu2 %v6332_v1  ;;  %2052 = vmatpush.msrb.mxu3 %v6427_v19  ;;  %v10822_v1 = vld [vmem:[#allocation47_spill] sm:$0xff]  ;;  %v7142_v19 = vld [vmem:[%s10173_s5 + $0x80] sm:$0xff] }
 0x26c   :  { %1746 = vmatpush.msrb.mxu0 %v7115_v24  ;;  %2013 = vmatpush.msrb.mxu1 %v10819_v36  ;;  %v10854_v36 = vld [vmem:[#allocation72_spill] sm:$0xff] }
 0x26d   :  { %1786 = vmatpush.msrb.mxu2 %v10820_v63  ;;  %2053 = vmatpush.msrb.mxu3 %v10821_v54  ;;  %v10856_v63 = vld [vmem:[#allocation74_spill] sm:$0xff]  ;;  %v10866_v54 = vld [vmem:[#allocation84_spill] sm:$0xff] }
 0x26e   :  { %1747 = vmatpush.msrb.mxu0 %v7124_v40  ;;  %2014 = vmatpush.msrb.mxu1 %v10822_v1  ;;  %v10867_v1 = vld [vmem:[#allocation85_spill] sm:$0xff] }
 0x26f   :  { %1787 = vmatpush.msrb.mxu2 %v10823_v60  ;;  %2054 = vmatpush.msrb.mxu3 %v10824_v48  ;;  %v10868_v60 = vld [vmem:[#allocation86_spill] sm:$0xff]  ;;  %v10869_v48 = vld [vmem:[#allocation87_spill] sm:$0xff] }
 0x270   :  { %1748 = vmatpush.msrb.mxu0 %v7133_v39  ;;  %2015 = vmatpush.msrb.mxu1 %v10825_v12  ;;  %v10870_v12 = vld [vmem:[#allocation88_spill] sm:$0xff] }
 0x271   :  { %1788 = vmatpush.msrb.mxu2 %v10826_v29  ;;  %2055 = vmatpush.msrb.mxu3 %v10827_v22  ;;  %v10871_v29 = vld [vmem:[#allocation89_spill] sm:$0xff]  ;;  %v10872_v22 = vld [vmem:[#allocation90_spill] sm:$0xff] }
 0x272   :  { %1749 = vmatpush.msrb.mxu0 %v7142_v19  ;;  %2016 = vmatpush.msrb.mxu1 %v10828_v62  ;;  %v10873_v62 = vld [vmem:[#allocation21_spill] sm:$0xff] }
 0x273   :  { %1789 = vmatpush.msrb.mxu2 %v10829_v7  ;;  %2056 = vmatpush.msrb.mxu3 %v10830_v8  ;;  %v10874_v7 = vld [vmem:[#allocation27_spill] sm:$0xff] }
 0x274   :  { %1750 = vmatpush.msrb.mxu0 %v7151_v50  ;;  %2017 = vmatpush.msrb.mxu1 %v10831_v21  ;;  %v10875_v8 = vld [vmem:[#allocation91_spill] sm:$0xff]  ;;  %v10876_v21 = vld [vmem:[#allocation92_spill] sm:$0xff] }
 0x275   :  { %1790 = vmatpush.msrb.mxu2 %v10832_v31  ;;  %2057 = vmatpush.msrb.mxu3 %v10833_v18  ;;  %v10877_v31 = vld [vmem:[#allocation93_spill] sm:$0xff]  ;;  %v10878_v18 = vld [vmem:[#allocation94_spill] sm:$0xff] }
 0x276   :  { %1751 = vmatpush.msrb.mxu0 %v7160_v51  ;;  %2018 = vmatpush.msrb.mxu1 %v10834_v55  ;;  %v10879_v55 = vld [vmem:[#allocation24_spill] sm:$0xff] }
 0x277   :  { %1791 = vmatpush.msrb.mxu2 %v10835_v44  ;;  %2058 = vmatpush.msrb.mxu3 %v10836_v42  ;;  %v10880_v44 = vld [vmem:[#allocation30_spill] sm:$0xff]  ;;  %v10881_v42 = vld [vmem:[#allocation25_spill] sm:$0xff] }
 0x278   :  { %1752 = vmatpush.msrb.mxu0 %v7169_v33  ;;  %2019 = vmatpush.msrb.mxu1 %v6504_v28  ;;  %v10843_v28 = vld [vmem:[#allocation62_spill] sm:$0xff] }
 0x279   :  { %1792 = vmatpush.msrb.mxu2 %v10837_v38  ;;  %2059 = vmatpush.msrb.mxu3 %v6509_v13  ;;  %v10845_v13 = vld [vmem:[#allocation65_spill] sm:$0xff]  ;;  %v10882_v38 = vld [vmem:[#allocation10_spill] sm:$0xff] }
 0x27a   :  { %1753 = vmatpush.msrb.mxu0 %v7178_v6  ;;  %2020 = vmatpush.msrb.mxu1 %v10838_v47  ;;  %v10883_v47 = vld [vmem:[#allocation95_spill] sm:$0xff] }
 0x27b   :  { %1793 = vmatpush.msrb.mxu2 %v10839_v26  ;;  %1754 = vmatmul.f32.vlgmr.msrb.gmra.mxu0 %v7039_v4  ;;  %v10884_v26 = vld [vmem:[#allocation96_spill] sm:$0xff] }
 0x27c   :  { %1794 = vmatmul.f32.vlgmr.msrb.gmra.mxu2 %v7039_v4  ;;  %2060 = vmatpush.msrb.mxu3 %v10840_v5  ;;  %v10850_v4 = vld [vmem:[#allocation69_spill] sm:$0xff] }
 0x27d   :  { %2021 = vmatpush.msrb.mxu1 %v10841_v56  ;;  %1990 = vmatpush.msra.mxu0 %v10842_v52  ;;  %v10885_v5 = vld [vmem:[#allocation97_spill] sm:$0xff]  ;;  %v10886_v56 = vld [vmem:[#allocation98_spill] sm:$0xff]  ;;  %v10887_v52 = vld [vmem:[#allocation99_spill] sm:$0xff] }
 0x27e   :  { %2061 = vmatpush.msrb.mxu3 %v10843_v28  ;;  %2030 = vmatpush.msra.mxu2 %v10844_v53  ;;  %v10888_v28 = vld [vmem:[#allocation100_spill] sm:$0xff]  ;;  %v10889_v53 = vld [vmem:[#allocation101_spill] sm:$0xff] }
 0x27f   :  { %2022 = vmatpush.msrb.mxu1 %v10845_v13  ;;  %1991 = vmatpush.msra.mxu0 %v10846_v35  ;;  %v10890_v13 = vld [vmem:[#allocation102_spill] sm:$0xff]  ;;  %v10891_v35 = vld [vmem:[#allocation103_spill] sm:$0xff] }
 0x280   :  { %2062 = vmatpush.msrb.mxu3 %v10847_v2  ;;  %2031 = vmatpush.msra.mxu2 %v10848_v59  ;;  %v10892_v2 = vld [vmem:[#allocation104_spill] sm:$0xff]  ;;  %v10893_v59 = vld [vmem:[#allocation105_spill] sm:$0xff] }
 0x281   :  { %2023 = vmatpush.msrb.mxu1 %v10849_v58  ;;  %1992 = vmatpush.msra.mxu0 %v10850_v4  ;;  %v10894_v58 = vld [vmem:[#allocation106_spill] sm:$0xff]  ;;  %v10895_v4 = vld [vmem:[#allocation108_spill] sm:$0xff] }
 0x282   :  { %2063 = vmatpush.msrb.mxu3 %v10851_v9  ;;  %2032 = vmatpush.msra.mxu2 %v10852_v61  ;;  %v10896_v9 = vld [vmem:[#allocation109_spill] sm:$0xff]  ;;  %v10897_v61 = vld [vmem:[#allocation110_spill] sm:$0xff] }
 0x283   :  { %2024 = vmatpush.msrb.mxu1 %v10853_v49  ;;  %1993 = vmatpush.msra.mxu0 %v6614_v11  ;;  %v10855_v11 = vld [vmem:[#allocation73_spill] sm:$0xff]  ;;  %v10898_v49 = vld [vmem:[#allocation111_spill] sm:$0xff] }
 0x284   :  { %2064 = vmatpush.msrb.mxu3 %v10854_v36  ;;  %2033 = vmatpush.msra.mxu2 %v6619_v14  ;;  %v10857_v14 = vld [vmem:[#allocation75_spill] sm:$0xff]  ;;  %v10899_v36 = vld [vmem:[#allocation112_spill] sm:$0xff] }
 0x285   :  { %1994 = vmatpush.msra.mxu0 %v6628_v17  ;;  %v10858_v17 = vld [vmem:[#allocation76_spill] sm:$0xff] }
 0x286   :  { %2034 = vmatpush.msra.mxu2 %v6633_v20  ;;  %v10859_v20 = vld [vmem:[#allocation77_spill] sm:$0xff] }
 0x287   :  { %1995 = vmatpush.msra.mxu0 %v6642_v34  ;;  %v10860_v34 = vld [vmem:[#allocation78_spill] sm:$0xff] }
 0x288   :  { %2035 = vmatpush.msra.mxu2 %v6647_v37  ;;  %v10861_v37 = vld [vmem:[#allocation79_spill] sm:$0xff] }
 0x289   :  { %1996 = vmatpush.msra.mxu0 %v6656_v30  ;;  %v10862_v30 = vld [vmem:[#allocation80_spill] sm:$0xff] }
 0x28a   :  { %2036 = vmatpush.msra.mxu2 %v6661_v45  ;;  %v10863_v45 = vld [vmem:[#allocation81_spill] sm:$0xff] }
 0x28b   :  { %1997 = vmatpush.msra.mxu0 %v6670_v15  ;;  %v10864_v15 = vld [vmem:[#allocation82_spill] sm:$0xff] }
 0x28c   :  { %2037 = vmatpush.msra.mxu2 %v6675_v41  ;;  %v10865_v41 = vld [vmem:[#allocation83_spill] sm:$0xff] }
 0x28d   :  { %1998 = vmatpush.msra.mxu0 %v10855_v11  ;;  %v10900_v11 = vld [vmem:[#allocation113_spill] sm:$0xff] }
 0x28e   :  { %2038 = vmatpush.msra.mxu2 %v10856_v63  ;;  %v7266_v63 = vld [vmem:[%s10174_s6 + $0x200] sm:$0xff] }
 0x28f   :  { %1999 = vmatpush.msra.mxu0 %v10857_v14  ;;  %v7271_v14 = vld [vmem:[%s10174_s6 + $0x208] sm:$0xff]  ;;  %2025 = vmatpush.msrb.mxu1 %v7266_v63 }
 0x290   :  { %2039 = vmatpush.msra.mxu2 %v10858_v17  ;;  %2065 = vmatpush.msrb.mxu3 %v7271_v14  ;;  %v7290_v17 = vld [vmem:[%s10174_s6 + $0x3d0] sm:$0xff] }
 0x291   :  { %2000 = vmatpush.msra.mxu0 %v10859_v20  ;;  %v7295_v20 = vld [vmem:[%s10174_s6 + $0x3d8] sm:$0xff] }
 0x292   :  { %2040 = vmatpush.msra.mxu2 %v10860_v34  ;;  %v7302_v34 = vld [vmem:[%s10174_s6 + $0x3b0] sm:$0xff] }
 0x293   :  { %2001 = vmatpush.msra.mxu0 %v10861_v37  ;;  %v7307_v37 = vld [vmem:[%s10174_s6 + $0x3b8] sm:$0xff] }
 0x294   :  { %2041 = vmatpush.msra.mxu2 %v10862_v30  ;;  %v7314_v30 = vld [vmem:[%s10174_s6 + $0x390] sm:$0xff] }
 0x295   :  { %2002 = vmatpush.msra.mxu0 %v10863_v45  ;;  %v7319_v45 = vld [vmem:[%s10174_s6 + $0x398] sm:$0xff] }
 0x296   :  { %2042 = vmatpush.msra.mxu2 %v10864_v15  ;;  %v7326_v15 = vld [vmem:[%s10174_s6 + $0x370] sm:$0xff] }
 0x297   :  { %2003 = vmatpush.msra.mxu0 %v10865_v41  ;;  %v7331_v41 = vld [vmem:[%s10174_s6 + $0x378] sm:$0xff] }
 0x298   :  { %2043 = vmatpush.msra.mxu2 %v10866_v54  ;;  %v7338_v54 = vld [vmem:[%s10174_s6 + $0x350] sm:$0xff] }
 0x299   :  { %2004 = vmatpush.msra.mxu0 %v10867_v1  ;;  %v7343_v1 = vld [vmem:[%s10174_s6 + $0x358] sm:$0xff] }
 0x29a   :  { %2044 = vmatpush.msra.mxu2 %v10868_v60  ;;  %v7350_v60 = vld [vmem:[%s10174_s6 + $0x330] sm:$0xff] }
 0x29b   :  { %2005 = vmatpush.msra.mxu0 %v10869_v48  ;;  %v7355_v48 = vld [vmem:[%s10174_s6 + $0x338] sm:$0xff] }
 0x29c   :  { %2045 = vmatpush.msra.mxu2 %v10870_v12  ;;  %v7362_v12 = vld [vmem:[%s10174_s6 + $0x310] sm:$0xff] }
 0x29d   :  { %2070 = vmatpush.msrb.mxu0 %v10871_v29  ;;  %v7367_v29 = vld [vmem:[%s10174_s6 + $0x318] sm:$0xff] }
 0x29e   :  { %2110 = vmatpush.msrb.mxu2 %v10872_v22  ;;  %v7374_v22 = vld [vmem:[%s10174_s6 + $0x2f0] sm:$0xff] }
 0x29f   :  { %2071 = vmatpush.msrb.mxu0 %v10873_v62  ;;  %v7379_v62 = vld [vmem:[%s10174_s6 + $0x2f8] sm:$0xff] }
 0x2a0   :  { %2111 = vmatpush.msrb.mxu2 %v10874_v7  ;;  %v7386_v7 = vld [vmem:[%s10174_s6 + $0x2d0] sm:$0xff] }
 0x2a1   :  { %2072 = vmatpush.msrb.mxu0 %v10875_v8  ;;  %v7391_v8 = vld [vmem:[%s10174_s6 + $0x2d8] sm:$0xff] }
 0x2a2   :  { %2112 = vmatpush.msrb.mxu2 %v10876_v21  ;;  %v7398_v21 = vld [vmem:[%s10174_s6 + $0x2b0] sm:$0xff] }
 0x2a3   :  { %2073 = vmatpush.msrb.mxu0 %v10877_v31  ;;  %v7403_v31 = vld [vmem:[%s10174_s6 + $0x2b8] sm:$0xff] }
 0x2a4   :  { %2113 = vmatpush.msrb.mxu2 %v10878_v18 }
 0x2a5   :  { %2074 = vmatpush.msrb.mxu0 %v10879_v55 }
 0x2a6   :  { %2114 = vmatpush.msrb.mxu2 %v10880_v44  ;;  %v10901_v44 = vld [vmem:[#allocation26_spill] sm:$0xff] }
 0x2a7   :  { %2075 = vmatpush.msrb.mxu0 %v10881_v42 }
 0x2a8   :  { %2115 = vmatpush.msrb.mxu2 %v10882_v38  ;;  %v7411_v38 = vld [vmem:[%s10174_s6 + $0x290] sm:$0xff] }
 0x2a9   :  { %2076 = vmatpush.msrb.mxu0 %v10883_v47  ;;  %v7416_v47 = vld [vmem:[%s10174_s6 + $0x298] sm:$0xff] }
 0x2aa   :  { %2116 = vmatpush.msrb.mxu2 %v10884_v26  ;;  %10902 = vst [vmem:[#allocation12_spill] sm:$0xff] %v7416_v47 }
 0x2ab   :  { %2077 = vmatpush.msrb.mxu0 %v10885_v5  ;;  %v7423_v5 = vld [vmem:[%s10174_s6 + $0x270] sm:$0xff] }
 0x2ac   :  { %2117 = vmatpush.msrb.mxu2 %v10886_v56  ;;  %10903 = vst [vmem:[#allocation13_spill] sm:$0xff] %v7423_v5  ;;  %v7428_v56 = vld [vmem:[%s10174_s6 + $0x278] sm:$0xff] }
 0x2ad   :  { %2078 = vmatpush.msrb.mxu0 %v10887_v52  ;;  %10904 = vst [vmem:[#allocation14_spill] sm:$0xff] %v7428_v56 }
 0x2ae   :  { %2118 = vmatpush.msrb.mxu2 %v10888_v28 }
 0x2af   :  { %2079 = vmatpush.msrb.mxu0 %v10889_v53 }
 0x2b0   :  { %2119 = vmatpush.msrb.mxu2 %v10890_v13  ;;  %v10905_v13 = vld [vmem:[#allocation28_spill] sm:$0xff] }
 0x2b1   :  { %2080 = vmatpush.msrb.mxu0 %v10891_v35  ;;  %v10906_v35 = vld [vmem:[#allocation23_spill] sm:$0xff] }
 0x2b2   :  { %2120 = vmatpush.msrb.mxu2 %v10892_v2  ;;  %v10907_v2 = vld [vmem:[#allocation22_spill] sm:$0xff] }
 0x2b3   :  { %2081 = vmatpush.msrb.mxu0 %v10893_v59 }
 0x2b4   :  { %2121 = vmatpush.msrb.mxu2 %v10894_v58  ;;  %v7438_v58 = vld [vmem:[%s10174_s6 + $0x230] sm:$0xff] }
 0x2b5   :  { %2082 = vmatpush.msrb.mxu0 %v10895_v4  ;;  %10908 = vst [vmem:[#allocation15_spill] sm:$0xff] %v7438_v58  ;;  %v7443_v4 = vld [vmem:[%s10174_s6 + $0x238] sm:$0xff] }
 0x2b6   :  { %2122 = vmatpush.msrb.mxu2 %v10896_v9  ;;  %10909 = vst [vmem:[#allocation16_spill] sm:$0xff] %v7443_v4 }
 0x2b7   :  { %2083 = vmatpush.msrb.mxu0 %v10897_v61 }
 0x2b8   :  { %2123 = vmatpush.msrb.mxu2 %v10898_v49  ;;  %v10910_v49 = vld [vmem:[#allocation29_spill] sm:$0xff] }
 0x2b9   :  { %2084 = vmatpush.msrb.mxu0 %v10899_v36 }
 0x2ba   :  { %2124 = vmatpush.msrb.mxu2 %v10900_v11  ;;  %v7451_v11 = vld [vmem:[%s10174_s6 + $0x210] sm:$0xff] }
 0x2bb   :  { %2085 = vmatpush.msrb.mxu0 %v7002_v46  ;;  %v7278_v46 = vld [vmem:[%s10174_s6 + $0x3f0] sm:$0xff]  ;;  %10911 = vst [vmem:[#allocation17_spill] sm:$0xff] %v7451_v11 }
 0x2bc   :  { %2125 = vmatpush.msrb.mxu2 %v7007_v32  ;;  %v7283_v32 = vld [vmem:[%s10174_s6 + $0x3f8] sm:$0xff]  ;;  %2090 = vmatpush.msra.mxu1 %v7278_v46 }
 0x2bd   :  { %2130 = vmatpush.msra.mxu3 %v7283_v32 }
 0x2be   :  { %2091 = vmatpush.msra.mxu1 %v7290_v17  ;;  %v1528_v18 = vpop.f32.mrf.mxu1 }
 0x2bf   :  { %2131 = vmatpush.msra.mxu3 %v7295_v20 }
 0x2c0   :  { %2092 = vmatpush.msra.mxu1 %v7302_v34 }
 0x2c1   :  { %2132 = vmatpush.msra.mxu3 %v7307_v37 }
 0x2c2   :  { %2093 = vmatpush.msra.mxu1 %v7314_v30 }
 0x2c3   :  { %2133 = vmatpush.msra.mxu3 %v7319_v45 }
 0x2c4   :  { %2094 = vmatpush.msra.mxu1 %v7326_v15  ;;  %v1568_v28 = vpop.f32.mrf.mxu3 }
 0x2c5   :  { %2134 = vmatpush.msra.mxu3 %v7331_v41 }
 0x2c6   :  { %2095 = vmatpush.msra.mxu1 %v7338_v54 }
 0x2c7   :  { %2135 = vmatpush.msra.mxu3 %v7343_v1 }
 0x2c8   :  { %2096 = vmatpush.msra.mxu1 %v7350_v60 }
 0x2c9   :  { %2136 = vmatpush.msra.mxu3 %v7355_v48 }
 0x2ca   :  { %2097 = vmatpush.msra.mxu1 %v7362_v12 }
 0x2cb   :  { %2137 = vmatpush.msra.mxu3 %v7367_v29 }
 0x2cc   :  { %2098 = vmatpush.msra.mxu1 %v7374_v22 }
 0x2cd   :  { %2138 = vmatpush.msra.mxu3 %v7379_v62 }
 0x2ce   :  { %2099 = vmatpush.msra.mxu1 %v7386_v7 }
 0x2cf   :  { %2139 = vmatpush.msra.mxu3 %v7391_v8 }
 0x2d0   :  { %2100 = vmatpush.msra.mxu1 %v7398_v21 }
 0x2d1   :  { %2140 = vmatpush.msra.mxu3 %v7403_v31 }
 0x2d2   :  { %2101 = vmatpush.msra.mxu1 %v7411_v38 }
 0x2d3   :  { %2141 = vmatpush.msra.mxu3 %v7416_v47 }
 0x2d4   :  { %2102 = vmatpush.msra.mxu1 %v7423_v5 }
 0x2d5   :  { %2142 = vmatpush.msra.mxu3 %v7428_v56 }
 0x2d6   :  { %2103 = vmatpush.msra.mxu1 %v10905_v13 }
 0x2d7   :  { %2143 = vmatpush.msra.mxu3 %v10906_v35  ;;  %v1648_v35 = vpop.f32.mrf.mxu3 }
 0x2d8   :  { %v1508_v55 = vpop.f32.mrf.mxu0  ;;  %2104 = vmatpush.msra.mxu1 %v7438_v58 }
 0x2d9   :  { %v1509_v42 = vadd.f32 %v1508_v55, %v10901_v44  ;;  %2144 = vmatpush.msra.mxu3 %v7443_v4  ;;  %v1608_v55 = vpop.f32.mrf.mxu1 }
 0x2da   :  { %2105 = vmatpush.msra.mxu1 %v7451_v11 }
 0x2db   :  { %v1529_v26 = vadd.f32 %v1528_v18, %v1509_v42  ;;  %v7456_v18 = vld [vmem:[%s10174_s6 + $0x218] sm:$0xff] }
 0x2dc   :  { %10912 = vst [vmem:[#allocation18_spill] sm:$0xff] %v7456_v18  ;;  %2145 = vmatpush.msra.mxu3 %v7456_v18 }
 0x2dd   :  { %v1651_v52 = vmul.f32 0.5, %v1529_v26 }
 0x2de   :  { %v1548_v53 = vpop.f32.mrf.mxu2 }
 0x2df   :  { %v1549_v59 = vadd.f32 %v1548_v53, %v10907_v2  ;;  %4308 = vtanh.f32 %v1651_v52  ;;  %v10913_v53 = vld [vmem:[#allocation11_spill] sm:$0xff] }
 0x2e0   :  { %v1588_v9 = vpop.f32.mrf.mxu0 }
 0x2e1   :  { %v1569_v61 = vadd.f32 %v1568_v28, %v1549_v59  ;;  %v1589_v36 = vadd.f32 %v1588_v9, %v10910_v49  ;;  %v1775_v4 = vpop.f32.mrf.mxu1 }
 0x2e2   :  { %v1823_v18 = vrot.slane %v1775_v4, 2 }
 0x2e3   :  { %v1655_v42 = vmul.f32 0.5, %v1569_v61  ;;  %v1609_v26 = vadd.f32 %v1608_v55, %v1589_v36  ;;  %v10914_v61 = vld [vmem:[#allocation107_spill] sm:$0xff] }
 0x2e5   :  { %4310 = vtanh.f32 %v1655_v42  ;;  %v4309_v28 = vpop.eup %4308  ;;  %v1671_v42 = vld [vmem:[#allocation2] sm:$0xc0] }
 0x2e6   :  { %v1628_v52 = vpop.f32.mrf.mxu2  ;;  %4312 = vtanh.f32 %v1609_v26  ;;  %v1653_v9 = vmul.f32 0.5, %v4309_v28  ;;  %v1831_v26 = vadd.f32 %v1823_v18, %v1671_v42  ;;  %v7468_v42 = vld [vmem:[%s10173_s5 + $0x1e8] sm:$0xff] }
 0x2e7   :  { %v1629_v13 = vadd.f32 %v1628_v52, %v10913_v53 }
 0x2e8   :  { %v1654_v11 = vadd.f32 0.5, %v1653_v9 }
 0x2e9   :  { %v1649_v59 = vadd.f32 %v1648_v35, %v1629_v13  ;;  %v1838_v13 = vmul.f32 0.5, %v1831_v26  ;;  %v1815_v35 = vpop.f32.mrf.mxu3  ;;  %v7473_v26 = vld [vmem:[%s10173_s5 + $0x1f8] sm:$0xff] }
 0x2ea   :  { %v1825_v9 = vrot.slane %v1815_v35, 2  ;;  %v7483_v35 = vld [vmem:[%s10173_s5 + $0x1d8] sm:$0xff] }
 0x2eb   :  { %v4311_v49 = vpop.eup %4310  ;;  %v1660_v58 = vmul.f32 0.5, %v1649_v59 }
 0x2ec   :  { %v1657_v2 = vmul.f32 0.5, %v4311_v49  ;;  %v4313_v56 = vpop.eup %4312 }
 0x2ed   :  { %4314 = vtanh.f32 %v1660_v58  ;;  %v1665_v55 = vmul.f32 %v4313_v56, %v1654_v11 }
 0x2ee   :  { %v1658_v5 = vadd.f32 0.5, %v1657_v2  ;;  %v1670_v2 = vld [vmem:[#allocation2 + $0x30] sm:$0xc0] }
 0x2f0   :  { %v1664_v36 = vmul.f32 %v1658_v5, %v10914_v61  ;;  %v1673_v61 = vld [vmem:[#allocation2 + $0x10] sm:$0xc0] }
 0x2f1   :  { %v1833_v18 = vadd.f32 %v1825_v9, %v1673_v61 }
 0x2f2   :  { %v7462_v47 = vadd.f32 %v1665_v55, %v1664_v36 }
 0x2f3   :  { %v4315_v52 = vpop.eup %4314 }
 0x2f4   :  { %4316 = vtanh.f32 %v7462_v47  ;;  %v1662_v28 = vmul.f32 0.5, %v4315_v52 }
 0x2f5   :  { %4318 = vtanh.f32 %v1838_v13  ;;  %v7478_v13 = vld [vmem:[%s10173_s5 + $0x1c8] sm:$0xff] }
 0x2f6   :  { %v1663_v49 = vadd.f32 0.5, %v1662_v28  ;;  %v1672_v28 = vld [vmem:[#allocation2 + $0x18] sm:$0xc0] }
 0x2f8   :  { %v1755_v59 = vpop.f32.mrf.mxu0 }
 0x2f9   :  { %v1822_v53 = vrot.slane %v1755_v59, 2 }
 0x2fa   :  { %v4317_v58 = vpop.eup %4316 }
 0x2fb   :  { %v1668_v4 = vmul.f32 %v4317_v58, %v1663_v49  ;;  %v1830_v5 = vadd.f32 %v1822_v53, %v1670_v2  ;;  %v4319_v52 = vpop.eup %4318  ;;  %v1843_v58 = vmul.f32 0.5, %v1833_v18  ;;  %v7490_v2 = vld [vmem:[%s10173_s5 + $0x1a8] sm:$0xff] }
 0x2fc   :  { %v1840_v49 = vmul.f32 0.5, %v4319_v52  ;;  %v7514_v18 = vld [vmem:[%s10173_s5 + $0x168] sm:$0xff] }
 0x2fd   :  { %1669 = vst [vmem:[#allocation3 + $0x4] sm:$0x3] %v1668_v4  ;;  %v1834_v56 = vmul.f32 0.5, %v1830_v5  ;;  %v1856_v11 = vrot.slane %v1668_v4, 2  ;;  %v7495_v4 = vld [vmem:[%s10173_s5 + $0x1b8] sm:$0xff]  ;;  %v7502_v5 = vld [vmem:[%s10173_s5 + $0x188] sm:$0xff] }
 0x2fe   :  { %v1841_v61 = vadd.f32 0.5, %v1840_v49  ;;  %10915 = vst [vmem:[#allocation19_spill] sm:$0xff] %v7514_v18 }
 0x2ff   :  { %4320 = vtanh.f32 %v1834_v56  ;;  %v1795_v36 = vpop.f32.mrf.mxu2  ;;  %v1987_v55 = vrot.slane %v1856_v11, 6  ;;  %v7507_v56 = vld [vmem:[%s10173_s5 + $0x198] sm:$0xff] }
 0x300   :  { %v1824_v53 = vrot.slane %v1795_v36, 2  ;;  %v7519_v36 = vld [vmem:[%s10173_s5 + $0x178] sm:$0xff] }
 0x301   :  { %2026 = vmatmul.f32.vlgmr.msrb.gmra.mxu1 %v1987_v55  ;;  %2066 = vmatmul.f32.vlgmr.msrb.gmra.mxu3 %v1987_v55 }
 0x302   :  { %v1832_v59 = vadd.f32 %v1824_v53, %v1672_v28  ;;  %2257 = vmatpush.msrb.mxu1 %v7468_v42  ;;  %2297 = vmatpush.msrb.mxu3 %v7473_v26  ;;  %v1848_v53 = vrot.slane %v7024_v16, 6  ;;  %v7527_v28 = vld [vmem:[%s10173_s5 + $0x148] sm:$0xff] }
 0x303   :  { %v7539_v16 = vld [vmem:[%s10173_s5 + $0x128] sm:$0xff] }
 0x304   :  { %4322 = vtanh.f32 %v1832_v59  ;;  %2258 = vmatpush.msrb.mxu1 %v7478_v13  ;;  %2298 = vmatpush.msrb.mxu3 %v7483_v35  ;;  %v7532_v59 = vld [vmem:[%s10173_s5 + $0x158] sm:$0xff]  ;;  %10917 = vst [vmem:[#allocation31_spill] sm:$0xff] %v7539_v16 }
 0x305   :  { %v4321_v9 = vpop.eup %4320  ;;  %4324 = vtanh.f32 %v1843_v58  ;;  %10916 = vst [vmem:[#allocation20_spill] sm:$0xff] %v7532_v59  ;;  %v1850_v58 = vmul.f32 %v1848_v53, %v1841_v61  ;;  %v7553_v61 = vld [vmem:[%s10173_s5 + $0x108] sm:$0xff] }
 0x306   :  { %v1836_v11 = vmul.f32 0.5, %v4321_v9  ;;  %2259 = vmatpush.msrb.mxu1 %v7490_v2  ;;  %2299 = vmatpush.msrb.mxu3 %v7495_v4  ;;  %10919 = vst [vmem:[#allocation32_spill] sm:$0xff] %v7553_v61  ;;  %v7566_v53 = vld [vmem:[%s10173_s5 + $0xe8] sm:$0xff] }
 0x307   :  { %10921 = vst [vmem:[#allocation34_spill] sm:$0xff] %v7566_v53 }
 0x308   :  { %v1837_v52 = vadd.f32 0.5, %v1836_v11  ;;  %2260 = vmatpush.msrb.mxu1 %v7502_v5  ;;  %2300 = vmatpush.msrb.mxu3 %v7507_v56 }
 0x309   :  { %2106 = vmatmul.f32.vlgmr.msra.gmra.mxu1 %v1987_v55  ;;  %2146 = vmatmul.f32.vlgmr.msra.gmra.mxu3 %v1987_v55  ;;  %v7544_v55 = vld [vmem:[%s10173_s5 + $0x138] sm:$0xff] }
 0x30a   :  { %v4323_v49 = vpop.eup %4322  ;;  %2261 = vmatpush.msrb.mxu1 %v7514_v18  ;;  %2301 = vmatpush.msrb.mxu3 %v7519_v36  ;;  %10918 = vst [vmem:[#allocation33_spill] sm:$0xff] %v7544_v55 }
 0x30b   :  { %v1851_v9 = vmul.f32 %v4323_v49, %v1837_v52  ;;  %v4325_v11 = vpop.eup %4324  ;;  %v7558_v52 = vld [vmem:[%s10173_s5 + $0x118] sm:$0xff] }
 0x30c   :  { %2262 = vmatpush.msrb.mxu1 %v7527_v28  ;;  %2302 = vmatpush.msrb.mxu3 %v7532_v59  ;;  %10920 = vst [vmem:[#allocation35_spill] sm:$0xff] %v7558_v52  ;;  %v7571_v49 = vld [vmem:[%s10173_s5 + $0xf8] sm:$0xff] }
 0x30d   :  { %v7548_v18 = vadd.f32 %v1851_v9, %v1850_v58  ;;  %10922 = vst [vmem:[#allocation36_spill] sm:$0xff] %v7571_v49  ;;  %v1845_v58 = vmul.f32 0.5, %v4325_v11  ;;  %v7578_v9 = vld [vmem:[%s10173_s5 + $0xc8] sm:$0xff] }
 0x30e   :  { %2263 = vmatpush.msrb.mxu1 %v7539_v16  ;;  %2303 = vmatpush.msrb.mxu3 %v7544_v55  ;;  %10923 = vst [vmem:[#allocation45_spill] sm:$0xff] %v7578_v9  ;;  %v7583_v55 = vld [vmem:[%s10173_s5 + $0xd8] sm:$0xff]  ;;  %v7590_v11 = vld [vmem:[%s10173_s5 + $0xa8] sm:$0xff] }
 0x30f   :  { %4326 = vtanh.f32 %v7548_v18  ;;  %10924 = vst [vmem:[#allocation37_spill] sm:$0xff] %v7583_v55 }
 0x310   :  { %2264 = vmatpush.msrb.mxu1 %v7553_v61  ;;  %2304 = vmatpush.msrb.mxu3 %v7558_v52  ;;  %v7595_v52 = vld [vmem:[%s10173_s5 + $0xb8] sm:$0xff]  ;;  %v1846_v61 = vadd.f32 0.5, %v1845_v58 }
 0x312   :  { %2265 = vmatpush.msrb.mxu1 %v7566_v53  ;;  %2305 = vmatpush.msrb.mxu3 %v7571_v49  ;;  %v7602_v49 = vld [vmem:[%s10173_s5 + $0x88] sm:$0xff]  ;;  %v7607_v53 = vld [vmem:[%s10173_s5 + $0x98] sm:$0xff] }
 0x313   :  { %10925 = vst [vmem:[#allocation46_spill] sm:$0xff] %v7607_v53 }
 0x314   :  { %2266 = vmatpush.msrb.mxu1 %v7578_v9  ;;  %2306 = vmatpush.msrb.mxu3 %v7583_v55  ;;  %v7618_v55 = vld [vmem:[%s10173_s5 + $0x1f0] sm:$0xff]  ;;  %v7623_v9 = vld [vmem:[%s10173_s5 + $0x68] sm:$0xff] }
 0x315   :  { %v4327_v16 = vpop.eup %4326  ;;  %10926 = vst [vmem:[#allocation47_spill] sm:$0xff] %v7618_v55 }
 0x316   :  { %v1854_v59 = vmul.f32 %v4327_v16, %v1846_v61  ;;  %2267 = vmatpush.msrb.mxu1 %v7590_v11  ;;  %2307 = vmatpush.msrb.mxu3 %v7595_v52  ;;  %10927 = vst [vmem:[#allocation38_spill] sm:$0xff] %v7623_v9  ;;  %v7628_v16 = vld [vmem:[%s10173_s5 + $0x78] sm:$0xff]  ;;  %v7642_v61 = vld [vmem:[%s10173_s5 + $0x48] sm:$0xff] }
 0x317   :  { %10929 = vst [vmem:[#allocation49_spill] sm:$0xff] %v7642_v61 }
 0x318   :  { %v7611_v58 = vrot.slane %v1854_v59, 6  ;;  %2268 = vmatpush.msrb.mxu1 %v7602_v49  ;;  %2308 = vmatpush.msrb.mxu3 %v7607_v53  ;;  %v7635_v59 = vld [vmem:[%s10173_s5 + $0x1d0] sm:$0xff]  ;;  %v7647_v53 = vld [vmem:[%s10173_s5 + $0x58] sm:$0xff] }
 0x319   :  { %10928 = vst [vmem:[#allocation48_spill] sm:$0xff] %v7635_v59 }
 0x31a   :  { %2006 = vmatmul.f32.vlgmr.msra.gmra.mxu0 %v7611_v58  ;;  %2046 = vmatmul.f32.vlgmr.msra.gmra.mxu2 %v7611_v58 }
 0x31b   :  { %2237 = vmatpush.msra.mxu0 %v7044_v43  ;;  %2277 = vmatpush.msra.mxu2 %v7618_v55  ;;  %v7654_v43 = vld [vmem:[%s10173_s5 + $0x1b0] sm:$0xff]  ;;  %v7661_v55 = vld [vmem:[%s10173_s5 + $0x28] sm:$0xff] }
 0x31c   :  { %2269 = vmatpush.msrb.mxu1 %v7623_v9  ;;  %2309 = vmatpush.msrb.mxu3 %v7628_v16  ;;  %10930 = vst [vmem:[#allocation39_spill] sm:$0xff] %v7654_v43  ;;  %v7666_v9 = vld [vmem:[%s10173_s5 + $0x38] sm:$0xff] }
 0x31d   :  { %2238 = vmatpush.msra.mxu0 %v7053_v27  ;;  %2278 = vmatpush.msra.mxu2 %v7635_v59  ;;  %v7673_v27 = vld [vmem:[%s10173_s5 + $0x190] sm:$0xff]  ;;  %v7680_v59 = vld [vmem:[%s10173_s5 + $0x8] sm:$0xff] }
 0x31e   :  { %2270 = vmatpush.msrb.mxu1 %v7642_v61  ;;  %2310 = vmatpush.msrb.mxu3 %v7647_v53  ;;  %10931 = vst [vmem:[#allocation50_spill] sm:$0xff] %v7673_v27  ;;  %v7685_v61 = vld [vmem:[%s10173_s5 + $0x18] sm:$0xff] }
 0x31f   :  { %2239 = vmatpush.msra.mxu0 %v7062_v25  ;;  %2279 = vmatpush.msra.mxu2 %v7654_v43  ;;  %v7696_v25 = vld [vmem:[%s10173_s5 + $0x170] sm:$0xff]  ;;  %v7703_v43 = vld [vmem:[%s10174_s6 + $0x3e0] sm:$0xff] }
 0x320   :  { %2271 = vmatpush.msrb.mxu1 %v7661_v55  ;;  %2311 = vmatpush.msrb.mxu3 %v7666_v9  ;;  %10932 = vst [vmem:[#allocation51_spill] sm:$0xff] %v7696_v25 }
 0x321   :  { %2240 = vmatpush.msra.mxu0 %v7071_v0  ;;  %2280 = vmatpush.msra.mxu2 %v7673_v27  ;;  %v7710_v0 = vld [vmem:[%s10173_s5 + $0x150] sm:$0xff]  ;;  %v7715_v27 = vld [vmem:[%s10174_s6 + $0x3e8] sm:$0xff] }
 0x322   :  { %2272 = vmatpush.msrb.mxu1 %v7680_v59  ;;  %2312 = vmatpush.msrb.mxu3 %v7685_v61 }
 0x323   :  { %2086 = vmatmul.f32.vlgmr.msrb.gmra.mxu0 %v7611_v58  ;;  %2126 = vmatmul.f32.vlgmr.msrb.gmra.mxu2 %v7611_v58 }
 0x324   :  { %2241 = vmatpush.msra.mxu0 %v7080_v3  ;;  %2273 = vmatmul.f32.vlgmr.msrb.gmra.mxu1 %v7611_v58  ;;  %v7723_v3 = vld [vmem:[%s10173_s5 + $0x130] sm:$0xff] }
 0x325   :  { %2281 = vmatpush.msra.mxu2 %v7696_v25  ;;  %2313 = vmatmul.f32.vlgmr.msrb.gmra.mxu3 %v7611_v58  ;;  %v7732_v25 = vld [vmem:[%s10173_s5 + $0x110] sm:$0xff] }
 0x326   :  { %2242 = vmatpush.msra.mxu0 %v7089_v10  ;;  %2490 = vmatpush.msra.mxu1 %v7703_v43  ;;  %v7739_v10 = vld [vmem:[%s10173_s5 + $0xf0] sm:$0xff] }
 0x327   :  { %2282 = vmatpush.msra.mxu2 %v7710_v0  ;;  %2530 = vmatpush.msra.mxu3 %v7715_v27  ;;  %10933 = vst [vmem:[#allocation40_spill] sm:$0xff] %v7739_v10 }
 0x328   :  { %2243 = vmatpush.msra.mxu0 %v7098_v23  ;;  %v7746_v23 = vld [vmem:[%s10173_s5 + $0xd0] sm:$0xff] }
 0x329   :  { %2283 = vmatpush.msra.mxu2 %v7723_v3  ;;  %10934 = vst [vmem:[#allocation52_spill] sm:$0xff] %v7746_v23 }
 0x32a   :  { %2244 = vmatpush.msra.mxu0 %v7106_v57  ;;  %v7753_v57 = vld [vmem:[%s10173_s5 + $0xb0] sm:$0xff] }
 0x32b   :  { %2284 = vmatpush.msra.mxu2 %v7732_v25  ;;  %10935 = vst [vmem:[#allocation53_spill] sm:$0xff] %v7753_v57 }
 0x32c   :  { %2245 = vmatpush.msra.mxu0 %v7115_v24  ;;  %v7760_v24 = vld [vmem:[%s10173_s5 + $0x90] sm:$0xff] }
 0x32d   :  { %2285 = vmatpush.msra.mxu2 %v7739_v10  ;;  %10936 = vst [vmem:[#allocation41_spill] sm:$0xff] %v7760_v24  ;;  %v7926_v10 = vld [vmem:[%s10174_s6 + $0x280] sm:$0xff] }
 0x32e   :  { %2246 = vmatpush.msra.mxu0 %v7124_v40  ;;  %v7767_v40 = vld [vmem:[%s10173_s5 + $0x70] sm:$0xff] }
 0x32f   :  { %2286 = vmatpush.msra.mxu2 %v7746_v23  ;;  %10937 = vst [vmem:[#allocation54_spill] sm:$0xff] %v7767_v40  ;;  %v7856_v23 = vld [vmem:[%s10174_s6 + $0x320] sm:$0xff] }
 0x330   :  { %2247 = vmatpush.msra.mxu0 %v7133_v39  ;;  %v7774_v39 = vld [vmem:[%s10173_s5 + $0x50] sm:$0xff]  ;;  %10947 = vst [vmem:[#allocation62_spill] sm:$0xff] %v7856_v23 }
 0x331   :  { %2287 = vmatpush.msra.mxu2 %v7753_v57  ;;  %10938 = vst [vmem:[#allocation55_spill] sm:$0xff] %v7774_v39  ;;  %v7851_v57 = vld [vmem:[%s10174_s6 + $0x348] sm:$0xff] }
 0x332   :  { %2248 = vmatpush.msra.mxu0 %v7142_v19  ;;  %v7781_v19 = vld [vmem:[%s10173_s5 + $0x30] sm:$0xff]  ;;  %10946 = vst [vmem:[#allocation63_spill] sm:$0xff] %v7851_v57 }
 0x333   :  { %2288 = vmatpush.msra.mxu2 %v7760_v24  ;;  %10939 = vst [vmem:[#allocation42_spill] sm:$0xff] %v7781_v19  ;;  %v7846_v24 = vld [vmem:[%s10174_s6 + $0x340] sm:$0xff] }
 0x334   :  { %2249 = vmatpush.msra.mxu0 %v7151_v50  ;;  %v7788_v50 = vld [vmem:[%s10173_s5 + $0x10] sm:$0xff]  ;;  %10945 = vst [vmem:[#allocation61_spill] sm:$0xff] %v7846_v24 }
 0x335   :  { %2289 = vmatpush.msra.mxu2 %v7767_v40  ;;  %10940 = vst [vmem:[#allocation56_spill] sm:$0xff] %v7788_v50  ;;  %v7839_v40 = vld [vmem:[%s10174_s6 + $0x368] sm:$0xff] }
 0x336   :  { %2250 = vmatpush.msra.mxu0 %v7160_v51  ;;  %v7798_v51 = vld [vmem:[%s10174_s6 + $0x3c0] sm:$0xff]  ;;  %10944 = vst [vmem:[#allocation58_spill] sm:$0xff] %v7839_v40 }
 0x337   :  { %2290 = vmatpush.msra.mxu2 %v7774_v39  ;;  %2491 = vmatpush.msra.mxu1 %v7798_v51  ;;  %v7834_v39 = vld [vmem:[%s10174_s6 + $0x360] sm:$0xff] }
 0x338   :  { %2251 = vmatpush.msra.mxu0 %v7169_v33  ;;  %v7803_v33 = vld [vmem:[%s10174_s6 + $0x3c8] sm:$0xff]  ;;  %10943 = vst [vmem:[#allocation44_spill] sm:$0xff] %v7834_v39 }
 0x339   :  { %2291 = vmatpush.msra.mxu2 %v7781_v19  ;;  %2531 = vmatpush.msra.mxu3 %v7803_v33  ;;  %v7825_v19 = vld [vmem:[%s10174_s6 + $0x388] sm:$0xff] }
 0x33a   :  { %2252 = vmatpush.msra.mxu0 %v7178_v6  ;;  %v7808_v6 = vld [vmem:[%s10174_s6 + $0x3a0] sm:$0xff]  ;;  %10942 = vst [vmem:[#allocation57_spill] sm:$0xff] %v7825_v19 }
 0x33b   :  { %2292 = vmatpush.msra.mxu2 %v7788_v50  ;;  %2253 = vmatmul.f32.vlgmr.msra.gmra.mxu0 %v7611_v58  ;;  %v7820_v50 = vld [vmem:[%s10174_s6 + $0x380] sm:$0xff] }
 0x33c   :  { %2293 = vmatmul.f32.vlgmr.msra.gmra.mxu2 %v7611_v58  ;;  %v7815_v58 = vld [vmem:[%s10174_s6 + $0x3a8] sm:$0xff]  ;;  %10941 = vst [vmem:[#allocation43_spill] sm:$0xff] %v7820_v50  ;;  %2492 = vmatpush.msra.mxu1 %v7808_v6 }
 0x33d   :  { %2532 = vmatpush.msra.mxu3 %v7815_v58 }
 0x33e   :  { %2493 = vmatpush.msra.mxu1 %v7820_v50  ;;  %v7931_v50 = vld [vmem:[%s10174_s6 + $0x288] sm:$0xff] }
 0x33f   :  { %2533 = vmatpush.msra.mxu3 %v7825_v19  ;;  %v7873_v19 = vld [vmem:[%s10174_s6 + $0x308] sm:$0xff] }
 0x340   :  { %2494 = vmatpush.msra.mxu1 %v7834_v39  ;;  %v7868_v39 = vld [vmem:[%s10174_s6 + $0x300] sm:$0xff]  ;;  %10950 = vst [vmem:[#allocation59_spill] sm:$0xff] %v7873_v19 }
 0x341   :  { %2534 = vmatpush.msra.mxu3 %v7839_v40  ;;  %v7863_v40 = vld [vmem:[%s10174_s6 + $0x328] sm:$0xff]  ;;  %10949 = vst [vmem:[#allocation65_spill] sm:$0xff] %v7868_v39 }
 0x342   :  { %2495 = vmatpush.msra.mxu1 %v7846_v24  ;;  %10948 = vst [vmem:[#allocation64_spill] sm:$0xff] %v7863_v40  ;;  %v7887_v24 = vld [vmem:[%s10174_s6 + $0x2e8] sm:$0xff] }
 0x343   :  { %2535 = vmatpush.msra.mxu3 %v7851_v57  ;;  %v7882_v57 = vld [vmem:[%s10174_s6 + $0x2e0] sm:$0xff]  ;;  %10952 = vst [vmem:[#allocation60_spill] sm:$0xff] %v7887_v24 }
 0x344   :  { %2496 = vmatpush.msra.mxu1 %v7856_v23  ;;  %10951 = vst [vmem:[#allocation66_spill] sm:$0xff] %v7882_v57  ;;  %v7892_v23 = vld [vmem:[%s10174_s6 + $0x2c0] sm:$0xff] }
 0x345   :  { %2536 = vmatpush.msra.mxu3 %v7863_v40  ;;  %10953 = vst [vmem:[#allocation67_spill] sm:$0xff] %v7892_v23  ;;  %v7909_v40 = vld [vmem:[%s10174_s6 + $0x2a8] sm:$0xff] }
 0x346   :  { %2497 = vmatpush.msra.mxu1 %v7868_v39  ;;  %v7904_v39 = vld [vmem:[%s10174_s6 + $0x2a0] sm:$0xff] }
 0x347   :  { %2537 = vmatpush.msra.mxu3 %v7873_v19  ;;  %v7899_v19 = vld [vmem:[%s10174_s6 + $0x2c8] sm:$0xff] }
 0x348   :  { %2498 = vmatpush.msra.mxu1 %v7882_v57  ;;  %10954 = vst [vmem:[#allocation69_spill] sm:$0xff] %v7899_v19  ;;  %v7914_v57 = vld [vmem:[%s10174_s6 + $0x1e0] sm:$0xff] }
 0x349   :  { %2538 = vmatpush.msra.mxu3 %v7887_v24  ;;  %10955 = vst [vmem:[#allocation68_spill] sm:$0xff] %v7914_v57  ;;  %v7921_v24 = vld [vmem:[%s10174_s6 + $0x1e8] sm:$0xff]  ;;  %2470 = vmatpush.msrb.mxu0 %v7914_v57 }
 0x34a   :  { %2499 = vmatpush.msra.mxu1 %v7892_v23  ;;  %10956 = vst [vmem:[#allocation70_spill] sm:$0xff] %v7921_v24  ;;  %2510 = vmatpush.msrb.mxu2 %v7921_v24  ;;  %v7945_v23 = vld [vmem:[%s10174_s6 + $0x268] sm:$0xff]  ;;  %v7954_v24 = vld [vmem:[%s10174_s6 + $0x1c0] sm:$0xff] }
 0x34b   :  { %2539 = vmatpush.msra.mxu3 %v7899_v19  ;;  %v7940_v19 = vld [vmem:[%s10174_s6 + $0x260] sm:$0xff]  ;;  %10958 = vst [vmem:[#allocation72_spill] sm:$0xff] %v7945_v23  ;;  %v7959_v57 = vld [vmem:[%s10174_s6 + $0x1c8] sm:$0xff]  ;;  %2471 = vmatpush.msrb.mxu0 %v7954_v24 }
 0x34c   :  { %2500 = vmatpush.msra.mxu1 %v7904_v39  ;;  %10957 = vst [vmem:[#allocation71_spill] sm:$0xff] %v7940_v19  ;;  %2511 = vmatpush.msrb.mxu2 %v7959_v57 }
 0x34d   :  { %2540 = vmatpush.msra.mxu3 %v7909_v40  ;;  %10959 = vst [vmem:[#allocation73_spill] sm:$0xff] %v7954_v24  ;;  %v7978_v24 = vld [vmem:[%s10174_s6 + $0x1a0] sm:$0xff] }
 0x34e   :  { %2501 = vmatpush.msra.mxu1 %v7926_v10  ;;  %10960 = vst [vmem:[#allocation74_spill] sm:$0xff] %v7959_v57  ;;  %v7983_v57 = vld [vmem:[%s10174_s6 + $0x1a8] sm:$0xff]  ;;  %2472 = vmatpush.msrb.mxu0 %v7978_v24 }
 0x34f   :  { %2541 = vmatpush.msra.mxu3 %v7931_v50  ;;  %10963 = vst [vmem:[#allocation77_spill] sm:$0xff] %v7978_v24  ;;  %2512 = vmatpush.msrb.mxu2 %v7983_v57  ;;  %v8002_v24 = vld [vmem:[%s10174_s6 + $0x180] sm:$0xff] }
 0x350   :  { %2502 = vmatpush.msra.mxu1 %v7940_v19  ;;  %v7966_v19 = vld [vmem:[%s10174_s6 + $0x240] sm:$0xff]  ;;  %10964 = vst [vmem:[#allocation78_spill] sm:$0xff] %v7983_v57  ;;  %v8007_v57 = vld [vmem:[%s10174_s6 + $0x188] sm:$0xff]  ;;  %2473 = vmatpush.msrb.mxu0 %v8002_v24 }
 0x351   :  { %2542 = vmatpush.msra.mxu3 %v7945_v23  ;;  %10961 = vst [vmem:[#allocation75_spill] sm:$0xff] %v7966_v19  ;;  %v7971_v23 = vld [vmem:[%s10174_s6 + $0x248] sm:$0xff]  ;;  %2513 = vmatpush.msrb.mxu2 %v8007_v57 }
 0x352   :  { %10962 = vst [vmem:[#allocation76_spill] sm:$0xff] %v7971_v23  ;;  %2503 = vmatpush.msra.mxu1 %v7966_v19  ;;  %v7990_v19 = vld [vmem:[%s10174_s6 + $0x220] sm:$0xff] }
 0x353   :  { %2543 = vmatpush.msra.mxu3 %v7971_v23  ;;  %10965 = vst [vmem:[#allocation79_spill] sm:$0xff] %v7990_v19  ;;  %v7995_v23 = vld [vmem:[%s10174_s6 + $0x228] sm:$0xff] }
 0x354   :  { %10966 = vst [vmem:[#allocation80_spill] sm:$0xff] %v7995_v23  ;;  %2504 = vmatpush.msra.mxu1 %v7990_v19  ;;  %v8021_v19 = vld [vmem:[%s10174_s6 + $0x168] sm:$0xff] }
 0x355   :  { %2544 = vmatpush.msra.mxu3 %v7995_v23  ;;  %v8016_v23 = vld [vmem:[%s10174_s6 + $0x160] sm:$0xff]  ;;  %2514 = vmatpush.msrb.mxu2 %v8021_v19 }
 0x356   :  { %2505 = vmatpush.msra.mxu1 %v7266_v63  ;;  %2474 = vmatpush.msrb.mxu0 %v8016_v23  ;;  %v8030_v63 = vld [vmem:[%s10174_s6 + $0x140] sm:$0xff] }
 0x357   :  { %2545 = vmatpush.msra.mxu3 %v7271_v14  ;;  %v8035_v14 = vld [vmem:[%s10174_s6 + $0x148] sm:$0xff] }
 0x358   :  { %2570 = vmatpush.msrb.mxu1 %v7278_v46  ;;  %2475 = vmatpush.msrb.mxu0 %v8030_v63  ;;  %v8044_v46 = vld [vmem:[%s10174_s6 + $0x120] sm:$0xff] }
 0x359   :  { %2610 = vmatpush.msrb.mxu3 %v7283_v32  ;;  %2515 = vmatpush.msrb.mxu2 %v8035_v14  ;;  %v8049_v32 = vld [vmem:[%s10174_s6 + $0x128] sm:$0xff] }
 0x35a   :  { %2571 = vmatpush.msrb.mxu1 %v7290_v17  ;;  %2476 = vmatpush.msrb.mxu0 %v8044_v46  ;;  %v8058_v17 = vld [vmem:[%s10174_s6 + $0x100] sm:$0xff] }
 0x35b   :  { %2611 = vmatpush.msrb.mxu3 %v7295_v20  ;;  %2516 = vmatpush.msrb.mxu2 %v8049_v32  ;;  %v8063_v20 = vld [vmem:[%s10174_s6 + $0x108] sm:$0xff] }
 0x35c   :  { %2572 = vmatpush.msrb.mxu1 %v7302_v34  ;;  %2477 = vmatpush.msrb.mxu0 %v8058_v17  ;;  %v8072_v34 = vld [vmem:[%s10174_s6 + $0xe0] sm:$0xff] }
 0x35d   :  { %2612 = vmatpush.msrb.mxu3 %v7307_v37  ;;  %2517 = vmatpush.msrb.mxu2 %v8063_v20  ;;  %v8077_v37 = vld [vmem:[%s10174_s6 + $0xe8] sm:$0xff] }
 0x35e   :  { %2573 = vmatpush.msrb.mxu1 %v7314_v30  ;;  %2478 = vmatpush.msrb.mxu0 %v8072_v34  ;;  %v8086_v30 = vld [vmem:[%s10174_s6 + $0xc0] sm:$0xff] }
 0x35f   :  { %2613 = vmatpush.msrb.mxu3 %v7319_v45  ;;  %2518 = vmatpush.msrb.mxu2 %v8077_v37  ;;  %v8091_v45 = vld [vmem:[%s10174_s6 + $0xc8] sm:$0xff] }
 0x360   :  { %2574 = vmatpush.msrb.mxu1 %v7326_v15  ;;  %2479 = vmatpush.msrb.mxu0 %v8086_v30  ;;  %v8100_v15 = vld [vmem:[%s10174_s6 + $0xa0] sm:$0xff] }
 0x361   :  { %2614 = vmatpush.msrb.mxu3 %v7331_v41  ;;  %2519 = vmatpush.msrb.mxu2 %v8091_v45  ;;  %v8105_v41 = vld [vmem:[%s10174_s6 + $0xa8] sm:$0xff] }
 0x362   :  { %2575 = vmatpush.msrb.mxu1 %v7338_v54  ;;  %2480 = vmatpush.msrb.mxu0 %v8100_v15  ;;  %v8114_v54 = vld [vmem:[%s10174_s6 + $0x80] sm:$0xff] }
 0x363   :  { %2615 = vmatpush.msrb.mxu3 %v7343_v1  ;;  %2520 = vmatpush.msrb.mxu2 %v8105_v41  ;;  %10967 = vst [vmem:[#allocation81_spill] sm:$0xff] %v8114_v54  ;;  %v8119_v1 = vld [vmem:[%s10174_s6 + $0x88] sm:$0xff] }
 0x364   :  { %2576 = vmatpush.msrb.mxu1 %v7350_v60  ;;  %10968 = vst [vmem:[#allocation82_spill] sm:$0xff] %v8119_v1  ;;  %2481 = vmatpush.msrb.mxu0 %v8114_v54  ;;  %v8128_v60 = vld [vmem:[%s10174_s6 + $0x60] sm:$0xff] }
 0x365   :  { %2616 = vmatpush.msrb.mxu3 %v7355_v48  ;;  %2521 = vmatpush.msrb.mxu2 %v8119_v1  ;;  %10969 = vst [vmem:[#allocation83_spill] sm:$0xff] %v8128_v60  ;;  %v8133_v48 = vld [vmem:[%s10174_s6 + $0x68] sm:$0xff]  ;;  %v2172_v54 = vld [vmem:[#allocation2 + $0x38] sm:$0x3] }
 0x366   :  { %2577 = vmatpush.msrb.mxu1 %v7362_v12  ;;  %10970 = vst [vmem:[#allocation84_spill] sm:$0xff] %v8133_v48  ;;  %2482 = vmatpush.msrb.mxu0 %v8128_v60  ;;  %v8142_v12 = vld [vmem:[%s10174_s6 + $0x40] sm:$0xff] }
 0x367   :  { %2617 = vmatpush.msrb.mxu3 %v7367_v29  ;;  %2522 = vmatpush.msrb.mxu2 %v8133_v48  ;;  %10971 = vst [vmem:[#allocation85_spill] sm:$0xff] %v8142_v12  ;;  %v8147_v29 = vld [vmem:[%s10174_s6 + $0x48] sm:$0xff] }
 0x368   :  { %2578 = vmatpush.msrb.mxu1 %v7374_v22  ;;  %10972 = vst [vmem:[#allocation86_spill] sm:$0xff] %v8147_v29  ;;  %2483 = vmatpush.msrb.mxu0 %v8142_v12  ;;  %v8156_v22 = vld [vmem:[%s10174_s6 + $0x20] sm:$0xff]  ;;  %v10979_v12 = vld [vmem:[#allocation12_spill] sm:$0xff] }
 0x369   :  { %2618 = vmatpush.msrb.mxu3 %v7379_v62  ;;  %2523 = vmatpush.msrb.mxu2 %v8147_v29  ;;  %10973 = vst [vmem:[#allocation87_spill] sm:$0xff] %v8156_v22  ;;  %v8161_v62 = vld [vmem:[%s10174_s6 + $0x28] sm:$0xff] }
 0x36a   :  { %2579 = vmatpush.msrb.mxu1 %v7386_v7  ;;  %10974 = vst [vmem:[#allocation88_spill] sm:$0xff] %v8161_v62  ;;  %2484 = vmatpush.msrb.mxu0 %v8156_v22  ;;  %v8170_v7 = vld [vmem:[%s10174_s6] sm:$0xff] }
 0x36b   :  { %2619 = vmatpush.msrb.mxu3 %v7391_v8  ;;  %2524 = vmatpush.msrb.mxu2 %v8161_v62  ;;  %10975 = vst [vmem:[#allocation89_spill] sm:$0xff] %v8170_v7  ;;  %v8175_v8 = vld [vmem:[%s10174_s6 + $0x8] sm:$0xff] }
 0x36c   :  { %2580 = vmatpush.msrb.mxu1 %v7398_v21  ;;  %10976 = vst [vmem:[#allocation90_spill] sm:$0xff] %v8175_v8  ;;  %2485 = vmatpush.msrb.mxu0 %v8170_v7  ;;  %v8182_v21 = vld [vmem:[%s10174_s6 + $0x1f0] sm:$0xff]  ;;  %v8202_v7 = vld [vmem:[%s10174_s6 + $0x1d8] sm:$0xff] }
 0x36d   :  { %2620 = vmatpush.msrb.mxu3 %v7403_v31  ;;  %2525 = vmatpush.msrb.mxu2 %v8175_v8  ;;  %10977 = vst [vmem:[#allocation21_spill] sm:$0xff] %v8182_v21  ;;  %v8187_v31 = vld [vmem:[%s10174_s6 + $0x1f8] sm:$0xff]  ;;  %v8197_v8 = vld [vmem:[%s10174_s6 + $0x1d0] sm:$0xff] }
 0x36e   :  { %10978 = vst [vmem:[#allocation27_spill] sm:$0xff] %v8187_v31  ;;  %2581 = vmatpush.msrb.mxu1 %v7411_v38  ;;  %2550 = vmatpush.msra.mxu0 %v8182_v21  ;;  %v10983_v38 = vld [vmem:[#allocation14_spill] sm:$0xff]  ;;  %v10991_v21 = vld [vmem:[#allocation15_spill] sm:$0xff] }
 0x36f   :  { %2621 = vmatpush.msrb.mxu3 %v10979_v12  ;;  %2590 = vmatpush.msra.mxu2 %v8187_v31  ;;  %10980 = vst [vmem:[#allocation91_spill] sm:$0xff] %v8197_v8  ;;  %v8209_v12 = vld [vmem:[%s10174_s6 + $0x250] sm:$0xff]  ;;  %v10990_v31 = vld [vmem:[#allocation22_spill] sm:$0xff] }
 0x370   :  { %10981 = vst [vmem:[#allocation92_spill] sm:$0xff] %v8202_v7  ;;  %2551 = vmatpush.msra.mxu0 %v8197_v8  ;;  %v8240_v8 = vld [vmem:[%s10174_s6 + $0x198] sm:$0xff] }
 0x371   :  { %2622 = vmatpush.msrb.mxu3 %v10983_v38  ;;  %10984 = vst [vmem:[#allocation93_spill] sm:$0xff] %v8209_v12  ;;  %2591 = vmatpush.msra.mxu2 %v8202_v7  ;;  %v8235_v7 = vld [vmem:[%s10174_s6 + $0x190] sm:$0xff] }
 0x372   :  { %10988 = vst [vmem:[#allocation25_spill] sm:$0xff] %v8235_v7 }
 0x373   :  { %10989 = vst [vmem:[#allocation10_spill] sm:$0xff] %v8240_v8 }
 0x37e   :  { %v2027_v62 = vpop.f32.mrf.mxu1 }
 0x397   :  { %v2007_v29 = vpop.f32.mrf.mxu0 }
 0x398   :  { %v2008_v22 = vadd.f32 %v2007_v29, %v10901_v44  ;;  %v10982_v29 = vld [vmem:[#allocation13_spill] sm:$0xff] }
 0x399   :  { %2582 = vmatpush.msrb.mxu1 %v10982_v29  ;;  %v8214_v44 = vld [vmem:[%s10174_s6 + $0x258] sm:$0xff] }
 0x39a   :  { %v2028_v48 = vadd.f32 %v2027_v62, %v2008_v22  ;;  %10985 = vst [vmem:[#allocation94_spill] sm:$0xff] %v8214_v44  ;;  %v8221_v22 = vld [vmem:[%s10174_s6 + $0x1b0] sm:$0xff]  ;;  %v8226_v62 = vld [vmem:[%s10174_s6 + $0x1b8] sm:$0xff]  ;;  %2623 = vmatpush.msrb.mxu3 %v8214_v44 }
 0x39b   :  { %10986 = vst [vmem:[#allocation24_spill] sm:$0xff] %v8221_v22  ;;  %2583 = vmatpush.msrb.mxu1 %v8209_v12  ;;  %2552 = vmatpush.msra.mxu0 %v8221_v22  ;;  %v10992_v44 = vld [vmem:[#allocation16_spill] sm:$0xff]  ;;  %v8255_v22 = vld [vmem:[%s10174_s6 + $0x178] sm:$0xff] }
 0x39c   :  { %10987 = vst [vmem:[#allocation30_spill] sm:$0xff] %v8226_v62  ;;  %v2150_v29 = vmul.f32 0.5, %v2028_v48  ;;  %2592 = vmatpush.msra.mxu2 %v8226_v62  ;;  %v2067_v48 = vpop.f32.mrf.mxu3  ;;  %2624 = vmatpush.msrb.mxu3 %v10992_v44  ;;  %v8250_v62 = vld [vmem:[%s10174_s6 + $0x170] sm:$0xff]  ;;  %v10996_v44 = vld [vmem:[#allocation18_spill] sm:$0xff] }
 0x39d   :  { %v2047_v38 = vpop.f32.mrf.mxu2  ;;  %2584 = vmatpush.msrb.mxu1 %v10991_v21  ;;  %2553 = vmatpush.msra.mxu0 %v8235_v7  ;;  %10993 = vst [vmem:[#allocation95_spill] sm:$0xff] %v8250_v62  ;;  %v10995_v21 = vld [vmem:[#allocation17_spill] sm:$0xff] }
 0x39e   :  { %v2048_v12 = vadd.f32 %v2047_v38, %v10990_v31  ;;  %2593 = vmatpush.msra.mxu2 %v8240_v8  ;;  %10994 = vst [vmem:[#allocation96_spill] sm:$0xff] %v8255_v22  ;;  %4328 = vtanh.f32 %v2150_v29  ;;  %2625 = vmatpush.msrb.mxu3 %v10996_v44  ;;  %v10997_v7 = vld [vmem:[#allocation29_spill] sm:$0xff]  ;;  %v8265_v8 = vld [vmem:[%s10174_s6 + $0x150] sm:$0xff]  ;;  %v2107_v29 = vpop.f32.mrf.mxu1 }
 0x39f   :  { %2585 = vmatpush.msrb.mxu1 %v10995_v21  ;;  %2554 = vmatpush.msra.mxu0 %v8250_v62  ;;  %10998 = vst [vmem:[#allocation97_spill] sm:$0xff] %v8265_v8  ;;  %v8282_v44 = vld [vmem:[%s10174_s6 + $0x138] sm:$0xff] }
 0x3a0   :  { %v2068_v38 = vadd.f32 %v2067_v48, %v2048_v12  ;;  %v2087_v31 = vpop.f32.mrf.mxu0  ;;  %2594 = vmatpush.msra.mxu2 %v8255_v22  ;;  %v8270_v12 = vld [vmem:[%s10174_s6 + $0x158] sm:$0xff]  ;;  %11001 = vst [vmem:[#allocation100_spill] sm:$0xff] %v8282_v44 }
 0x3a1   :  { %v2088_v60 = vadd.f32 %v2087_v31, %v10997_v7  ;;  %10999 = vst [vmem:[#allocation98_spill] sm:$0xff] %v8270_v12  ;;  %2555 = vmatpush.msra.mxu0 %v8265_v8  ;;  %v8277_v31 = vld [vmem:[%s10174_s6 + $0x130] sm:$0xff] }
 0x3a2   :  { %v2154_v48 = vmul.f32 0.5, %v2068_v38  ;;  %2595 = vmatpush.msra.mxu2 %v8270_v12  ;;  %11000 = vst [vmem:[#allocation99_spill] sm:$0xff] %v8277_v31  ;;  %v8294_v38 = vld [vmem:[%s10174_s6 + $0x118] sm:$0xff]  ;;  %v11004_v12 = vld [vmem:[#allocation11_spill] sm:$0xff] }
 0x3a3   :  { %v2108_v21 = vadd.f32 %v2107_v29, %v2088_v60  ;;  %2556 = vmatpush.msra.mxu0 %v8277_v31  ;;  %v8289_v60 = vld [vmem:[%s10174_s6 + $0x110] sm:$0xff]  ;;  %11003 = vst [vmem:[#allocation102_spill] sm:$0xff] %v8294_v38 }
 0x3a4   :  { %4330 = vtanh.f32 %v2154_v48  ;;  %2596 = vmatpush.msra.mxu2 %v8282_v44  ;;  %11002 = vst [vmem:[#allocation101_spill] sm:$0xff] %v8289_v60  ;;  %v4329_v29 = vpop.eup %4328  ;;  %v8302_v48 = vld [vmem:[%s10174_s6 + $0xf0] sm:$0xff]  ;;  %v8307_v44 = vld [vmem:[%s10174_s6 + $0xf8] sm:$0xff]  ;;  %v2147_v31 = vpop.f32.mrf.mxu3 }
 0x3a5   :  { %4332 = vtanh.f32 %v2108_v21  ;;  %2557 = vmatpush.msra.mxu0 %v8289_v60  ;;  %11005 = vst [vmem:[#allocation103_spill] sm:$0xff] %v8302_v48  ;;  %v2152_v22 = vmul.f32 0.5, %v4329_v29 }
 0x3a6   :  { %v2127_v7 = vpop.f32.mrf.mxu2  ;;  %2597 = vmatpush.msra.mxu2 %v8294_v38  ;;  %11006 = vst [vmem:[#allocation104_spill] sm:$0xff] %v8307_v44  ;;  %v2274_v1 = vpop.f32.mrf.mxu1 }
 0x3a7   :  { %v2128_v8 = vadd.f32 %v2127_v7, %v11004_v12  ;;  %2558 = vmatpush.msra.mxu0 %v8302_v48  ;;  %v8314_v7 = vld [vmem:[%s10174_s6 + $0xd0] sm:$0xff]  ;;  %v8319_v12 = vld [vmem:[%s10174_s6 + $0xd8] sm:$0xff] }
 0x3a8   :  { %2598 = vmatpush.msra.mxu2 %v8307_v44  ;;  %11007 = vst [vmem:[#allocation105_spill] sm:$0xff] %v8314_v7  ;;  %v2153_v44 = vadd.f32 0.5, %v2152_v22 }
 0x3a9   :  { %v2148_v21 = vadd.f32 %v2147_v31, %v2128_v8  ;;  %11008 = vst [vmem:[#allocation106_spill] sm:$0xff] %v8319_v12  ;;  %2559 = vmatpush.msra.mxu0 %v8314_v7  ;;  %v8326_v8 = vld [vmem:[%s10174_s6 + $0xb0] sm:$0xff]  ;;  %v8331_v31 = vld [vmem:[%s10174_s6 + $0xb8] sm:$0xff] }
 0x3aa   :  { %v4331_v38 = vpop.eup %4330  ;;  %2599 = vmatpush.msra.mxu2 %v8319_v12  ;;  %11009 = vst [vmem:[#allocation108_spill] sm:$0xff] %v8326_v8 }
 0x3ab   :  { %v2156_v60 = vmul.f32 0.5, %v4331_v38  ;;  %v2159_v62 = vmul.f32 0.5, %v2148_v21  ;;  %11010 = vst [vmem:[#allocation109_spill] sm:$0xff] %v8331_v31  ;;  %v4333_v29 = vpop.eup %4332  ;;  %2560 = vmatpush.msra.mxu0 %v8326_v8  ;;  %v8338_v38 = vld [vmem:[%s10174_s6 + $0x90] sm:$0xff]  ;;  %v8343_v21 = vld [vmem:[%s10174_s6 + $0x98] sm:$0xff] }
 0x3ac   :  { %2600 = vmatpush.msra.mxu2 %v8331_v31  ;;  %11011 = vst [vmem:[#allocation110_spill] sm:$0xff] %v8338_v38  ;;  %v2164_v22 = vmul.f32 %v4333_v29, %v2153_v44  ;;  %v8356_v31 = vld [vmem:[%s10174_s6 + $0x78] sm:$0xff] }
 0x3ad   :  { %v2157_v48 = vadd.f32 0.5, %v2156_v60  ;;  %4334 = vtanh.f32 %v2159_v62  ;;  %11012 = vst [vmem:[#allocation111_spill] sm:$0xff] %v8343_v21  ;;  %v2170_v60 = vld [vmem:[#allocation2 + $0x20] sm:$0x3]  ;;  %2561 = vmatpush.msra.mxu0 %v8338_v38  ;;  %v8351_v62 = vld [vmem:[%s10174_s6 + $0x70] sm:$0xff]  ;;  %v8370_v44 = vld [vmem:[%s10174_s6 + $0x58] sm:$0xff] }
 0x3ae   :  { %2601 = vmatpush.msra.mxu2 %v8343_v21  ;;  %11013 = vst [vmem:[#allocation112_spill] sm:$0xff] %v8351_v62  ;;  %v2318_v8 = vadd.f32 %v2274_v1, %v2170_v60  ;;  %v8378_v1 = vld [vmem:[%s10174_s6 + $0x30] sm:$0xff]  ;;  %v2314_v21 = vpop.f32.mrf.mxu3 }
 0x3af   :  { %v2163_v12 = vmul.f32 %v2157_v48, %v7462_v47  ;;  %11014 = vst [vmem:[#allocation113_spill] sm:$0xff] %v8356_v31  ;;  %2562 = vmatpush.msra.mxu0 %v8351_v62  ;;  %v8365_v47 = vld [vmem:[%s10174_s6 + $0x50] sm:$0xff] }
 0x3b0   :  { %2602 = vmatpush.msra.mxu2 %v8356_v31  ;;  %11016 = vst [vmem:[#allocation23_spill] sm:$0xff] %v8365_v47  ;;  %v2325_v29 = vmul.f32 0.5, %v2318_v8  ;;  %v8388_v60 = vld [vmem:[%s10174_s6 + $0x10] sm:$0xff] }
 0x3b1   :  { %v8358_v7 = vadd.f32 %v2164_v22, %v2163_v12  ;;  %11017 = vst [vmem:[#allocation107_spill] sm:$0xff] %v8370_v44  ;;  %2563 = vmatpush.msra.mxu0 %v8365_v47  ;;  %v8383_v12 = vld [vmem:[%s10174_s6 + $0x38] sm:$0xff] }
 0x3b2   :  { %2603 = vmatpush.msra.mxu2 %v8370_v44  ;;  %11018 = vst [vmem:[#allocation12_spill] sm:$0xff] %v8378_v1 }
 0x3b3   :  { %11015 = vst [vmem:[#allocation28_spill] sm:$0xff] %v8358_v7  ;;  %v4335_v48 = vpop.eup %4334  ;;  %4336 = vtanh.f32 %v8358_v7  ;;  %v8393_v7 = vld [vmem:[%s10174_s6 + $0x18] sm:$0xff]  ;;  %2564 = vmatpush.msra.mxu0 %v8378_v1  ;;  %v2320_v1 = vadd.f32 %v2314_v21, %v2172_v54 }
 0x3b4   :  { %v2161_v22 = vmul.f32 0.5, %v4335_v48  ;;  %11019 = vst [vmem:[#allocation13_spill] sm:$0xff] %v8393_v7  ;;  %2604 = vmatpush.msra.mxu2 %v8383_v12  ;;  %4338 = vtanh.f32 %v2325_v29  ;;  %v2169_v48 = vld [vmem:[#allocation2 + $0x8] sm:$0x3]  ;;  %v11023_v21 = vld [vmem:[#allocation33_spill] sm:$0xff] }
 0x3b5   :  { %2565 = vmatpush.msra.mxu0 %v8388_v60  ;;  %v2171_v29 = vld [vmem:[#allocation2 + $0x28] sm:$0x3] }
 0x3b6   :  { %2605 = vmatpush.msra.mxu2 %v8393_v7  ;;  %v2162_v8 = vadd.f32 0.5, %v2161_v22 }
 0x3b8   :  { %v2254_v44 = vpop.f32.mrf.mxu0 }
 0x3b9   :  { %v4337_v47 = vpop.eup %4336  ;;  %v2317_v31 = vadd.f32 %v2254_v44, %v2169_v48 }
 0x3ba   :  { %v2167_v62 = vmul.f32 %v4337_v47, %v2162_v8  ;;  %v4339_v7 = vpop.eup %4338  ;;  %v11024_v8 = vld [vmem:[#allocation32_spill] sm:$0xff] }
 0x3bb   :  { %v2321_v38 = vmul.f32 0.5, %v2317_v31  ;;  %v2327_v44 = vmul.f32 0.5, %v4339_v7  ;;  %v2330_v31 = vmul.f32 0.5, %v2320_v1 }
 0x3bc   :  { %2168 = vst [vmem:[#allocation3 + $0x6] sm:$0x3] %v2167_v62  ;;  %2506 = vmatmul.f32.vlgmr.msra.gmra.mxu1 %v2167_v62  ;;  %2546 = vmatmul.f32.vlgmr.msra.gmra.mxu3 %v2167_v62 }
 0x3bd   :  { %4340 = vtanh.f32 %v2321_v38  ;;  %2737 = vmatpush.msra.mxu1 %v7468_v42  ;;  %2777 = vmatpush.msra.mxu3 %v7473_v26  ;;  %v2328_v26 = vadd.f32 0.5, %v2327_v44 }
 0x3bf   :  { %v2294_v22 = vpop.f32.mrf.mxu2  ;;  %2738 = vmatpush.msra.mxu1 %v7478_v13  ;;  %2778 = vmatpush.msra.mxu3 %v7483_v35  ;;  %v11020_v13 = vld [vmem:[#allocation19_spill] sm:$0xff] }
 0x3c0   :  { %v2319_v47 = vadd.f32 %v2294_v22, %v2171_v29  ;;  %v11028_v29 = vld [vmem:[#allocation45_spill] sm:$0xff] }
 0x3c1   :  { %2739 = vmatpush.msra.mxu1 %v7490_v2  ;;  %2779 = vmatpush.msra.mxu3 %v7495_v4  ;;  %v2335_v2 = vrot.slane %v7548_v18, 6  ;;  %v11021_v4 = vld [vmem:[#allocation20_spill] sm:$0xff]  ;;  %v11026_v18 = vld [vmem:[#allocation34_spill] sm:$0xff]  ;;  %v11029_v22 = vld [vmem:[#allocation37_spill] sm:$0xff] }
 0x3c2   :  { %4342 = vtanh.f32 %v2319_v47 }
 0x3c3   :  { %v4341_v54 = vpop.eup %4340  ;;  %2740 = vmatpush.msra.mxu1 %v7502_v5  ;;  %2780 = vmatpush.msra.mxu3 %v7507_v56  ;;  %4344 = vtanh.f32 %v2330_v31  ;;  %v2337_v5 = vmul.f32 %v2335_v2, %v2328_v26  ;;  %v11022_v56 = vld [vmem:[#allocation31_spill] sm:$0xff]  ;;  %v11030_v31 = vld [vmem:[#allocation46_spill] sm:$0xff] }
 0x3c4   :  { %v2323_v42 = vmul.f32 0.5, %v4341_v54  ;;  %2586 = vmatmul.f32.vlgmr.msrb.gmra.mxu1 %v2167_v62  ;;  %2626 = vmatmul.f32.vlgmr.msrb.gmra.mxu3 %v2167_v62  ;;  %v11031_v26 = vld [vmem:[#allocation38_spill] sm:$0xff] }
 0x3c5   :  { %2741 = vmatpush.msra.mxu1 %v11020_v13  ;;  %2781 = vmatpush.msra.mxu3 %v7519_v36  ;;  %v11025_v36 = vld [vmem:[#allocation35_spill] sm:$0xff]  ;;  %v11034_v13 = vld [vmem:[#allocation48_spill] sm:$0xff]  ;;  %v8468_v2 = vld [vmem:[%s10173_s5 + $0x160] sm:$0xff] }
 0x3c6   :  { %v2324_v35 = vadd.f32 0.5, %v2323_v42  ;;  %v8432_v42 = vld [vmem:[%s10173_s5 + $0x1e0] sm:$0xff] }
 0x3c7   :  { %2742 = vmatpush.msra.mxu1 %v7527_v28  ;;  %2782 = vmatpush.msra.mxu3 %v11021_v4  ;;  %v11027_v28 = vld [vmem:[#allocation36_spill] sm:$0xff]  ;;  %v8494_v4 = vld [vmem:[%s10173_s5 + $0x100] sm:$0xff] }
 0x3c8   :  { %v4343_v7 = vpop.eup %4342 }
 0x3c9   :  { %v2338_v38 = vmul.f32 %v4343_v7, %v2324_v35  ;;  %2743 = vmatpush.msra.mxu1 %v11022_v56  ;;  %2783 = vmatpush.msra.mxu3 %v11023_v21  ;;  %v4345_v62 = vpop.eup %4344  ;;  %v8459_v35 = vld [vmem:[%s10173_s5 + $0x180] sm:$0xff]  ;;  %v11046_v21 = vld [vmem:[#allocation63_spill] sm:$0xff] }
 0x3ca   :  { %v2332_v48 = vmul.f32 0.5, %v4345_v62  ;;  %v8503_v7 = vld [vmem:[%s10173_s5 + $0xe0] sm:$0xff] }
 0x3cb   :  { %v8414_v1 = vadd.f32 %v2338_v38, %v2337_v5  ;;  %2744 = vmatpush.msra.mxu1 %v11024_v8  ;;  %2784 = vmatpush.msra.mxu3 %v11025_v36  ;;  %v11044_v5 = vld [vmem:[#allocation61_spill] sm:$0xff]  ;;  %v8539_v56 = vld [vmem:[%s10173_s5 + $0x60] sm:$0xff] }
 0x3cc   :  { %v2333_v47 = vadd.f32 0.5, %v2332_v48  ;;  %v11045_v38 = vld [vmem:[#allocation53_spill] sm:$0xff]  ;;  %v11047_v62 = vld [vmem:[#allocation62_spill] sm:$0xff] }
 0x3cd   :  { %4346 = vtanh.f32 %v8414_v1  ;;  %2745 = vmatpush.msra.mxu1 %v11026_v18  ;;  %2785 = vmatpush.msra.mxu3 %v11027_v28  ;;  %v11048_v8 = vld [vmem:[#allocation41_spill] sm:$0xff]  ;;  %v8548_v36 = vld [vmem:[%s10173_s5 + $0x40] sm:$0xff]  ;;  %v11049_v18 = vld [vmem:[#allocation64_spill] sm:$0xff] }
 0x3ce   :  { %v11050_v28 = vld [vmem:[#allocation65_spill] sm:$0xff]  ;;  %v11051_v48 = vld [vmem:[#allocation54_spill] sm:$0xff] }
 0x3cf   :  { %2746 = vmatpush.msra.mxu1 %v11028_v29  ;;  %2786 = vmatpush.msra.mxu3 %v11029_v22  ;;  %v8557_v29 = vld [vmem:[%s10173_s5 + $0x20] sm:$0xff]  ;;  %v11052_v22 = vld [vmem:[#allocation59_spill] sm:$0xff] }
 0x3d1   :  { %2747 = vmatpush.msra.mxu1 %v7590_v11  ;;  %2787 = vmatpush.msra.mxu3 %v7595_v52  ;;  %v8441_v52 = vld [vmem:[%s10173_s5 + $0x1c0] sm:$0xff]  ;;  %v11033_v11 = vld [vmem:[#allocation49_spill] sm:$0xff] }
 0x3d3   :  { %v4347_v44 = vpop.eup %4346  ;;  %2748 = vmatpush.msra.mxu1 %v7602_v49  ;;  %2788 = vmatpush.msra.mxu3 %v11030_v31  ;;  %v11032_v49 = vld [vmem:[#allocation47_spill] sm:$0xff]  ;;  %v8566_v31 = vld [vmem:[%s10173_s5] sm:$0xff] }
 0x3d4   :  { %v8427_v54 = vmul.f32 %v4347_v44, %v2333_v47  ;;  %v11053_v47 = vld [vmem:[#allocation66_spill] sm:$0xff]  ;;  %v11054_v44 = vld [vmem:[#allocation55_spill] sm:$0xff] }
 0x3d5   :  { %2749 = vmatpush.msra.mxu1 %v11031_v26  ;;  %2789 = vmatpush.msra.mxu3 %v7628_v16  ;;  %v8450_v16 = vld [vmem:[%s10173_s5 + $0x1a0] sm:$0xff]  ;;  %v11055_v26 = vld [vmem:[#allocation60_spill] sm:$0xff] }
 0x3d6   :  { %2486 = vmatmul.f32.vlgmr.msrb.gmra.mxu0 %v8427_v54  ;;  %2526 = vmatmul.f32.vlgmr.msrb.gmra.mxu2 %v8427_v54 }
 0x3d7   :  { %2717 = vmatpush.msrb.mxu0 %v8432_v42  ;;  %2757 = vmatpush.msrb.mxu2 %v11032_v49  ;;  %v11056_v49 = vld [vmem:[#allocation67_spill] sm:$0xff] }
 0x3d8   :  { %2750 = vmatpush.msra.mxu1 %v11033_v11  ;;  %2790 = vmatpush.msra.mxu3 %v7647_v53  ;;  %v11035_v53 = vld [vmem:[#allocation39_spill] sm:$0xff]  ;;  %v11057_v11 = vld [vmem:[#allocation42_spill] sm:$0xff] }
 0x3d9   :  { %2718 = vmatpush.msrb.mxu0 %v8441_v52  ;;  %2758 = vmatpush.msrb.mxu2 %v11034_v13  ;;  %v11058_v13 = vld [vmem:[#allocation69_spill] sm:$0xff] }
 0x3da   :  { %2751 = vmatpush.msra.mxu1 %v7661_v55  ;;  %2791 = vmatpush.msra.mxu3 %v7666_v9  ;;  %v11036_v55 = vld [vmem:[#allocation50_spill] sm:$0xff] }
 0x3db   :  { %2719 = vmatpush.msrb.mxu0 %v8450_v16  ;;  %2759 = vmatpush.msrb.mxu2 %v11035_v53  ;;  %v8477_v9 = vld [vmem:[%s10173_s5 + $0x140] sm:$0xff]  ;;  %v11059_v53 = vld [vmem:[#allocation56_spill] sm:$0xff] }
 0x3dc   :  { %2752 = vmatpush.msra.mxu1 %v7680_v59  ;;  %2792 = vmatpush.msra.mxu3 %v7685_v61  ;;  %v11037_v59 = vld [vmem:[#allocation51_spill] sm:$0xff]  ;;  %v8486_v61 = vld [vmem:[%s10173_s5 + $0x120] sm:$0xff] }
 0x3dd   :  { %2720 = vmatpush.msrb.mxu0 %v8459_v35  ;;  %2760 = vmatpush.msrb.mxu2 %v11036_v55  ;;  %v11060_v55 = vld [vmem:[#allocation68_spill] sm:$0xff] }
 0x3de   :  { %2566 = vmatmul.f32.vlgmr.msra.gmra.mxu0 %v8427_v54  ;;  %2606 = vmatmul.f32.vlgmr.msra.gmra.mxu2 %v8427_v54 }
 0x3df   :  { %2721 = vmatpush.msrb.mxu0 %v8468_v2  ;;  %2753 = vmatmul.f32.vlgmr.msra.gmra.mxu1 %v8427_v54 }
 0x3e0   :  { %2761 = vmatpush.msrb.mxu2 %v11037_v59  ;;  %2793 = vmatmul.f32.vlgmr.msra.gmra.mxu3 %v8427_v54  ;;  %v11061_v59 = vld [vmem:[#allocation70_spill] sm:$0xff] }
 0x3e1   :  { %2722 = vmatpush.msrb.mxu0 %v8477_v9  ;;  %2989 = vmatpush.msrb.mxu1 %v7703_v43  ;;  %v8512_v43 = vld [vmem:[%s10173_s5 + $0xc0] sm:$0xff] }
 0x3e2   :  { %2762 = vmatpush.msrb.mxu2 %v7710_v0  ;;  %3029 = vmatpush.msrb.mxu3 %v7715_v27  ;;  %v11038_v27 = vld [vmem:[#allocation43_spill] sm:$0xff]  ;;  %v11039_v0 = vld [vmem:[#allocation40_spill] sm:$0xff] }
 0x3e3   :  { %2723 = vmatpush.msrb.mxu0 %v8486_v61  ;;  %2990 = vmatpush.msrb.mxu1 %v7798_v51  ;;  %v11040_v51 = vld [vmem:[#allocation57_spill] sm:$0xff] }
 0x3e4   :  { %2763 = vmatpush.msrb.mxu2 %v7723_v3  ;;  %3030 = vmatpush.msrb.mxu3 %v7803_v33  ;;  %v8521_v3 = vld [vmem:[%s10173_s5 + $0xa0] sm:$0xff]  ;;  %v11042_v33 = vld [vmem:[#allocation52_spill] sm:$0xff] }
 0x3e5   :  { %2724 = vmatpush.msrb.mxu0 %v8494_v4  ;;  %2991 = vmatpush.msrb.mxu1 %v7808_v6  ;;  %v8530_v6 = vld [vmem:[%s10173_s5 + $0x80] sm:$0xff] }
 0x3e6   :  { %2764 = vmatpush.msrb.mxu2 %v7732_v25  ;;  %3031 = vmatpush.msrb.mxu3 %v7815_v58  ;;  %v11041_v25 = vld [vmem:[#allocation44_spill] sm:$0xff]  ;;  %v11043_v58 = vld [vmem:[#allocation58_spill] sm:$0xff] }
 0x3e7   :  { %2725 = vmatpush.msrb.mxu0 %v8503_v7  ;;  %2992 = vmatpush.msrb.mxu1 %v11038_v27  ;;  %v11062_v27 = vld [vmem:[#allocation71_spill] sm:$0xff] }
 0x3e8   :  { %2765 = vmatpush.msrb.mxu2 %v11039_v0  ;;  %3032 = vmatpush.msrb.mxu3 %v11040_v51  ;;  %v11063_v0 = vld [vmem:[#allocation73_spill] sm:$0xff]  ;;  %v11065_v51 = vld [vmem:[#allocation74_spill] sm:$0xff] }
 0x3e9   :  { %2726 = vmatpush.msrb.mxu0 %v8512_v43  ;;  %2993 = vmatpush.msrb.mxu1 %v11041_v25  ;;  %v11066_v25 = vld [vmem:[#allocation75_spill] sm:$0xff] }
 0x3ea   :  { %2766 = vmatpush.msrb.mxu2 %v11042_v33  ;;  %3033 = vmatpush.msrb.mxu3 %v11043_v58  ;;  %v11070_v33 = vld [vmem:[#allocation79_spill] sm:$0xff]  ;;  %v11088_v58 = vld [vmem:[#allocation25_spill] sm:$0xff] }
 0x3eb   :  { %2727 = vmatpush.msrb.mxu0 %v8521_v3  ;;  %2994 = vmatpush.msrb.mxu1 %v11044_v5  ;;  %v11089_v5 = vld [vmem:[#allocation10_spill] sm:$0xff] }
 0x3ec   :  { %2767 = vmatpush.msrb.mxu2 %v11045_v38  ;;  %3034 = vmatpush.msrb.mxu3 %v11046_v21  ;;  %v11090_v38 = vld [vmem:[#allocation95_spill] sm:$0xff]  ;;  %v11091_v21 = vld [vmem:[#allocation96_spill] sm:$0xff] }
 0x3ed   :  { %2728 = vmatpush.msrb.mxu0 %v8530_v6  ;;  %2995 = vmatpush.msrb.mxu1 %v11047_v62  ;;  %v11092_v62 = vld [vmem:[#allocation97_spill] sm:$0xff] }
 0x3ee   :  { %2768 = vmatpush.msrb.mxu2 %v11048_v8  ;;  %3035 = vmatpush.msrb.mxu3 %v11049_v18  ;;  %v11093_v8 = vld [vmem:[#allocation98_spill] sm:$0xff]  ;;  %v11094_v18 = vld [vmem:[#allocation99_spill] sm:$0xff] }
 0x3ef   :  { %2729 = vmatpush.msrb.mxu0 %v8539_v56  ;;  %2996 = vmatpush.msrb.mxu1 %v11050_v28  ;;  %v11095_v28 = vld [vmem:[#allocation100_spill] sm:$0xff] }
 0x3f0   :  { %2769 = vmatpush.msrb.mxu2 %v11051_v48  ;;  %3036 = vmatpush.msrb.mxu3 %v11052_v22  ;;  %v11096_v48 = vld [vmem:[#allocation101_spill] sm:$0xff]  ;;  %v11097_v22 = vld [vmem:[#allocation102_spill] sm:$0xff] }
 0x3f1   :  { %2730 = vmatpush.msrb.mxu0 %v8548_v36  ;;  %2997 = vmatpush.msrb.mxu1 %v11053_v47  ;;  %v11098_v47 = vld [vmem:[#allocation103_spill] sm:$0xff] }
 0x3f2   :  { %2770 = vmatpush.msrb.mxu2 %v11054_v44  ;;  %3037 = vmatpush.msrb.mxu3 %v11055_v26  ;;  %v11099_v44 = vld [vmem:[#allocation104_spill] sm:$0xff]  ;;  %v11100_v26 = vld [vmem:[#allocation105_spill] sm:$0xff] }
 0x3f3   :  { %2731 = vmatpush.msrb.mxu0 %v8557_v29  ;;  %2998 = vmatpush.msrb.mxu1 %v11056_v49  ;;  %v11101_v49 = vld [vmem:[#allocation106_spill] sm:$0xff] }
 0x3f4   :  { %2771 = vmatpush.msrb.mxu2 %v11057_v11  ;;  %3038 = vmatpush.msrb.mxu3 %v11058_v13  ;;  %v11102_v11 = vld [vmem:[#allocation108_spill] sm:$0xff]  ;;  %v11103_v13 = vld [vmem:[#allocation109_spill] sm:$0xff] }
 0x3f5   :  { %2732 = vmatpush.msrb.mxu0 %v8566_v31  ;;  %2999 = vmatpush.msrb.mxu1 %v7904_v39  ;;  %v11064_v39 = vld [vmem:[#allocation72_spill] sm:$0xff] }
 0x3f6   :  { %2772 = vmatpush.msrb.mxu2 %v11059_v53  ;;  %2733 = vmatmul.f32.vlgmr.msrb.gmra.mxu0 %v8427_v54  ;;  %v11104_v53 = vld [vmem:[#allocation110_spill] sm:$0xff] }
 0x3f7   :  { %2773 = vmatmul.f32.vlgmr.msrb.gmra.mxu2 %v8427_v54  ;;  %3039 = vmatpush.msrb.mxu3 %v7909_v40  ;;  %v11067_v54 = vld [vmem:[#allocation77_spill] sm:$0xff]  ;;  %v11068_v40 = vld [vmem:[#allocation76_spill] sm:$0xff] }
 0x3f8   :  { %3000 = vmatpush.msrb.mxu1 %v7926_v10  ;;  %2969 = vmatpush.msra.mxu0 %v11060_v55  ;;  %v11069_v10 = vld [vmem:[#allocation78_spill] sm:$0xff]  ;;  %v11105_v55 = vld [vmem:[#allocation111_spill] sm:$0xff] }
 0x3f9   :  { %3040 = vmatpush.msrb.mxu3 %v7931_v50  ;;  %3009 = vmatpush.msra.mxu2 %v11061_v59  ;;  %v11071_v50 = vld [vmem:[#allocation80_spill] sm:$0xff] }
 0x3fa   :  { %3001 = vmatpush.msrb.mxu1 %v11062_v27  ;;  %2970 = vmatpush.msra.mxu0 %v11063_v0  ;;  %v11106_v59 = vld [vmem:[#allocation112_spill] sm:$0xff]  ;;  %v11107_v27 = vld [vmem:[#allocation113_spill] sm:$0xff]  ;;  %v11108_v0 = vld [vmem:[#allocation23_spill] sm:$0xff] }
 0x3fb   :  { %3041 = vmatpush.msrb.mxu3 %v11064_v39  ;;  %3010 = vmatpush.msra.mxu2 %v11065_v51  ;;  %v11109_v39 = vld [vmem:[#allocation107_spill] sm:$0xff]  ;;  %v11110_v51 = vld [vmem:[#allocation12_spill] sm:$0xff] }
 0x3fc   :  { %3002 = vmatpush.msrb.mxu1 %v11066_v25  ;;  %2971 = vmatpush.msra.mxu0 %v11067_v54  ;;  %v11111_v25 = vld [vmem:[#allocation13_spill] sm:$0xff]  ;;  %v8654_v54 = vld [vmem:[%s10174_s6 + $0x200] sm:$0xff] }
 0x3fd   :  { %3042 = vmatpush.msrb.mxu3 %v11068_v40  ;;  %3011 = vmatpush.msra.mxu2 %v11069_v10  ;;  %v8659_v40 = vld [vmem:[%s10174_s6 + $0x208] sm:$0xff]  ;;  %v8678_v10 = vld [vmem:[%s10174_s6 + $0x3d0] sm:$0xff] }
 0x3fe   :  { %3003 = vmatpush.msrb.mxu1 %v11070_v33  ;;  %2972 = vmatpush.msra.mxu0 %v8002_v24  ;;  %v11074_v24 = vld [vmem:[#allocation83_spill] sm:$0xff]  ;;  %v8683_v33 = vld [vmem:[%s10174_s6 + $0x3d8] sm:$0xff] }
 0x3ff   :  { %3043 = vmatpush.msrb.mxu3 %v11071_v50  ;;  %3012 = vmatpush.msra.mxu2 %v8007_v57  ;;  %v11073_v57 = vld [vmem:[#allocation82_spill] sm:$0xff]  ;;  %v8690_v50 = vld [vmem:[%s10174_s6 + $0x3b0] sm:$0xff] }
 0x400   :  { %2973 = vmatpush.msra.mxu0 %v8016_v23  ;;  %v11072_v23 = vld [vmem:[#allocation81_spill] sm:$0xff]  ;;  %3004 = vmatpush.msrb.mxu1 %v8654_v54 }
 0x401   :  { %3013 = vmatpush.msra.mxu2 %v8021_v19  ;;  %v11075_v19 = vld [vmem:[#allocation84_spill] sm:$0xff]  ;;  %3044 = vmatpush.msrb.mxu3 %v8659_v40 }
 0x402   :  { %2974 = vmatpush.msra.mxu0 %v8030_v63  ;;  %v11076_v63 = vld [vmem:[#allocation85_spill] sm:$0xff] }
 0x403   :  { %3014 = vmatpush.msra.mxu2 %v8035_v14  ;;  %v11077_v14 = vld [vmem:[#allocation86_spill] sm:$0xff] }
 0x404   :  { %2975 = vmatpush.msra.mxu0 %v8044_v46  ;;  %v11078_v46 = vld [vmem:[#allocation87_spill] sm:$0xff] }
 0x405   :  { %3015 = vmatpush.msra.mxu2 %v8049_v32  ;;  %v11079_v32 = vld [vmem:[#allocation88_spill] sm:$0xff] }
 0x406   :  { %2976 = vmatpush.msra.mxu0 %v8058_v17  ;;  %v11080_v17 = vld [vmem:[#allocation89_spill] sm:$0xff] }
 0x407   :  { %3016 = vmatpush.msra.mxu2 %v8063_v20  ;;  %v11081_v20 = vld [vmem:[#allocation90_spill] sm:$0xff] }
 0x408   :  { %2977 = vmatpush.msra.mxu0 %v8072_v34  ;;  %v11082_v34 = vld [vmem:[#allocation21_spill] sm:$0xff] }
 0x409   :  { %3017 = vmatpush.msra.mxu2 %v8077_v37  ;;  %v11083_v37 = vld [vmem:[#allocation27_spill] sm:$0xff] }
 0x40a   :  { %2978 = vmatpush.msra.mxu0 %v8086_v30  ;;  %v11084_v30 = vld [vmem:[#allocation91_spill] sm:$0xff] }
 0x40b   :  { %3018 = vmatpush.msra.mxu2 %v8091_v45  ;;  %v11085_v45 = vld [vmem:[#allocation92_spill] sm:$0xff] }
 0x40c   :  { %2979 = vmatpush.msra.mxu0 %v8100_v15  ;;  %v11086_v15 = vld [vmem:[#allocation24_spill] sm:$0xff] }
 0x40d   :  { %3019 = vmatpush.msra.mxu2 %v8105_v41  ;;  %v11087_v41 = vld [vmem:[#allocation30_spill] sm:$0xff] }
 0x40e   :  { %2980 = vmatpush.msra.mxu0 %v11072_v23  ;;  %v8695_v23 = vld [vmem:[%s10174_s6 + $0x3b8] sm:$0xff] }
 0x40f   :  { %3020 = vmatpush.msra.mxu2 %v11073_v57  ;;  %v8702_v57 = vld [vmem:[%s10174_s6 + $0x390] sm:$0xff] }
 0x410   :  { %2981 = vmatpush.msra.mxu0 %v11074_v24  ;;  %v8707_v24 = vld [vmem:[%s10174_s6 + $0x398] sm:$0xff] }
 0x411   :  { %3021 = vmatpush.msra.mxu2 %v11075_v19  ;;  %v8714_v19 = vld [vmem:[%s10174_s6 + $0x370] sm:$0xff] }
 0x412   :  { %2982 = vmatpush.msra.mxu0 %v11076_v63  ;;  %v8719_v63 = vld [vmem:[%s10174_s6 + $0x378] sm:$0xff] }
 0x413   :  { %3022 = vmatpush.msra.mxu2 %v11077_v14  ;;  %v8726_v14 = vld [vmem:[%s10174_s6 + $0x350] sm:$0xff] }
 0x414   :  { %2983 = vmatpush.msra.mxu0 %v11078_v46  ;;  %v8731_v46 = vld [vmem:[%s10174_s6 + $0x358] sm:$0xff] }
 0x415   :  { %3023 = vmatpush.msra.mxu2 %v11079_v32  ;;  %v8738_v32 = vld [vmem:[%s10174_s6 + $0x330] sm:$0xff] }
 0x416   :  { %2984 = vmatpush.msra.mxu0 %v11080_v17  ;;  %v8743_v17 = vld [vmem:[%s10174_s6 + $0x338] sm:$0xff] }
 0x417   :  { %3024 = vmatpush.msra.mxu2 %v11081_v20  ;;  %v8750_v20 = vld [vmem:[%s10174_s6 + $0x310] sm:$0xff] }
 0x418   :  { %3049 = vmatpush.msrb.mxu0 %v11082_v34  ;;  %v8755_v34 = vld [vmem:[%s10174_s6 + $0x318] sm:$0xff] }
 0x419   :  { %3089 = vmatpush.msrb.mxu2 %v11083_v37  ;;  %v8762_v37 = vld [vmem:[%s10174_s6 + $0x2f0] sm:$0xff] }
 0x41a   :  { %3050 = vmatpush.msrb.mxu0 %v11084_v30  ;;  %v8767_v30 = vld [vmem:[%s10174_s6 + $0x2f8] sm:$0xff] }
 0x41b   :  { %3090 = vmatpush.msrb.mxu2 %v11085_v45  ;;  %v8774_v45 = vld [vmem:[%s10174_s6 + $0x2d0] sm:$0xff] }
 0x41c   :  { %3051 = vmatpush.msrb.mxu0 %v11086_v15  ;;  %v8779_v15 = vld [vmem:[%s10174_s6 + $0x2d8] sm:$0xff] }
 0x41d   :  { %3091 = vmatpush.msrb.mxu2 %v11087_v41  ;;  %v8786_v41 = vld [vmem:[%s10174_s6 + $0x2b0] sm:$0xff] }
 0x41e   :  { %3052 = vmatpush.msrb.mxu0 %v11088_v58  ;;  %v8791_v58 = vld [vmem:[%s10174_s6 + $0x2b8] sm:$0xff] }
 0x41f   :  { %3092 = vmatpush.msrb.mxu2 %v11089_v5 }
 0x420   :  { %3053 = vmatpush.msrb.mxu0 %v11090_v38 }
 0x421   :  { %3093 = vmatpush.msrb.mxu2 %v11091_v21  ;;  %v11112_v21 = vld [vmem:[#allocation26_spill] sm:$0xff] }
 0x422   :  { %3054 = vmatpush.msrb.mxu0 %v11092_v62 }
 0x423   :  { %3094 = vmatpush.msrb.mxu2 %v11093_v8  ;;  %v8799_v8 = vld [vmem:[%s10174_s6 + $0x290] sm:$0xff] }
 0x424   :  { %3055 = vmatpush.msrb.mxu0 %v11094_v18  ;;  %v8804_v18 = vld [vmem:[%s10174_s6 + $0x298] sm:$0xff] }
 0x425   :  { %3095 = vmatpush.msrb.mxu2 %v11095_v28  ;;  %11113 = vst [vmem:[#allocation14_spill] sm:$0xff] %v8804_v18 }
 0x426   :  { %3056 = vmatpush.msrb.mxu0 %v11096_v48  ;;  %v8811_v48 = vld [vmem:[%s10174_s6 + $0x270] sm:$0xff] }
 0x427   :  { %3096 = vmatpush.msrb.mxu2 %v11097_v22  ;;  %11114 = vst [vmem:[#allocation15_spill] sm:$0xff] %v8811_v48  ;;  %v8816_v22 = vld [vmem:[%s10174_s6 + $0x278] sm:$0xff] }
 0x428   :  { %3057 = vmatpush.msrb.mxu0 %v11098_v47  ;;  %11115 = vst [vmem:[#allocation16_spill] sm:$0xff] %v8816_v22 }
 0x429   :  { %3097 = vmatpush.msrb.mxu2 %v11099_v44 }
 0x42a   :  { %3058 = vmatpush.msrb.mxu0 %v11100_v26 }
 0x42b   :  { %3098 = vmatpush.msrb.mxu2 %v11101_v49  ;;  %v11116_v49 = vld [vmem:[#allocation93_spill] sm:$0xff] }
 0x42c   :  { %3059 = vmatpush.msrb.mxu0 %v11102_v11  ;;  %v11117_v11 = vld [vmem:[#allocation94_spill] sm:$0xff] }
 0x42d   :  { %3099 = vmatpush.msrb.mxu2 %v11103_v13  ;;  %v11118_v13 = vld [vmem:[#allocation22_spill] sm:$0xff] }
 0x42e   :  { %3060 = vmatpush.msrb.mxu0 %v11104_v53 }
 0x42f   :  { %3100 = vmatpush.msrb.mxu2 %v11105_v55  ;;  %v8826_v55 = vld [vmem:[%s10174_s6 + $0x230] sm:$0xff] }
 0x430   :  { %3061 = vmatpush.msrb.mxu0 %v11106_v59  ;;  %11119 = vst [vmem:[#allocation17_spill] sm:$0xff] %v8826_v55  ;;  %v8831_v59 = vld [vmem:[%s10174_s6 + $0x238] sm:$0xff] }
 0x431   :  { %3101 = vmatpush.msrb.mxu2 %v11107_v27  ;;  %11120 = vst [vmem:[#allocation18_spill] sm:$0xff] %v8831_v59 }
 0x432   :  { %3062 = vmatpush.msrb.mxu0 %v11108_v0 }
 0x433   :  { %3102 = vmatpush.msrb.mxu2 %v11109_v39  ;;  %v11121_v39 = vld [vmem:[#allocation29_spill] sm:$0xff] }
 0x434   :  { %3063 = vmatpush.msrb.mxu0 %v11110_v51 }
 0x435   :  { %3103 = vmatpush.msrb.mxu2 %v8383_v12  ;;  %v8666_v12 = vld [vmem:[%s10174_s6 + $0x3f0] sm:$0xff] }
 0x436   :  { %3064 = vmatpush.msrb.mxu0 %v8388_v60  ;;  %v8671_v60 = vld [vmem:[%s10174_s6 + $0x3f8] sm:$0xff]  ;;  %3069 = vmatpush.msra.mxu1 %v8666_v12 }
 0x437   :  { %3104 = vmatpush.msrb.mxu2 %v11111_v25  ;;  %3109 = vmatpush.msra.mxu3 %v8671_v60  ;;  %v8839_v25 = vld [vmem:[%s10174_s6 + $0x210] sm:$0xff] }
 0x438   :  { %3070 = vmatpush.msra.mxu1 %v8678_v10  ;;  %11122 = vst [vmem:[#allocation19_spill] sm:$0xff] %v8839_v25 }
 0x439   :  { %3110 = vmatpush.msra.mxu3 %v8683_v33  ;;  %v2507_v5 = vpop.f32.mrf.mxu1 }
 0x43a   :  { %3071 = vmatpush.msra.mxu1 %v8690_v50 }
 0x43b   :  { %3111 = vmatpush.msra.mxu3 %v8695_v23 }
 0x43c   :  { %3072 = vmatpush.msra.mxu1 %v8702_v57 }
 0x43d   :  { %3112 = vmatpush.msra.mxu3 %v8707_v24 }
 0x43e   :  { %3073 = vmatpush.msra.mxu1 %v8714_v19 }
 0x43f   :  { %3113 = vmatpush.msra.mxu3 %v8719_v63  ;;  %v2547_v44 = vpop.f32.mrf.mxu3 }
 0x440   :  { %3074 = vmatpush.msra.mxu1 %v8726_v14 }
 0x441   :  { %3114 = vmatpush.msra.mxu3 %v8731_v46 }
 0x442   :  { %3075 = vmatpush.msra.mxu1 %v8738_v32 }
 0x443   :  { %3115 = vmatpush.msra.mxu3 %v8743_v17 }
 0x444   :  { %3076 = vmatpush.msra.mxu1 %v8750_v20 }
 0x445   :  { %3116 = vmatpush.msra.mxu3 %v8755_v34 }
 0x446   :  { %3077 = vmatpush.msra.mxu1 %v8762_v37 }
 0x447   :  { %3117 = vmatpush.msra.mxu3 %v8767_v30 }
 0x448   :  { %3078 = vmatpush.msra.mxu1 %v8774_v45 }
 0x449   :  { %3118 = vmatpush.msra.mxu3 %v8779_v15 }
 0x44a   :  { %3079 = vmatpush.msra.mxu1 %v8786_v41 }
 0x44b   :  { %3119 = vmatpush.msra.mxu3 %v8791_v58 }
 0x44c   :  { %3080 = vmatpush.msra.mxu1 %v8799_v8 }
 0x44d   :  { %3120 = vmatpush.msra.mxu3 %v8804_v18 }
 0x44e   :  { %3081 = vmatpush.msra.mxu1 %v8811_v48 }
 0x44f   :  { %3121 = vmatpush.msra.mxu3 %v8816_v22 }
 0x450   :  { %3082 = vmatpush.msra.mxu1 %v11116_v49 }
 0x451   :  { %3122 = vmatpush.msra.mxu3 %v11117_v11  ;;  %v2627_v11 = vpop.f32.mrf.mxu3 }
 0x452   :  { %3083 = vmatpush.msra.mxu1 %v8826_v55 }
 0x453   :  { %v2487_v38 = vpop.f32.mrf.mxu0  ;;  %3123 = vmatpush.msra.mxu3 %v8831_v59 }
 0x454   :  { %v2488_v62 = vadd.f32 %v2487_v38, %v11112_v21  ;;  %v2587_v38 = vpop.f32.mrf.mxu1  ;;  %3084 = vmatpush.msra.mxu1 %v8839_v25 }
 0x456   :  { %v2508_v28 = vadd.f32 %v2507_v5, %v2488_v62  ;;  %v8844_v5 = vld [vmem:[%s10174_s6 + $0x218] sm:$0xff] }
 0x457   :  { %11123 = vst [vmem:[#allocation20_spill] sm:$0xff] %v8844_v5  ;;  %3124 = vmatpush.msra.mxu3 %v8844_v5 }
 0x458   :  { %v2630_v47 = vmul.f32 0.5, %v2508_v28 }
 0x459   :  { %v2527_v26 = vpop.f32.mrf.mxu2 }
 0x45a   :  { %v2528_v53 = vadd.f32 %v2527_v26, %v11118_v13  ;;  %4348 = vtanh.f32 %v2630_v47  ;;  %v11124_v26 = vld [vmem:[#allocation11_spill] sm:$0xff] }
 0x45b   :  { %v2567_v27 = vpop.f32.mrf.mxu0 }
 0x45c   :  { %v2548_v0 = vadd.f32 %v2547_v44, %v2528_v53  ;;  %v2568_v51 = vadd.f32 %v2567_v27, %v11121_v39  ;;  %v2754_v55 = vpop.f32.mrf.mxu1 }
 0x45d   :  { %v2802_v5 = vrot.slane %v2754_v55, 6 }
 0x45e   :  { %v2634_v62 = vmul.f32 0.5, %v2548_v0  ;;  %v2588_v28 = vadd.f32 %v2587_v38, %v2568_v51  ;;  %v11125_v0 = vld [vmem:[#allocation28_spill] sm:$0xff] }
 0x460   :  { %4350 = vtanh.f32 %v2634_v62  ;;  %v4349_v44 = vpop.eup %4348  ;;  %v2650_v62 = vld [vmem:[#allocation2 + $0x20] sm:$0xc] }
 0x461   :  { %v2607_v47 = vpop.f32.mrf.mxu2  ;;  %4352 = vtanh.f32 %v2588_v28  ;;  %v2632_v27 = vmul.f32 0.5, %v4349_v44  ;;  %v2810_v28 = vadd.f32 %v2802_v5, %v2650_v62  ;;  %v8856_v62 = vld [vmem:[%s10173_s5 + $0x1e8] sm:$0xff] }
 0x462   :  { %v2608_v49 = vadd.f32 %v2607_v47, %v11124_v26 }
 0x463   :  { %v2633_v25 = vadd.f32 0.5, %v2632_v27 }
 0x464   :  { %v2628_v53 = vadd.f32 %v2627_v11, %v2608_v49  ;;  %v2817_v49 = vmul.f32 0.5, %v2810_v28  ;;  %v2794_v11 = vpop.f32.mrf.mxu3  ;;  %v8861_v28 = vld [vmem:[%s10173_s5 + $0x1f8] sm:$0xff] }
 0x465   :  { %v2804_v27 = vrot.slane %v2794_v11, 6  ;;  %v8871_v11 = vld [vmem:[%s10173_s5 + $0x1d8] sm:$0xff] }
 0x466   :  { %v4351_v59 = vpop.eup %4350  ;;  %v2639_v39 = vmul.f32 0.5, %v2628_v53 }
 0x467   :  { %v2636_v13 = vmul.f32 0.5, %v4351_v59  ;;  %v4353_v22 = vpop.eup %4352 }
 0x468   :  { %4354 = vtanh.f32 %v2639_v39  ;;  %v2644_v38 = vmul.f32 %v4353_v22, %v2633_v25 }
 0x469   :  { %v2637_v48 = vadd.f32 0.5, %v2636_v13  ;;  %v2649_v13 = vld [vmem:[#allocation2 + $0x8] sm:$0xc] }
 0x46b   :  { %v2643_v51 = vmul.f32 %v2637_v48, %v11125_v0  ;;  %v2652_v0 = vld [vmem:[#allocation2 + $0x38] sm:$0xc] }
 0x46c   :  { %v2812_v5 = vadd.f32 %v2804_v27, %v2652_v0 }
 0x46d   :  { %v8850_v18 = vadd.f32 %v2644_v38, %v2643_v51 }
 0x46e   :  { %v4355_v47 = vpop.eup %4354 }
 0x46f   :  { %4356 = vtanh.f32 %v8850_v18  ;;  %v2641_v44 = vmul.f32 0.5, %v4355_v47 }
 0x470   :  { %4358 = vtanh.f32 %v2817_v49  ;;  %v8866_v49 = vld [vmem:[%s10173_s5 + $0x1c8] sm:$0xff] }
 0x471   :  { %v2642_v59 = vadd.f32 0.5, %v2641_v44  ;;  %v2651_v44 = vld [vmem:[#allocation2 + $0x28] sm:$0xc] }
 0x473   :  { %v2734_v53 = vpop.f32.mrf.mxu0 }
 0x474   :  { %v2801_v26 = vrot.slane %v2734_v53, 6 }
 0x475   :  { %v4357_v39 = vpop.eup %4356 }
 0x476   :  { %v2647_v55 = vmul.f32 %v4357_v39, %v2642_v59  ;;  %v2809_v48 = vadd.f32 %v2801_v26, %v2649_v13  ;;  %v4359_v47 = vpop.eup %4358  ;;  %v2822_v39 = vmul.f32 0.5, %v2812_v5  ;;  %v8878_v13 = vld [vmem:[%s10173_s5 + $0x1a8] sm:$0xff] }
 0x477   :  { %v2819_v59 = vmul.f32 0.5, %v4359_v47  ;;  %v8902_v5 = vld [vmem:[%s10173_s5 + $0x168] sm:$0xff] }
 0x478   :  { %2648 = vst [vmem:[#allocation3 + $0x8] sm:$0x3] %v2647_v55  ;;  %v2813_v22 = vmul.f32 0.5, %v2809_v48  ;;  %v2835_v25 = vrot.slane %v2647_v55, 6  ;;  %v8883_v55 = vld [vmem:[%s10173_s5 + $0x1b8] sm:$0xff]  ;;  %v8890_v48 = vld [vmem:[%s10173_s5 + $0x188] sm:$0xff] }
 0x479   :  { %v2820_v0 = vadd.f32 0.5, %v2819_v59  ;;  %11126 = vst [vmem:[#allocation31_spill] sm:$0xff] %v8902_v5 }
 0x47a   :  { %4360 = vtanh.f32 %v2813_v22  ;;  %v2774_v51 = vpop.f32.mrf.mxu2  ;;  %v2966_v38 = vrot.slane %v2835_v25, 2  ;;  %v8895_v22 = vld [vmem:[%s10173_s5 + $0x198] sm:$0xff] }
 0x47b   :  { %v2803_v26 = vrot.slane %v2774_v51, 6  ;;  %v8907_v51 = vld [vmem:[%s10173_s5 + $0x178] sm:$0xff] }
 0x47c   :  { %3005 = vmatmul.f32.vlgmr.msrb.gmra.mxu1 %v2966_v38  ;;  %3045 = vmatmul.f32.vlgmr.msrb.gmra.mxu3 %v2966_v38 }
 0x47d   :  { %v2811_v53 = vadd.f32 %v2803_v26, %v2651_v44  ;;  %3236 = vmatpush.msrb.mxu1 %v8856_v62  ;;  %3276 = vmatpush.msrb.mxu3 %v8861_v28  ;;  %v2827_v26 = vrot.slane %v8414_v1, 6  ;;  %v8915_v44 = vld [vmem:[%s10173_s5 + $0x148] sm:$0xff] }
 0x47e   :  { %v8927_v1 = vld [vmem:[%s10173_s5 + $0x128] sm:$0xff] }
 0x47f   :  { %4362 = vtanh.f32 %v2811_v53  ;;  %3237 = vmatpush.msrb.mxu1 %v8866_v49  ;;  %3277 = vmatpush.msrb.mxu3 %v8871_v11  ;;  %v8920_v53 = vld [vmem:[%s10173_s5 + $0x158] sm:$0xff]  ;;  %11128 = vst [vmem:[#allocation32_spill] sm:$0xff] %v8927_v1 }
 0x480   :  { %v4361_v27 = vpop.eup %4360  ;;  %4364 = vtanh.f32 %v2822_v39  ;;  %11127 = vst [vmem:[#allocation33_spill] sm:$0xff] %v8920_v53  ;;  %v2829_v39 = vmul.f32 %v2827_v26, %v2820_v0  ;;  %v8941_v0 = vld [vmem:[%s10173_s5 + $0x108] sm:$0xff] }
 0x481   :  { %v2815_v25 = vmul.f32 0.5, %v4361_v27  ;;  %3238 = vmatpush.msrb.mxu1 %v8878_v13  ;;  %3278 = vmatpush.msrb.mxu3 %v8883_v55  ;;  %11130 = vst [vmem:[#allocation34_spill] sm:$0xff] %v8941_v0  ;;  %v8954_v26 = vld [vmem:[%s10173_s5 + $0xe8] sm:$0xff] }
 0x482   :  { %11132 = vst [vmem:[#allocation45_spill] sm:$0xff] %v8954_v26 }
 0x483   :  { %v2816_v47 = vadd.f32 0.5, %v2815_v25  ;;  %3239 = vmatpush.msrb.mxu1 %v8890_v48  ;;  %3279 = vmatpush.msrb.mxu3 %v8895_v22 }
 0x484   :  { %3085 = vmatmul.f32.vlgmr.msra.gmra.mxu1 %v2966_v38  ;;  %3125 = vmatmul.f32.vlgmr.msra.gmra.mxu3 %v2966_v38  ;;  %v8932_v38 = vld [vmem:[%s10173_s5 + $0x138] sm:$0xff] }
 0x485   :  { %v4363_v59 = vpop.eup %4362  ;;  %3240 = vmatpush.msrb.mxu1 %v8902_v5  ;;  %3280 = vmatpush.msrb.mxu3 %v8907_v51  ;;  %11129 = vst [vmem:[#allocation35_spill] sm:$0xff] %v8932_v38 }
 0x486   :  { %v2830_v27 = vmul.f32 %v4363_v59, %v2816_v47  ;;  %v4365_v25 = vpop.eup %4364  ;;  %v8946_v47 = vld [vmem:[%s10173_s5 + $0x118] sm:$0xff] }
 0x487   :  { %3241 = vmatpush.msrb.mxu1 %v8915_v44  ;;  %3281 = vmatpush.msrb.mxu3 %v8920_v53  ;;  %11131 = vst [vmem:[#allocation36_spill] sm:$0xff] %v8946_v47  ;;  %v8959_v59 = vld [vmem:[%s10173_s5 + $0xf8] sm:$0xff] }
 0x488   :  { %v8936_v5 = vadd.f32 %v2830_v27, %v2829_v39  ;;  %11133 = vst [vmem:[#allocation37_spill] sm:$0xff] %v8959_v59  ;;  %v2824_v39 = vmul.f32 0.5, %v4365_v25  ;;  %v8966_v27 = vld [vmem:[%s10173_s5 + $0xc8] sm:$0xff] }
 0x489   :  { %3242 = vmatpush.msrb.mxu1 %v8927_v1  ;;  %3282 = vmatpush.msrb.mxu3 %v8932_v38  ;;  %11134 = vst [vmem:[#allocation46_spill] sm:$0xff] %v8966_v27  ;;  %v8971_v38 = vld [vmem:[%s10173_s5 + $0xd8] sm:$0xff]  ;;  %v8978_v25 = vld [vmem:[%s10173_s5 + $0xa8] sm:$0xff] }
 0x48a   :  { %4366 = vtanh.f32 %v8936_v5  ;;  %11135 = vst [vmem:[#allocation38_spill] sm:$0xff] %v8971_v38 }
 0x48b   :  { %3243 = vmatpush.msrb.mxu1 %v8941_v0  ;;  %3283 = vmatpush.msrb.mxu3 %v8946_v47  ;;  %v8983_v47 = vld [vmem:[%s10173_s5 + $0xb8] sm:$0xff]  ;;  %v2825_v0 = vadd.f32 0.5, %v2824_v39 }
 0x48d   :  { %3244 = vmatpush.msrb.mxu1 %v8954_v26  ;;  %3284 = vmatpush.msrb.mxu3 %v8959_v59  ;;  %v8990_v59 = vld [vmem:[%s10173_s5 + $0x88] sm:$0xff]  ;;  %v8995_v26 = vld [vmem:[%s10173_s5 + $0x98] sm:$0xff] }
 0x48e   :  { %11136 = vst [vmem:[#allocation47_spill] sm:$0xff] %v8995_v26 }
 0x48f   :  { %3245 = vmatpush.msrb.mxu1 %v8966_v27  ;;  %3285 = vmatpush.msrb.mxu3 %v8971_v38  ;;  %v9006_v38 = vld [vmem:[%s10173_s5 + $0x1f0] sm:$0xff]  ;;  %v9011_v27 = vld [vmem:[%s10173_s5 + $0x68] sm:$0xff] }
 0x490   :  { %v4367_v1 = vpop.eup %4366  ;;  %11137 = vst [vmem:[#allocation49_spill] sm:$0xff] %v9006_v38 }
 0x491   :  { %v2833_v53 = vmul.f32 %v4367_v1, %v2825_v0  ;;  %3246 = vmatpush.msrb.mxu1 %v8978_v25  ;;  %3286 = vmatpush.msrb.mxu3 %v8983_v47  ;;  %11138 = vst [vmem:[#allocation48_spill] sm:$0xff] %v9011_v27  ;;  %v9016_v1 = vld [vmem:[%s10173_s5 + $0x78] sm:$0xff]  ;;  %v9030_v0 = vld [vmem:[%s10173_s5 + $0x48] sm:$0xff] }
 0x492   :  { %11140 = vst [vmem:[#allocation50_spill] sm:$0xff] %v9030_v0 }
 0x493   :  { %v8999_v39 = vrot.slane %v2833_v53, 2  ;;  %3247 = vmatpush.msrb.mxu1 %v8990_v59  ;;  %3287 = vmatpush.msrb.mxu3 %v8995_v26  ;;  %v9023_v53 = vld [vmem:[%s10173_s5 + $0x1d0] sm:$0xff]  ;;  %v9035_v26 = vld [vmem:[%s10173_s5 + $0x58] sm:$0xff] }
 0x494   :  { %11139 = vst [vmem:[#allocation39_spill] sm:$0xff] %v9023_v53 }
 0x495   :  { %2985 = vmatmul.f32.vlgmr.msra.gmra.mxu0 %v8999_v39  ;;  %3025 = vmatmul.f32.vlgmr.msra.gmra.mxu2 %v8999_v39 }
 0x496   :  { %3216 = vmatpush.msra.mxu0 %v8432_v42  ;;  %3256 = vmatpush.msra.mxu2 %v9006_v38  ;;  %v9042_v42 = vld [vmem:[%s10173_s5 + $0x1b0] sm:$0xff]  ;;  %v9049_v38 = vld [vmem:[%s10173_s5 + $0x28] sm:$0xff] }
 0x497   :  { %3248 = vmatpush.msrb.mxu1 %v9011_v27  ;;  %3288 = vmatpush.msrb.mxu3 %v9016_v1  ;;  %v9054_v27 = vld [vmem:[%s10173_s5 + $0x38] sm:$0xff] }
 0x498   :  { %3217 = vmatpush.msra.mxu0 %v8441_v52  ;;  %3257 = vmatpush.msra.mxu2 %v9023_v53  ;;  %v9061_v52 = vld [vmem:[%s10173_s5 + $0x190] sm:$0xff]  ;;  %v9068_v53 = vld [vmem:[%s10173_s5 + $0x8] sm:$0xff] }
 0x499   :  { %3249 = vmatpush.msrb.mxu1 %v9030_v0  ;;  %3289 = vmatpush.msrb.mxu3 %v9035_v26  ;;  %11141 = vst [vmem:[#allocation51_spill] sm:$0xff] %v9061_v52  ;;  %v9073_v0 = vld [vmem:[%s10173_s5 + $0x18] sm:$0xff] }
 0x49a   :  { %3218 = vmatpush.msra.mxu0 %v8450_v16  ;;  %3258 = vmatpush.msra.mxu2 %v9042_v42  ;;  %v9084_v16 = vld [vmem:[%s10173_s5 + $0x170] sm:$0xff] }
 0x49b   :  { %3250 = vmatpush.msrb.mxu1 %v9049_v38  ;;  %3290 = vmatpush.msrb.mxu3 %v9054_v27 }
 0x49c   :  { %3219 = vmatpush.msra.mxu0 %v8459_v35  ;;  %3259 = vmatpush.msra.mxu2 %v9061_v52  ;;  %v9093_v35 = vld [vmem:[%s10173_s5 + $0x150] sm:$0xff] }
 0x49d   :  { %3251 = vmatpush.msrb.mxu1 %v9068_v53  ;;  %3291 = vmatpush.msrb.mxu3 %v9073_v0  ;;  %v9101_v52 = vld [vmem:[%s10173_s5 + $0x130] sm:$0xff] }
 0x49e   :  { %3065 = vmatmul.f32.vlgmr.msrb.gmra.mxu0 %v8999_v39  ;;  %3105 = vmatmul.f32.vlgmr.msrb.gmra.mxu2 %v8999_v39 }
 0x49f   :  { %3220 = vmatpush.msra.mxu0 %v8468_v2  ;;  %3252 = vmatmul.f32.vlgmr.msrb.gmra.mxu1 %v8999_v39  ;;  %v9108_v2 = vld [vmem:[%s10173_s5 + $0x110] sm:$0xff] }
 0x4a0   :  { %3260 = vmatpush.msra.mxu2 %v9084_v16  ;;  %3292 = vmatmul.f32.vlgmr.msrb.gmra.mxu3 %v8999_v39 }
 0x4a1   :  { %3221 = vmatpush.msra.mxu0 %v8477_v9  ;;  %v9115_v9 = vld [vmem:[%s10173_s5 + $0xf0] sm:$0xff] }
 0x4a2   :  { %3261 = vmatpush.msra.mxu2 %v9093_v35  ;;  %11142 = vst [vmem:[#allocation43_spill] sm:$0xff] %v9115_v9 }
 0x4a3   :  { %3222 = vmatpush.msra.mxu0 %v8486_v61  ;;  %v9122_v61 = vld [vmem:[%s10173_s5 + $0xd0] sm:$0xff] }
 0x4a4   :  { %3262 = vmatpush.msra.mxu2 %v9101_v52  ;;  %11143 = vst [vmem:[#allocation40_spill] sm:$0xff] %v9122_v61 }
 0x4a5   :  { %3223 = vmatpush.msra.mxu0 %v8494_v4  ;;  %v9129_v4 = vld [vmem:[%s10173_s5 + $0xb0] sm:$0xff] }
 0x4a6   :  { %3263 = vmatpush.msra.mxu2 %v9108_v2  ;;  %11144 = vst [vmem:[#allocation57_spill] sm:$0xff] %v9129_v4 }
 0x4a7   :  { %3224 = vmatpush.msra.mxu0 %v8503_v7  ;;  %v9136_v7 = vld [vmem:[%s10173_s5 + $0x90] sm:$0xff] }
 0x4a8   :  { %3264 = vmatpush.msra.mxu2 %v9115_v9  ;;  %11145 = vst [vmem:[#allocation44_spill] sm:$0xff] %v9136_v7  ;;  %v9237_v9 = vld [vmem:[%s10174_s6 + $0x348] sm:$0xff] }
 0x4a9   :  { %3225 = vmatpush.msra.mxu0 %v8512_v43  ;;  %v9143_v43 = vld [vmem:[%s10173_s5 + $0x70] sm:$0xff]  ;;  %11155 = vst [vmem:[#allocation54_spill] sm:$0xff] %v9237_v9 }
 0x4aa   :  { %3265 = vmatpush.msra.mxu2 %v9122_v61  ;;  %11146 = vst [vmem:[#allocation52_spill] sm:$0xff] %v9143_v43  ;;  %v9232_v61 = vld [vmem:[%s10174_s6 + $0x340] sm:$0xff] }
 0x4ab   :  { %3226 = vmatpush.msra.mxu0 %v8521_v3  ;;  %v9150_v3 = vld [vmem:[%s10173_s5 + $0x50] sm:$0xff]  ;;  %11154 = vst [vmem:[#allocation65_spill] sm:$0xff] %v9232_v61 }
 0x4ac   :  { %3266 = vmatpush.msra.mxu2 %v9129_v4  ;;  %11147 = vst [vmem:[#allocation58_spill] sm:$0xff] %v9150_v3  ;;  %v9227_v4 = vld [vmem:[%s10174_s6 + $0x368] sm:$0xff] }
 0x4ad   :  { %3227 = vmatpush.msra.mxu0 %v8530_v6  ;;  %v9157_v6 = vld [vmem:[%s10173_s5 + $0x30] sm:$0xff]  ;;  %11153 = vst [vmem:[#allocation64_spill] sm:$0xff] %v9227_v4 }
 0x4ae   :  { %3267 = vmatpush.msra.mxu2 %v9136_v7  ;;  %11148 = vst [vmem:[#allocation61_spill] sm:$0xff] %v9157_v6  ;;  %v9220_v7 = vld [vmem:[%s10174_s6 + $0x360] sm:$0xff] }
 0x4af   :  { %3228 = vmatpush.msra.mxu0 %v8539_v56  ;;  %v9164_v56 = vld [vmem:[%s10173_s5 + $0x10] sm:$0xff]  ;;  %11152 = vst [vmem:[#allocation41_spill] sm:$0xff] %v9220_v7 }
 0x4b0   :  { %3268 = vmatpush.msra.mxu2 %v9143_v43  ;;  %11149 = vst [vmem:[#allocation53_spill] sm:$0xff] %v9164_v56  ;;  %v9215_v43 = vld [vmem:[%s10174_s6 + $0x388] sm:$0xff] }
 0x4b1   :  { %3229 = vmatpush.msra.mxu0 %v8548_v36  ;;  %v9174_v36 = vld [vmem:[%s10174_s6 + $0x3e0] sm:$0xff]  ;;  %11151 = vst [vmem:[#allocation62_spill] sm:$0xff] %v9215_v43 }
 0x4b2   :  { %3269 = vmatpush.msra.mxu2 %v9150_v3  ;;  %3488 = vmatpush.msra.mxu1 %v9174_v36  ;;  %v9210_v3 = vld [vmem:[%s10174_s6 + $0x380] sm:$0xff] }
 0x4b3   :  { %3230 = vmatpush.msra.mxu0 %v8557_v29  ;;  %v9179_v29 = vld [vmem:[%s10174_s6 + $0x3e8] sm:$0xff]  ;;  %11150 = vst [vmem:[#allocation63_spill] sm:$0xff] %v9210_v3 }
 0x4b4   :  { %3270 = vmatpush.msra.mxu2 %v9157_v6  ;;  %3528 = vmatpush.msra.mxu3 %v9179_v29  ;;  %v9203_v6 = vld [vmem:[%s10174_s6 + $0x3a8] sm:$0xff] }
 0x4b5   :  { %3231 = vmatpush.msra.mxu0 %v8566_v31  ;;  %v9184_v31 = vld [vmem:[%s10174_s6 + $0x3c0] sm:$0xff] }
 0x4b6   :  { %3271 = vmatpush.msra.mxu2 %v9164_v56  ;;  %3232 = vmatmul.f32.vlgmr.msra.gmra.mxu0 %v8999_v39  ;;  %v9198_v56 = vld [vmem:[%s10174_s6 + $0x3a0] sm:$0xff] }
 0x4b7   :  { %3272 = vmatmul.f32.vlgmr.msra.gmra.mxu2 %v8999_v39  ;;  %v9191_v39 = vld [vmem:[%s10174_s6 + $0x3c8] sm:$0xff]  ;;  %3489 = vmatpush.msra.mxu1 %v9184_v31 }
 0x4b8   :  { %3529 = vmatpush.msra.mxu3 %v9191_v39 }
 0x4b9   :  { %3490 = vmatpush.msra.mxu1 %v9198_v56 }
 0x4ba   :  { %3530 = vmatpush.msra.mxu3 %v9203_v6 }
 0x4bb   :  { %3491 = vmatpush.msra.mxu1 %v9210_v3  ;;  %v9251_v3 = vld [vmem:[%s10174_s6 + $0x328] sm:$0xff] }
 0x4bc   :  { %3531 = vmatpush.msra.mxu3 %v9215_v43  ;;  %v9246_v43 = vld [vmem:[%s10174_s6 + $0x320] sm:$0xff]  ;;  %11157 = vst [vmem:[#allocation66_spill] sm:$0xff] %v9251_v3 }
 0x4bd   :  { %3492 = vmatpush.msra.mxu1 %v9220_v7  ;;  %11156 = vst [vmem:[#allocation59_spill] sm:$0xff] %v9246_v43  ;;  %v9256_v7 = vld [vmem:[%s10174_s6 + $0x300] sm:$0xff] }
 0x4be   :  { %3532 = vmatpush.msra.mxu3 %v9227_v4  ;;  %11158 = vst [vmem:[#allocation55_spill] sm:$0xff] %v9256_v7  ;;  %v9273_v4 = vld [vmem:[%s10174_s6 + $0x2e8] sm:$0xff] }
 0x4bf   :  { %3493 = vmatpush.msra.mxu1 %v9232_v61  ;;  %v9268_v61 = vld [vmem:[%s10174_s6 + $0x2e0] sm:$0xff]  ;;  %11161 = vst [vmem:[#allocation42_spill] sm:$0xff] %v9273_v4 }
 0x4c0   :  { %3533 = vmatpush.msra.mxu3 %v9237_v9  ;;  %v9263_v9 = vld [vmem:[%s10174_s6 + $0x308] sm:$0xff]  ;;  %11160 = vst [vmem:[#allocation67_spill] sm:$0xff] %v9268_v61 }
 0x4c1   :  { %3494 = vmatpush.msra.mxu1 %v9246_v43  ;;  %11159 = vst [vmem:[#allocation60_spill] sm:$0xff] %v9263_v9  ;;  %v9285_v43 = vld [vmem:[%s10174_s6 + $0x2c8] sm:$0xff] }
 0x4c2   :  { %3534 = vmatpush.msra.mxu3 %v9251_v3  ;;  %v9280_v3 = vld [vmem:[%s10174_s6 + $0x2c0] sm:$0xff] }
 0x4c3   :  { %3495 = vmatpush.msra.mxu1 %v9256_v7  ;;  %v9292_v7 = vld [vmem:[%s10174_s6 + $0x2a0] sm:$0xff] }
 0x4c4   :  { %3535 = vmatpush.msra.mxu3 %v9263_v9  ;;  %11162 = vst [vmem:[#allocation69_spill] sm:$0xff] %v9292_v7  ;;  %v9297_v9 = vld [vmem:[%s10174_s6 + $0x2a8] sm:$0xff] }
 0x4c5   :  { %3496 = vmatpush.msra.mxu1 %v9268_v61  ;;  %11163 = vst [vmem:[#allocation56_spill] sm:$0xff] %v9297_v9  ;;  %v9311_v61 = vld [vmem:[%s10174_s6 + $0x288] sm:$0xff] }
 0x4c6   :  { %3536 = vmatpush.msra.mxu3 %v9273_v4  ;;  %v9306_v4 = vld [vmem:[%s10174_s6 + $0x280] sm:$0xff]  ;;  %11165 = vst [vmem:[#allocation70_spill] sm:$0xff] %v9311_v61 }
 0x4c7   :  { %3497 = vmatpush.msra.mxu1 %v9280_v3  ;;  %11164 = vst [vmem:[#allocation68_spill] sm:$0xff] %v9306_v4 }
 0x4c8   :  { %3537 = vmatpush.msra.mxu3 %v9285_v43 }
 0x4c9   :  { %3498 = vmatpush.msra.mxu1 %v9292_v7  ;;  %v9318_v7 = vld [vmem:[%s10174_s6 + $0x1e0] sm:$0xff] }
 0x4ca   :  { %3538 = vmatpush.msra.mxu3 %v9297_v9  ;;  %11166 = vst [vmem:[#allocation71_spill] sm:$0xff] %v9318_v7  ;;  %v9323_v9 = vld [vmem:[%s10174_s6 + $0x1e8] sm:$0xff]  ;;  %3468 = vmatpush.msrb.mxu0 %v9318_v7  ;;  %v9342_v7 = vld [vmem:[%s10174_s6 + $0x1c0] sm:$0xff] }
 0x4cb   :  { %3499 = vmatpush.msra.mxu1 %v9306_v4  ;;  %11167 = vst [vmem:[#allocation73_spill] sm:$0xff] %v9323_v9  ;;  %3508 = vmatpush.msrb.mxu2 %v9323_v9  ;;  %v9330_v4 = vld [vmem:[%s10174_s6 + $0x260] sm:$0xff]  ;;  %v9347_v9 = vld [vmem:[%s10174_s6 + $0x1c8] sm:$0xff] }
 0x4cc   :  { %3539 = vmatpush.msra.mxu3 %v9311_v61  ;;  %11168 = vst [vmem:[#allocation72_spill] sm:$0xff] %v9330_v4  ;;  %v9335_v61 = vld [vmem:[%s10174_s6 + $0x268] sm:$0xff]  ;;  %3469 = vmatpush.msrb.mxu0 %v9342_v7 }
 0x4cd   :  { %11169 = vst [vmem:[#allocation74_spill] sm:$0xff] %v9335_v61  ;;  %3500 = vmatpush.msra.mxu1 %v9330_v4  ;;  %3509 = vmatpush.msrb.mxu2 %v9347_v9  ;;  %v9354_v4 = vld [vmem:[%s10174_s6 + $0x240] sm:$0xff] }
 0x4ce   :  { %3540 = vmatpush.msra.mxu3 %v9335_v61  ;;  %11170 = vst [vmem:[#allocation75_spill] sm:$0xff] %v9342_v7  ;;  %v9359_v61 = vld [vmem:[%s10174_s6 + $0x248] sm:$0xff]  ;;  %v9366_v7 = vld [vmem:[%s10174_s6 + $0x1a0] sm:$0xff] }
 0x4cf   :  { %11171 = vst [vmem:[#allocation77_spill] sm:$0xff] %v9347_v9  ;;  %3501 = vmatpush.msra.mxu1 %v9354_v4  ;;  %v9371_v9 = vld [vmem:[%s10174_s6 + $0x1a8] sm:$0xff]  ;;  %3470 = vmatpush.msrb.mxu0 %v9366_v7 }
 0x4d0   :  { %11172 = vst [vmem:[#allocation76_spill] sm:$0xff] %v9354_v4  ;;  %3541 = vmatpush.msra.mxu3 %v9359_v61  ;;  %3510 = vmatpush.msrb.mxu2 %v9371_v9  ;;  %v9378_v4 = vld [vmem:[%s10174_s6 + $0x220] sm:$0xff] }
 0x4d1   :  { %11173 = vst [vmem:[#allocation78_spill] sm:$0xff] %v9359_v61  ;;  %v9383_v61 = vld [vmem:[%s10174_s6 + $0x228] sm:$0xff]  ;;  %3502 = vmatpush.msra.mxu1 %v9378_v4 }
 0x4d2   :  { %11174 = vst [vmem:[#allocation79_spill] sm:$0xff] %v9366_v7  ;;  %3542 = vmatpush.msra.mxu3 %v9383_v61  ;;  %v9390_v7 = vld [vmem:[%s10174_s6 + $0x180] sm:$0xff] }
 0x4d3   :  { %11175 = vst [vmem:[#allocation80_spill] sm:$0xff] %v9371_v9  ;;  %v9395_v9 = vld [vmem:[%s10174_s6 + $0x188] sm:$0xff]  ;;  %3471 = vmatpush.msrb.mxu0 %v9390_v7  ;;  %3503 = vmatpush.msra.mxu1 %v8654_v54  ;;  %v9418_v54 = vld [vmem:[%s10174_s6 + $0x140] sm:$0xff] }
 0x4d4   :  { %11176 = vst [vmem:[#allocation81_spill] sm:$0xff] %v9378_v4  ;;  %3511 = vmatpush.msrb.mxu2 %v9395_v9  ;;  %3543 = vmatpush.msra.mxu3 %v8659_v40  ;;  %v9409_v4 = vld [vmem:[%s10174_s6 + $0x168] sm:$0xff] }
 0x4d5   :  { %11177 = vst [vmem:[#allocation82_spill] sm:$0xff] %v9383_v61  ;;  %v9404_v61 = vld [vmem:[%s10174_s6 + $0x160] sm:$0xff]  ;;  %3568 = vmatpush.msrb.mxu1 %v8666_v12  ;;  %v9423_v40 = vld [vmem:[%s10174_s6 + $0x148] sm:$0xff] }
 0x4d6   :  { %3472 = vmatpush.msrb.mxu0 %v9404_v61  ;;  %3512 = vmatpush.msrb.mxu2 %v9409_v4  ;;  %v9432_v12 = vld [vmem:[%s10174_s6 + $0x120] sm:$0xff] }
 0x4d7   :  { %3608 = vmatpush.msrb.mxu3 %v8671_v60  ;;  %3569 = vmatpush.msrb.mxu1 %v8678_v10  ;;  %v9437_v60 = vld [vmem:[%s10174_s6 + $0x128] sm:$0xff]  ;;  %v9446_v10 = vld [vmem:[%s10174_s6 + $0x100] sm:$0xff] }
 0x4d8   :  { %3473 = vmatpush.msrb.mxu0 %v9418_v54  ;;  %3513 = vmatpush.msrb.mxu2 %v9423_v40 }
 0x4d9   :  { %3609 = vmatpush.msrb.mxu3 %v8683_v33  ;;  %3570 = vmatpush.msrb.mxu1 %v8690_v50  ;;  %v9451_v33 = vld [vmem:[%s10174_s6 + $0x108] sm:$0xff]  ;;  %v9460_v50 = vld [vmem:[%s10174_s6 + $0xe0] sm:$0xff] }
 0x4da   :  { %3474 = vmatpush.msrb.mxu0 %v9432_v12  ;;  %3514 = vmatpush.msrb.mxu2 %v9437_v60 }
 0x4db   :  { %3610 = vmatpush.msrb.mxu3 %v8695_v23  ;;  %3571 = vmatpush.msrb.mxu1 %v8702_v57  ;;  %v9465_v23 = vld [vmem:[%s10174_s6 + $0xe8] sm:$0xff]  ;;  %v9474_v57 = vld [vmem:[%s10174_s6 + $0xc0] sm:$0xff] }
 0x4dc   :  { %3475 = vmatpush.msrb.mxu0 %v9446_v10  ;;  %3515 = vmatpush.msrb.mxu2 %v9451_v33  ;;  %11178 = vst [vmem:[#allocation83_spill] sm:$0xff] %v9465_v23 }
 0x4dd   :  { %3611 = vmatpush.msrb.mxu3 %v8707_v24  ;;  %3572 = vmatpush.msrb.mxu1 %v8714_v19  ;;  %11179 = vst [vmem:[#allocation84_spill] sm:$0xff] %v9474_v57  ;;  %v9479_v24 = vld [vmem:[%s10174_s6 + $0xc8] sm:$0xff]  ;;  %v9488_v19 = vld [vmem:[%s10174_s6 + $0xa0] sm:$0xff] }
 0x4de   :  { %3476 = vmatpush.msrb.mxu0 %v9460_v50  ;;  %3516 = vmatpush.msrb.mxu2 %v9465_v23  ;;  %11180 = vst [vmem:[#allocation85_spill] sm:$0xff] %v9479_v24 }
 0x4df   :  { %3612 = vmatpush.msrb.mxu3 %v8719_v63  ;;  %3573 = vmatpush.msrb.mxu1 %v8726_v14  ;;  %11181 = vst [vmem:[#allocation86_spill] sm:$0xff] %v9488_v19  ;;  %v9493_v63 = vld [vmem:[%s10174_s6 + $0xa8] sm:$0xff]  ;;  %v9502_v14 = vld [vmem:[%s10174_s6 + $0x80] sm:$0xff] }
 0x4e0   :  { %3477 = vmatpush.msrb.mxu0 %v9474_v57  ;;  %3517 = vmatpush.msrb.mxu2 %v9479_v24  ;;  %11182 = vst [vmem:[#allocation87_spill] sm:$0xff] %v9493_v63 }
 0x4e1   :  { %3613 = vmatpush.msrb.mxu3 %v8731_v46  ;;  %3574 = vmatpush.msrb.mxu1 %v8738_v32  ;;  %11183 = vst [vmem:[#allocation88_spill] sm:$0xff] %v9502_v14  ;;  %v9507_v46 = vld [vmem:[%s10174_s6 + $0x88] sm:$0xff]  ;;  %v9516_v32 = vld [vmem:[%s10174_s6 + $0x60] sm:$0xff] }
 0x4e2   :  { %3478 = vmatpush.msrb.mxu0 %v9488_v19  ;;  %3518 = vmatpush.msrb.mxu2 %v9493_v63  ;;  %11184 = vst [vmem:[#allocation89_spill] sm:$0xff] %v9507_v46  ;;  %v3151_v63 = vld [vmem:[#allocation2 + $0x38] sm:$0x30] }
 0x4e3   :  { %3614 = vmatpush.msrb.mxu3 %v8743_v17  ;;  %3575 = vmatpush.msrb.mxu1 %v8750_v20  ;;  %11185 = vst [vmem:[#allocation90_spill] sm:$0xff] %v9516_v32  ;;  %v9521_v17 = vld [vmem:[%s10174_s6 + $0x68] sm:$0xff]  ;;  %v9530_v20 = vld [vmem:[%s10174_s6 + $0x40] sm:$0xff] }
 0x4e4   :  { %3479 = vmatpush.msrb.mxu0 %v9502_v14  ;;  %3519 = vmatpush.msrb.mxu2 %v9507_v46  ;;  %11186 = vst [vmem:[#allocation21_spill] sm:$0xff] %v9521_v17 }
 0x4e5   :  { %3615 = vmatpush.msrb.mxu3 %v8755_v34  ;;  %3576 = vmatpush.msrb.mxu1 %v8762_v37  ;;  %11187 = vst [vmem:[#allocation27_spill] sm:$0xff] %v9530_v20  ;;  %v9535_v34 = vld [vmem:[%s10174_s6 + $0x48] sm:$0xff]  ;;  %v9544_v37 = vld [vmem:[%s10174_s6 + $0x20] sm:$0xff] }
 0x4e6   :  { %3480 = vmatpush.msrb.mxu0 %v9516_v32  ;;  %3520 = vmatpush.msrb.mxu2 %v9521_v17  ;;  %11188 = vst [vmem:[#allocation91_spill] sm:$0xff] %v9535_v34 }
 0x4e7   :  { %3616 = vmatpush.msrb.mxu3 %v8767_v30  ;;  %3577 = vmatpush.msrb.mxu1 %v8774_v45  ;;  %11189 = vst [vmem:[#allocation92_spill] sm:$0xff] %v9544_v37  ;;  %v9549_v30 = vld [vmem:[%s10174_s6 + $0x28] sm:$0xff]  ;;  %v9559_v45 = vld [vmem:[%s10174_s6] sm:$0xff] }
 0x4e8   :  { %3481 = vmatpush.msrb.mxu0 %v9530_v20  ;;  %3521 = vmatpush.msrb.mxu2 %v9535_v34  ;;  %11190 = vst [vmem:[#allocation24_spill] sm:$0xff] %v9549_v30 }
 0x4e9   :  { %3617 = vmatpush.msrb.mxu3 %v8779_v15  ;;  %3578 = vmatpush.msrb.mxu1 %v8786_v41  ;;  %11191 = vst [vmem:[#allocation30_spill] sm:$0xff] %v9559_v45  ;;  %v9564_v15 = vld [vmem:[%s10174_s6 + $0x8] sm:$0xff]  ;;  %v9571_v41 = vld [vmem:[%s10174_s6 + $0x1f0] sm:$0xff] }
 0x4ea   :  { %3482 = vmatpush.msrb.mxu0 %v9544_v37  ;;  %3522 = vmatpush.msrb.mxu2 %v9549_v30  ;;  %11192 = vst [vmem:[#allocation25_spill] sm:$0xff] %v9564_v15  ;;  %v11198_v30 = vld [vmem:[#allocation15_spill] sm:$0xff] }
 0x4eb   :  { %3618 = vmatpush.msrb.mxu3 %v8791_v58  ;;  %11193 = vst [vmem:[#allocation10_spill] sm:$0xff] %v9571_v41  ;;  %v9576_v58 = vld [vmem:[%s10174_s6 + $0x1f8] sm:$0xff]  ;;  %3579 = vmatpush.msrb.mxu1 %v8799_v8  ;;  %v11199_v8 = vld [vmem:[#allocation16_spill] sm:$0xff] }
 0x4ec   :  { %3483 = vmatpush.msrb.mxu0 %v9559_v45  ;;  %3523 = vmatpush.msrb.mxu2 %v9564_v15  ;;  %11194 = vst [vmem:[#allocation95_spill] sm:$0xff] %v9576_v58 }
 0x4ed   :  { %3580 = vmatpush.msrb.mxu1 %v11198_v30  ;;  %v9610_v30 = vld [vmem:[%s10174_s6 + $0x1b0] sm:$0xff] }
 0x4ee   :  { %3548 = vmatpush.msra.mxu0 %v9571_v41  ;;  %3588 = vmatpush.msra.mxu2 %v9576_v58  ;;  %v11202_v41 = vld [vmem:[#allocation22_spill] sm:$0xff]  ;;  %11203 = vst [vmem:[#allocation100_spill] sm:$0xff] %v9610_v30 }
 0x4f9   :  { %v3006_v17 = vpop.f32.mrf.mxu1 }
 0x4ff   :  { %v3046_v58 = vpop.f32.mrf.mxu3 }
 0x512   :  { %v2986_v46 = vpop.f32.mrf.mxu0 }
 0x513   :  { %v2987_v20 = vadd.f32 %v2986_v46, %v11112_v21  ;;  %v11195_v46 = vld [vmem:[#allocation14_spill] sm:$0xff] }
 0x514   :  { %3619 = vmatpush.msrb.mxu3 %v11195_v46  ;;  %v9602_v46 = vld [vmem:[%s10174_s6 + $0x258] sm:$0xff] }
 0x515   :  { %v3007_v34 = vadd.f32 %v3006_v17, %v2987_v20  ;;  %v9585_v17 = vld [vmem:[%s10174_s6 + $0x1d0] sm:$0xff]  ;;  %v9590_v20 = vld [vmem:[%s10174_s6 + $0x1d8] sm:$0xff]  ;;  %11201 = vst [vmem:[#allocation99_spill] sm:$0xff] %v9602_v46 }
 0x516   :  { %11196 = vst [vmem:[#allocation96_spill] sm:$0xff] %v9585_v17  ;;  %3620 = vmatpush.msrb.mxu3 %v11199_v8  ;;  %3549 = vmatpush.msra.mxu0 %v9585_v17  ;;  %v9615_v8 = vld [vmem:[%s10174_s6 + $0x1b8] sm:$0xff] }
 0x517   :  { %v3129_v21 = vmul.f32 0.5, %v3007_v34  ;;  %11197 = vst [vmem:[#allocation97_spill] sm:$0xff] %v9590_v20  ;;  %v9597_v34 = vld [vmem:[%s10174_s6 + $0x250] sm:$0xff]  ;;  %3589 = vmatpush.msra.mxu2 %v9590_v20  ;;  %v9629_v17 = vld [vmem:[%s10174_s6 + $0x198] sm:$0xff] }
 0x518   :  { %v3026_v15 = vpop.f32.mrf.mxu2  ;;  %11200 = vst [vmem:[#allocation98_spill] sm:$0xff] %v9597_v34  ;;  %3581 = vmatpush.msrb.mxu1 %v9597_v34  ;;  %3621 = vmatpush.msrb.mxu3 %v9602_v46  ;;  %v9624_v20 = vld [vmem:[%s10174_s6 + $0x190] sm:$0xff]  ;;  %v11207_v34 = vld [vmem:[#allocation29_spill] sm:$0xff] }
 0x519   :  { %v3027_v45 = vadd.f32 %v3026_v15, %v11202_v41  ;;  %11204 = vst [vmem:[#allocation101_spill] sm:$0xff] %v9615_v8  ;;  %4368 = vtanh.f32 %v3129_v21  ;;  %3550 = vmatpush.msra.mxu0 %v9610_v30  ;;  %3590 = vmatpush.msra.mxu2 %v9615_v8  ;;  %v11208_v46 = vld [vmem:[#allocation17_spill] sm:$0xff]  ;;  %v11209_v21 = vld [vmem:[#allocation18_spill] sm:$0xff]  ;;  %v9639_v8 = vld [vmem:[%s10174_s6 + $0x170] sm:$0xff] }
 0x51a   :  { %11205 = vst [vmem:[#allocation102_spill] sm:$0xff] %v9624_v20  ;;  %3582 = vmatpush.msrb.mxu1 %v11208_v46  ;;  %3622 = vmatpush.msrb.mxu3 %v11209_v21  ;;  %v9644_v30 = vld [vmem:[%s10174_s6 + $0x178] sm:$0xff]  ;;  %v11212_v46 = vld [vmem:[#allocation19_spill] sm:$0xff]  ;;  %v11213_v21 = vld [vmem:[#allocation20_spill] sm:$0xff] }
 0x51b   :  { %v3047_v15 = vadd.f32 %v3046_v58, %v3027_v45  ;;  %v3066_v41 = vpop.f32.mrf.mxu0  ;;  %11206 = vst [vmem:[#allocation103_spill] sm:$0xff] %v9629_v17  ;;  %v3086_v45 = vpop.f32.mrf.mxu1  ;;  %3551 = vmatpush.msra.mxu0 %v9624_v20  ;;  %3591 = vmatpush.msra.mxu2 %v9629_v17 }
 0x51c   :  { %v3067_v37 = vadd.f32 %v3066_v41, %v11207_v34  ;;  %11210 = vst [vmem:[#allocation104_spill] sm:$0xff] %v9639_v8  ;;  %3583 = vmatpush.msrb.mxu1 %v11212_v46  ;;  %3623 = vmatpush.msrb.mxu3 %v11213_v21  ;;  %v9658_v34 = vld [vmem:[%s10174_s6 + $0x158] sm:$0xff]  ;;  %v11218_v21 = vld [vmem:[#allocation11_spill] sm:$0xff]  ;;  %v3126_v17 = vpop.f32.mrf.mxu3 }
 0x51d   :  { %v3133_v58 = vmul.f32 0.5, %v3047_v15  ;;  %11211 = vst [vmem:[#allocation105_spill] sm:$0xff] %v9644_v30  ;;  %3552 = vmatpush.msra.mxu0 %v9639_v8  ;;  %3592 = vmatpush.msra.mxu2 %v9644_v30  ;;  %v9653_v15 = vld [vmem:[%s10174_s6 + $0x150] sm:$0xff]  ;;  %v9670_v46 = vld [vmem:[%s10174_s6 + $0x138] sm:$0xff] }
 0x51e   :  { %v3087_v41 = vadd.f32 %v3086_v45, %v3067_v37  ;;  %11214 = vst [vmem:[#allocation106_spill] sm:$0xff] %v9653_v15 }
 0x51f   :  { %4370 = vtanh.f32 %v3133_v58  ;;  %11215 = vst [vmem:[#allocation108_spill] sm:$0xff] %v9658_v34  ;;  %v4369_v37 = vpop.eup %4368  ;;  %3553 = vmatpush.msra.mxu0 %v9653_v15  ;;  %3593 = vmatpush.msra.mxu2 %v9658_v34  ;;  %v9665_v58 = vld [vmem:[%s10174_s6 + $0x130] sm:$0xff]  ;;  %v9683_v34 = vld [vmem:[%s10174_s6 + $0x118] sm:$0xff] }
 0x520   :  { %4372 = vtanh.f32 %v3087_v41  ;;  %11216 = vst [vmem:[#allocation109_spill] sm:$0xff] %v9665_v58  ;;  %v9678_v41 = vld [vmem:[%s10174_s6 + $0x110] sm:$0xff]  ;;  %v3131_v15 = vmul.f32 0.5, %v4369_v37 }
 0x521   :  { %v3106_v45 = vpop.f32.mrf.mxu2  ;;  %11217 = vst [vmem:[#allocation110_spill] sm:$0xff] %v9670_v46  ;;  %3554 = vmatpush.msra.mxu0 %v9665_v58  ;;  %3594 = vmatpush.msra.mxu2 %v9670_v46 }
 0x522   :  { %v3107_v30 = vadd.f32 %v3106_v45, %v11218_v21  ;;  %11219 = vst [vmem:[#allocation111_spill] sm:$0xff] %v9678_v41  ;;  %v9690_v45 = vld [vmem:[%s10174_s6 + $0xf0] sm:$0xff]  ;;  %v9695_v21 = vld [vmem:[%s10174_s6 + $0xf8] sm:$0xff] }
 0x523   :  { %11220 = vst [vmem:[#allocation112_spill] sm:$0xff] %v9683_v34  ;;  %3555 = vmatpush.msra.mxu0 %v9678_v41  ;;  %3595 = vmatpush.msra.mxu2 %v9683_v34  ;;  %v3253_v58 = vpop.f32.mrf.mxu1  ;;  %v3132_v34 = vadd.f32 0.5, %v3131_v15 }
 0x524   :  { %v3127_v8 = vadd.f32 %v3126_v17, %v3107_v30  ;;  %11221 = vst [vmem:[#allocation113_spill] sm:$0xff] %v9690_v45  ;;  %v9702_v17 = vld [vmem:[%s10174_s6 + $0xd0] sm:$0xff]  ;;  %v9707_v30 = vld [vmem:[%s10174_s6 + $0xd8] sm:$0xff] }
 0x525   :  { %v4371_v20 = vpop.eup %4370  ;;  %11222 = vst [vmem:[#allocation23_spill] sm:$0xff] %v9695_v21  ;;  %3556 = vmatpush.msra.mxu0 %v9690_v45  ;;  %3596 = vmatpush.msra.mxu2 %v9695_v21  ;;  %v9719_v21 = vld [vmem:[%s10174_s6 + $0xb8] sm:$0xff] }
 0x526   :  { %v3135_v46 = vmul.f32 0.5, %v4371_v20  ;;  %v3138_v32 = vmul.f32 0.5, %v3127_v8  ;;  %v4373_v37 = vpop.eup %4372  ;;  %11223 = vst [vmem:[#allocation107_spill] sm:$0xff] %v9702_v17  ;;  %v3301_v20 = vrot.slane %v3253_v58, 4  ;;  %v9714_v8 = vld [vmem:[%s10174_s6 + $0xb0] sm:$0xff]  ;;  %v9732_v58 = vld [vmem:[%s10174_s6 + $0x98] sm:$0xff] }
 0x527   :  { %11224 = vst [vmem:[#allocation12_spill] sm:$0xff] %v9707_v30  ;;  %3557 = vmatpush.msra.mxu0 %v9702_v17  ;;  %3597 = vmatpush.msra.mxu2 %v9707_v30  ;;  %v3143_v15 = vmul.f32 %v4373_v37, %v3132_v34  ;;  %v3149_v30 = vld [vmem:[#allocation2 + $0x20] sm:$0x30]  ;;  %v9746_v34 = vld [vmem:[%s10174_s6 + $0x78] sm:$0xff]  ;;  %v9754_v37 = vld [vmem:[%s10174_s6 + $0x50] sm:$0xff] }
 0x528   :  { %v3136_v41 = vadd.f32 0.5, %v3135_v46  ;;  %4374 = vtanh.f32 %v3138_v32  ;;  %11225 = vst [vmem:[#allocation13_spill] sm:$0xff] %v9714_v8  ;;  %v9727_v32 = vld [vmem:[%s10174_s6 + $0x90] sm:$0xff]  ;;  %v3309_v17 = vadd.f32 %v3301_v20, %v3149_v30  ;;  %v9759_v30 = vld [vmem:[%s10174_s6 + $0x58] sm:$0xff] }
 0x529   :  { %11226 = vst [vmem:[#allocation93_spill] sm:$0xff] %v9719_v21  ;;  %3558 = vmatpush.msra.mxu0 %v9714_v8  ;;  %3598 = vmatpush.msra.mxu2 %v9719_v21  ;;  %v3148_v21 = vld [vmem:[#allocation2 + $0x8] sm:$0x30] }
 0x52a   :  { %v3142_v45 = vmul.f32 %v3136_v41, %v8850_v18  ;;  %11227 = vst [vmem:[#allocation94_spill] sm:$0xff] %v9727_v32  ;;  %v9741_v18 = vld [vmem:[%s10174_s6 + $0x70] sm:$0xff]  ;;  %v3316_v20 = vmul.f32 0.5, %v3309_v17 }
 0x52b   :  { %11228 = vst [vmem:[#allocation28_spill] sm:$0xff] %v9732_v58  ;;  %3559 = vmatpush.msra.mxu0 %v9727_v32  ;;  %3599 = vmatpush.msra.mxu2 %v9732_v58  ;;  %v9778_v17 = vld [vmem:[%s10174_s6 + $0x10] sm:$0xff] }
 0x52c   :  { %v9734_v46 = vadd.f32 %v3143_v15, %v3142_v45  ;;  %11230 = vst [vmem:[#allocation15_spill] sm:$0xff] %v9741_v18  ;;  %v9766_v15 = vld [vmem:[%s10174_s6 + $0x30] sm:$0xff] }
 0x52d   :  { %11231 = vst [vmem:[#allocation16_spill] sm:$0xff] %v9746_v34  ;;  %3560 = vmatpush.msra.mxu0 %v9741_v18  ;;  %3600 = vmatpush.msra.mxu2 %v9746_v34  ;;  %v3293_v34 = vpop.f32.mrf.mxu3 }
 0x52e   :  { %11229 = vst [vmem:[#allocation14_spill] sm:$0xff] %v9734_v46  ;;  %v4375_v41 = vpop.eup %4374  ;;  %4376 = vtanh.f32 %v9734_v46 }
 0x52f   :  { %v3140_v45 = vmul.f32 0.5, %v4375_v41  ;;  %11232 = vst [vmem:[#allocation17_spill] sm:$0xff] %v9754_v37  ;;  %3561 = vmatpush.msra.mxu0 %v9754_v37  ;;  %3601 = vmatpush.msra.mxu2 %v9759_v30  ;;  %v9771_v41 = vld [vmem:[%s10174_s6 + $0x38] sm:$0xff]  ;;  %4378 = vtanh.f32 %v3316_v20 }
 0x530   :  { %11233 = vst [vmem:[#allocation18_spill] sm:$0xff] %v9759_v30  ;;  %v9783_v30 = vld [vmem:[%s10174_s6 + $0x18] sm:$0xff] }
 0x531   :  { %11234 = vst [vmem:[#allocation19_spill] sm:$0xff] %v9766_v15  ;;  %v3141_v46 = vadd.f32 0.5, %v3140_v45  ;;  %3562 = vmatpush.msra.mxu0 %v9766_v15  ;;  %3602 = vmatpush.msra.mxu2 %v9771_v41 }
 0x532   :  { %11235 = vst [vmem:[#allocation20_spill] sm:$0xff] %v9771_v41  ;;  %v3303_v41 = vrot.slane %v3293_v34, 4 }
 0x533   :  { %v3233_v58 = vpop.f32.mrf.mxu0  ;;  %3563 = vmatpush.msra.mxu0 %v9778_v17  ;;  %3603 = vmatpush.msra.mxu2 %v9783_v30 }
 0x534   :  { %v4377_v37 = vpop.eup %4376  ;;  %v3300_v18 = vrot.slane %v3233_v58, 4  ;;  %v3311_v24 = vadd.f32 %v3303_v41, %v3151_v63  ;;  %v3150_v58 = vld [vmem:[#allocation2 + $0x28] sm:$0x30] }
 0x535   :  { %v3146_v45 = vmul.f32 %v4377_v37, %v3141_v46  ;;  %v4379_v23 = vpop.eup %4378  ;;  %v11245_v37 = vld [vmem:[#allocation38_spill] sm:$0xff] }
 0x536   :  { %v3308_v15 = vadd.f32 %v3300_v18, %v3148_v21  ;;  %v3318_v34 = vmul.f32 0.5, %v4379_v23  ;;  %v3321_v21 = vmul.f32 0.5, %v3311_v24  ;;  %v11239_v24 = vld [vmem:[#allocation35_spill] sm:$0xff]  ;;  %v11243_v18 = vld [vmem:[#allocation37_spill] sm:$0xff] }
 0x537   :  { %3147 = vst [vmem:[#allocation3 + $0xa] sm:$0x3] %v3146_v45  ;;  %v3334_v32 = vrot.slane %v3146_v45, 4  ;;  %v11246_v45 = vld [vmem:[#allocation47_spill] sm:$0xff] }
 0x538   :  { %v3312_v8 = vmul.f32 0.5, %v3308_v15 }
 0x539   :  { %v3465_v14 = vrot.slane %v3334_v32, 4  ;;  %v11242_v32 = vld [vmem:[#allocation45_spill] sm:$0xff] }
 0x53a   :  { %4380 = vtanh.f32 %v3312_v8  ;;  %v3273_v19 = vpop.f32.mrf.mxu2  ;;  %v3319_v8 = vadd.f32 0.5, %v3318_v34  ;;  %v11247_v34 = vld [vmem:[#allocation48_spill] sm:$0xff] }
 0x53b   :  { %v3302_v57 = vrot.slane %v3273_v19, 4  ;;  %3504 = vmatmul.f32.vlgmr.msra.gmra.mxu1 %v3465_v14  ;;  %3544 = vmatmul.f32.vlgmr.msra.gmra.mxu3 %v3465_v14 }
 0x53c   :  { %3735 = vmatpush.msra.mxu1 %v8856_v62  ;;  %3775 = vmatpush.msra.mxu3 %v8861_v28  ;;  %v3326_v28 = vrot.slane %v8936_v5, 6  ;;  %v11240_v5 = vld [vmem:[#allocation34_spill] sm:$0xff] }
 0x53d   :  { %v3310_v46 = vadd.f32 %v3302_v57, %v3150_v58 }
 0x53e   :  { %3736 = vmatpush.msra.mxu1 %v8866_v49  ;;  %3776 = vmatpush.msra.mxu3 %v8871_v11  ;;  %v11236_v49 = vld [vmem:[#allocation31_spill] sm:$0xff] }
 0x53f   :  { %4382 = vtanh.f32 %v3310_v46  ;;  %v3711_v46 = vld [vmem:[%s10173_s5 + $0x1e0] sm:$0xff] }
 0x540   :  { %v4381_v63 = vpop.eup %4380  ;;  %3737 = vmatpush.msra.mxu1 %v8878_v13  ;;  %3777 = vmatpush.msra.mxu3 %v8883_v55  ;;  %4384 = vtanh.f32 %v3321_v21  ;;  %v3328_v13 = vmul.f32 %v3326_v28, %v3319_v8  ;;  %v11237_v55 = vld [vmem:[#allocation33_spill] sm:$0xff]  ;;  %v3703_v21 = vld [vmem:[%s10173_s5 + $0x1a0] sm:$0xff]  ;;  %v11261_v28 = vld [vmem:[#allocation59_spill] sm:$0xff] }
 0x541   :  { %v3314_v19 = vmul.f32 0.5, %v4381_v63  ;;  %v3699_v63 = vld [vmem:[%s10173_s5 + $0x180] sm:$0xff] }
 0x542   :  { %3738 = vmatpush.msra.mxu1 %v8890_v48  ;;  %3778 = vmatpush.msra.mxu3 %v8895_v22  ;;  %v11238_v22 = vld [vmem:[#allocation32_spill] sm:$0xff]  ;;  %v3663_v8 = vld [vmem:[%s10173_s5 + $0x60] sm:$0xff] }
 0x543   :  { %v3315_v62 = vadd.f32 0.5, %v3314_v19  ;;  %3584 = vmatmul.f32.vlgmr.msrb.gmra.mxu1 %v3465_v14  ;;  %3624 = vmatmul.f32.vlgmr.msrb.gmra.mxu3 %v3465_v14  ;;  %v11241_v14 = vld [vmem:[#allocation36_spill] sm:$0xff]  ;;  %v11251_v19 = vld [vmem:[#allocation51_spill] sm:$0xff] }
 0x544   :  { %3739 = vmatpush.msra.mxu1 %v11236_v49  ;;  %3779 = vmatpush.msra.mxu3 %v8907_v51  ;;  %v11262_v49 = vld [vmem:[#allocation44_spill] sm:$0xff] }
 0x545   :  { %v4383_v11 = vpop.eup %4382 }
 0x546   :  { %v3329_v23 = vmul.f32 %v4383_v11, %v3315_v62  ;;  %3740 = vmatpush.msra.mxu1 %v8915_v44  ;;  %3780 = vmatpush.msra.mxu3 %v11237_v55  ;;  %v4385_v57 = vpop.eup %4384  ;;  %v11244_v44 = vld [vmem:[#allocation46_spill] sm:$0xff]  ;;  %v11265_v55 = vld [vmem:[#allocation52_spill] sm:$0xff] }
 0x547   :  { %v3323_v51 = vmul.f32 0.5, %v4385_v57  ;;  %v11260_v62 = vld [vmem:[#allocation54_spill] sm:$0xff] }
 0x548   :  { %v9800_v48 = vadd.f32 %v3329_v23, %v3328_v13  ;;  %3741 = vmatpush.msra.mxu1 %v11238_v22  ;;  %3781 = vmatpush.msra.mxu3 %v11239_v24  ;;  %v3659_v11 = vld [vmem:[%s10173_s5 + $0x40] sm:$0xff]  ;;  %v11264_v23 = vld [vmem:[#allocation55_spill] sm:$0xff]  ;;  %v11266_v22 = vld [vmem:[#allocation60_spill] sm:$0xff] }
 0x549   :  { %v3324_v20 = vadd.f32 0.5, %v3323_v51  ;;  %v11263_v13 = vld [vmem:[#allocation66_spill] sm:$0xff]  ;;  %v11267_v24 = vld [vmem:[#allocation67_spill] sm:$0xff] }
 0x54a   :  { %4386 = vtanh.f32 %v9800_v48  ;;  %3742 = vmatpush.msra.mxu1 %v11240_v5  ;;  %3782 = vmatpush.msra.mxu3 %v11241_v14  ;;  %v3655_v57 = vld [vmem:[%s10173_s5 + $0x20] sm:$0xff] }
 0x54b   :  { %v11268_v5 = vld [vmem:[#allocation58_spill] sm:$0xff] }
 0x54c   :  { %3743 = vmatpush.msra.mxu1 %v11242_v32  ;;  %3783 = vmatpush.msra.mxu3 %v11243_v18  ;;  %v3651_v14 = vld [vmem:[%s10173_s5] sm:$0xff]  ;;  %v11270_v32 = vld [vmem:[#allocation61_spill] sm:$0xff] }
 0x54d   :  { %v11269_v51 = vld [vmem:[#allocation42_spill] sm:$0xff]  ;;  %v11271_v18 = vld [vmem:[#allocation69_spill] sm:$0xff] }
 0x54e   :  { %3744 = vmatpush.msra.mxu1 %v11244_v44  ;;  %3784 = vmatpush.msra.mxu3 %v11245_v37  ;;  %v11272_v44 = vld [vmem:[#allocation53_spill] sm:$0xff]  ;;  %v11273_v37 = vld [vmem:[#allocation71_spill] sm:$0xff] }
 0x550   :  { %v4387_v15 = vpop.eup %4386  ;;  %3745 = vmatpush.msra.mxu1 %v8978_v25  ;;  %3785 = vmatpush.msra.mxu3 %v8983_v47  ;;  %v3707_v47 = vld [vmem:[%s10173_s5 + $0x1c0] sm:$0xff] }
 0x551   :  { %v3332_v41 = vmul.f32 %v4387_v15, %v3324_v20  ;;  %v11249_v25 = vld [vmem:[#allocation50_spill] sm:$0xff]  ;;  %v11274_v20 = vld [vmem:[#allocation56_spill] sm:$0xff] }
 0x552   :  { %3746 = vmatpush.msra.mxu1 %v8990_v59  ;;  %3786 = vmatpush.msra.mxu3 %v11246_v45  ;;  %v11248_v59 = vld [vmem:[#allocation49_spill] sm:$0xff]  ;;  %v11275_v15 = vld [vmem:[#allocation68_spill] sm:$0xff] }
 0x553   :  { %v9815_v58 = vrot.slane %v3332_v41, 4  ;;  %v11277_v41 = vld [vmem:[#allocation73_spill] sm:$0xff]  ;;  %v11279_v45 = vld [vmem:[#allocation72_spill] sm:$0xff] }
 0x554   :  { %3747 = vmatpush.msra.mxu1 %v11247_v34  ;;  %3787 = vmatpush.msra.mxu3 %v9016_v1  ;;  %v11250_v1 = vld [vmem:[#allocation39_spill] sm:$0xff]  ;;  %v11281_v34 = vld [vmem:[#allocation77_spill] sm:$0xff] }
 0x555   :  { %3484 = vmatmul.f32.vlgmr.msrb.gmra.mxu0 %v9815_v58  ;;  %3524 = vmatmul.f32.vlgmr.msrb.gmra.mxu2 %v9815_v58 }
 0x556   :  { %3715 = vmatpush.msrb.mxu0 %v3711_v46  ;;  %3755 = vmatpush.msrb.mxu2 %v11248_v59  ;;  %v11280_v46 = vld [vmem:[#allocation79_spill] sm:$0xff]  ;;  %v11284_v59 = vld [vmem:[#allocation80_spill] sm:$0xff] }
 0x557   :  { %3748 = vmatpush.msra.mxu1 %v11249_v25  ;;  %3788 = vmatpush.msra.mxu3 %v9035_v26  ;;  %v3695_v26 = vld [vmem:[%s10173_s5 + $0x160] sm:$0xff] }
 0x558   :  { %3716 = vmatpush.msrb.mxu0 %v3707_v47  ;;  %3756 = vmatpush.msrb.mxu2 %v11250_v1  ;;  %v11282_v47 = vld [vmem:[#allocation74_spill] sm:$0xff] }
 0x559   :  { %3749 = vmatpush.msra.mxu1 %v9049_v38  ;;  %3789 = vmatpush.msra.mxu3 %v9054_v27  ;;  %v3691_v38 = vld [vmem:[%s10173_s5 + $0x140] sm:$0xff] }
 0x55a   :  { %3717 = vmatpush.msrb.mxu0 %v3703_v21  ;;  %3757 = vmatpush.msrb.mxu2 %v9042_v42  ;;  %v3687_v27 = vld [vmem:[%s10173_s5 + $0x120] sm:$0xff]  ;;  %v11286_v21 = vld [vmem:[#allocation81_spill] sm:$0xff] }
 0x55b   :  { %3750 = vmatpush.msra.mxu1 %v9068_v53  ;;  %3790 = vmatpush.msra.mxu3 %v9073_v0  ;;  %v3683_v53 = vld [vmem:[%s10173_s5 + $0x100] sm:$0xff] }
 0x55c   :  { %3718 = vmatpush.msrb.mxu0 %v3699_v63  ;;  %3758 = vmatpush.msrb.mxu2 %v11251_v19  ;;  %v3679_v0 = vld [vmem:[%s10173_s5 + $0xe0] sm:$0xff]  ;;  %v11299_v63 = vld [vmem:[#allocation91_spill] sm:$0xff]  ;;  %v11301_v19 = vld [vmem:[#allocation24_spill] sm:$0xff] }
 0x55d   :  { %3564 = vmatmul.f32.vlgmr.msra.gmra.mxu0 %v9815_v58  ;;  %3604 = vmatmul.f32.vlgmr.msra.gmra.mxu2 %v9815_v58  ;;  %v3675_v42 = vld [vmem:[%s10173_s5 + $0xc0] sm:$0xff] }
 0x55e   :  { %3719 = vmatpush.msrb.mxu0 %v3695_v26  ;;  %3751 = vmatmul.f32.vlgmr.msra.gmra.mxu1 %v9815_v58  ;;  %v11285_v25 = vld [vmem:[#allocation78_spill] sm:$0xff] }
 0x55f   :  { %3759 = vmatpush.msrb.mxu2 %v9084_v16  ;;  %3791 = vmatmul.f32.vlgmr.msra.gmra.mxu3 %v9815_v58  ;;  %v11252_v16 = vld [vmem:[#allocation63_spill] sm:$0xff]  ;;  %v11287_v1 = vld [vmem:[#allocation82_spill] sm:$0xff] }
 0x560   :  { %3720 = vmatpush.msrb.mxu0 %v3691_v38  ;;  %3987 = vmatpush.msrb.mxu1 %v9174_v36  ;;  %v11254_v36 = vld [vmem:[#allocation62_spill] sm:$0xff] }
 0x561   :  { %3760 = vmatpush.msrb.mxu2 %v9093_v35  ;;  %4027 = vmatpush.msrb.mxu3 %v9179_v29  ;;  %v3671_v35 = vld [vmem:[%s10173_s5 + $0xa0] sm:$0xff]  ;;  %v11257_v29 = vld [vmem:[#allocation64_spill] sm:$0xff] }
 0x562   :  { %3721 = vmatpush.msrb.mxu0 %v3687_v27  ;;  %3988 = vmatpush.msrb.mxu1 %v9184_v31  ;;  %v11258_v31 = vld [vmem:[#allocation65_spill] sm:$0xff]  ;;  %v11300_v26 = vld [vmem:[#allocation30_spill] sm:$0xff] }
 0x563   :  { %3761 = vmatpush.msrb.mxu2 %v9101_v52  ;;  %4028 = vmatpush.msrb.mxu3 %v9191_v39  ;;  %v11253_v52 = vld [vmem:[#allocation43_spill] sm:$0xff]  ;;  %v11259_v39 = vld [vmem:[#allocation57_spill] sm:$0xff]  ;;  %v11302_v38 = vld [vmem:[#allocation10_spill] sm:$0xff] }
 0x564   :  { %3722 = vmatpush.msrb.mxu0 %v3683_v53  ;;  %3989 = vmatpush.msrb.mxu1 %v9198_v56  ;;  %v11255_v56 = vld [vmem:[#allocation41_spill] sm:$0xff]  ;;  %v11304_v53 = vld [vmem:[#allocation96_spill] sm:$0xff] }
 0x565   :  { %3762 = vmatpush.msrb.mxu2 %v9108_v2  ;;  %4029 = vmatpush.msrb.mxu3 %v9203_v6  ;;  %v11256_v2 = vld [vmem:[#allocation40_spill] sm:$0xff]  ;;  %v3667_v6 = vld [vmem:[%s10173_s5 + $0x80] sm:$0xff]  ;;  %v11303_v27 = vld [vmem:[#allocation25_spill] sm:$0xff] }
 0x566   :  { %3723 = vmatpush.msrb.mxu0 %v3679_v0  ;;  %3990 = vmatpush.msrb.mxu1 %v11252_v16  ;;  %v11305_v0 = vld [vmem:[#allocation95_spill] sm:$0xff]  ;;  %v11307_v16 = vld [vmem:[#allocation97_spill] sm:$0xff] }
 0x567   :  { %3763 = vmatpush.msrb.mxu2 %v11253_v52  ;;  %4030 = vmatpush.msrb.mxu3 %v11254_v36  ;;  %v11308_v52 = vld [vmem:[#allocation102_spill] sm:$0xff]  ;;  %v11310_v36 = vld [vmem:[#allocation104_spill] sm:$0xff] }
 0x568   :  { %3724 = vmatpush.msrb.mxu0 %v3675_v42  ;;  %3991 = vmatpush.msrb.mxu1 %v11255_v56  ;;  %v11306_v42 = vld [vmem:[#allocation100_spill] sm:$0xff]  ;;  %v11311_v56 = vld [vmem:[#allocation103_spill] sm:$0xff] }
 0x569   :  { %3764 = vmatpush.msrb.mxu2 %v11256_v2  ;;  %4031 = vmatpush.msrb.mxu3 %v11257_v29  ;;  %v11312_v2 = vld [vmem:[#allocation106_spill] sm:$0xff]  ;;  %v11314_v29 = vld [vmem:[#allocation109_spill] sm:$0xff] }
 0x56a   :  { %3725 = vmatpush.msrb.mxu0 %v3671_v35  ;;  %3992 = vmatpush.msrb.mxu1 %v11258_v31  ;;  %v11309_v35 = vld [vmem:[#allocation101_spill] sm:$0xff]  ;;  %v11315_v31 = vld [vmem:[#allocation108_spill] sm:$0xff] }
 0x56b   :  { %3765 = vmatpush.msrb.mxu2 %v11259_v39  ;;  %4032 = vmatpush.msrb.mxu3 %v11260_v62  ;;  %v11316_v39 = vld [vmem:[#allocation111_spill] sm:$0xff]  ;;  %v11318_v62 = vld [vmem:[#allocation113_spill] sm:$0xff] }
 0x56c   :  { %3726 = vmatpush.msrb.mxu0 %v3667_v6  ;;  %3993 = vmatpush.msrb.mxu1 %v11261_v28  ;;  %v11313_v6 = vld [vmem:[#allocation105_spill] sm:$0xff]  ;;  %v11319_v28 = vld [vmem:[#allocation112_spill] sm:$0xff] }
 0x56d   :  { %3766 = vmatpush.msrb.mxu2 %v11262_v49  ;;  %4033 = vmatpush.msrb.mxu3 %v11263_v13  ;;  %v11320_v49 = vld [vmem:[#allocation107_spill] sm:$0xff]  ;;  %v11322_v13 = vld [vmem:[#allocation13_spill] sm:$0xff] }
 0x56e   :  { %3727 = vmatpush.msrb.mxu0 %v3663_v8  ;;  %3994 = vmatpush.msrb.mxu1 %v11264_v23  ;;  %v11317_v8 = vld [vmem:[#allocation110_spill] sm:$0xff]  ;;  %v11323_v23 = vld [vmem:[#allocation12_spill] sm:$0xff] }
 0x56f   :  { %3767 = vmatpush.msrb.mxu2 %v11265_v55  ;;  %4034 = vmatpush.msrb.mxu3 %v11266_v22  ;;  %v11324_v55 = vld [vmem:[#allocation94_spill] sm:$0xff]  ;;  %v11326_v22 = vld [vmem:[#allocation15_spill] sm:$0xff] }
 0x570   :  { %3728 = vmatpush.msrb.mxu0 %v3659_v11  ;;  %3995 = vmatpush.msrb.mxu1 %v11267_v24  ;;  %v11321_v11 = vld [vmem:[#allocation23_spill] sm:$0xff]  ;;  %v11327_v24 = vld [vmem:[#allocation28_spill] sm:$0xff] }
 0x571   :  { %3768 = vmatpush.msrb.mxu2 %v11268_v5  ;;  %4035 = vmatpush.msrb.mxu3 %v11269_v51  ;;  %v11328_v5 = vld [vmem:[#allocation17_spill] sm:$0xff]  ;;  %v11330_v51 = vld [vmem:[#allocation19_spill] sm:$0xff] }
 0x572   :  { %3729 = vmatpush.msrb.mxu0 %v3655_v57  ;;  %3996 = vmatpush.msrb.mxu1 %v9280_v3  ;;  %v11276_v3 = vld [vmem:[#allocation75_spill] sm:$0xff]  ;;  %v11325_v57 = vld [vmem:[#allocation93_spill] sm:$0xff] }
 0x573   :  { %3769 = vmatpush.msrb.mxu2 %v11270_v32  ;;  %4036 = vmatpush.msrb.mxu3 %v9285_v43  ;;  %v11278_v43 = vld [vmem:[#allocation70_spill] sm:$0xff] }
 0x574   :  { %3730 = vmatpush.msrb.mxu0 %v3651_v14  ;;  %3997 = vmatpush.msrb.mxu1 %v11271_v18  ;;  %v11329_v14 = vld [vmem:[#allocation16_spill] sm:$0xff]  ;;  %v11331_v32 = vld [vmem:[#allocation18_spill] sm:$0xff] }
 0x575   :  { %3770 = vmatpush.msrb.mxu2 %v11272_v44  ;;  %3731 = vmatmul.f32.vlgmr.msrb.gmra.mxu0 %v9815_v58  ;;  %v11332_v18 = vld [vmem:[#allocation20_spill] sm:$0xff]  ;;  %v3898_v44 = vld [vmem:[%s10174_s6 + $0x200] sm:$0xff] }
 0x576   :  { %3771 = vmatmul.f32.vlgmr.msrb.gmra.mxu2 %v9815_v58  ;;  %3967 = vmatpush.msra.mxu0 %v11273_v37  ;;  %v11283_v58 = vld [vmem:[#allocation76_spill] sm:$0xff]  ;;  %v3899_v37 = vld [vmem:[%s10174_s6 + $0x208] sm:$0xff] }
 0x577   :  { %4037 = vmatpush.msrb.mxu3 %v11274_v20  ;;  %3998 = vmatpush.msrb.mxu1 %v11275_v15  ;;  %v3960_v20 = vld [vmem:[%s10174_s6 + $0x3f0] sm:$0xff]  ;;  %v3957_v15 = vld [vmem:[%s10174_s6 + $0x3d8] sm:$0xff] }
 0x578   :  { %3968 = vmatpush.msra.mxu0 %v11276_v3  ;;  %4007 = vmatpush.msra.mxu2 %v11277_v41  ;;  %v3952_v3 = vld [vmem:[%s10174_s6 + $0x3b0] sm:$0xff]  ;;  %v3953_v41 = vld [vmem:[%s10174_s6 + $0x3b8] sm:$0xff] }
 0x579   :  { %4038 = vmatpush.msrb.mxu3 %v11278_v43  ;;  %3999 = vmatpush.msrb.mxu1 %v11279_v45  ;;  %v3948_v43 = vld [vmem:[%s10174_s6 + $0x390] sm:$0xff]  ;;  %v3949_v45 = vld [vmem:[%s10174_s6 + $0x398] sm:$0xff] }
 0x57a   :  { %3969 = vmatpush.msra.mxu0 %v11280_v46  ;;  %4008 = vmatpush.msra.mxu2 %v11281_v34  ;;  %v3944_v46 = vld [vmem:[%s10174_s6 + $0x370] sm:$0xff]  ;;  %v3945_v34 = vld [vmem:[%s10174_s6 + $0x378] sm:$0xff] }
 0x57b   :  { %4039 = vmatpush.msrb.mxu3 %v11282_v47  ;;  %4000 = vmatpush.msrb.mxu1 %v11283_v58  ;;  %v3940_v47 = vld [vmem:[%s10174_s6 + $0x350] sm:$0xff]  ;;  %v3941_v58 = vld [vmem:[%s10174_s6 + $0x358] sm:$0xff] }
 0x57c   :  { %3970 = vmatpush.msra.mxu0 %v9390_v7  ;;  %4009 = vmatpush.msra.mxu2 %v11284_v59  ;;  %v11290_v7 = vld [vmem:[#allocation86_spill] sm:$0xff]  ;;  %v3936_v59 = vld [vmem:[%s10174_s6 + $0x330] sm:$0xff] }
 0x57d   :  { %4040 = vmatpush.msrb.mxu3 %v11285_v25  ;;  %4001 = vmatpush.msrb.mxu1 %v11286_v21  ;;  %v3937_v25 = vld [vmem:[%s10174_s6 + $0x338] sm:$0xff] }
 0x57e   :  { %3971 = vmatpush.msra.mxu0 %v9404_v61  ;;  %4010 = vmatpush.msra.mxu2 %v9395_v9  ;;  %v11288_v61 = vld [vmem:[#allocation84_spill] sm:$0xff]  ;;  %v11289_v9 = vld [vmem:[#allocation83_spill] sm:$0xff] }
 0x57f   :  { %4041 = vmatpush.msrb.mxu3 %v11287_v1  ;;  %4002 = vmatpush.msrb.mxu1 %v3898_v44 }
 0x580   :  { %3972 = vmatpush.msra.mxu0 %v9418_v54  ;;  %4011 = vmatpush.msra.mxu2 %v9409_v4  ;;  %v11291_v54 = vld [vmem:[#allocation85_spill] sm:$0xff]  ;;  %v11292_v4 = vld [vmem:[#allocation88_spill] sm:$0xff] }
 0x581   :  { %4042 = vmatpush.msrb.mxu3 %v3899_v37  ;;  %4067 = vmatpush.msra.mxu1 %v3960_v20 }
 0x582   :  { %3973 = vmatpush.msra.mxu0 %v9432_v12  ;;  %4012 = vmatpush.msra.mxu2 %v9423_v40  ;;  %v11293_v12 = vld [vmem:[#allocation87_spill] sm:$0xff]  ;;  %v11294_v40 = vld [vmem:[#allocation90_spill] sm:$0xff] }
 0x584   :  { %3974 = vmatpush.msra.mxu0 %v9446_v10  ;;  %4013 = vmatpush.msra.mxu2 %v9437_v60  ;;  %v11295_v10 = vld [vmem:[#allocation89_spill] sm:$0xff]  ;;  %v11296_v60 = vld [vmem:[#allocation27_spill] sm:$0xff] }
 0x586   :  { %3975 = vmatpush.msra.mxu0 %v9460_v50  ;;  %4014 = vmatpush.msra.mxu2 %v9451_v33  ;;  %v11297_v50 = vld [vmem:[#allocation21_spill] sm:$0xff]  ;;  %v11298_v33 = vld [vmem:[#allocation92_spill] sm:$0xff] }
 0x588   :  { %3976 = vmatpush.msra.mxu0 %v11288_v61  ;;  %4015 = vmatpush.msra.mxu2 %v11289_v9  ;;  %v11333_v61 = vld [vmem:[#allocation26_spill] sm:$0xff] }
 0x58a   :  { %3977 = vmatpush.msra.mxu0 %v11290_v7  ;;  %4016 = vmatpush.msra.mxu2 %v11291_v54  ;;  %v3932_v7 = vld [vmem:[%s10174_s6 + $0x310] sm:$0xff]  ;;  %v3933_v54 = vld [vmem:[%s10174_s6 + $0x318] sm:$0xff] }
 0x58c   :  { %3978 = vmatpush.msra.mxu0 %v11292_v4  ;;  %4017 = vmatpush.msra.mxu2 %v11293_v12  ;;  %v3928_v12 = vld [vmem:[%s10174_s6 + $0x2f0] sm:$0xff] }
 0x58e   :  { %3979 = vmatpush.msra.mxu0 %v11294_v40  ;;  %4018 = vmatpush.msra.mxu2 %v11295_v10  ;;  %v3929_v40 = vld [vmem:[%s10174_s6 + $0x2f8] sm:$0xff] }
 0x590   :  { %3980 = vmatpush.msra.mxu0 %v11296_v60  ;;  %4019 = vmatpush.msra.mxu2 %v11297_v50  ;;  %v3924_v60 = vld [vmem:[%s10174_s6 + $0x2d0] sm:$0xff]  ;;  %v3925_v50 = vld [vmem:[%s10174_s6 + $0x2d8] sm:$0xff] }
 0x592   :  { %3981 = vmatpush.msra.mxu0 %v11298_v33  ;;  %4020 = vmatpush.msra.mxu2 %v11299_v63 }
 0x594   :  { %3982 = vmatpush.msra.mxu0 %v11300_v26  ;;  %4021 = vmatpush.msra.mxu2 %v11301_v19  ;;  %v11334_v26 = vld [vmem:[#allocation22_spill] sm:$0xff] }
 0x596   :  { %4047 = vmatpush.msrb.mxu0 %v11302_v38  ;;  %4022 = vmatpush.msra.mxu2 %v11303_v27  ;;  %v3920_v38 = vld [vmem:[%s10174_s6 + $0x2b0] sm:$0xff]  ;;  %v3921_v27 = vld [vmem:[%s10174_s6 + $0x2b8] sm:$0xff] }
 0x598   :  { %4048 = vmatpush.msrb.mxu0 %v11304_v53  ;;  %4087 = vmatpush.msrb.mxu2 %v11305_v0 }
 0x59a   :  { %4049 = vmatpush.msrb.mxu0 %v11306_v42  ;;  %4088 = vmatpush.msrb.mxu2 %v11307_v16  ;;  %v11335_v42 = vld [vmem:[#allocation29_spill] sm:$0xff] }
 0x59c   :  { %4050 = vmatpush.msrb.mxu0 %v11308_v52  ;;  %4089 = vmatpush.msrb.mxu2 %v11309_v35  ;;  %v3916_v52 = vld [vmem:[%s10174_s6 + $0x290] sm:$0xff]  ;;  %v3917_v35 = vld [vmem:[%s10174_s6 + $0x298] sm:$0xff] }
 0x59e   :  { %4051 = vmatpush.msrb.mxu0 %v11310_v36  ;;  %4090 = vmatpush.msrb.mxu2 %v11311_v56 }
 0x5a0   :  { %4052 = vmatpush.msrb.mxu0 %v11312_v2  ;;  %4091 = vmatpush.msrb.mxu2 %v11313_v6  ;;  %v3912_v6 = vld [vmem:[%s10174_s6 + $0x270] sm:$0xff] }
 0x5a2   :  { %4053 = vmatpush.msrb.mxu0 %v11314_v29  ;;  %4092 = vmatpush.msrb.mxu2 %v11315_v31  ;;  %v3913_v29 = vld [vmem:[%s10174_s6 + $0x278] sm:$0xff] }
 0x5a4   :  { %4054 = vmatpush.msrb.mxu0 %v11316_v39  ;;  %4093 = vmatpush.msrb.mxu2 %v11317_v8  ;;  %v11336_v39 = vld [vmem:[#allocation98_spill] sm:$0xff]  ;;  %v11337_v8 = vld [vmem:[#allocation99_spill] sm:$0xff] }
 0x5a6   :  { %4055 = vmatpush.msrb.mxu0 %v11318_v62  ;;  %4094 = vmatpush.msrb.mxu2 %v11319_v28  ;;  %v11338_v28 = vld [vmem:[#allocation11_spill] sm:$0xff] }
 0x5a8   :  { %4056 = vmatpush.msrb.mxu0 %v11320_v49  ;;  %4095 = vmatpush.msrb.mxu2 %v11321_v11  ;;  %v3904_v11 = vld [vmem:[%s10174_s6 + $0x230] sm:$0xff] }
 0x5aa   :  { %4057 = vmatpush.msrb.mxu0 %v11322_v13  ;;  %4096 = vmatpush.msrb.mxu2 %v11323_v23  ;;  %v3905_v13 = vld [vmem:[%s10174_s6 + $0x238] sm:$0xff] }
 0x5ac   :  { %4058 = vmatpush.msrb.mxu0 %v11324_v55  ;;  %4097 = vmatpush.msrb.mxu2 %v11325_v57  ;;  %v3900_v57 = vld [vmem:[%s10174_s6 + $0x210] sm:$0xff] }
 0x5ae   :  { %4059 = vmatpush.msrb.mxu0 %v11326_v22  ;;  %4098 = vmatpush.msrb.mxu2 %v11327_v24  ;;  %v3901_v22 = vld [vmem:[%s10174_s6 + $0x218] sm:$0xff] }
 0x5b0   :  { %4060 = vmatpush.msrb.mxu0 %v11328_v5  ;;  %4099 = vmatpush.msrb.mxu2 %v11329_v14 }
 0x5b2   :  { %4061 = vmatpush.msrb.mxu0 %v11330_v51  ;;  %4100 = vmatpush.msrb.mxu2 %v11331_v32 }
 0x5b4   :  { %4062 = vmatpush.msrb.mxu0 %v9778_v17  ;;  %4101 = vmatpush.msrb.mxu2 %v11332_v18  ;;  %v3961_v17 = vld [vmem:[%s10174_s6 + $0x3f8] sm:$0xff] }
 0x5b5   :  { %4107 = vmatpush.msra.mxu3 %v3961_v17  ;;  %v11339_v17 = vld [vmem:[#allocation14_spill] sm:$0xff] }
 0x5b6   :  { %4102 = vmatpush.msrb.mxu2 %v9783_v30  ;;  %v3956_v30 = vld [vmem:[%s10174_s6 + $0x3d0] sm:$0xff] }
 0x5b7   :  { %4068 = vmatpush.msra.mxu1 %v3956_v30  ;;  %4108 = vmatpush.msra.mxu3 %v3957_v15 }
 0x5b8   :  { %v3505_v21 = vpop.f32.mrf.mxu1 }
 0x5b9   :  { %4069 = vmatpush.msra.mxu1 %v3952_v3  ;;  %4109 = vmatpush.msra.mxu3 %v3953_v41  ;;  %v3648_v3 = vld [vmem:[#allocation2 + $0x20] sm:$0xc0] }
 0x5bb   :  { %4070 = vmatpush.msra.mxu1 %v3948_v43  ;;  %4110 = vmatpush.msra.mxu3 %v3949_v45 }
 0x5bd   :  { %4071 = vmatpush.msra.mxu1 %v3944_v46  ;;  %4111 = vmatpush.msra.mxu3 %v3945_v34 }
 0x5be   :  { %v3545_v33 = vpop.f32.mrf.mxu3 }
 0x5bf   :  { %4072 = vmatpush.msra.mxu1 %v3940_v47  ;;  %4112 = vmatpush.msra.mxu3 %v3941_v58 }
 0x5c0   :  { %v3585_v36 = vpop.f32.mrf.mxu1 }
 0x5c1   :  { %4073 = vmatpush.msra.mxu1 %v3936_v59  ;;  %4113 = vmatpush.msra.mxu3 %v3937_v25 }
 0x5c3   :  { %4074 = vmatpush.msra.mxu1 %v3932_v7  ;;  %4114 = vmatpush.msra.mxu3 %v3933_v54 }
 0x5c5   :  { %4075 = vmatpush.msra.mxu1 %v3928_v12  ;;  %4115 = vmatpush.msra.mxu3 %v3929_v40  ;;  %v3650_v40 = vld [vmem:[#allocation2 + $0x38] sm:$0xc0] }
 0x5c6   :  { %v3625_v23 = vpop.f32.mrf.mxu3 }
 0x5c7   :  { %4076 = vmatpush.msra.mxu1 %v3924_v60  ;;  %4116 = vmatpush.msra.mxu3 %v3925_v50 }
 0x5c9   :  { %4077 = vmatpush.msra.mxu1 %v3920_v38  ;;  %4117 = vmatpush.msra.mxu3 %v3921_v27 }
 0x5cb   :  { %4078 = vmatpush.msra.mxu1 %v3916_v52  ;;  %4118 = vmatpush.msra.mxu3 %v3917_v35 }
 0x5cd   :  { %4079 = vmatpush.msra.mxu1 %v3912_v6  ;;  %4119 = vmatpush.msra.mxu3 %v3913_v29 }
 0x5cf   :  { %4080 = vmatpush.msra.mxu1 %v11336_v39  ;;  %4120 = vmatpush.msra.mxu3 %v11337_v8 }
 0x5d1   :  { %4081 = vmatpush.msra.mxu1 %v3904_v11  ;;  %4121 = vmatpush.msra.mxu3 %v3905_v13  ;;  %v4169_v13 = vld [vmem:[%s10176_s8 + $0x78] sm:$0xff] }
 0x5d2   :  { %v3485_v1 = vpop.f32.mrf.mxu0 }
 0x5d3   :  { %v3486_v9 = vadd.f32 %v3485_v1, %v11333_v61  ;;  %4082 = vmatpush.msra.mxu1 %v3900_v57  ;;  %4122 = vmatpush.msra.mxu3 %v3901_v22  ;;  %v3647_v1 = vld [vmem:[#allocation2 + $0x8] sm:$0xc0]  ;;  %v4165_v57 = vld [vmem:[%s10176_s8 + $0x58] sm:$0xff] }
 0x5d4   :  { %v4164_v22 = vld [vmem:[%s10176_s8 + $0x50] sm:$0xff] }
 0x5d5   :  { %v3506_v4 = vadd.f32 %v3505_v21, %v3486_v9 }
 0x5d7   :  { %v3628_v10 = vmul.f32 0.5, %v3506_v4 }
 0x5d8   :  { %v3525_v63 = vpop.f32.mrf.mxu2 }
 0x5d9   :  { %v3526_v19 = vadd.f32 %v3525_v63, %v11334_v26  ;;  %4388 = vtanh.f32 %v3628_v10 }
 0x5da   :  { %v3565_v53 = vpop.f32.mrf.mxu0 }
 0x5db   :  { %v3546_v0 = vadd.f32 %v3545_v33, %v3526_v19  ;;  %v3566_v16 = vadd.f32 %v3565_v53, %v11335_v42  ;;  %v3752_v14 = vpop.f32.mrf.mxu1  ;;  %v3649_v19 = vld [vmem:[#allocation2 + $0x28] sm:$0xc0] }
 0x5dc   :  { %v3800_v20 = vrot.slane %v3752_v14, 2  ;;  %v4161_v14 = vld [vmem:[%s10176_s8 + $0x38] sm:$0xff] }
 0x5dd   :  { %v3632_v56 = vmul.f32 0.5, %v3546_v0  ;;  %v3586_v2 = vadd.f32 %v3585_v36, %v3566_v16  ;;  %v3825_v36 = vrot.slane %v9800_v48, 6  ;;  %v4168_v48 = vld [vmem:[%s10176_s8 + $0x70] sm:$0xff] }
 0x5de   :  { %v3808_v43 = vadd.f32 %v3800_v20, %v3648_v3  ;;  %v4155_v20 = vld [vmem:[%s10176_s8 + $0x8] sm:$0xff] }
 0x5df   :  { %4390 = vtanh.f32 %v3632_v56  ;;  %v4389_v62 = vpop.eup %4388 }
 0x5e0   :  { %v3605_v31 = vpop.f32.mrf.mxu2  ;;  %4392 = vtanh.f32 %v3586_v2  ;;  %v3630_v24 = vmul.f32 0.5, %v4389_v62  ;;  %v3815_v34 = vmul.f32 0.5, %v3808_v43 }
 0x5e1   :  { %v3606_v49 = vadd.f32 %v3605_v31, %v11338_v28 }
 0x5e2   :  { %v3631_v44 = vadd.f32 0.5, %v3630_v24  ;;  %v3792_v47 = vpop.f32.mrf.mxu3  ;;  %v4163_v24 = vld [vmem:[%s10176_s8 + $0x48] sm:$0xff] }
 0x5e3   :  { %v3626_v55 = vadd.f32 %v3625_v23, %v3606_v49  ;;  %v3802_v7 = vrot.slane %v3792_v47, 2  ;;  %v4167_v23 = vld [vmem:[%s10176_s8 + $0x68] sm:$0xff] }
 0x5e5   :  { %v4391_v5 = vpop.eup %4390  ;;  %v3637_v51 = vmul.f32 0.5, %v3626_v55  ;;  %v3810_v10 = vadd.f32 %v3802_v7, %v3650_v40  ;;  %v4166_v55 = vld [vmem:[%s10176_s8 + $0x60] sm:$0xff] }
 0x5e6   :  { %v3634_v32 = vmul.f32 0.5, %v4391_v5  ;;  %v4393_v18 = vpop.eup %4392  ;;  %v4162_v5 = vld [vmem:[%s10176_s8 + $0x40] sm:$0xff] }
 0x5e7   :  { %4394 = vtanh.f32 %v3637_v51  ;;  %v3642_v15 = vmul.f32 %v4393_v18, %v3631_v44  ;;  %v3820_v53 = vmul.f32 0.5, %v3810_v10  ;;  %v4160_v51 = vld [vmem:[%s10176_s8 + $0x30] sm:$0xff]  ;;  %v4158_v18 = vld [vmem:[%s10176_s8 + $0x20] sm:$0xff]  ;;  %v4157_v44 = vld [vmem:[%s10176_s8 + $0x18] sm:$0xff] }
 0x5e8   :  { %v3635_v37 = vadd.f32 0.5, %v3634_v32  ;;  %v4159_v32 = vld [vmem:[%s10176_s8 + $0x28] sm:$0xff] }
 0x5ea   :  { %v3641_v30 = vmul.f32 %v3635_v37, %v11339_v17  ;;  %v4156_v37 = vld [vmem:[%s10176_s8 + $0x10] sm:$0xff]  ;;  %v4154_v17 = vld [vmem:[%s10176_s8] sm:$0xff] }
 0x5ec   :  { %v10094_v41 = vadd.f32 %v3642_v15, %v3641_v30  ;;  %v4152_v30 = vld [vmem:[#allocation3] sm:$0xff] }
 0x5ed   :  { %v4395_v45 = vpop.eup %4394 }
 0x5ee   :  { %4396 = vtanh.f32 %v10094_v41  ;;  %v3639_v46 = vmul.f32 0.5, %v4395_v45 }
 0x5ef   :  { %4398 = vtanh.f32 %v3815_v34 }
 0x5f0   :  { %v3640_v59 = vadd.f32 0.5, %v3639_v46 }
 0x5f2   :  { %v3732_v58 = vpop.f32.mrf.mxu0 }
 0x5f3   :  { %v3799_v25 = vrot.slane %v3732_v58, 2 }
 0x5f4   :  { %v4397_v21 = vpop.eup %4396 }
 0x5f5   :  { %v3645_v9 = vmul.f32 %v4397_v21, %v3640_v59  ;;  %v3807_v54 = vadd.f32 %v3799_v25, %v3647_v1  ;;  %v4399_v33 = vpop.eup %4398 }
 0x5f6   :  { %v3817_v27 = vmul.f32 0.5, %v4399_v33 }
 0x5f7   :  { %3646 = vst [vmem:[#allocation3 + $0xc] sm:$0x3] %v3645_v9  ;;  %v3811_v4 = vmul.f32 0.5, %v3807_v54  ;;  %v3833_v12 = vrot.slane %v3645_v9, 2 }
 0x5f8   :  { %v3818_v52 = vadd.f32 0.5, %v3817_v27 }
 0x5f9   :  { %4400 = vtanh.f32 %v3811_v4  ;;  %v3772_v60 = vpop.f32.mrf.mxu2  ;;  %v3964_v50 = vrot.slane %v3833_v12, 6 }
 0x5fa   :  { %v3801_v63 = vrot.slane %v3772_v60, 2  ;;  %v3827_v2 = vmul.f32 %v3825_v36, %v3818_v52 }
 0x5fb   :  { %4003 = vmatmul.f32.vlgmr.msrb.gmra.mxu1 %v3964_v50  ;;  %4043 = vmatmul.f32.vlgmr.msrb.gmra.mxu3 %v3964_v50 }
 0x5fc   :  { %v3809_v38 = vadd.f32 %v3801_v63, %v3649_v19 }
 0x5fe   :  { %4402 = vtanh.f32 %v3809_v38 }
 0x5ff   :  { %v4401_v0 = vpop.eup %4400  ;;  %4404 = vtanh.f32 %v3820_v53 }
 0x600   :  { %v3813_v16 = vmul.f32 0.5, %v4401_v0 }
 0x602   :  { %v3814_v35 = vadd.f32 0.5, %v3813_v16 }
 0x603   :  { %4083 = vmatmul.f32.vlgmr.msra.gmra.mxu1 %v3964_v50  ;;  %4123 = vmatmul.f32.vlgmr.msra.gmra.mxu3 %v3964_v50 }
 0x604   :  { %v4403_v56 = vpop.eup %4402 }
 0x605   :  { %v3828_v6 = vmul.f32 %v4403_v56, %v3814_v35  ;;  %v4405_v29 = vpop.eup %4404 }
 0x606   :  { %v3822_v39 = vmul.f32 0.5, %v4405_v29 }
 0x607   :  { %v3829_v31 = vadd.f32 %v3828_v6, %v3827_v2 }
 0x608   :  { %v3823_v8 = vadd.f32 0.5, %v3822_v39 }
 0x609   :  { %4406 = vtanh.f32 %v3829_v31  ;;  %4147 = vst [vmem:[#allocation6 - $0x6] sm:$0xc0] %v3829_v31 }
 0x60f   :  { %v4407_v62 = vpop.eup %4406 }
 0x610   :  { %v3831_v49 = vmul.f32 %v4407_v62, %v3823_v8 }
 0x612   :  { %v3963_v11 = vrot.slane %v3831_v49, 6  ;;  %4146 = vst [vmem:[#allocation4 - $0x6] sm:$0xc0] %v3831_v49 }
 0x614   :  { %3983 = vmatmul.f32.vlgmr.msra.gmra.mxu0 %v3963_v11  ;;  %4023 = vmatmul.f32.vlgmr.msra.gmra.mxu2 %v3963_v11 }
 0x615   :  { %4174 = vmatpush.msra.mxu0 %v4169_v13 }
 0x617   :  { %4175 = vmatpush.msra.mxu0 %v4168_v48 }
 0x619   :  { %4176 = vmatpush.msra.mxu0 %v4167_v23 }
 0x61b   :  { %4177 = vmatpush.msra.mxu0 %v4166_v55 }
 0x61c   :  { %4063 = vmatmul.f32.vlgmr.msrb.gmra.mxu0 %v3963_v11  ;;  %4103 = vmatmul.f32.vlgmr.msrb.gmra.mxu2 %v3963_v11 }
 0x61d   :  { %4178 = vmatpush.msra.mxu0 %v4165_v57 }
 0x61f   :  { %4179 = vmatpush.msra.mxu0 %v4164_v22 }
 0x621   :  { %4180 = vmatpush.msra.mxu0 %v4163_v24 }
 0x623   :  { %4181 = vmatpush.msra.mxu0 %v4162_v5 }
 0x625   :  { %4182 = vmatpush.msra.mxu0 %v4161_v14 }
 0x627   :  { %4183 = vmatpush.msra.mxu0 %v4160_v51 }
 0x629   :  { %4184 = vmatpush.msra.mxu0 %v4159_v32 }
 0x62b   :  { %4185 = vmatpush.msra.mxu0 %v4158_v18 }
 0x62d   :  { %4186 = vmatpush.msra.mxu0 %v4157_v44 }
 0x62f   :  { %4187 = vmatpush.msra.mxu0 %v4156_v37 }
 0x631   :  { %4188 = vmatpush.msra.mxu0 %v4155_v20 }
 0x633   :  { %4189 = vmatpush.msra.mxu0 %v4154_v17 }
 0x634   :  { %4190 = vmatmul.f32.vlgmr.msra.gmra.mxu0 %v4152_v30 }
 0x678   :  { %v4004_v15 = vpop.f32.mrf.mxu1 }
 0x67e   :  { %v4044_v34 = vpop.f32.mrf.mxu3 }
 0x680   :  { %v4084_v1 = vpop.f32.mrf.mxu1 }
 0x686   :  { %v4124_v12 = vpop.f32.mrf.mxu3 }
 0x691   :  { %v3984_v3 = vpop.f32.mrf.mxu0 }
 0x692   :  { %v3985_v43 = vadd.f32 %v3984_v3, %v11333_v61 }
 0x694   :  { %v4005_v45 = vadd.f32 %v4004_v15, %v3985_v43 }
 0x696   :  { %v4127_v46 = vmul.f32 0.5, %v4005_v45 }
 0x697   :  { %v4024_v47 = vpop.f32.mrf.mxu2 }
 0x698   :  { %v4025_v58 = vadd.f32 %v4024_v47, %v11334_v26  ;;  %4408 = vtanh.f32 %v4127_v46 }
 0x699   :  { %v4064_v59 = vpop.f32.mrf.mxu0 }
 0x69a   :  { %v4045_v25 = vadd.f32 %v4044_v34, %v4025_v58  ;;  %v4065_v21 = vadd.f32 %v4064_v59, %v11335_v42 }
 0x69c   :  { %v4131_v9 = vmul.f32 0.5, %v4045_v25  ;;  %v4085_v7 = vadd.f32 %v4084_v1, %v4065_v21 }
 0x69e   :  { %4410 = vtanh.f32 %v4131_v9  ;;  %v4409_v4 = vpop.eup %4408 }
 0x69f   :  { %v4104_v54 = vpop.f32.mrf.mxu2  ;;  %4412 = vtanh.f32 %v4085_v7  ;;  %v4129_v10 = vmul.f32 0.5, %v4409_v4 }
 0x6a0   :  { %v4105_v61 = vadd.f32 %v4104_v54, %v11338_v28  ;;  %v4257_v28 = vld [vmem:[%s10177_s9] ss:$0 sm:$0xff]  ;;  %s4476_s9 = smov 32  }
 0x6a1   :  { %v4130_v63 = vadd.f32 0.5, %v4129_v10 }
 0x6a2   :  { %v4125_v40 = vadd.f32 %v4124_v12, %v4105_v61 }
 0x6a4   :  { %v4411_v60 = vpop.eup %4410  ;;  %v4136_v50 = vmul.f32 0.5, %v4125_v40 }
 0x6a5   :  { %v4133_v26 = vmul.f32 0.5, %v4411_v60  ;;  %v4413_v33 = vpop.eup %4412 }
 0x6a6   :  { %4414 = vtanh.f32 %v4136_v50  ;;  %v4141_v38 = vmul.f32 %v4413_v33, %v4130_v63 }
 0x6a7   :  { %v4134_v19 = vadd.f32 0.5, %v4133_v26 }
 0x6a9   :  { %v4140_v42 = vmul.f32 %v4134_v19, %v10094_v41 }
 0x6ab   :  { %v4142_v27 = vadd.f32 %v4141_v38, %v4140_v42 }
 0x6ac   :  { %v4415_v53 = vpop.eup %4414 }
 0x6ad   :  { %4416 = vtanh.f32 %v4142_v27  ;;  %4151 = vst [vmem:[#allocation6 + $0x2] sm:$0x3] %v4142_v27  ;;  %v4138_v0 = vmul.f32 0.5, %v4415_v53 }
 0x6ae   :  { %4226 = dma.vmem_to_hbm [thread:$0]  %s4219_s3, 64, %s4221_s25, [#allocation7], %s4476_s9, %s4476_s9, %s4477_s21  }
 0x6af   :  { %v4139_v52 = vadd.f32 0.5, %v4138_v0 }
 0x6b1   :  { %v4191_v16 = vpop.f32.mrf.mxu0 }
 0x6b2   :  { %v4192_v35 = vadd.f32 %v4257_v28, %v4191_v16 }
 0x6b3   :  { %v4417_v36 = vpop.eup %4416 }
 0x6b4   :  { %v4144_v56 = vmul.f32 %v4417_v36, %v4139_v52  ;;  %4197 = vst.msk [vmem:[%s10178_s10] sm:$0xff] %vm63_vm1, %v4192_v35 }
 0x6b6   :  { %4145 = vst [vmem:[#allocation3 + $0xe] sm:$0x3] %v4144_v56 }
 0x6b7   :  { %4149 = vst [vmem:[#allocation4 + $0x2] sm:$0x3] %v4144_v56 }
 0x6b8   :  { %4213 = dma.vmem_to_hbm [thread:$0]  %s4206_s19, 64, %s4208_s1, [#allocation5], %s4476_s9, %s4476_s9, %s4477_s21  }
 0x6bd   :  { %v4153_v41 = vld [vmem:[#allocation3 + $0x8] sm:$0xff] }
 0x6be   :  { %4193 = vmatmul.f32.gmra.mxu0 %v4153_v41 }
 0x73b   :  { %v4194_v2 = vpop.f32.mrf.mxu0 }
 0x73c   :  { %v4195_v6 = vadd.f32 %v4257_v28, %v4194_v2 }
 0x73e   :  { %4198 = vst.msk [vmem:[%s10178_s10 + $0x8] sm:$0xff] %vm63_vm1, %v4195_v6 }
 0x73f   :  { %4471 = dma.done.wait [#allocation5], 64  }
 0x740   :  { %4472 = vsyncadd [#allocation5], 4294967232 }
 0x741   :  { %4473 = dma.done.wait [#allocation7], 64  }
 0x742   :  { %4474 = vsyncadd [#allocation7], 4294967232 }
 0x743   :  { %4237 = vsyncpa [#allocation5], 1 }
 0x744   :  { %4238 = vsyncpa [#allocation7], 1 }

</bundles_post_ra>
